<compile_context>
chip_gen: v6e
topology: v6e:2x2x1
jax: 0.10.0
libtpu: 0.0.40
codegen_flags: <defaults>
</compile_context>

<pallas_src>
import functools
import math

import jax
import jax.numpy as jnp
from jax.experimental import pallas as pl
from jax.experimental.pallas import tpu as pltpu

_LN_EPS = 1e-5
_INV_SQRT2 = 1.0 / math.sqrt(2.0)
_VMEM_SPEC = pl.BlockSpec(memory_space=pltpu.MemorySpace.VMEM)


def _vmem_specs(n):
    return [_VMEM_SPEC] * n


# --------------------------- in-kernel helpers (traced) ---------------------------

def _layernorm(z, gamma, beta):
    mu = jnp.mean(z, axis=-1, keepdims=True)
    var = jnp.mean((z - mu) ** 2, axis=-1, keepdims=True)
    return (z - mu) * jax.lax.rsqrt(var + _LN_EPS) * gamma + beta


def _gelu(h):
    # exact (erf) GELU, matching torch nn.GELU default
    return 0.5 * h * (1.0 + jax.lax.erf(h * _INV_SQRT2))


def _attn_rows(xq, xkv, wq, bq, wkv, bkv, wo, bo, nhead):
    """Multi-head attention for a single batch element (pre-residual output).

    xq: [Sq, D], xkv: [Skv, D]; wq: [D, D], wkv: [D, 2D] (K|V packed),
    wo: [D, D]; biases are [1, *].  Returns [Sq, D], f32.
    """
    _, D = xq.shape
    dh = D // nhead
    scale = 1.0 / math.sqrt(dh)

    q = jnp.dot(xq, wq, preferred_element_type=jnp.float32) + bq        # [Sq, D]
    kv = jnp.dot(xkv, wkv, preferred_element_type=jnp.float32) + bkv    # [Skv, 2D]

    proj = None
    for h in range(nhead):                       # static unroll over heads
        lo, hi = h * dh, (h + 1) * dh
        qh = q[:, lo:hi]                         # [Sq, dh]   (static lane slice)
        kh = kv[:, lo:hi]                        # [Skv, dh]
        vh = kv[:, D + lo:D + hi]                # [Skv, dh]
        s = jnp.dot(qh, kh.T, preferred_element_type=jnp.float32) * scale
        m = jnp.max(s, axis=-1, keepdims=True)
        p = jnp.exp(s - m)
        denom = jnp.sum(p, axis=-1, keepdims=True)
        attn = p * pl.reciprocal(denom, approx=True)           # EUP reciprocal
        ctx = jnp.dot(attn, vh, preferred_element_type=jnp.float32)     # [Sq, dh]
        contrib = jnp.dot(ctx, wo[lo:hi, :], preferred_element_type=jnp.float32)
        proj = contrib if proj is None else proj + contrib
    return proj + bo


# ----------------------------- Pallas kernels -----------------------------

def _embed_pe_kernel(src_ref, w_ref, bpe_ref, o_ref):
    # out[b, s, :] = src[b, s, 0] * (sqrt(D)*W_emb) + (sqrt(D)*b_emb + PE[s])
    w = w_ref[...]          # [1, D]
    bpe = bpe_ref[...]      # [S, D]
    for b in range(src_ref.shape[0]):            # small static batch
        o_ref[b] = (src_ref[b] * w + bpe).astype(o_ref.dtype)


def _encoder_layer_kernel(x_ref,
                          wq_ref, bq_ref, wkv_ref, bkv_ref, wo_ref, bo_ref,
                          g1_ref, be1_ref,
                          w1_ref, b1_ref, w2_ref, b2_ref, g2_ref, be2_ref,
                          o_ref, *, nhead):
    # post-norm TransformerEncoderLayer (activation=relu), one batch at a time.
    wq, bq = wq_ref[...], bq_ref[...]
    wkv, bkv = wkv_ref[...], bkv_ref[...]
    wo, bo = wo_ref[...], bo_ref[...]
    g1, be1 = g1_ref[...], be1_ref[...]
    w1, b1 = w1_ref[...], b1_ref[...]
    w2, b2 = w2_ref[...], b2_ref[...]
    g2, be2 = g2_ref[...], be2_ref[...]
    for b in range(x_ref.shape[0]):              # static unroll over batch
        x = x_ref[b]                             # [S, D]
        sa = _attn_rows(x, x, wq, bq, wkv, bkv, wo, bo, nhead)
        x2 = _layernorm(x + sa, g1, be1)
        h = jnp.maximum(jnp.dot(x2, w1, preferred_element_type=jnp.float32) + b1, 0.0)
        ff = jnp.dot(h, w2, preferred_element_type=jnp.float32) + b2
        o_ref[b] = _layernorm(x2 + ff, g2, be2).astype(o_ref.dtype)


def _decoder_layer_kernel(y_ref, mem_ref,
                          swq_ref, sbq_ref, swkv_ref, sbkv_ref, swo_ref, sbo_ref,
                          g1_ref, be1_ref,
                          cwq_ref, cbq_ref, cwkv_ref, cbkv_ref, cwo_ref, cbo_ref,
                          g2_ref, be2_ref,
                          w1_ref, b1_ref, w2_ref, b2_ref, g3_ref, be3_ref,
                          o_ref, *, nhead):
    # post-norm TransformerDecoderLayer (activation=gelu), no masks.
    swq, sbq = swq_ref[...], sbq_ref[...]
    swkv, sbkv = swkv_ref[...], sbkv_ref[...]
    swo, sbo = swo_ref[...], sbo_ref[...]
    g1, be1 = g1_ref[...], be1_ref[...]
    cwq, cbq = cwq_ref[...], cbq_ref[...]
    cwkv, cbkv = cwkv_ref[...], cbkv_ref[...]
    cwo, cbo = cwo_ref[...], cbo_ref[...]
    g2, be2 = g2_ref[...], be2_ref[...]
    w1, b1 = w1_ref[...], b1_ref[...]
    w2, b2 = w2_ref[...], b2_ref[...]
    g3, be3 = g3_ref[...], be3_ref[...]
    for b in range(y_ref.shape[0]):
        y = y_ref[b]                             # [S, D]
        mem = mem_ref[b]                         # [S, D]
        sa = _attn_rows(y, y, swq, sbq, swkv, sbkv, swo, sbo, nhead)
        y2 = _layernorm(y + sa, g1, be1)
        ca = _attn_rows(y2, mem, cwq, cbq, cwkv, cbkv, cwo, cbo, nhead)
        y3 = _layernorm(y2 + ca, g2, be2)
        h = _gelu(jnp.dot(y3, w1, preferred_element_type=jnp.float32) + b1)
        ff = jnp.dot(h, w2, preferred_element_type=jnp.float32) + b2
        o_ref[b] = _layernorm(y3 + ff, g3, be3).astype(o_ref.dtype)


def _classifier_kernel(x_ref, w_ref, b_ref, o_ref):
    o_ref[...] = (jnp.dot(x_ref[...], w_ref[...], preferred_element_type=jnp.float32)
                  + b_ref[...]).astype(o_ref.dtype)


# ----------------------------- kernel wrappers -----------------------------

def embed_posenc(src, w_emb_scaled, bias_pe):
    B, S, _ = src.shape
    D = w_emb_scaled.shape[-1]
    return pl.pallas_call(
        _embed_pe_kernel,
        out_shape=jax.ShapeDtypeStruct((B, S, D), jnp.float32),
        in_specs=_vmem_specs(3),
        out_specs=_VMEM_SPEC,
    )(src, w_emb_scaled, bias_pe)


def encoder_layer(x, p, nhead):
    B, S, D = x.shape
    a = p["self_attn"]
    args = (x, a["wq"], a["bq"], a["wkv"], a["bkv"], a["wo"], a["bo"],
            p["ln1_g"], p["ln1_b"],
            p["w1"], p["b1"], p["w2"], p["b2"], p["ln2_g"], p["ln2_b"])
    return pl.pallas_call(
        functools.partial(_encoder_layer_kernel, nhead=nhead),
        out_shape=jax.ShapeDtypeStruct((B, S, D), jnp.float32),
        in_specs=_vmem_specs(len(args)),
        out_specs=_VMEM_SPEC,
    )(*args)


def decoder_layer(y, memory, p, nhead):
    B, S, D = y.shape
    sa, ca = p["self_attn"], p["cross_attn"]
    args = (y, memory,
            sa["wq"], sa["bq"], sa["wkv"], sa["bkv"], sa["wo"], sa["bo"],
            p["ln1_g"], p["ln1_b"],
            ca["wq"], ca["bq"], ca["wkv"], ca["bkv"], ca["wo"], ca["bo"],
            p["ln2_g"], p["ln2_b"],
            p["w1"], p["b1"], p["w2"], p["b2"], p["ln3_g"], p["ln3_b"])
    return pl.pallas_call(
        functools.partial(_decoder_layer_kernel, nhead=nhead),
        out_shape=jax.ShapeDtypeStruct((B, S, D), jnp.float32),
        in_specs=_vmem_specs(len(args)),
        out_specs=_VMEM_SPEC,
    )(*args)


def classifier(x2d, w, b):
    M = x2d.shape[0]
    N = w.shape[1]
    return pl.pallas_call(
        _classifier_kernel,
        out_shape=jax.ShapeDtypeStruct((M, N), jnp.float32),
        in_specs=_vmem_specs(3),
        out_specs=_VMEM_SPEC,
    )(x2d, w, b)


# ------------------------------- forward pass -------------------------------

@functools.partial(jax.jit, static_argnames=("nhead",))
def transformer_seq2seq_de_forward(params, src, nhead):
    """src: [B, S, 1]  ->  output: [B, S] (one prediction per time step)."""
    B, S, _ = src.shape
    D = params["w_emb_scaled"].shape[-1]

    # TokenEmbedding (Linear(1,D) * sqrt(D)) fused with positional encoding;
    # dropout = identity (eval).  Batch-first layout [B, S, D] throughout.
    x = embed_posenc(src, params["w_emb_scaled"], params["bias_pe"])

    for p in params["enc_layers"]:
        x = encoder_layer(x, p, nhead)
    memory = x

    # tgt = decoder_input.expand(-1, B, -1)  (batch-first broadcast here)
    y = jnp.broadcast_to(params["decoder_input"][None, :, :], (B, S, D))
    for p in params["dec_layers"]:
        y = decoder_layer(y, memory, p, nhead)

    # permute(1,0,2).reshape(B,-1) in the PyTorch (seq-first) code is just a
    # contiguous reshape in this batch-first layout.
    out = classifier(y.reshape(B, S * D), params["w_cls"], params["b_cls"])
    return out


# ------------------------------- parameter init -------------------------------

def _init_linear(key, fan_in, fan_out, scale=0.02):
    kw, kb = jax.random.split(key)
    w = jax.random.normal(kw, (fan_in, fan_out), jnp.float32) * scale
    b = jax.random.normal(kb, (fan_out,), jnp.float32) * scale
    return w, b


def _init_attn(key, D):
    ks = jax.random.split(key, 4)
    wq, bq = _init_linear(ks[0], D, D)
    wk, bk = _init_linear(ks[1], D, D)
    wv, bv = _init_linear(ks[2], D, D)
    wo, bo = _init_linear(ks[3], D, D)
    return dict(wq=wq, bq=bq.reshape(1, D),
                wkv=jnp.concatenate([wk, wv], axis=1),                 # [D, 2D]
                bkv=jnp.concatenate([bk, bv]).reshape(1, 2 * D),
                wo=wo, bo=bo.reshape(1, D))


def _init_enc_layer(key, D):
    ks = jax.random.split(key, 3)
    w1, b1 = _init_linear(ks[1], D, 4 * D)    # encoder FFN = d_model * 4
    w2, b2 = _init_linear(ks[2], 4 * D, D)
    return dict(self_attn=_init_attn(ks[0], D),
                w1=w1, b1=b1.reshape(1, 4 * D), w2=w2, b2=b2.reshape(1, D),
                ln1_g=jnp.ones((1, D), jnp.float32), ln1_b=jnp.zeros((1, D), jnp.float32),
                ln2_g=jnp.ones((1, D), jnp.float32), ln2_b=jnp.zeros((1, D), jnp.float32))


def _init_dec_layer(key, D, dff):
    ks = jax.random.split(key, 4)
    w1, b1 = _init_linear(ks[2], D, dff)
    w2, b2 = _init_linear(ks[3], dff, D)
    return dict(self_attn=_init_attn(ks[0], D),
                cross_attn=_init_attn(ks[1], D),
                w1=w1, b1=b1.reshape(1, dff), w2=w2, b2=b2.reshape(1, D),
                ln1_g=jnp.ones((1, D), jnp.float32), ln1_b=jnp.zeros((1, D), jnp.float32),
                ln2_g=jnp.ones((1, D), jnp.float32), ln2_b=jnp.zeros((1, D), jnp.float32),
                ln3_g=jnp.ones((1, D), jnp.float32), ln3_b=jnp.zeros((1, D), jnp.float32))


def init_params(key, window_size, d_model, num_enc, num_dec, dff):
    S, D = window_size, d_model
    keys = jax.random.split(key, 2 + num_enc + num_dec)

    w_emb, b_emb = _init_linear(keys[0], 1, D)        # TokenEmbedding.linear
    w_cls, b_cls = _init_linear(keys[1], S * D, S)    # classifier Linear(D*S, S)

    # sin/cos positional encoding table [S, D]
    position = jnp.arange(S, dtype=jnp.float32)[:, None]
    div_term = jnp.exp(jnp.arange(0, D, 2, dtype=jnp.float32) * (-math.log(10000.0) / D))
    pe = jnp.zeros((S, D), jnp.float32)
    pe = pe.at[:, 0::2].set(jnp.sin(position * div_term))
    pe = pe.at[:, 1::2].set(jnp.cos(position * div_term))

    # fold sqrt(D) embedding scale + b_emb + positional encoding into constants
    sqrt_d = math.sqrt(D)
    w_emb_scaled = (w_emb * sqrt_d).reshape(1, D)     # [1, D]
    bias_pe = b_emb.reshape(1, D) * sqrt_d + pe       # [S, D]

    # decoder_input parameter is initialized to zeros in the PyTorch module
    decoder_input = jnp.zeros((S, D), jnp.float32)

    enc_layers = [_init_enc_layer(keys[2 + i], D) for i in range(num_enc)]
    dec_layers = [_init_dec_layer(keys[2 + num_enc + i], D, dff) for i in range(num_dec)]

    return dict(w_emb_scaled=w_emb_scaled, bias_pe=bias_pe,
                decoder_input=decoder_input,
                enc_layers=enc_layers, dec_layers=dec_layers,
                w_cls=w_cls, b_cls=b_cls.reshape(1, S))


# ----------------------------------- main -----------------------------------

if __name__ == "__main__":
    # Small-shape config consistent with the module: window_size=S, d_model=D
    B, S, D, H = 2, 8, 32, 4
    NUM_ENC, NUM_DEC, DFF = 2, 2, 64

    key = jax.random.PRNGKey(0)
    k_param, k_src = jax.random.split(key)
    params = init_params(k_param, window_size=S, d_model=D,
                         num_enc=NUM_ENC, num_dec=NUM_DEC, dff=DFF)

    src = jax.random.normal(k_src, (B, S, 1), jnp.float32)   # aggregate power series

    out = transformer_seq2seq_de_forward(params, src, nhead=H)
    out = jax.block_until_ready(out)
    assert out.shape == (B, S), out.shape
    assert bool(jnp.all(jnp.isfinite(out)))
    print("KERNEL_OK")
</pallas_src>

<mosaic_0001>
module attributes {stable_mosaic.version = 11 : i64} {
  func.func @_embed_pe_kernel(%arg0: memref<2x8x1xf32, #tpu.memory_space<vmem>>, %arg1: memref<1x32xf32, #tpu.memory_space<vmem>>, %arg2: memref<8x32xf32, #tpu.memory_space<vmem>>, %arg3: memref<2x8x32xf32, #tpu.memory_space<vmem>>) attributes {dimension_semantics = [], scalar_prefetch = 0 : i64, scratch_operands = 0 : i64, tpu.core_type = #tpu.core_type<tc>} {
    %c0 = arith.constant 0 : index
    %c0_0 = arith.constant 0 : index
    %0 = vector.load %arg1[%c0, %c0_0] : memref<1x32xf32, #tpu.memory_space<vmem>>, vector<1x32xf32>
    %c0_1 = arith.constant 0 : index
    %c0_2 = arith.constant 0 : index
    %1 = vector.load %arg2[%c0_1, %c0_2] : memref<8x32xf32, #tpu.memory_space<vmem>>, vector<8x32xf32>
    %c0_3 = arith.constant 0 : index
    %c0_4 = arith.constant 0 : index
    %c0_5 = arith.constant 0 : index
    %2 = vector.load %arg0[%c0_3, %c0_4, %c0_5] : memref<2x8x1xf32, #tpu.memory_space<vmem>>, vector<1x8x1xf32>
    %3 = vector.shape_cast %2 : vector<1x8x1xf32> to vector<8x1xf32>
    %4 = vector.broadcast %3 : vector<8x1xf32> to vector<8x32xf32>
    %5 = vector.broadcast %0 : vector<1x32xf32> to vector<8x32xf32>
    %6 = arith.mulf %4, %5 : vector<8x32xf32>
    %7 = arith.addf %6, %1 : vector<8x32xf32>
    %c0_6 = arith.constant 0 : index
    %c0_7 = arith.constant 0 : index
    %c0_8 = arith.constant 0 : index
    %8 = vector.load %arg3[%c0_6, %c0_7, %c0_8] : memref<2x8x32xf32, #tpu.memory_space<vmem>>, vector<1x8x32xf32>
    %9 = vector.shape_cast %8 : vector<1x8x32xf32> to vector<8x32xf32>
    %10 = vector.shape_cast %7 : vector<8x32xf32> to vector<1x8x32xf32>
    tpu.vector_store %arg3[%c0_6, %c0_7, %c0_8], %10 {strides = array<i32>} : memref<2x8x32xf32, #tpu.memory_space<vmem>>, vector<1x8x32xf32>,
    %c1 = arith.constant 1 : index
    %c0_9 = arith.constant 0 : index
    %c0_10 = arith.constant 0 : index
    %11 = vector.load %arg0[%c1, %c0_9, %c0_10] : memref<2x8x1xf32, #tpu.memory_space<vmem>>, vector<1x8x1xf32>
    %12 = vector.shape_cast %11 : vector<1x8x1xf32> to vector<8x1xf32>
    %13 = vector.broadcast %12 : vector<8x1xf32> to vector<8x32xf32>
    %14 = vector.broadcast %0 : vector<1x32xf32> to vector<8x32xf32>
    %15 = arith.mulf %13, %14 : vector<8x32xf32>
    %16 = arith.addf %15, %1 : vector<8x32xf32>
    %c1_11 = arith.constant 1 : index
    %c0_12 = arith.constant 0 : index
    %c0_13 = arith.constant 0 : index
    %17 = vector.load %arg3[%c1_11, %c0_12, %c0_13] : memref<2x8x32xf32, #tpu.memory_space<vmem>>, vector<1x8x32xf32>
    %18 = vector.shape_cast %17 : vector<1x8x32xf32> to vector<8x32xf32>
    %19 = vector.shape_cast %16 : vector<8x32xf32> to vector<1x8x32xf32>
    tpu.vector_store %arg3[%c1_11, %c0_12, %c0_13], %19 {strides = array<i32>} : memref<2x8x32xf32, #tpu.memory_space<vmem>>, vector<1x8x32xf32>,
    return
  }
}

module attributes {stable_mosaic.version = 11 : i64} {
  func.func @_encoder_layer_kernel(%arg0: memref<2x8x32xf32, #tpu.memory_space<vmem>>, %arg1: memref<32x32xf32, #tpu.memory_space<vmem>>, %arg2: memref<1x32xf32, #tpu.memory_space<vmem>>, %arg3: memref<32x64xf32, #tpu.memory_space<vmem>>, %arg4: memref<1x64xf32, #tpu.memory_space<vmem>>, %arg5: memref<32x32xf32, #tpu.memory_space<vmem>>, %arg6: memref<1x32xf32, #tpu.memory_space<vmem>>, %arg7: memref<1x32xf32, #tpu.memory_space<vmem>>, %arg8: memref<1x32xf32, #tpu.memory_space<vmem>>, %arg9: memref<32x128xf32, #tpu.memory_space<vmem>>, %arg10: memref<1x128xf32, #tpu.memory_space<vmem>>, %arg11: memref<128x32xf32, #tpu.memory_space<vmem>>, %arg12: memref<1x32xf32, #tpu.memory_space<vmem>>, %arg13: memref<1x32xf32, #tpu.memory_space<vmem>>, %arg14: memref<1x32xf32, #tpu.memory_space<vmem>>, %arg15: memref<2x8x32xf32, #tpu.memory_space<vmem>>) attributes {dimension_semantics = [], scalar_prefetch = 0 : i64, scratch_operands = 0 : i64, tpu.core_type = #tpu.core_type<tc>} {
    %c0 = arith.constant 0 : index
    %c0_0 = arith.constant 0 : index
    %0 = vector.load %arg1[%c0, %c0_0] : memref<32x32xf32, #tpu.memory_space<vmem>>, vector<32x32xf32>
    %c0_1 = arith.constant 0 : index
    %c0_2 = arith.constant 0 : index
    %1 = vector.load %arg2[%c0_1, %c0_2] : memref<1x32xf32, #tpu.memory_space<vmem>>, vector<1x32xf32>
    %c0_3 = arith.constant 0 : index
    %c0_4 = arith.constant 0 : index
    %2 = vector.load %arg3[%c0_3, %c0_4] : memref<32x64xf32, #tpu.memory_space<vmem>>, vector<32x64xf32>
    %c0_5 = arith.constant 0 : index
    %c0_6 = arith.constant 0 : index
    %3 = vector.load %arg4[%c0_5, %c0_6] : memref<1x64xf32, #tpu.memory_space<vmem>>, vector<1x64xf32>
    %c0_7 = arith.constant 0 : index
    %c0_8 = arith.constant 0 : index
    %4 = vector.load %arg5[%c0_7, %c0_8] : memref<32x32xf32, #tpu.memory_space<vmem>>, vector<32x32xf32>
    %c0_9 = arith.constant 0 : index
    %c0_10 = arith.constant 0 : index
    %5 = vector.load %arg6[%c0_9, %c0_10] : memref<1x32xf32, #tpu.memory_space<vmem>>, vector<1x32xf32>
    %c0_11 = arith.constant 0 : index
    %c0_12 = arith.constant 0 : index
    %6 = vector.load %arg7[%c0_11, %c0_12] : memref<1x32xf32, #tpu.memory_space<vmem>>, vector<1x32xf32>
    %c0_13 = arith.constant 0 : index
    %c0_14 = arith.constant 0 : index
    %7 = vector.load %arg8[%c0_13, %c0_14] : memref<1x32xf32, #tpu.memory_space<vmem>>, vector<1x32xf32>
    %c0_15 = arith.constant 0 : index
    %c0_16 = arith.constant 0 : index
    %8 = vector.load %arg9[%c0_15, %c0_16] : memref<32x128xf32, #tpu.memory_space<vmem>>, vector<32x128xf32>
    %c0_17 = arith.constant 0 : index
    %c0_18 = arith.constant 0 : index
    %9 = vector.load %arg10[%c0_17, %c0_18] : memref<1x128xf32, #tpu.memory_space<vmem>>, vector<1x128xf32>
    %c0_19 = arith.constant 0 : index
    %c0_20 = arith.constant 0 : index
    %10 = vector.load %arg11[%c0_19, %c0_20] : memref<128x32xf32, #tpu.memory_space<vmem>>, vector<128x32xf32>
    %c0_21 = arith.constant 0 : index
    %c0_22 = arith.constant 0 : index
    %11 = vector.load %arg12[%c0_21, %c0_22] : memref<1x32xf32, #tpu.memory_space<vmem>>, vector<1x32xf32>
    %c0_23 = arith.constant 0 : index
    %c0_24 = arith.constant 0 : index
    %12 = vector.load %arg13[%c0_23, %c0_24] : memref<1x32xf32, #tpu.memory_space<vmem>>, vector<1x32xf32>
    %c0_25 = arith.constant 0 : index
    %c0_26 = arith.constant 0 : index
    %13 = vector.load %arg14[%c0_25, %c0_26] : memref<1x32xf32, #tpu.memory_space<vmem>>, vector<1x32xf32>
    %c0_27 = arith.constant 0 : index
    %c0_28 = arith.constant 0 : index
    %c0_29 = arith.constant 0 : index
    %14 = vector.load %arg0[%c0_27, %c0_28, %c0_29] : memref<2x8x32xf32, #tpu.memory_space<vmem>>, vector<1x8x32xf32>
    %15 = vector.shape_cast %14 : vector<1x8x32xf32> to vector<8x32xf32>
    %cst = arith.constant dense<0.000000e+00> : vector<8x32xf32>
    %16 = tpu.matmul %15, %0, %cst {dimension_numbers = #tpu.dot_dimension_numbers<[1], [0], [0], [1], [0, 0, 1, 1], [], []>} : vector<8x32xf32>, vector<32x32xf32>, vector<8x32xf32> -> vector<8x32xf32>
    %17 = vector.broadcast %1 : vector<1x32xf32> to vector<8x32xf32>
    %18 = arith.addf %16, %17 : vector<8x32xf32>
    %cst_30 = arith.constant dense<0.000000e+00> : vector<8x64xf32>
    %19 = tpu.matmul %15, %2, %cst_30 {dimension_numbers = #tpu.dot_dimension_numbers<[1], [0], [0], [1], [0, 0, 1, 1], [], []>} : vector<8x32xf32>, vector<32x64xf32>, vector<8x64xf32> -> vector<8x64xf32>
    %20 = vector.broadcast %3 : vector<1x64xf32> to vector<8x64xf32>
    %21 = arith.addf %19, %20 : vector<8x64xf32>
    %22 = vector.extract_strided_slice %18 {offsets = [0, 0], sizes = [8, 8], strides = [1, 1]} : vector<8x32xf32> to vector<8x8xf32>
    %23 = vector.extract_strided_slice %21 {offsets = [0, 0], sizes = [8, 8], strides = [1, 1]} : vector<8x64xf32> to vector<8x8xf32>
    %24 = vector.extract_strided_slice %21 {offsets = [0, 32], sizes = [8, 8], strides = [1, 1]} : vector<8x64xf32> to vector<8x8xf32>
    %25 = tpu.transpose %23, [1, 0] : vector<8x8xf32> -> vector<8x8xf32>
    %cst_31 = arith.constant dense<0.000000e+00> : vector<8x8xf32>
    %26 = tpu.matmul %22, %25, %cst_31 {dimension_numbers = #tpu.dot_dimension_numbers<[1], [0], [0], [1], [0, 0, 1, 1], [], []>} : vector<8x8xf32>, vector<8x8xf32>, vector<8x8xf32> -> vector<8x8xf32>
    %cst_32 = arith.constant 0.353553385 : f32
    %27 = vector.broadcast %cst_32 : f32 to vector<8x8xf32>
    %28 = arith.mulf %26, %27 : vector<8x8xf32>
    %cst_33 = arith.constant dense<0xFF800000> : vector<8xf32>
    %29 = vector.multi_reduction <maximumf>, %28, %cst_33 [1] : vector<8x8xf32> to vector<8xf32>
    %30 = vector.shape_cast %29 : vector<8xf32> to vector<8x1xf32>
    %31 = vector.broadcast %30 : vector<8x1xf32> to vector<8x8xf32>
    %32 = arith.subf %28, %31 : vector<8x8xf32>
    %33 = math.exp %32 : vector<8x8xf32>
    %cst_34 = arith.constant dense<0.000000e+00> : vector<8xf32>
    %34 = vector.multi_reduction <add>, %33, %cst_34 [1] : vector<8x8xf32> to vector<8xf32>
    %35 = vector.shape_cast %34 : vector<8xf32> to vector<8x1xf32>
    %36 = tpu.reciprocal %35 {approx = true} : vector<8x1xf32> -> vector<8x1xf32>
    %37 = vector.broadcast %36 : vector<8x1xf32> to vector<8x8xf32>
    %38 = arith.mulf %33, %37 : vector<8x8xf32>
    %cst_35 = arith.constant dense<0.000000e+00> : vector<8x8xf32>
    %39 = tpu.matmul %38, %24, %cst_35 {dimension_numbers = #tpu.dot_dimension_numbers<[1], [0], [0], [1], [0, 0, 1, 1], [], []>} : vector<8x8xf32>, vector<8x8xf32>, vector<8x8xf32> -> vector<8x8xf32>
    %40 = vector.extract_strided_slice %4 {offsets = [0, 0], sizes = [8, 32], strides = [1, 1]} : vector<32x32xf32> to vector<8x32xf32>
    %cst_36 = arith.constant dense<0.000000e+00> : vector<8x32xf32>
    %41 = tpu.matmul %39, %40, %cst_36 {dimension_numbers = #tpu.dot_dimension_numbers<[1], [0], [0], [1], [0, 0, 1, 1], [], []>} : vector<8x8xf32>, vector<8x32xf32>, vector<8x32xf32> -> vector<8x32xf32>
    %42 = vector.extract_strided_slice %18 {offsets = [0, 8], sizes = [8, 8], strides = [1, 1]} : vector<8x32xf32> to vector<8x8xf32>
    %43 = vector.extract_strided_slice %21 {offsets = [0, 8], sizes = [8, 8], strides = [1, 1]} : vector<8x64xf32> to vector<8x8xf32>
    %44 = vector.extract_strided_slice %21 {offsets = [0, 40], sizes = [8, 8], strides = [1, 1]} : vector<8x64xf32> to vector<8x8xf32>
    %45 = tpu.transpose %43, [1, 0] : vector<8x8xf32> -> vector<8x8xf32>
    %cst_37 = arith.constant dense<0.000000e+00> : vector<8x8xf32>
    %46 = tpu.matmul %42, %45, %cst_37 {dimension_numbers = #tpu.dot_dimension_numbers<[1], [0], [0], [1], [0, 0, 1, 1], [], []>} : vector<8x8xf32>, vector<8x8xf32>, vector<8x8xf32> -> vector<8x8xf32>
    %cst_38 = arith.constant 0.353553385 : f32
    %47 = vector.broadcast %cst_38 : f32 to vector<8x8xf32>
    %48 = arith.mulf %46, %47 : vector<8x8xf32>
    %cst_39 = arith.constant dense<0xFF800000> : vector<8xf32>
    %49 = vector.multi_reduction <maximumf>, %48, %cst_39 [1] : vector<8x8xf32> to vector<8xf32>
    %50 = vector.shape_cast %49 : vector<8xf32> to vector<8x1xf32>
    %51 = vector.broadcast %50 : vector<8x1xf32> to vector<8x8xf32>
    %52 = arith.subf %48, %51 : vector<8x8xf32>
    %53 = math.exp %52 : vector<8x8xf32>
    %cst_40 = arith.constant dense<0.000000e+00> : vector<8xf32>
    %54 = vector.multi_reduction <add>, %53, %cst_40 [1] : vector<8x8xf32> to vector<8xf32>
    %55 = vector.shape_cast %54 : vector<8xf32> to vector<8x1xf32>
    %56 = tpu.reciprocal %55 {approx = true} : vector<8x1xf32> -> vector<8x1xf32>
    %57 = vector.broadcast %56 : vector<8x1xf32> to vector<8x8xf32>
    %58 = arith.mulf %53, %57 : vector<8x8xf32>
    %cst_41 = arith.constant dense<0.000000e+00> : vector<8x8xf32>
    %59 = tpu.matmul %58, %44, %cst_41 {dimension_numbers = #tpu.dot_dimension_numbers<[1], [0], [0], [1], [0, 0, 1, 1], [], []>} : vector<8x8xf32>, vector<8x8xf32>, vector<8x8xf32> -> vector<8x8xf32>
    %60 = vector.extract_strided_slice %4 {offsets = [8, 0], sizes = [8, 32], strides = [1, 1]} : vector<32x32xf32> to vector<8x32xf32>
    %cst_42 = arith.constant dense<0.000000e+00> : vector<8x32xf32>
    %61 = tpu.matmul %59, %60, %cst_42 {dimension_numbers = #tpu.dot_dimension_numbers<[1], [0], [0], [1], [0, 0, 1, 1], [], []>} : vector<8x8xf32>, vector<8x32xf32>, vector<8x32xf32> -> vector<8x32xf32>
    %62 = arith.addf %41, %61 : vector<8x32xf32>
    %63 = vector.extract_strided_slice %18 {offsets = [0, 16], sizes = [8, 8], strides = [1, 1]} : vector<8x32xf32> to vector<8x8xf32>
    %64 = vector.extract_strided_slice %21 {offsets = [0, 16], sizes = [8, 8], strides = [1, 1]} : vector<8x64xf32> to vector<8x8xf32>
    %65 = vector.extract_strided_slice %21 {offsets = [0, 48], sizes = [8, 8], strides = [1, 1]} : vector<8x64xf32> to vector<8x8xf32>
    %66 = tpu.transpose %64, [1, 0] : vector<8x8xf32> -> vector<8x8xf32>
    %cst_43 = arith.constant dense<0.000000e+00> : vector<8x8xf32>
    %67 = tpu.matmul %63, %66, %cst_43 {dimension_numbers = #tpu.dot_dimension_numbers<[1], [0], [0], [1], [0, 0, 1, 1], [], []>} : vector<8x8xf32>, vector<8x8xf32>, vector<8x8xf32> -> vector<8x8xf32>
    %cst_44 = arith.constant 0.353553385 : f32
    %68 = vector.broadcast %cst_44 : f32 to vector<8x8xf32>
    %69 = arith.mulf %67, %68 : vector<8x8xf32>
    %cst_45 = arith.constant dense<0xFF800000> : vector<8xf32>
    %70 = vector.multi_reduction <maximumf>, %69, %cst_45 [1] : vector<8x8xf32> to vector<8xf32>
    %71 = vector.shape_cast %70 : vector<8xf32> to vector<8x1xf32>
    %72 = vector.broadcast %71 : vector<8x1xf32> to vector<8x8xf32>
    %73 = arith.subf %69, %72 : vector<8x8xf32>
    %74 = math.exp %73 : vector<8x8xf32>
    %cst_46 = arith.constant dense<0.000000e+00> : vector<8xf32>
    %75 = vector.multi_reduction <add>, %74, %cst_46 [1] : vector<8x8xf32> to vector<8xf32>
    %76 = vector.shape_cast %75 : vector<8xf32> to vector<8x1xf32>
    %77 = tpu.reciprocal %76 {approx = true} : vector<8x1xf32> -> vector<8x1xf32>
    %78 = vector.broadcast %77 : vector<8x1xf32> to vector<8x8xf32>
    %79 = arith.mulf %74, %78 : vector<8x8xf32>
    %cst_47 = arith.constant dense<0.000000e+00> : vector<8x8xf32>
    %80 = tpu.matmul %79, %65, %cst_47 {dimension_numbers = #tpu.dot_dimension_numbers<[1], [0], [0], [1], [0, 0, 1, 1], [], []>} : vector<8x8xf32>, vector<8x8xf32>, vector<8x8xf32> -> vector<8x8xf32>
    %81 = vector.extract_strided_slice %4 {offsets = [16, 0], sizes = [8, 32], strides = [1, 1]} : vector<32x32xf32> to vector<8x32xf32>
    %cst_48 = arith.constant dense<0.000000e+00> : vector<8x32xf32>
    %82 = tpu.matmul %80, %81, %cst_48 {dimension_numbers = #tpu.dot_dimension_numbers<[1], [0], [0], [1], [0, 0, 1, 1], [], []>} : vector<8x8xf32>, vector<8x32xf32>, vector<8x32xf32> -> vector<8x32xf32>
    %83 = arith.addf %62, %82 : vector<8x32xf32>
    %84 = vector.extract_strided_slice %18 {offsets = [0, 24], sizes = [8, 8], strides = [1, 1]} : vector<8x32xf32> to vector<8x8xf32>
    %85 = vector.extract_strided_slice %21 {offsets = [0, 24], sizes = [8, 8], strides = [1, 1]} : vector<8x64xf32> to vector<8x8xf32>
    %86 = vector.extract_strided_slice %21 {offsets = [0, 56], sizes = [8, 8], strides = [1, 1]} : vector<8x64xf32> to vector<8x8xf32>
    %87 = tpu.transpose %85, [1, 0] : vector<8x8xf32> -> vector<8x8xf32>
    %cst_49 = arith.constant dense<0.000000e+00> : vector<8x8xf32>
    %88 = tpu.matmul %84, %87, %cst_49 {dimension_numbers = #tpu.dot_dimension_numbers<[1], [0], [0], [1], [0, 0, 1, 1], [], []>} : vector<8x8xf32>, vector<8x8xf32>, vector<8x8xf32> -> vector<8x8xf32>
    %cst_50 = arith.constant 0.353553385 : f32
    %89 = vector.broadcast %cst_50 : f32 to vector<8x8xf32>
    %90 = arith.mulf %88, %89 : vector<8x8xf32>
    %cst_51 = arith.constant dense<0xFF800000> : vector<8xf32>
    %91 = vector.multi_reduction <maximumf>, %90, %cst_51 [1] : vector<8x8xf32> to vector<8xf32>
    %92 = vector.shape_cast %91 : vector<8xf32> to vector<8x1xf32>
    %93 = vector.broadcast %92 : vector<8x1xf32> to vector<8x8xf32>
    %94 = arith.subf %90, %93 : vector<8x8xf32>
    %95 = math.exp %94 : vector<8x8xf32>
    %cst_52 = arith.constant dense<0.000000e+00> : vector<8xf32>
    %96 = vector.multi_reduction <add>, %95, %cst_52 [1] : vector<8x8xf32> to vector<8xf32>
    %97 = vector.shape_cast %96 : vector<8xf32> to vector<8x1xf32>
    %98 = tpu.reciprocal %97 {approx = true} : vector<8x1xf32> -> vector<8x1xf32>
    %99 = vector.broadcast %98 : vector<8x1xf32> to vector<8x8xf32>
    %100 = arith.mulf %95, %99 : vector<8x8xf32>
    %cst_53 = arith.constant dense<0.000000e+00> : vector<8x8xf32>
    %101 = tpu.matmul %100, %86, %cst_53 {dimension_numbers = #tpu.dot_dimension_numbers<[1], [0], [0], [1], [0, 0, 1, 1], [], []>} : vector<8x8xf32>, vector<8x8xf32>, vector<8x8xf32> -> vector<8x8xf32>
    %102 = vector.extract_strided_slice %4 {offsets = [24, 0], sizes = [8, 32], strides = [1, 1]} : vector<32x32xf32> to vector<8x32xf32>
    %cst_54 = arith.constant dense<0.000000e+00> : vector<8x32xf32>
    %103 = tpu.matmul %101, %102, %cst_54 {dimension_numbers = #tpu.dot_dimension_numbers<[1], [0], [0], [1], [0, 0, 1, 1], [], []>} : vector<8x8xf32>, vector<8x32xf32>, vector<8x32xf32> -> vector<8x32xf32>
    %104 = arith.addf %83, %103 : vector<8x32xf32>
    %105 = vector.broadcast %5 : vector<1x32xf32> to vector<8x32xf32>
    %106 = arith.addf %104, %105 : vector<8x32xf32>
    %107 = arith.addf %15, %106 : vector<8x32xf32>
    %cst_55 = arith.constant dense<0.000000e+00> : vector<8xf32>
    %108 = vector.multi_reduction <add>, %107, %cst_55 [1] : vector<8x32xf32> to vector<8xf32>
    %109 = vector.shape_cast %108 : vector<8xf32> to vector<8x1xf32>
    %cst_56 = arith.constant 3.200000e+01 : f32
    %110 = vector.broadcast %cst_56 : f32 to vector<8x1xf32>
    %111 = arith.divf %109, %110 : vector<8x1xf32>
    %112 = vector.broadcast %111 : vector<8x1xf32> to vector<8x32xf32>
    %113 = arith.subf %107, %112 : vector<8x32xf32>
    %114 = arith.mulf %113, %113 : vector<8x32xf32>
    %cst_57 = arith.constant dense<0.000000e+00> : vector<8xf32>
    %115 = vector.multi_reduction <add>, %114, %cst_57 [1] : vector<8x32xf32> to vector<8xf32>
    %116 = vector.shape_cast %115 : vector<8xf32> to vector<8x1xf32>
    %cst_58 = arith.constant 3.200000e+01 : f32
    %117 = vector.broadcast %cst_58 : f32 to vector<8x1xf32>
    %118 = arith.divf %116, %117 : vector<8x1xf32>
    %119 = vector.broadcast %111 : vector<8x1xf32> to vector<8x32xf32>
    %120 = arith.subf %107, %119 : vector<8x32xf32>
    %cst_59 = arith.constant 9.99999974E-6 : f32
    %121 = vector.broadcast %cst_59 : f32 to vector<8x1xf32>
    %122 = arith.addf %118, %121 : vector<8x1xf32>
    %123 = math.rsqrt %122 : vector<8x1xf32>
    %124 = vector.broadcast %123 : vector<8x1xf32> to vector<8x32xf32>
    %125 = arith.mulf %120, %124 : vector<8x32xf32>
    %126 = vector.broadcast %6 : vector<1x32xf32> to vector<8x32xf32>
    %127 = arith.mulf %125, %126 : vector<8x32xf32>
    %128 = vector.broadcast %7 : vector<1x32xf32> to vector<8x32xf32>
    %129 = arith.addf %127, %128 : vector<8x32xf32>
    %cst_60 = arith.constant dense<0.000000e+00> : vector<8x128xf32>
    %130 = tpu.matmul %129, %8, %cst_60 {dimension_numbers = #tpu.dot_dimension_numbers<[1], [0], [0], [1], [0, 0, 1, 1], [], []>} : vector<8x32xf32>, vector<32x128xf32>, vector<8x128xf32> -> vector<8x128xf32>
    %131 = vector.broadcast %9 : vector<1x128xf32> to vector<8x128xf32>
    %132 = arith.addf %130, %131 : vector<8x128xf32>
    %cst_61 = arith.constant 0.000000e+00 : f32
    %133 = vector.broadcast %cst_61 : f32 to vector<8x128xf32>
    %134 = arith.maximumf %132, %133 : vector<8x128xf32>
    %cst_62 = arith.constant dense<0.000000e+00> : vector<8x32xf32>
    %135 = tpu.matmul %134, %10, %cst_62 {dimension_numbers = #tpu.dot_dimension_numbers<[1], [0], [0], [1], [0, 0, 1, 1], [], []>} : vector<8x128xf32>, vector<128x32xf32>, vector<8x32xf32> -> vector<8x32xf32>
    %136 = vector.broadcast %11 : vector<1x32xf32> to vector<8x32xf32>
    %137 = arith.addf %135, %136 : vector<8x32xf32>
    %138 = arith.addf %129, %137 : vector<8x32xf32>
    %cst_63 = arith.constant dense<0.000000e+00> : vector<8xf32>
    %139 = vector.multi_reduction <add>, %138, %cst_63 [1] : vector<8x32xf32> to vector<8xf32>
    %140 = vector.shape_cast %139 : vector<8xf32> to vector<8x1xf32>
    %cst_64 = arith.constant 3.200000e+01 : f32
    %141 = vector.broadcast %cst_64 : f32 to vector<8x1xf32>
    %142 = arith.divf %140, %141 : vector<8x1xf32>
    %143 = vector.broadcast %142 : vector<8x1xf32> to vector<8x32xf32>
    %144 = arith.subf %138, %143 : vector<8x32xf32>
    %145 = arith.mulf %144, %144 : vector<8x32xf32>
    %cst_65 = arith.constant dense<0.000000e+00> : vector<8xf32>
    %146 = vector.multi_reduction <add>, %145, %cst_65 [1] : vector<8x32xf32> to vector<8xf32>
    %147 = vector.shape_cast %146 : vector<8xf32> to vector<8x1xf32>
    %cst_66 = arith.constant 3.200000e+01 : f32
    %148 = vector.broadcast %cst_66 : f32 to vector<8x1xf32>
    %149 = arith.divf %147, %148 : vector<8x1xf32>
    %150 = vector.broadcast %142 : vector<8x1xf32> to vector<8x32xf32>
    %151 = arith.subf %138, %150 : vector<8x32xf32>
    %cst_67 = arith.constant 9.99999974E-6 : f32
    %152 = vector.broadcast %cst_67 : f32 to vector<8x1xf32>
    %153 = arith.addf %149, %152 : vector<8x1xf32>
    %154 = math.rsqrt %153 : vector<8x1xf32>
    %155 = vector.broadcast %154 : vector<8x1xf32> to vector<8x32xf32>
    %156 = arith.mulf %151, %155 : vector<8x32xf32>
    %157 = vector.broadcast %12 : vector<1x32xf32> to vector<8x32xf32>
    %158 = arith.mulf %156, %157 : vector<8x32xf32>
    %159 = vector.broadcast %13 : vector<1x32xf32> to vector<8x32xf32>
    %160 = arith.addf %158, %159 : vector<8x32xf32>
    %c0_68 = arith.constant 0 : index
    %c0_69 = arith.constant 0 : index
    %c0_70 = arith.constant 0 : index
    %161 = vector.load %arg15[%c0_68, %c0_69, %c0_70] : memref<2x8x32xf32, #tpu.memory_space<vmem>>, vector<1x8x32xf32>
    %162 = vector.shape_cast %161 : vector<1x8x32xf32> to vector<8x32xf32>
    %163 = vector.shape_cast %160 : vector<8x32xf32> to vector<1x8x32xf32>
    tpu.vector_store %arg15[%c0_68, %c0_69, %c0_70], %163 {strides = array<i32>} : memref<2x8x32xf32, #tpu.memory_space<vmem>>, vector<1x8x32xf32>,
    %c1 = arith.constant 1 : index
    %c0_71 = arith.constant 0 : index
    %c0_72 = arith.constant 0 : index
    %164 = vector.load %arg0[%c1, %c0_71, %c0_72] : memref<2x8x32xf32, #tpu.memory_space<vmem>>, vector<1x8x32xf32>
    %165 = vector.shape_cast %164 : vector<1x8x32xf32> to vector<8x32xf32>
    %cst_73 = arith.constant dense<0.000000e+00> : vector<8x32xf32>
    %166 = tpu.matmul %165, %0, %cst_73 {dimension_numbers = #tpu.dot_dimension_numbers<[1], [0], [0], [1], [0, 0, 1, 1], [], []>} : vector<8x32xf32>, vector<32x32xf32>, vector<8x32xf32> -> vector<8x32xf32>
    %167 = vector.broadcast %1 : vector<1x32xf32> to vector<8x32xf32>
    %168 = arith.addf %166, %167 : vector<8x32xf32>
    %cst_74 = arith.constant dense<0.000000e+00> : vector<8x64xf32>
    %169 = tpu.matmul %165, %2, %cst_74 {dimension_numbers = #tpu.dot_dimension_numbers<[1], [0], [0], [1], [0, 0, 1, 1], [], []>} : vector<8x32xf32>, vector<32x64xf32>, vector<8x64xf32> -> vector<8x64xf32>
    %170 = vector.broadcast %3 : vector<1x64xf32> to vector<8x64xf32>
    %171 = arith.addf %169, %170 : vector<8x64xf32>
    %172 = vector.extract_strided_slice %168 {offsets = [0, 0], sizes = [8, 8], strides = [1, 1]} : vector<8x32xf32> to vector<8x8xf32>
    %173 = vector.extract_strided_slice %171 {offsets = [0, 0], sizes = [8, 8], strides = [1, 1]} : vector<8x64xf32> to vector<8x8xf32>
    %174 = vector.extract_strided_slice %171 {offsets = [0, 32], sizes = [8, 8], strides = [1, 1]} : vector<8x64xf32> to vector<8x8xf32>
    %175 = tpu.transpose %173, [1, 0] : vector<8x8xf32> -> vector<8x8xf32>
    %cst_75 = arith.constant dense<0.000000e+00> : vector<8x8xf32>
    %176 = tpu.matmul %172, %175, %cst_75 {dimension_numbers = #tpu.dot_dimension_numbers<[1], [0], [0], [1], [0, 0, 1, 1], [], []>} : vector<8x8xf32>, vector<8x8xf32>, vector<8x8xf32> -> vector<8x8xf32>
    %cst_76 = arith.constant 0.353553385 : f32
    %177 = vector.broadcast %cst_76 : f32 to vector<8x8xf32>
    %178 = arith.mulf %176, %177 : vector<8x8xf32>
    %cst_77 = arith.constant dense<0xFF800000> : vector<8xf32>
    %179 = vector.multi_reduction <maximumf>, %178, %cst_77 [1] : vector<8x8xf32> to vector<8xf32>
    %180 = vector.shape_cast %179 : vector<8xf32> to vector<8x1xf32>
    %181 = vector.broadcast %180 : vector<8x1xf32> to vector<8x8xf32>
    %182 = arith.subf %178, %181 : vector<8x8xf32>
    %183 = math.exp %182 : vector<8x8xf32>
    %cst_78 = arith.constant dense<0.000000e+00> : vector<8xf32>
    %184 = vector.multi_reduction <add>, %183, %cst_78 [1] : vector<8x8xf32> to vector<8xf32>
    %185 = vector.shape_cast %184 : vector<8xf32> to vector<8x1xf32>
    %186 = tpu.reciprocal %185 {approx = true} : vector<8x1xf32> -> vector<8x1xf32>
    %187 = vector.broadcast %186 : vector<8x1xf32> to vector<8x8xf32>
    %188 = arith.mulf %183, %187 : vector<8x8xf32>
    %cst_79 = arith.constant dense<0.000000e+00> : vector<8x8xf32>
    %189 = tpu.matmul %188, %174, %cst_79 {dimension_numbers = #tpu.dot_dimension_numbers<[1], [0], [0], [1], [0, 0, 1, 1], [], []>} : vector<8x8xf32>, vector<8x8xf32>, vector<8x8xf32> -> vector<8x8xf32>
    %190 = vector.extract_strided_slice %4 {offsets = [0, 0], sizes = [8, 32], strides = [1, 1]} : vector<32x32xf32> to vector<8x32xf32>
    %cst_80 = arith.constant dense<0.000000e+00> : vector<8x32xf32>
    %191 = tpu.matmul %189, %190, %cst_80 {dimension_numbers = #tpu.dot_dimension_numbers<[1], [0], [0], [1], [0, 0, 1, 1], [], []>} : vector<8x8xf32>, vector<8x32xf32>, vector<8x32xf32> -> vector<8x32xf32>
    %192 = vector.extract_strided_slice %168 {offsets = [0, 8], sizes = [8, 8], strides = [1, 1]} : vector<8x32xf32> to vector<8x8xf32>
    %193 = vector.extract_strided_slice %171 {offsets = [0, 8], sizes = [8, 8], strides = [1, 1]} : vector<8x64xf32> to vector<8x8xf32>
    %194 = vector.extract_strided_slice %171 {offsets = [0, 40], sizes = [8, 8], strides = [1, 1]} : vector<8x64xf32> to vector<8x8xf32>
    %195 = tpu.transpose %193, [1, 0] : vector<8x8xf32> -> vector<8x8xf32>
    %cst_81 = arith.constant dense<0.000000e+00> : vector<8x8xf32>
    %196 = tpu.matmul %192, %195, %cst_81 {dimension_numbers = #tpu.dot_dimension_numbers<[1], [0], [0], [1], [0, 0, 1, 1], [], []>} : vector<8x8xf32>, vector<8x8xf32>, vector<8x8xf32> -> vector<8x8xf32>
    %cst_82 = arith.constant 0.353553385 : f32
    %197 = vector.broadcast %cst_82 : f32 to vector<8x8xf32>
    %198 = arith.mulf %196, %197 : vector<8x8xf32>
    %cst_83 = arith.constant dense<0xFF800000> : vector<8xf32>
    %199 = vector.multi_reduction <maximumf>, %198, %cst_83 [1] : vector<8x8xf32> to vector<8xf32>
    %200 = vector.shape_cast %199 : vector<8xf32> to vector<8x1xf32>
    %201 = vector.broadcast %200 : vector<8x1xf32> to vector<8x8xf32>
    %202 = arith.subf %198, %201 : vector<8x8xf32>
    %203 = math.exp %202 : vector<8x8xf32>
    %cst_84 = arith.constant dense<0.000000e+00> : vector<8xf32>
    %204 = vector.multi_reduction <add>, %203, %cst_84 [1] : vector<8x8xf32> to vector<8xf32>
    %205 = vector.shape_cast %204 : vector<8xf32> to vector<8x1xf32>
    %206 = tpu.reciprocal %205 {approx = true} : vector<8x1xf32> -> vector<8x1xf32>
    %207 = vector.broadcast %206 : vector<8x1xf32> to vector<8x8xf32>
    %208 = arith.mulf %203, %207 : vector<8x8xf32>
    %cst_85 = arith.constant dense<0.000000e+00> : vector<8x8xf32>
    %209 = tpu.matmul %208, %194, %cst_85 {dimension_numbers = #tpu.dot_dimension_numbers<[1], [0], [0], [1], [0, 0, 1, 1], [], []>} : vector<8x8xf32>, vector<8x8xf32>, vector<8x8xf32> -> vector<8x8xf32>
    %210 = vector.extract_strided_slice %4 {offsets = [8, 0], sizes = [8, 32], strides = [1, 1]} : vector<32x32xf32> to vector<8x32xf32>
    %cst_86 = arith.constant dense<0.000000e+00> : vector<8x32xf32>
    %211 = tpu.matmul %209, %210, %cst_86 {dimension_numbers = #tpu.dot_dimension_numbers<[1], [0], [0], [1], [0, 0, 1, 1], [], []>} : vector<8x8xf32>, vector<8x32xf32>, vector<8x32xf32> -> vector<8x32xf32>
    %212 = arith.addf %191, %211 : vector<8x32xf32>
    %213 = vector.extract_strided_slice %168 {offsets = [0, 16], sizes = [8, 8], strides = [1, 1]} : vector<8x32xf32> to vector<8x8xf32>
    %214 = vector.extract_strided_slice %171 {offsets = [0, 16], sizes = [8, 8], strides = [1, 1]} : vector<8x64xf32> to vector<8x8xf32>
    %215 = vector.extract_strided_slice %171 {offsets = [0, 48], sizes = [8, 8], strides = [1, 1]} : vector<8x64xf32> to vector<8x8xf32>
    %216 = tpu.transpose %214, [1, 0] : vector<8x8xf32> -> vector<8x8xf32>
    %cst_87 = arith.constant dense<0.000000e+00> : vector<8x8xf32>
    %217 = tpu.matmul %213, %216, %cst_87 {dimension_numbers = #tpu.dot_dimension_numbers<[1], [0], [0], [1], [0, 0, 1, 1], [], []>} : vector<8x8xf32>, vector<8x8xf32>, vector<8x8xf32> -> vector<8x8xf32>
    %cst_88 = arith.constant 0.353553385 : f32
    %218 = vector.broadcast %cst_88 : f32 to vector<8x8xf32>
    %219 = arith.mulf %217, %218 : vector<8x8xf32>
    %cst_89 = arith.constant dense<0xFF800000> : vector<8xf32>
    %220 = vector.multi_reduction <maximumf>, %219, %cst_89 [1] : vector<8x8xf32> to vector<8xf32>
    %221 = vector.shape_cast %220 : vector<8xf32> to vector<8x1xf32>
    %222 = vector.broadcast %221 : vector<8x1xf32> to vector<8x8xf32>
    %223 = arith.subf %219, %222 : vector<8x8xf32>
    %224 = math.exp %223 : vector<8x8xf32>
    %cst_90 = arith.constant dense<0.000000e+00> : vector<8xf32>
    %225 = vector.multi_reduction <add>, %224, %cst_90 [1] : vector<8x8xf32> to vector<8xf32>
    %226 = vector.shape_cast %225 : vector<8xf32> to vector<8x1xf32>
    %227 = tpu.reciprocal %226 {approx = true} : vector<8x1xf32> -> vector<8x1xf32>
    %228 = vector.broadcast %227 : vector<8x1xf32> to vector<8x8xf32>
    %229 = arith.mulf %224, %228 : vector<8x8xf32>
    %cst_91 = arith.constant dense<0.000000e+00> : vector<8x8xf32>
    %230 = tpu.matmul %229, %215, %cst_91 {dimension_numbers = #tpu.dot_dimension_numbers<[1], [0], [0], [1], [0, 0, 1, 1], [], []>} : vector<8x8xf32>, vector<8x8xf32>, vector<8x8xf32> -> vector<8x8xf32>
    %231 = vector.extract_strided_slice %4 {offsets = [16, 0], sizes = [8, 32], strides = [1, 1]} : vector<32x32xf32> to vector<8x32xf32>
    %cst_92 = arith.constant dense<0.000000e+00> : vector<8x32xf32>
    %232 = tpu.matmul %230, %231, %cst_92 {dimension_numbers = #tpu.dot_dimension_numbers<[1], [0], [0], [1], [0, 0, 1, 1], [], []>} : vector<8x8xf32>, vector<8x32xf32>, vector<8x32xf32> -> vector<8x32xf32>
    %233 = arith.addf %212, %232 : vector<8x32xf32>
    %234 = vector.extract_strided_slice %168 {offsets = [0, 24], sizes = [8, 8], strides = [1, 1]} : vector<8x32xf32> to vector<8x8xf32>
    %235 = vector.extract_strided_slice %171 {offsets = [0, 24], sizes = [8, 8], strides = [1, 1]} : vector<8x64xf32> to vector<8x8xf32>
    %236 = vector.extract_strided_slice %171 {offsets = [0, 56], sizes = [8, 8], strides = [1, 1]} : vector<8x64xf32> to vector<8x8xf32>
    %237 = tpu.transpose %235, [1, 0] : vector<8x8xf32> -> vector<8x8xf32>
    %cst_93 = arith.constant dense<0.000000e+00> : vector<8x8xf32>
    %238 = tpu.matmul %234, %237, %cst_93 {dimension_numbers = #tpu.dot_dimension_numbers<[1], [0], [0], [1], [0, 0, 1, 1], [], []>} : vector<8x8xf32>, vector<8x8xf32>, vector<8x8xf32> -> vector<8x8xf32>
    %cst_94 = arith.constant 0.353553385 : f32
    %239 = vector.broadcast %cst_94 : f32 to vector<8x8xf32>
    %240 = arith.mulf %238, %239 : vector<8x8xf32>
    %cst_95 = arith.constant dense<0xFF800000> : vector<8xf32>
    %241 = vector.multi_reduction <maximumf>, %240, %cst_95 [1] : vector<8x8xf32> to vector<8xf32>
    %242 = vector.shape_cast %241 : vector<8xf32> to vector<8x1xf32>
    %243 = vector.broadcast %242 : vector<8x1xf32> to vector<8x8xf32>
    %244 = arith.subf %240, %243 : vector<8x8xf32>
    %245 = math.exp %244 : vector<8x8xf32>
    %cst_96 = arith.constant dense<0.000000e+00> : vector<8xf32>
    %246 = vector.multi_reduction <add>, %245, %cst_96 [1] : vector<8x8xf32> to vector<8xf32>
    %247 = vector.shape_cast %246 : vector<8xf32> to vector<8x1xf32>
    %248 = tpu.reciprocal %247 {approx = true} : vector<8x1xf32> -> vector<8x1xf32>
    %249 = vector.broadcast %248 : vector<8x1xf32> to vector<8x8xf32>
    %250 = arith.mulf %245, %249 : vector<8x8xf32>
    %cst_97 = arith.constant dense<0.000000e+00> : vector<8x8xf32>
    %251 = tpu.matmul %250, %236, %cst_97 {dimension_numbers = #tpu.dot_dimension_numbers<[1], [0], [0], [1], [0, 0, 1, 1], [], []>} : vector<8x8xf32>, vector<8x8xf32>, vector<8x8xf32> -> vector<8x8xf32>
    %252 = vector.extract_strided_slice %4 {offsets = [24, 0], sizes = [8, 32], strides = [1, 1]} : vector<32x32xf32> to vector<8x32xf32>
    %cst_98 = arith.constant dense<0.000000e+00> : vector<8x32xf32>
    %253 = tpu.matmul %251, %252, %cst_98 {dimension_numbers = #tpu.dot_dimension_numbers<[1], [0], [0], [1], [0, 0, 1, 1], [], []>} : vector<8x8xf32>, vector<8x32xf32>, vector<8x32xf32> -> vector<8x32xf32>
    %254 = arith.addf %233, %253 : vector<8x32xf32>
    %255 = vector.broadcast %5 : vector<1x32xf32> to vector<8x32xf32>
    %256 = arith.addf %254, %255 : vector<8x32xf32>
    %257 = arith.addf %165, %256 : vector<8x32xf32>
    %cst_99 = arith.constant dense<0.000000e+00> : vector<8xf32>
    %258 = vector.multi_reduction <add>, %257, %cst_99 [1] : vector<8x32xf32> to vector<8xf32>
    %259 = vector.shape_cast %258 : vector<8xf32> to vector<8x1xf32>
    %cst_100 = arith.constant 3.200000e+01 : f32
    %260 = vector.broadcast %cst_100 : f32 to vector<8x1xf32>
    %261 = arith.divf %259, %260 : vector<8x1xf32>
    %262 = vector.broadcast %261 : vector<8x1xf32> to vector<8x32xf32>
    %263 = arith.subf %257, %262 : vector<8x32xf32>
    %264 = arith.mulf %263, %263 : vector<8x32xf32>
    %cst_101 = arith.constant dense<0.000000e+00> : vector<8xf32>
    %265 = vector.multi_reduction <add>, %264, %cst_101 [1] : vector<8x32xf32> to vector<8xf32>
    %266 = vector.shape_cast %265 : vector<8xf32> to vector<8x1xf32>
    %cst_102 = arith.constant 3.200000e+01 : f32
    %267 = vector.broadcast %cst_102 : f32 to vector<8x1xf32>
    %268 = arith.divf %266, %267 : vector<8x1xf32>
    %269 = vector.broadcast %261 : vector<8x1xf32> to vector<8x32xf32>
    %270 = arith.subf %257, %269 : vector<8x32xf32>
    %cst_103 = arith.constant 9.99999974E-6 : f32
    %271 = vector.broadcast %cst_103 : f32 to vector<8x1xf32>
    %272 = arith.addf %268, %271 : vector<8x1xf32>
    %273 = math.rsqrt %272 : vector<8x1xf32>
    %274 = vector.broadcast %273 : vector<8x1xf32> to vector<8x32xf32>
    %275 = arith.mulf %270, %274 : vector<8x32xf32>
    %276 = vector.broadcast %6 : vector<1x32xf32> to vector<8x32xf32>
    %277 = arith.mulf %275, %276 : vector<8x32xf32>
    %278 = vector.broadcast %7 : vector<1x32xf32> to vector<8x32xf32>
    %279 = arith.addf %277, %278 : vector<8x32xf32>
    %cst_104 = arith.constant dense<0.000000e+00> : vector<8x128xf32>
    %280 = tpu.matmul %279, %8, %cst_104 {dimension_numbers = #tpu.dot_dimension_numbers<[1], [0], [0], [1], [0, 0, 1, 1], [], []>} : vector<8x32xf32>, vector<32x128xf32>, vector<8x128xf32> -> vector<8x128xf32>
    %281 = vector.broadcast %9 : vector<1x128xf32> to vector<8x128xf32>
    %282 = arith.addf %280, %281 : vector<8x128xf32>
    %cst_105 = arith.constant 0.000000e+00 : f32
    %283 = vector.broadcast %cst_105 : f32 to vector<8x128xf32>
    %284 = arith.maximumf %282, %283 : vector<8x128xf32>
    %cst_106 = arith.constant dense<0.000000e+00> : vector<8x32xf32>
    %285 = tpu.matmul %284, %10, %cst_106 {dimension_numbers = #tpu.dot_dimension_numbers<[1], [0], [0], [1], [0, 0, 1, 1], [], []>} : vector<8x128xf32>, vector<128x32xf32>, vector<8x32xf32> -> vector<8x32xf32>
    %286 = vector.broadcast %11 : vector<1x32xf32> to vector<8x32xf32>
    %287 = arith.addf %285, %286 : vector<8x32xf32>
    %288 = arith.addf %279, %287 : vector<8x32xf32>
    %cst_107 = arith.constant dense<0.000000e+00> : vector<8xf32>
    %289 = vector.multi_reduction <add>, %288, %cst_107 [1] : vector<8x32xf32> to vector<8xf32>
    %290 = vector.shape_cast %289 : vector<8xf32> to vector<8x1xf32>
    %cst_108 = arith.constant 3.200000e+01 : f32
    %291 = vector.broadcast %cst_108 : f32 to vector<8x1xf32>
    %292 = arith.divf %290, %291 : vector<8x1xf32>
    %293 = vector.broadcast %292 : vector<8x1xf32> to vector<8x32xf32>
    %294 = arith.subf %288, %293 : vector<8x32xf32>
    %295 = arith.mulf %294, %294 : vector<8x32xf32>
    %cst_109 = arith.constant dense<0.000000e+00> : vector<8xf32>
    %296 = vector.multi_reduction <add>, %295, %cst_109 [1] : vector<8x32xf32> to vector<8xf32>
    %297 = vector.shape_cast %296 : vector<8xf32> to vector<8x1xf32>
    %cst_110 = arith.constant 3.200000e+01 : f32
    %298 = vector.broadcast %cst_110 : f32 to vector<8x1xf32>
    %299 = arith.divf %297, %298 : vector<8x1xf32>
    %300 = vector.broadcast %292 : vector<8x1xf32> to vector<8x32xf32>
    %301 = arith.subf %288, %300 : vector<8x32xf32>
    %cst_111 = arith.constant 9.99999974E-6 : f32
    %302 = vector.broadcast %cst_111 : f32 to vector<8x1xf32>
    %303 = arith.addf %299, %302 : vector<8x1xf32>
    %304 = math.rsqrt %303 : vector<8x1xf32>
    %305 = vector.broadcast %304 : vector<8x1xf32> to vector<8x32xf32>
    %306 = arith.mulf %301, %305 : vector<8x32xf32>
    %307 = vector.broadcast %12 : vector<1x32xf32> to vector<8x32xf32>
    %308 = arith.mulf %306, %307 : vector<8x32xf32>
    %309 = vector.broadcast %13 : vector<1x32xf32> to vector<8x32xf32>
    %310 = arith.addf %308, %309 : vector<8x32xf32>
    %c1_112 = arith.constant 1 : index
    %c0_113 = arith.constant 0 : index
    %c0_114 = arith.constant 0 : index
    %311 = vector.load %arg15[%c1_112, %c0_113, %c0_114] : memref<2x8x32xf32, #tpu.memory_space<vmem>>, vector<1x8x32xf32>
    %312 = vector.shape_cast %311 : vector<1x8x32xf32> to vector<8x32xf32>
    %313 = vector.shape_cast %310 : vector<8x32xf32> to vector<1x8x32xf32>
    tpu.vector_store %arg15[%c1_112, %c0_113, %c0_114], %313 {strides = array<i32>} : memref<2x8x32xf32, #tpu.memory_space<vmem>>, vector<1x8x32xf32>,
    return
  }
}

module attributes {stable_mosaic.version = 11 : i64} {
  func.func @_decoder_layer_kernel(%arg0: memref<2x8x32xf32, #tpu.memory_space<vmem>>, %arg1: memref<2x8x32xf32, #tpu.memory_space<vmem>>, %arg2: memref<32x32xf32, #tpu.memory_space<vmem>>, %arg3: memref<1x32xf32, #tpu.memory_space<vmem>>, %arg4: memref<32x64xf32, #tpu.memory_space<vmem>>, %arg5: memref<1x64xf32, #tpu.memory_space<vmem>>, %arg6: memref<32x32xf32, #tpu.memory_space<vmem>>, %arg7: memref<1x32xf32, #tpu.memory_space<vmem>>, %arg8: memref<1x32xf32, #tpu.memory_space<vmem>>, %arg9: memref<1x32xf32, #tpu.memory_space<vmem>>, %arg10: memref<32x32xf32, #tpu.memory_space<vmem>>, %arg11: memref<1x32xf32, #tpu.memory_space<vmem>>, %arg12: memref<32x64xf32, #tpu.memory_space<vmem>>, %arg13: memref<1x64xf32, #tpu.memory_space<vmem>>, %arg14: memref<32x32xf32, #tpu.memory_space<vmem>>, %arg15: memref<1x32xf32, #tpu.memory_space<vmem>>, %arg16: memref<1x32xf32, #tpu.memory_space<vmem>>, %arg17: memref<1x32xf32, #tpu.memory_space<vmem>>, %arg18: memref<32x64xf32, #tpu.memory_space<vmem>>, %arg19: memref<1x64xf32, #tpu.memory_space<vmem>>, %arg20: memref<64x32xf32, #tpu.memory_space<vmem>>, %arg21: memref<1x32xf32, #tpu.memory_space<vmem>>, %arg22: memref<1x32xf32, #tpu.memory_space<vmem>>, %arg23: memref<1x32xf32, #tpu.memory_space<vmem>>, %arg24: memref<2x8x32xf32, #tpu.memory_space<vmem>>) attributes {dimension_semantics = [], scalar_prefetch = 0 : i64, scratch_operands = 0 : i64, tpu.core_type = #tpu.core_type<tc>} {
    %c0 = arith.constant 0 : index
    %c0_0 = arith.constant 0 : index
    %0 = vector.load %arg2[%c0, %c0_0] : memref<32x32xf32, #tpu.memory_space<vmem>>, vector<32x32xf32>
    %c0_1 = arith.constant 0 : index
    %c0_2 = arith.constant 0 : index
    %1 = vector.load %arg3[%c0_1, %c0_2] : memref<1x32xf32, #tpu.memory_space<vmem>>, vector<1x32xf32>
    %c0_3 = arith.constant 0 : index
    %c0_4 = arith.constant 0 : index
    %2 = vector.load %arg4[%c0_3, %c0_4] : memref<32x64xf32, #tpu.memory_space<vmem>>, vector<32x64xf32>
    %c0_5 = arith.constant 0 : index
    %c0_6 = arith.constant 0 : index
    %3 = vector.load %arg5[%c0_5, %c0_6] : memref<1x64xf32, #tpu.memory_space<vmem>>, vector<1x64xf32>
    %c0_7 = arith.constant 0 : index
    %c0_8 = arith.constant 0 : index
    %4 = vector.load %arg6[%c0_7, %c0_8] : memref<32x32xf32, #tpu.memory_space<vmem>>, vector<32x32xf32>
    %c0_9 = arith.constant 0 : index
    %c0_10 = arith.constant 0 : index
    %5 = vector.load %arg7[%c0_9, %c0_10] : memref<1x32xf32, #tpu.memory_space<vmem>>, vector<1x32xf32>
    %c0_11 = arith.constant 0 : index
    %c0_12 = arith.constant 0 : index
    %6 = vector.load %arg8[%c0_11, %c0_12] : memref<1x32xf32, #tpu.memory_space<vmem>>, vector<1x32xf32>
    %c0_13 = arith.constant 0 : index
    %c0_14 = arith.constant 0 : index
    %7 = vector.load %arg9[%c0_13, %c0_14] : memref<1x32xf32, #tpu.memory_space<vmem>>, vector<1x32xf32>
    %c0_15 = arith.constant 0 : index
    %c0_16 = arith.constant 0 : index
    %8 = vector.load %arg10[%c0_15, %c0_16] : memref<32x32xf32, #tpu.memory_space<vmem>>, vector<32x32xf32>
    %c0_17 = arith.constant 0 : index
    %c0_18 = arith.constant 0 : index
    %9 = vector.load %arg11[%c0_17, %c0_18] : memref<1x32xf32, #tpu.memory_space<vmem>>, vector<1x32xf32>
    %c0_19 = arith.constant 0 : index
    %c0_20 = arith.constant 0 : index
    %10 = vector.load %arg12[%c0_19, %c0_20] : memref<32x64xf32, #tpu.memory_space<vmem>>, vector<32x64xf32>
    %c0_21 = arith.constant 0 : index
    %c0_22 = arith.constant 0 : index
    %11 = vector.load %arg13[%c0_21, %c0_22] : memref<1x64xf32, #tpu.memory_space<vmem>>, vector<1x64xf32>
    %c0_23 = arith.constant 0 : index
    %c0_24 = arith.constant 0 : index
    %12 = vector.load %arg14[%c0_23, %c0_24] : memref<32x32xf32, #tpu.memory_space<vmem>>, vector<32x32xf32>
    %c0_25 = arith.constant 0 : index
    %c0_26 = arith.constant 0 : index
    %13 = vector.load %arg15[%c0_25, %c0_26] : memref<1x32xf32, #tpu.memory_space<vmem>>, vector<1x32xf32>
    %c0_27 = arith.constant 0 : index
    %c0_28 = arith.constant 0 : index
    %14 = vector.load %arg16[%c0_27, %c0_28] : memref<1x32xf32, #tpu.memory_space<vmem>>, vector<1x32xf32>
    %c0_29 = arith.constant 0 : index
    %c0_30 = arith.constant 0 : index
    %15 = vector.load %arg17[%c0_29, %c0_30] : memref<1x32xf32, #tpu.memory_space<vmem>>, vector<1x32xf32>
    %c0_31 = arith.constant 0 : index
    %c0_32 = arith.constant 0 : index
    %16 = vector.load %arg18[%c0_31, %c0_32] : memref<32x64xf32, #tpu.memory_space<vmem>>, vector<32x64xf32>
    %c0_33 = arith.constant 0 : index
    %c0_34 = arith.constant 0 : index
    %17 = vector.load %arg19[%c0_33, %c0_34] : memref<1x64xf32, #tpu.memory_space<vmem>>, vector<1x64xf32>
    %c0_35 = arith.constant 0 : index
    %c0_36 = arith.constant 0 : index
    %18 = vector.load %arg20[%c0_35, %c0_36] : memref<64x32xf32, #tpu.memory_space<vmem>>, vector<64x32xf32>
    %c0_37 = arith.constant 0 : index
    %c0_38 = arith.constant 0 : index
    %19 = vector.load %arg21[%c0_37, %c0_38] : memref<1x32xf32, #tpu.memory_space<vmem>>, vector<1x32xf32>
    %c0_39 = arith.constant 0 : index
    %c0_40 = arith.constant 0 : index
    %20 = vector.load %arg22[%c0_39, %c0_40] : memref<1x32xf32, #tpu.memory_space<vmem>>, vector<1x32xf32>
    %c0_41 = arith.constant 0 : index
    %c0_42 = arith.constant 0 : index
    %21 = vector.load %arg23[%c0_41, %c0_42] : memref<1x32xf32, #tpu.memory_space<vmem>>, vector<1x32xf32>
    %c0_43 = arith.constant 0 : index
    %c0_44 = arith.constant 0 : index
    %c0_45 = arith.constant 0 : index
    %22 = vector.load %arg0[%c0_43, %c0_44, %c0_45] : memref<2x8x32xf32, #tpu.memory_space<vmem>>, vector<1x8x32xf32>
    %23 = vector.shape_cast %22 : vector<1x8x32xf32> to vector<8x32xf32>
    %c0_46 = arith.constant 0 : index
    %c0_47 = arith.constant 0 : index
    %c0_48 = arith.constant 0 : index
    %24 = vector.load %arg1[%c0_46, %c0_47, %c0_48] : memref<2x8x32xf32, #tpu.memory_space<vmem>>, vector<1x8x32xf32>
    %25 = vector.shape_cast %24 : vector<1x8x32xf32> to vector<8x32xf32>
    %cst = arith.constant dense<0.000000e+00> : vector<8x32xf32>
    %26 = tpu.matmul %23, %0, %cst {dimension_numbers = #tpu.dot_dimension_numbers<[1], [0], [0], [1], [0, 0, 1, 1], [], []>} : vector<8x32xf32>, vector<32x32xf32>, vector<8x32xf32> -> vector<8x32xf32>
    %27 = vector.broadcast %1 : vector<1x32xf32> to vector<8x32xf32>
    %28 = arith.addf %26, %27 : vector<8x32xf32>
    %cst_49 = arith.constant dense<0.000000e+00> : vector<8x64xf32>
    %29 = tpu.matmul %23, %2, %cst_49 {dimension_numbers = #tpu.dot_dimension_numbers<[1], [0], [0], [1], [0, 0, 1, 1], [], []>} : vector<8x32xf32>, vector<32x64xf32>, vector<8x64xf32> -> vector<8x64xf32>
    %30 = vector.broadcast %3 : vector<1x64xf32> to vector<8x64xf32>
    %31 = arith.addf %29, %30 : vector<8x64xf32>
    %32 = vector.extract_strided_slice %28 {offsets = [0, 0], sizes = [8, 8], strides = [1, 1]} : vector<8x32xf32> to vector<8x8xf32>
    %33 = vector.extract_strided_slice %31 {offsets = [0, 0], sizes = [8, 8], strides = [1, 1]} : vector<8x64xf32> to vector<8x8xf32>
    %34 = vector.extract_strided_slice %31 {offsets = [0, 32], sizes = [8, 8], strides = [1, 1]} : vector<8x64xf32> to vector<8x8xf32>
    %35 = tpu.transpose %33, [1, 0] : vector<8x8xf32> -> vector<8x8xf32>
    %cst_50 = arith.constant dense<0.000000e+00> : vector<8x8xf32>
    %36 = tpu.matmul %32, %35, %cst_50 {dimension_numbers = #tpu.dot_dimension_numbers<[1], [0], [0], [1], [0, 0, 1, 1], [], []>} : vector<8x8xf32>, vector<8x8xf32>, vector<8x8xf32> -> vector<8x8xf32>
    %cst_51 = arith.constant 0.353553385 : f32
    %37 = vector.broadcast %cst_51 : f32 to vector<8x8xf32>
    %38 = arith.mulf %36, %37 : vector<8x8xf32>
    %cst_52 = arith.constant dense<0xFF800000> : vector<8xf32>
    %39 = vector.multi_reduction <maximumf>, %38, %cst_52 [1] : vector<8x8xf32> to vector<8xf32>
    %40 = vector.shape_cast %39 : vector<8xf32> to vector<8x1xf32>
    %41 = vector.broadcast %40 : vector<8x1xf32> to vector<8x8xf32>
    %42 = arith.subf %38, %41 : vector<8x8xf32>
    %43 = math.exp %42 : vector<8x8xf32>
    %cst_53 = arith.constant dense<0.000000e+00> : vector<8xf32>
    %44 = vector.multi_reduction <add>, %43, %cst_53 [1] : vector<8x8xf32> to vector<8xf32>
    %45 = vector.shape_cast %44 : vector<8xf32> to vector<8x1xf32>
    %46 = tpu.reciprocal %45 {approx = true} : vector<8x1xf32> -> vector<8x1xf32>
    %47 = vector.broadcast %46 : vector<8x1xf32> to vector<8x8xf32>
    %48 = arith.mulf %43, %47 : vector<8x8xf32>
    %cst_54 = arith.constant dense<0.000000e+00> : vector<8x8xf32>
    %49 = tpu.matmul %48, %34, %cst_54 {dimension_numbers = #tpu.dot_dimension_numbers<[1], [0], [0], [1], [0, 0, 1, 1], [], []>} : vector<8x8xf32>, vector<8x8xf32>, vector<8x8xf32> -> vector<8x8xf32>
    %50 = vector.extract_strided_slice %4 {offsets = [0, 0], sizes = [8, 32], strides = [1, 1]} : vector<32x32xf32> to vector<8x32xf32>
    %cst_55 = arith.constant dense<0.000000e+00> : vector<8x32xf32>
    %51 = tpu.matmul %49, %50, %cst_55 {dimension_numbers = #tpu.dot_dimension_numbers<[1], [0], [0], [1], [0, 0, 1, 1], [], []>} : vector<8x8xf32>, vector<8x32xf32>, vector<8x32xf32> -> vector<8x32xf32>
    %52 = vector.extract_strided_slice %28 {offsets = [0, 8], sizes = [8, 8], strides = [1, 1]} : vector<8x32xf32> to vector<8x8xf32>
    %53 = vector.extract_strided_slice %31 {offsets = [0, 8], sizes = [8, 8], strides = [1, 1]} : vector<8x64xf32> to vector<8x8xf32>
    %54 = vector.extract_strided_slice %31 {offsets = [0, 40], sizes = [8, 8], strides = [1, 1]} : vector<8x64xf32> to vector<8x8xf32>
    %55 = tpu.transpose %53, [1, 0] : vector<8x8xf32> -> vector<8x8xf32>
    %cst_56 = arith.constant dense<0.000000e+00> : vector<8x8xf32>
    %56 = tpu.matmul %52, %55, %cst_56 {dimension_numbers = #tpu.dot_dimension_numbers<[1], [0], [0], [1], [0, 0, 1, 1], [], []>} : vector<8x8xf32>, vector<8x8xf32>, vector<8x8xf32> -> vector<8x8xf32>
    %cst_57 = arith.constant 0.353553385 : f32
    %57 = vector.broadcast %cst_57 : f32 to vector<8x8xf32>
    %58 = arith.mulf %56, %57 : vector<8x8xf32>
    %cst_58 = arith.constant dense<0xFF800000> : vector<8xf32>
    %59 = vector.multi_reduction <maximumf>, %58, %cst_58 [1] : vector<8x8xf32> to vector<8xf32>
    %60 = vector.shape_cast %59 : vector<8xf32> to vector<8x1xf32>
    %61 = vector.broadcast %60 : vector<8x1xf32> to vector<8x8xf32>
    %62 = arith.subf %58, %61 : vector<8x8xf32>
    %63 = math.exp %62 : vector<8x8xf32>
    %cst_59 = arith.constant dense<0.000000e+00> : vector<8xf32>
    %64 = vector.multi_reduction <add>, %63, %cst_59 [1] : vector<8x8xf32> to vector<8xf32>
    %65 = vector.shape_cast %64 : vector<8xf32> to vector<8x1xf32>
    %66 = tpu.reciprocal %65 {approx = true} : vector<8x1xf32> -> vector<8x1xf32>
    %67 = vector.broadcast %66 : vector<8x1xf32> to vector<8x8xf32>
    %68 = arith.mulf %63, %67 : vector<8x8xf32>
    %cst_60 = arith.constant dense<0.000000e+00> : vector<8x8xf32>
    %69 = tpu.matmul %68, %54, %cst_60 {dimension_numbers = #tpu.dot_dimension_numbers<[1], [0], [0], [1], [0, 0, 1, 1], [], []>} : vector<8x8xf32>, vector<8x8xf32>, vector<8x8xf32> -> vector<8x8xf32>
    %70 = vector.extract_strided_slice %4 {offsets = [8, 0], sizes = [8, 32], strides = [1, 1]} : vector<32x32xf32> to vector<8x32xf32>
    %cst_61 = arith.constant dense<0.000000e+00> : vector<8x32xf32>
    %71 = tpu.matmul %69, %70, %cst_61 {dimension_numbers = #tpu.dot_dimension_numbers<[1], [0], [0], [1], [0, 0, 1, 1], [], []>} : vector<8x8xf32>, vector<8x32xf32>, vector<8x32xf32> -> vector<8x32xf32>
    %72 = arith.addf %51, %71 : vector<8x32xf32>
    %73 = vector.extract_strided_slice %28 {offsets = [0, 16], sizes = [8, 8], strides = [1, 1]} : vector<8x32xf32> to vector<8x8xf32>
    %74 = vector.extract_strided_slice %31 {offsets = [0, 16], sizes = [8, 8], strides = [1, 1]} : vector<8x64xf32> to vector<8x8xf32>
    %75 = vector.extract_strided_slice %31 {offsets = [0, 48], sizes = [8, 8], strides = [1, 1]} : vector<8x64xf32> to vector<8x8xf32>
    %76 = tpu.transpose %74, [1, 0] : vector<8x8xf32> -> vector<8x8xf32>
    %cst_62 = arith.constant dense<0.000000e+00> : vector<8x8xf32>
    %77 = tpu.matmul %73, %76, %cst_62 {dimension_numbers = #tpu.dot_dimension_numbers<[1], [0], [0], [1], [0, 0, 1, 1], [], []>} : vector<8x8xf32>, vector<8x8xf32>, vector<8x8xf32> -> vector<8x8xf32>
    %cst_63 = arith.constant 0.353553385 : f32
    %78 = vector.broadcast %cst_63 : f32 to vector<8x8xf32>
    %79 = arith.mulf %77, %78 : vector<8x8xf32>
    %cst_64 = arith.constant dense<0xFF800000> : vector<8xf32>
    %80 = vector.multi_reduction <maximumf>, %79, %cst_64 [1] : vector<8x8xf32> to vector<8xf32>
    %81 = vector.shape_cast %80 : vector<8xf32> to vector<8x1xf32>
    %82 = vector.broadcast %81 : vector<8x1xf32> to vector<8x8xf32>
    %83 = arith.subf %79, %82 : vector<8x8xf32>
    %84 = math.exp %83 : vector<8x8xf32>
    %cst_65 = arith.constant dense<0.000000e+00> : vector<8xf32>
    %85 = vector.multi_reduction <add>, %84, %cst_65 [1] : vector<8x8xf32> to vector<8xf32>
    %86 = vector.shape_cast %85 : vector<8xf32> to vector<8x1xf32>
    %87 = tpu.reciprocal %86 {approx = true} : vector<8x1xf32> -> vector<8x1xf32>
    %88 = vector.broadcast %87 : vector<8x1xf32> to vector<8x8xf32>
    %89 = arith.mulf %84, %88 : vector<8x8xf32>
    %cst_66 = arith.constant dense<0.000000e+00> : vector<8x8xf32>
    %90 = tpu.matmul %89, %75, %cst_66 {dimension_numbers = #tpu.dot_dimension_numbers<[1], [0], [0], [1], [0, 0, 1, 1], [], []>} : vector<8x8xf32>, vector<8x8xf32>, vector<8x8xf32> -> vector<8x8xf32>
    %91 = vector.extract_strided_slice %4 {offsets = [16, 0], sizes = [8, 32], strides = [1, 1]} : vector<32x32xf32> to vector<8x32xf32>
    %cst_67 = arith.constant dense<0.000000e+00> : vector<8x32xf32>
    %92 = tpu.matmul %90, %91, %cst_67 {dimension_numbers = #tpu.dot_dimension_numbers<[1], [0], [0], [1], [0, 0, 1, 1], [], []>} : vector<8x8xf32>, vector<8x32xf32>, vector<8x32xf32> -> vector<8x32xf32>
    %93 = arith.addf %72, %92 : vector<8x32xf32>
    %94 = vector.extract_strided_slice %28 {offsets = [0, 24], sizes = [8, 8], strides = [1, 1]} : vector<8x32xf32> to vector<8x8xf32>
    %95 = vector.extract_strided_slice %31 {offsets = [0, 24], sizes = [8, 8], strides = [1, 1]} : vector<8x64xf32> to vector<8x8xf32>
    %96 = vector.extract_strided_slice %31 {offsets = [0, 56], sizes = [8, 8], strides = [1, 1]} : vector<8x64xf32> to vector<8x8xf32>
    %97 = tpu.transpose %95, [1, 0] : vector<8x8xf32> -> vector<8x8xf32>
    %cst_68 = arith.constant dense<0.000000e+00> : vector<8x8xf32>
    %98 = tpu.matmul %94, %97, %cst_68 {dimension_numbers = #tpu.dot_dimension_numbers<[1], [0], [0], [1], [0, 0, 1, 1], [], []>} : vector<8x8xf32>, vector<8x8xf32>, vector<8x8xf32> -> vector<8x8xf32>
    %cst_69 = arith.constant 0.353553385 : f32
    %99 = vector.broadcast %cst_69 : f32 to vector<8x8xf32>
    %100 = arith.mulf %98, %99 : vector<8x8xf32>
    %cst_70 = arith.constant dense<0xFF800000> : vector<8xf32>
    %101 = vector.multi_reduction <maximumf>, %100, %cst_70 [1] : vector<8x8xf32> to vector<8xf32>
    %102 = vector.shape_cast %101 : vector<8xf32> to vector<8x1xf32>
    %103 = vector.broadcast %102 : vector<8x1xf32> to vector<8x8xf32>
    %104 = arith.subf %100, %103 : vector<8x8xf32>
    %105 = math.exp %104 : vector<8x8xf32>
    %cst_71 = arith.constant dense<0.000000e+00> : vector<8xf32>
    %106 = vector.multi_reduction <add>, %105, %cst_71 [1] : vector<8x8xf32> to vector<8xf32>
    %107 = vector.shape_cast %106 : vector<8xf32> to vector<8x1xf32>
    %108 = tpu.reciprocal %107 {approx = true} : vector<8x1xf32> -> vector<8x1xf32>
    %109 = vector.broadcast %108 : vector<8x1xf32> to vector<8x8xf32>
    %110 = arith.mulf %105, %109 : vector<8x8xf32>
    %cst_72 = arith.constant dense<0.000000e+00> : vector<8x8xf32>
    %111 = tpu.matmul %110, %96, %cst_72 {dimension_numbers = #tpu.dot_dimension_numbers<[1], [0], [0], [1], [0, 0, 1, 1], [], []>} : vector<8x8xf32>, vector<8x8xf32>, vector<8x8xf32> -> vector<8x8xf32>
    %112 = vector.extract_strided_slice %4 {offsets = [24, 0], sizes = [8, 32], strides = [1, 1]} : vector<32x32xf32> to vector<8x32xf32>
    %cst_73 = arith.constant dense<0.000000e+00> : vector<8x32xf32>
    %113 = tpu.matmul %111, %112, %cst_73 {dimension_numbers = #tpu.dot_dimension_numbers<[1], [0], [0], [1], [0, 0, 1, 1], [], []>} : vector<8x8xf32>, vector<8x32xf32>, vector<8x32xf32> -> vector<8x32xf32>
    %114 = arith.addf %93, %113 : vector<8x32xf32>
    %115 = vector.broadcast %5 : vector<1x32xf32> to vector<8x32xf32>
    %116 = arith.addf %114, %115 : vector<8x32xf32>
    %117 = arith.addf %23, %116 : vector<8x32xf32>
    %cst_74 = arith.constant dense<0.000000e+00> : vector<8xf32>
    %118 = vector.multi_reduction <add>, %117, %cst_74 [1] : vector<8x32xf32> to vector<8xf32>
    %119 = vector.shape_cast %118 : vector<8xf32> to vector<8x1xf32>
    %cst_75 = arith.constant 3.200000e+01 : f32
    %120 = vector.broadcast %cst_75 : f32 to vector<8x1xf32>
    %121 = arith.divf %119, %120 : vector<8x1xf32>
    %122 = vector.broadcast %121 : vector<8x1xf32> to vector<8x32xf32>
    %123 = arith.subf %117, %122 : vector<8x32xf32>
    %124 = arith.mulf %123, %123 : vector<8x32xf32>
    %cst_76 = arith.constant dense<0.000000e+00> : vector<8xf32>
    %125 = vector.multi_reduction <add>, %124, %cst_76 [1] : vector<8x32xf32> to vector<8xf32>
    %126 = vector.shape_cast %125 : vector<8xf32> to vector<8x1xf32>
    %cst_77 = arith.constant 3.200000e+01 : f32
    %127 = vector.broadcast %cst_77 : f32 to vector<8x1xf32>
    %128 = arith.divf %126, %127 : vector<8x1xf32>
    %129 = vector.broadcast %121 : vector<8x1xf32> to vector<8x32xf32>
    %130 = arith.subf %117, %129 : vector<8x32xf32>
    %cst_78 = arith.constant 9.99999974E-6 : f32
    %131 = vector.broadcast %cst_78 : f32 to vector<8x1xf32>
    %132 = arith.addf %128, %131 : vector<8x1xf32>
    %133 = math.rsqrt %132 : vector<8x1xf32>
    %134 = vector.broadcast %133 : vector<8x1xf32> to vector<8x32xf32>
    %135 = arith.mulf %130, %134 : vector<8x32xf32>
    %136 = vector.broadcast %6 : vector<1x32xf32> to vector<8x32xf32>
    %137 = arith.mulf %135, %136 : vector<8x32xf32>
    %138 = vector.broadcast %7 : vector<1x32xf32> to vector<8x32xf32>
    %139 = arith.addf %137, %138 : vector<8x32xf32>
    %cst_79 = arith.constant dense<0.000000e+00> : vector<8x32xf32>
    %140 = tpu.matmul %139, %8, %cst_79 {dimension_numbers = #tpu.dot_dimension_numbers<[1], [0], [0], [1], [0, 0, 1, 1], [], []>} : vector<8x32xf32>, vector<32x32xf32>, vector<8x32xf32> -> vector<8x32xf32>
    %141 = vector.broadcast %9 : vector<1x32xf32> to vector<8x32xf32>
    %142 = arith.addf %140, %141 : vector<8x32xf32>
    %cst_80 = arith.constant dense<0.000000e+00> : vector<8x64xf32>
    %143 = tpu.matmul %25, %10, %cst_80 {dimension_numbers = #tpu.dot_dimension_numbers<[1], [0], [0], [1], [0, 0, 1, 1], [], []>} : vector<8x32xf32>, vector<32x64xf32>, vector<8x64xf32> -> vector<8x64xf32>
    %144 = vector.broadcast %11 : vector<1x64xf32> to vector<8x64xf32>
    %145 = arith.addf %143, %144 : vector<8x64xf32>
    %146 = vector.extract_strided_slice %142 {offsets = [0, 0], sizes = [8, 8], strides = [1, 1]} : vector<8x32xf32> to vector<8x8xf32>
    %147 = vector.extract_strided_slice %145 {offsets = [0, 0], sizes = [8, 8], strides = [1, 1]} : vector<8x64xf32> to vector<8x8xf32>
    %148 = vector.extract_strided_slice %145 {offsets = [0, 32], sizes = [8, 8], strides = [1, 1]} : vector<8x64xf32> to vector<8x8xf32>
    %149 = tpu.transpose %147, [1, 0] : vector<8x8xf32> -> vector<8x8xf32>
    %cst_81 = arith.constant dense<0.000000e+00> : vector<8x8xf32>
    %150 = tpu.matmul %146, %149, %cst_81 {dimension_numbers = #tpu.dot_dimension_numbers<[1], [0], [0], [1], [0, 0, 1, 1], [], []>} : vector<8x8xf32>, vector<8x8xf32>, vector<8x8xf32> -> vector<8x8xf32>
    %cst_82 = arith.constant 0.353553385 : f32
    %151 = vector.broadcast %cst_82 : f32 to vector<8x8xf32>
    %152 = arith.mulf %150, %151 : vector<8x8xf32>
    %cst_83 = arith.constant dense<0xFF800000> : vector<8xf32>
    %153 = vector.multi_reduction <maximumf>, %152, %cst_83 [1] : vector<8x8xf32> to vector<8xf32>
    %154 = vector.shape_cast %153 : vector<8xf32> to vector<8x1xf32>
    %155 = vector.broadcast %154 : vector<8x1xf32> to vector<8x8xf32>
    %156 = arith.subf %152, %155 : vector<8x8xf32>
    %157 = math.exp %156 : vector<8x8xf32>
    %cst_84 = arith.constant dense<0.000000e+00> : vector<8xf32>
    %158 = vector.multi_reduction <add>, %157, %cst_84 [1] : vector<8x8xf32> to vector<8xf32>
    %159 = vector.shape_cast %158 : vector<8xf32> to vector<8x1xf32>
    %160 = tpu.reciprocal %159 {approx = true} : vector<8x1xf32> -> vector<8x1xf32>
    %161 = vector.broadcast %160 : vector<8x1xf32> to vector<8x8xf32>
    %162 = arith.mulf %157, %161 : vector<8x8xf32>
    %cst_85 = arith.constant dense<0.000000e+00> : vector<8x8xf32>
    %163 = tpu.matmul %162, %148, %cst_85 {dimension_numbers = #tpu.dot_dimension_numbers<[1], [0], [0], [1], [0, 0, 1, 1], [], []>} : vector<8x8xf32>, vector<8x8xf32>, vector<8x8xf32> -> vector<8x8xf32>
    %164 = vector.extract_strided_slice %12 {offsets = [0, 0], sizes = [8, 32], strides = [1, 1]} : vector<32x32xf32> to vector<8x32xf32>
    %cst_86 = arith.constant dense<0.000000e+00> : vector<8x32xf32>
    %165 = tpu.matmul %163, %164, %cst_86 {dimension_numbers = #tpu.dot_dimension_numbers<[1], [0], [0], [1], [0, 0, 1, 1], [], []>} : vector<8x8xf32>, vector<8x32xf32>, vector<8x32xf32> -> vector<8x32xf32>
    %166 = vector.extract_strided_slice %142 {offsets = [0, 8], sizes = [8, 8], strides = [1, 1]} : vector<8x32xf32> to vector<8x8xf32>
    %167 = vector.extract_strided_slice %145 {offsets = [0, 8], sizes = [8, 8], strides = [1, 1]} : vector<8x64xf32> to vector<8x8xf32>
    %168 = vector.extract_strided_slice %145 {offsets = [0, 40], sizes = [8, 8], strides = [1, 1]} : vector<8x64xf32> to vector<8x8xf32>
    %169 = tpu.transpose %167, [1, 0] : vector<8x8xf32> -> vector<8x8xf32>
    %cst_87 = arith.constant dense<0.000000e+00> : vector<8x8xf32>
    %170 = tpu.matmul %166, %169, %cst_87 {dimension_numbers = #tpu.dot_dimension_numbers<[1], [0], [0], [1], [0, 0, 1, 1], [], []>} : vector<8x8xf32>, vector<8x8xf32>, vector<8x8xf32> -> vector<8x8xf32>
    %cst_88 = arith.constant 0.353553385 : f32
    %171 = vector.broadcast %cst_88 : f32 to vector<8x8xf32>
    %172 = arith.mulf %170, %171 : vector<8x8xf32>
    %cst_89 = arith.constant dense<0xFF800000> : vector<8xf32>
    %173 = vector.multi_reduction <maximumf>, %172, %cst_89 [1] : vector<8x8xf32> to vector<8xf32>
    %174 = vector.shape_cast %173 : vector<8xf32> to vector<8x1xf32>
    %175 = vector.broadcast %174 : vector<8x1xf32> to vector<8x8xf32>
    %176 = arith.subf %172, %175 : vector<8x8xf32>
    %177 = math.exp %176 : vector<8x8xf32>
    %cst_90 = arith.constant dense<0.000000e+00> : vector<8xf32>
    %178 = vector.multi_reduction <add>, %177, %cst_90 [1] : vector<8x8xf32> to vector<8xf32>
    %179 = vector.shape_cast %178 : vector<8xf32> to vector<8x1xf32>
    %180 = tpu.reciprocal %179 {approx = true} : vector<8x1xf32> -> vector<8x1xf32>
    %181 = vector.broadcast %180 : vector<8x1xf32> to vector<8x8xf32>
    %182 = arith.mulf %177, %181 : vector<8x8xf32>
    %cst_91 = arith.constant dense<0.000000e+00> : vector<8x8xf32>
    %183 = tpu.matmul %182, %168, %cst_91 {dimension_numbers = #tpu.dot_dimension_numbers<[1], [0], [0], [1], [0, 0, 1, 1], [], []>} : vector<8x8xf32>, vector<8x8xf32>, vector<8x8xf32> -> vector<8x8xf32>
    %184 = vector.extract_strided_slice %12 {offsets = [8, 0], sizes = [8, 32], strides = [1, 1]} : vector<32x32xf32> to vector<8x32xf32>
    %cst_92 = arith.constant dense<0.000000e+00> : vector<8x32xf32>
    %185 = tpu.matmul %183, %184, %cst_92 {dimension_numbers = #tpu.dot_dimension_numbers<[1], [0], [0], [1], [0, 0, 1, 1], [], []>} : vector<8x8xf32>, vector<8x32xf32>, vector<8x32xf32> -> vector<8x32xf32>
    %186 = arith.addf %165, %185 : vector<8x32xf32>
    %187 = vector.extract_strided_slice %142 {offsets = [0, 16], sizes = [8, 8], strides = [1, 1]} : vector<8x32xf32> to vector<8x8xf32>
    %188 = vector.extract_strided_slice %145 {offsets = [0, 16], sizes = [8, 8], strides = [1, 1]} : vector<8x64xf32> to vector<8x8xf32>
    %189 = vector.extract_strided_slice %145 {offsets = [0, 48], sizes = [8, 8], strides = [1, 1]} : vector<8x64xf32> to vector<8x8xf32>
    %190 = tpu.transpose %188, [1, 0] : vector<8x8xf32> -> vector<8x8xf32>
    %cst_93 = arith.constant dense<0.000000e+00> : vector<8x8xf32>
    %191 = tpu.matmul %187, %190, %cst_93 {dimension_numbers = #tpu.dot_dimension_numbers<[1], [0], [0], [1], [0, 0, 1, 1], [], []>} : vector<8x8xf32>, vector<8x8xf32>, vector<8x8xf32> -> vector<8x8xf32>
    %cst_94 = arith.constant 0.353553385 : f32
    %192 = vector.broadcast %cst_94 : f32 to vector<8x8xf32>
    %193 = arith.mulf %191, %192 : vector<8x8xf32>
    %cst_95 = arith.constant dense<0xFF800000> : vector<8xf32>
    %194 = vector.multi_reduction <maximumf>, %193, %cst_95 [1] : vector<8x8xf32> to vector<8xf32>
    %195 = vector.shape_cast %194 : vector<8xf32> to vector<8x1xf32>
    %196 = vector.broadcast %195 : vector<8x1xf32> to vector<8x8xf32>
    %197 = arith.subf %193, %196 : vector<8x8xf32>
    %198 = math.exp %197 : vector<8x8xf32>
    %cst_96 = arith.constant dense<0.000000e+00> : vector<8xf32>
    %199 = vector.multi_reduction <add>, %198, %cst_96 [1] : vector<8x8xf32> to vector<8xf32>
    %200 = vector.shape_cast %199 : vector<8xf32> to vector<8x1xf32>
    %201 = tpu.reciprocal %200 {approx = true} : vector<8x1xf32> -> vector<8x1xf32>
    %202 = vector.broadcast %201 : vector<8x1xf32> to vector<8x8xf32>
    %203 = arith.mulf %198, %202 : vector<8x8xf32>
    %cst_97 = arith.constant dense<0.000000e+00> : vector<8x8xf32>
    %204 = tpu.matmul %203, %189, %cst_97 {dimension_numbers = #tpu.dot_dimension_numbers<[1], [0], [0], [1], [0, 0, 1, 1], [], []>} : vector<8x8xf32>, vector<8x8xf32>, vector<8x8xf32> -> vector<8x8xf32>
    %205 = vector.extract_strided_slice %12 {offsets = [16, 0], sizes = [8, 32], strides = [1, 1]} : vector<32x32xf32> to vector<8x32xf32>
    %cst_98 = arith.constant dense<0.000000e+00> : vector<8x32xf32>
    %206 = tpu.matmul %204, %205, %cst_98 {dimension_numbers = #tpu.dot_dimension_numbers<[1], [0], [0], [1], [0, 0, 1, 1], [], []>} : vector<8x8xf32>, vector<8x32xf32>, vector<8x32xf32> -> vector<8x32xf32>
    %207 = arith.addf %186, %206 : vector<8x32xf32>
    %208 = vector.extract_strided_slice %142 {offsets = [0, 24], sizes = [8, 8], strides = [1, 1]} : vector<8x32xf32> to vector<8x8xf32>
    %209 = vector.extract_strided_slice %145 {offsets = [0, 24], sizes = [8, 8], strides = [1, 1]} : vector<8x64xf32> to vector<8x8xf32>
    %210 = vector.extract_strided_slice %145 {offsets = [0, 56], sizes = [8, 8], strides = [1, 1]} : vector<8x64xf32> to vector<8x8xf32>
    %211 = tpu.transpose %209, [1, 0] : vector<8x8xf32> -> vector<8x8xf32>
    %cst_99 = arith.constant dense<0.000000e+00> : vector<8x8xf32>
    %212 = tpu.matmul %208, %211, %cst_99 {dimension_numbers = #tpu.dot_dimension_numbers<[1], [0], [0], [1], [0, 0, 1, 1], [], []>} : vector<8x8xf32>, vector<8x8xf32>, vector<8x8xf32> -> vector<8x8xf32>
    %cst_100 = arith.constant 0.353553385 : f32
    %213 = vector.broadcast %cst_100 : f32 to vector<8x8xf32>
    %214 = arith.mulf %212, %213 : vector<8x8xf32>
    %cst_101 = arith.constant dense<0xFF800000> : vector<8xf32>
    %215 = vector.multi_reduction <maximumf>, %214, %cst_101 [1] : vector<8x8xf32> to vector<8xf32>
    %216 = vector.shape_cast %215 : vector<8xf32> to vector<8x1xf32>
    %217 = vector.broadcast %216 : vector<8x1xf32> to vector<8x8xf32>
    %218 = arith.subf %214, %217 : vector<8x8xf32>
    %219 = math.exp %218 : vector<8x8xf32>
    %cst_102 = arith.constant dense<0.000000e+00> : vector<8xf32>
    %220 = vector.multi_reduction <add>, %219, %cst_102 [1] : vector<8x8xf32> to vector<8xf32>
    %221 = vector.shape_cast %220 : vector<8xf32> to vector<8x1xf32>
    %222 = tpu.reciprocal %221 {approx = true} : vector<8x1xf32> -> vector<8x1xf32>
    %223 = vector.broadcast %222 : vector<8x1xf32> to vector<8x8xf32>
    %224 = arith.mulf %219, %223 : vector<8x8xf32>
    %cst_103 = arith.constant dense<0.000000e+00> : vector<8x8xf32>
    %225 = tpu.matmul %224, %210, %cst_103 {dimension_numbers = #tpu.dot_dimension_numbers<[1], [0], [0], [1], [0, 0, 1, 1], [], []>} : vector<8x8xf32>, vector<8x8xf32>, vector<8x8xf32> -> vector<8x8xf32>
    %226 = vector.extract_strided_slice %12 {offsets = [24, 0], sizes = [8, 32], strides = [1, 1]} : vector<32x32xf32> to vector<8x32xf32>
    %cst_104 = arith.constant dense<0.000000e+00> : vector<8x32xf32>
    %227 = tpu.matmul %225, %226, %cst_104 {dimension_numbers = #tpu.dot_dimension_numbers<[1], [0], [0], [1], [0, 0, 1, 1], [], []>} : vector<8x8xf32>, vector<8x32xf32>, vector<8x32xf32> -> vector<8x32xf32>
    %228 = arith.addf %207, %227 : vector<8x32xf32>
    %229 = vector.broadcast %13 : vector<1x32xf32> to vector<8x32xf32>
    %230 = arith.addf %228, %229 : vector<8x32xf32>
    %231 = arith.addf %139, %230 : vector<8x32xf32>
    %cst_105 = arith.constant dense<0.000000e+00> : vector<8xf32>
    %232 = vector.multi_reduction <add>, %231, %cst_105 [1] : vector<8x32xf32> to vector<8xf32>
    %233 = vector.shape_cast %232 : vector<8xf32> to vector<8x1xf32>
    %cst_106 = arith.constant 3.200000e+01 : f32
    %234 = vector.broadcast %cst_106 : f32 to vector<8x1xf32>
    %235 = arith.divf %233, %234 : vector<8x1xf32>
    %236 = vector.broadcast %235 : vector<8x1xf32> to vector<8x32xf32>
    %237 = arith.subf %231, %236 : vector<8x32xf32>
    %238 = arith.mulf %237, %237 : vector<8x32xf32>
    %cst_107 = arith.constant dense<0.000000e+00> : vector<8xf32>
    %239 = vector.multi_reduction <add>, %238, %cst_107 [1] : vector<8x32xf32> to vector<8xf32>
    %240 = vector.shape_cast %239 : vector<8xf32> to vector<8x1xf32>
    %cst_108 = arith.constant 3.200000e+01 : f32
    %241 = vector.broadcast %cst_108 : f32 to vector<8x1xf32>
    %242 = arith.divf %240, %241 : vector<8x1xf32>
    %243 = vector.broadcast %235 : vector<8x1xf32> to vector<8x32xf32>
    %244 = arith.subf %231, %243 : vector<8x32xf32>
    %cst_109 = arith.constant 9.99999974E-6 : f32
    %245 = vector.broadcast %cst_109 : f32 to vector<8x1xf32>
    %246 = arith.addf %242, %245 : vector<8x1xf32>
    %247 = math.rsqrt %246 : vector<8x1xf32>
    %248 = vector.broadcast %247 : vector<8x1xf32> to vector<8x32xf32>
    %249 = arith.mulf %244, %248 : vector<8x32xf32>
    %250 = vector.broadcast %14 : vector<1x32xf32> to vector<8x32xf32>
    %251 = arith.mulf %249, %250 : vector<8x32xf32>
    %252 = vector.broadcast %15 : vector<1x32xf32> to vector<8x32xf32>
    %253 = arith.addf %251, %252 : vector<8x32xf32>
    %cst_110 = arith.constant dense<0.000000e+00> : vector<8x64xf32>
    %254 = tpu.matmul %253, %16, %cst_110 {dimension_numbers = #tpu.dot_dimension_numbers<[1], [0], [0], [1], [0, 0, 1, 1], [], []>} : vector<8x32xf32>, vector<32x64xf32>, vector<8x64xf32> -> vector<8x64xf32>
    %255 = vector.broadcast %17 : vector<1x64xf32> to vector<8x64xf32>
    %256 = arith.addf %254, %255 : vector<8x64xf32>
    %cst_111 = arith.constant 5.000000e-01 : f32
    %257 = vector.broadcast %cst_111 : f32 to vector<8x64xf32>
    %258 = arith.mulf %257, %256 : vector<8x64xf32>
    %cst_112 = arith.constant 0.707106769 : f32
    %259 = vector.broadcast %cst_112 : f32 to vector<8x64xf32>
    %260 = arith.mulf %256, %259 : vector<8x64xf32>
    %261 = math.erf %260 : vector<8x64xf32>
    %cst_113 = arith.constant 1.000000e+00 : f32
    %262 = vector.broadcast %cst_113 : f32 to vector<8x64xf32>
    %263 = arith.addf %262, %261 : vector<8x64xf32>
    %264 = arith.mulf %258, %263 : vector<8x64xf32>
    %cst_114 = arith.constant dense<0.000000e+00> : vector<8x32xf32>
    %265 = tpu.matmul %264, %18, %cst_114 {dimension_numbers = #tpu.dot_dimension_numbers<[1], [0], [0], [1], [0, 0, 1, 1], [], []>} : vector<8x64xf32>, vector<64x32xf32>, vector<8x32xf32> -> vector<8x32xf32>
    %266 = vector.broadcast %19 : vector<1x32xf32> to vector<8x32xf32>
    %267 = arith.addf %265, %266 : vector<8x32xf32>
    %268 = arith.addf %253, %267 : vector<8x32xf32>
    %cst_115 = arith.constant dense<0.000000e+00> : vector<8xf32>
    %269 = vector.multi_reduction <add>, %268, %cst_115 [1] : vector<8x32xf32> to vector<8xf32>
    %270 = vector.shape_cast %269 : vector<8xf32> to vector<8x1xf32>
    %cst_116 = arith.constant 3.200000e+01 : f32
    %271 = vector.broadcast %cst_116 : f32 to vector<8x1xf32>
    %272 = arith.divf %270, %271 : vector<8x1xf32>
    %273 = vector.broadcast %272 : vector<8x1xf32> to vector<8x32xf32>
    %274 = arith.subf %268, %273 : vector<8x32xf32>
    %275 = arith.mulf %274, %274 : vector<8x32xf32>
    %cst_117 = arith.constant dense<0.000000e+00> : vector<8xf32>
    %276 = vector.multi_reduction <add>, %275, %cst_117 [1] : vector<8x32xf32> to vector<8xf32>
    %277 = vector.shape_cast %276 : vector<8xf32> to vector<8x1xf32>
    %cst_118 = arith.constant 3.200000e+01 : f32
    %278 = vector.broadcast %cst_118 : f32 to vector<8x1xf32>
    %279 = arith.divf %277, %278 : vector<8x1xf32>
    %280 = vector.broadcast %272 : vector<8x1xf32> to vector<8x32xf32>
    %281 = arith.subf %268, %280 : vector<8x32xf32>
    %cst_119 = arith.constant 9.99999974E-6 : f32
    %282 = vector.broadcast %cst_119 : f32 to vector<8x1xf32>
    %283 = arith.addf %279, %282 : vector<8x1xf32>
    %284 = math.rsqrt %283 : vector<8x1xf32>
    %285 = vector.broadcast %284 : vector<8x1xf32> to vector<8x32xf32>
    %286 = arith.mulf %281, %285 : vector<8x32xf32>
    %287 = vector.broadcast %20 : vector<1x32xf32> to vector<8x32xf32>
    %288 = arith.mulf %286, %287 : vector<8x32xf32>
    %289 = vector.broadcast %21 : vector<1x32xf32> to vector<8x32xf32>
    %290 = arith.addf %288, %289 : vector<8x32xf32>
    %c0_120 = arith.constant 0 : index
    %c0_121 = arith.constant 0 : index
    %c0_122 = arith.constant 0 : index
    %291 = vector.load %arg24[%c0_120, %c0_121, %c0_122] : memref<2x8x32xf32, #tpu.memory_space<vmem>>, vector<1x8x32xf32>
    %292 = vector.shape_cast %291 : vector<1x8x32xf32> to vector<8x32xf32>
    %293 = vector.shape_cast %290 : vector<8x32xf32> to vector<1x8x32xf32>
    tpu.vector_store %arg24[%c0_120, %c0_121, %c0_122], %293 {strides = array<i32>} : memref<2x8x32xf32, #tpu.memory_space<vmem>>, vector<1x8x32xf32>,
    %c1 = arith.constant 1 : index
    %c0_123 = arith.constant 0 : index
    %c0_124 = arith.constant 0 : index
    %294 = vector.load %arg0[%c1, %c0_123, %c0_124] : memref<2x8x32xf32, #tpu.memory_space<vmem>>, vector<1x8x32xf32>
    %295 = vector.shape_cast %294 : vector<1x8x32xf32> to vector<8x32xf32>
    %c1_125 = arith.constant 1 : index
    %c0_126 = arith.constant 0 : index
    %c0_127 = arith.constant 0 : index
    %296 = vector.load %arg1[%c1_125, %c0_126, %c0_127] : memref<2x8x32xf32, #tpu.memory_space<vmem>>, vector<1x8x32xf32>
    %297 = vector.shape_cast %296 : vector<1x8x32xf32> to vector<8x32xf32>
    %cst_128 = arith.constant dense<0.000000e+00> : vector<8x32xf32>
    %298 = tpu.matmul %295, %0, %cst_128 {dimension_numbers = #tpu.dot_dimension_numbers<[1], [0], [0], [1], [0, 0, 1, 1], [], []>} : vector<8x32xf32>, vector<32x32xf32>, vector<8x32xf32> -> vector<8x32xf32>
    %299 = vector.broadcast %1 : vector<1x32xf32> to vector<8x32xf32>
    %300 = arith.addf %298, %299 : vector<8x32xf32>
    %cst_129 = arith.constant dense<0.000000e+00> : vector<8x64xf32>
    %301 = tpu.matmul %295, %2, %cst_129 {dimension_numbers = #tpu.dot_dimension_numbers<[1], [0], [0], [1], [0, 0, 1, 1], [], []>} : vector<8x32xf32>, vector<32x64xf32>, vector<8x64xf32> -> vector<8x64xf32>
    %302 = vector.broadcast %3 : vector<1x64xf32> to vector<8x64xf32>
    %303 = arith.addf %301, %302 : vector<8x64xf32>
    %304 = vector.extract_strided_slice %300 {offsets = [0, 0], sizes = [8, 8], strides = [1, 1]} : vector<8x32xf32> to vector<8x8xf32>
    %305 = vector.extract_strided_slice %303 {offsets = [0, 0], sizes = [8, 8], strides = [1, 1]} : vector<8x64xf32> to vector<8x8xf32>
    %306 = vector.extract_strided_slice %303 {offsets = [0, 32], sizes = [8, 8], strides = [1, 1]} : vector<8x64xf32> to vector<8x8xf32>
    %307 = tpu.transpose %305, [1, 0] : vector<8x8xf32> -> vector<8x8xf32>
    %cst_130 = arith.constant dense<0.000000e+00> : vector<8x8xf32>
    %308 = tpu.matmul %304, %307, %cst_130 {dimension_numbers = #tpu.dot_dimension_numbers<[1], [0], [0], [1], [0, 0, 1, 1], [], []>} : vector<8x8xf32>, vector<8x8xf32>, vector<8x8xf32> -> vector<8x8xf32>
    %cst_131 = arith.constant 0.353553385 : f32
    %309 = vector.broadcast %cst_131 : f32 to vector<8x8xf32>
    %310 = arith.mulf %308, %309 : vector<8x8xf32>
    %cst_132 = arith.constant dense<0xFF800000> : vector<8xf32>
    %311 = vector.multi_reduction <maximumf>, %310, %cst_132 [1] : vector<8x8xf32> to vector<8xf32>
    %312 = vector.shape_cast %311 : vector<8xf32> to vector<8x1xf32>
    %313 = vector.broadcast %312 : vector<8x1xf32> to vector<8x8xf32>
    %314 = arith.subf %310, %313 : vector<8x8xf32>
    %315 = math.exp %314 : vector<8x8xf32>
    %cst_133 = arith.constant dense<0.000000e+00> : vector<8xf32>
    %316 = vector.multi_reduction <add>, %315, %cst_133 [1] : vector<8x8xf32> to vector<8xf32>
    %317 = vector.shape_cast %316 : vector<8xf32> to vector<8x1xf32>
    %318 = tpu.reciprocal %317 {approx = true} : vector<8x1xf32> -> vector<8x1xf32>
    %319 = vector.broadcast %318 : vector<8x1xf32> to vector<8x8xf32>
    %320 = arith.mulf %315, %319 : vector<8x8xf32>
    %cst_134 = arith.constant dense<0.000000e+00> : vector<8x8xf32>
    %321 = tpu.matmul %320, %306, %cst_134 {dimension_numbers = #tpu.dot_dimension_numbers<[1], [0], [0], [1], [0, 0, 1, 1], [], []>} : vector<8x8xf32>, vector<8x8xf32>, vector<8x8xf32> -> vector<8x8xf32>
    %322 = vector.extract_strided_slice %4 {offsets = [0, 0], sizes = [8, 32], strides = [1, 1]} : vector<32x32xf32> to vector<8x32xf32>
    %cst_135 = arith.constant dense<0.000000e+00> : vector<8x32xf32>
    %323 = tpu.matmul %321, %322, %cst_135 {dimension_numbers = #tpu.dot_dimension_numbers<[1], [0], [0], [1], [0, 0, 1, 1], [], []>} : vector<8x8xf32>, vector<8x32xf32>, vector<8x32xf32> -> vector<8x32xf32>
    %324 = vector.extract_strided_slice %300 {offsets = [0, 8], sizes = [8, 8], strides = [1, 1]} : vector<8x32xf32> to vector<8x8xf32>
    %325 = vector.extract_strided_slice %303 {offsets = [0, 8], sizes = [8, 8], strides = [1, 1]} : vector<8x64xf32> to vector<8x8xf32>
    %326 = vector.extract_strided_slice %303 {offsets = [0, 40], sizes = [8, 8], strides = [1, 1]} : vector<8x64xf32> to vector<8x8xf32>
    %327 = tpu.transpose %325, [1, 0] : vector<8x8xf32> -> vector<8x8xf32>
    %cst_136 = arith.constant dense<0.000000e+00> : vector<8x8xf32>
    %328 = tpu.matmul %324, %327, %cst_136 {dimension_numbers = #tpu.dot_dimension_numbers<[1], [0], [0], [1], [0, 0, 1, 1], [], []>} : vector<8x8xf32>, vector<8x8xf32>, vector<8x8xf32> -> vector<8x8xf32>
    %cst_137 = arith.constant 0.353553385 : f32
    %329 = vector.broadcast %cst_137 : f32 to vector<8x8xf32>
    %330 = arith.mulf %328, %329 : vector<8x8xf32>
    %cst_138 = arith.constant dense<0xFF800000> : vector<8xf32>
    %331 = vector.multi_reduction <maximumf>, %330, %cst_138 [1] : vector<8x8xf32> to vector<8xf32>
    %332 = vector.shape_cast %331 : vector<8xf32> to vector<8x1xf32>
    %333 = vector.broadcast %332 : vector<8x1xf32> to vector<8x8xf32>
    %334 = arith.subf %330, %333 : vector<8x8xf32>
    %335 = math.exp %334 : vector<8x8xf32>
    %cst_139 = arith.constant dense<0.000000e+00> : vector<8xf32>
    %336 = vector.multi_reduction <add>, %335, %cst_139 [1] : vector<8x8xf32> to vector<8xf32>
    %337 = vector.shape_cast %336 : vector<8xf32> to vector<8x1xf32>
    %338 = tpu.reciprocal %337 {approx = true} : vector<8x1xf32> -> vector<8x1xf32>
    %339 = vector.broadcast %338 : vector<8x1xf32> to vector<8x8xf32>
    %340 = arith.mulf %335, %339 : vector<8x8xf32>
    %cst_140 = arith.constant dense<0.000000e+00> : vector<8x8xf32>
    %341 = tpu.matmul %340, %326, %cst_140 {dimension_numbers = #tpu.dot_dimension_numbers<[1], [0], [0], [1], [0, 0, 1, 1], [], []>} : vector<8x8xf32>, vector<8x8xf32>, vector<8x8xf32> -> vector<8x8xf32>
    %342 = vector.extract_strided_slice %4 {offsets = [8, 0], sizes = [8, 32], strides = [1, 1]} : vector<32x32xf32> to vector<8x32xf32>
    %cst_141 = arith.constant dense<0.000000e+00> : vector<8x32xf32>
    %343 = tpu.matmul %341, %342, %cst_141 {dimension_numbers = #tpu.dot_dimension_numbers<[1], [0], [0], [1], [0, 0, 1, 1], [], []>} : vector<8x8xf32>, vector<8x32xf32>, vector<8x32xf32> -> vector<8x32xf32>
    %344 = arith.addf %323, %343 : vector<8x32xf32>
    %345 = vector.extract_strided_slice %300 {offsets = [0, 16], sizes = [8, 8], strides = [1, 1]} : vector<8x32xf32> to vector<8x8xf32>
    %346 = vector.extract_strided_slice %303 {offsets = [0, 16], sizes = [8, 8], strides = [1, 1]} : vector<8x64xf32> to vector<8x8xf32>
    %347 = vector.extract_strided_slice %303 {offsets = [0, 48], sizes = [8, 8], strides = [1, 1]} : vector<8x64xf32> to vector<8x8xf32>
    %348 = tpu.transpose %346, [1, 0] : vector<8x8xf32> -> vector<8x8xf32>
    %cst_142 = arith.constant dense<0.000000e+00> : vector<8x8xf32>
    %349 = tpu.matmul %345, %348, %cst_142 {dimension_numbers = #tpu.dot_dimension_numbers<[1], [0], [0], [1], [0, 0, 1, 1], [], []>} : vector<8x8xf32>, vector<8x8xf32>, vector<8x8xf32> -> vector<8x8xf32>
    %cst_143 = arith.constant 0.353553385 : f32
    %350 = vector.broadcast %cst_143 : f32 to vector<8x8xf32>
    %351 = arith.mulf %349, %350 : vector<8x8xf32>
    %cst_144 = arith.constant dense<0xFF800000> : vector<8xf32>
    %352 = vector.multi_reduction <maximumf>, %351, %cst_144 [1] : vector<8x8xf32> to vector<8xf32>
    %353 = vector.shape_cast %352 : vector<8xf32> to vector<8x1xf32>
    %354 = vector.broadcast %353 : vector<8x1xf32> to vector<8x8xf32>
    %355 = arith.subf %351, %354 : vector<8x8xf32>
    %356 = math.exp %355 : vector<8x8xf32>
    %cst_145 = arith.constant dense<0.000000e+00> : vector<8xf32>
    %357 = vector.multi_reduction <add>, %356, %cst_145 [1] : vector<8x8xf32> to vector<8xf32>
    %358 = vector.shape_cast %357 : vector<8xf32> to vector<8x1xf32>
    %359 = tpu.reciprocal %358 {approx = true} : vector<8x1xf32> -> vector<8x1xf32>
    %360 = vector.broadcast %359 : vector<8x1xf32> to vector<8x8xf32>
    %361 = arith.mulf %356, %360 : vector<8x8xf32>
    %cst_146 = arith.constant dense<0.000000e+00> : vector<8x8xf32>
    %362 = tpu.matmul %361, %347, %cst_146 {dimension_numbers = #tpu.dot_dimension_numbers<[1], [0], [0], [1], [0, 0, 1, 1], [], []>} : vector<8x8xf32>, vector<8x8xf32>, vector<8x8xf32> -> vector<8x8xf32>
    %363 = vector.extract_strided_slice %4 {offsets = [16, 0], sizes = [8, 32], strides = [1, 1]} : vector<32x32xf32> to vector<8x32xf32>
    %cst_147 = arith.constant dense<0.000000e+00> : vector<8x32xf32>
    %364 = tpu.matmul %362, %363, %cst_147 {dimension_numbers = #tpu.dot_dimension_numbers<[1], [0], [0], [1], [0, 0, 1, 1], [], []>} : vector<8x8xf32>, vector<8x32xf32>, vector<8x32xf32> -> vector<8x32xf32>
    %365 = arith.addf %344, %364 : vector<8x32xf32>
    %366 = vector.extract_strided_slice %300 {offsets = [0, 24], sizes = [8, 8], strides = [1, 1]} : vector<8x32xf32> to vector<8x8xf32>
    %367 = vector.extract_strided_slice %303 {offsets = [0, 24], sizes = [8, 8], strides = [1, 1]} : vector<8x64xf32> to vector<8x8xf32>
    %368 = vector.extract_strided_slice %303 {offsets = [0, 56], sizes = [8, 8], strides = [1, 1]} : vector<8x64xf32> to vector<8x8xf32>
    %369 = tpu.transpose %367, [1, 0] : vector<8x8xf32> -> vector<8x8xf32>
    %cst_148 = arith.constant dense<0.000000e+00> : vector<8x8xf32>
    %370 = tpu.matmul %366, %369, %cst_148 {dimension_numbers = #tpu.dot_dimension_numbers<[1], [0], [0], [1], [0, 0, 1, 1], [], []>} : vector<8x8xf32>, vector<8x8xf32>, vector<8x8xf32> -> vector<8x8xf32>
    %cst_149 = arith.constant 0.353553385 : f32
    %371 = vector.broadcast %cst_149 : f32 to vector<8x8xf32>
    %372 = arith.mulf %370, %371 : vector<8x8xf32>
    %cst_150 = arith.constant dense<0xFF800000> : vector<8xf32>
    %373 = vector.multi_reduction <maximumf>, %372, %cst_150 [1] : vector<8x8xf32> to vector<8xf32>
    %374 = vector.shape_cast %373 : vector<8xf32> to vector<8x1xf32>
    %375 = vector.broadcast %374 : vector<8x1xf32> to vector<8x8xf32>
    %376 = arith.subf %372, %375 : vector<8x8xf32>
    %377 = math.exp %376 : vector<8x8xf32>
    %cst_151 = arith.constant dense<0.000000e+00> : vector<8xf32>
    %378 = vector.multi_reduction <add>, %377, %cst_151 [1] : vector<8x8xf32> to vector<8xf32>
    %379 = vector.shape_cast %378 : vector<8xf32> to vector<8x1xf32>
    %380 = tpu.reciprocal %379 {approx = true} : vector<8x1xf32> -> vector<8x1xf32>
    %381 = vector.broadcast %380 : vector<8x1xf32> to vector<8x8xf32>
    %382 = arith.mulf %377, %381 : vector<8x8xf32>
    %cst_152 = arith.constant dense<0.000000e+00> : vector<8x8xf32>
    %383 = tpu.matmul %382, %368, %cst_152 {dimension_numbers = #tpu.dot_dimension_numbers<[1], [0], [0], [1], [0, 0, 1, 1], [], []>} : vector<8x8xf32>, vector<8x8xf32>, vector<8x8xf32> -> vector<8x8xf32>
    %384 = vector.extract_strided_slice %4 {offsets = [24, 0], sizes = [8, 32], strides = [1, 1]} : vector<32x32xf32> to vector<8x32xf32>
    %cst_153 = arith.constant dense<0.000000e+00> : vector<8x32xf32>
    %385 = tpu.matmul %383, %384, %cst_153 {dimension_numbers = #tpu.dot_dimension_numbers<[1], [0], [0], [1], [0, 0, 1, 1], [], []>} : vector<8x8xf32>, vector<8x32xf32>, vector<8x32xf32> -> vector<8x32xf32>
    %386 = arith.addf %365, %385 : vector<8x32xf32>
    %387 = vector.broadcast %5 : vector<1x32xf32> to vector<8x32xf32>
    %388 = arith.addf %386, %387 : vector<8x32xf32>
    %389 = arith.addf %295, %388 : vector<8x32xf32>
    %cst_154 = arith.constant dense<0.000000e+00> : vector<8xf32>
    %390 = vector.multi_reduction <add>, %389, %cst_154 [1] : vector<8x32xf32> to vector<8xf32>
    %391 = vector.shape_cast %390 : vector<8xf32> to vector<8x1xf32>
    %cst_155 = arith.constant 3.200000e+01 : f32
    %392 = vector.broadcast %cst_155 : f32 to vector<8x1xf32>
    %393 = arith.divf %391, %392 : vector<8x1xf32>
    %394 = vector.broadcast %393 : vector<8x1xf32> to vector<8x32xf32>
    %395 = arith.subf %389, %394 : vector<8x32xf32>
    %396 = arith.mulf %395, %395 : vector<8x32xf32>
    %cst_156 = arith.constant dense<0.000000e+00> : vector<8xf32>
    %397 = vector.multi_reduction <add>, %396, %cst_156 [1] : vector<8x32xf32> to vector<8xf32>
    %398 = vector.shape_cast %397 : vector<8xf32> to vector<8x1xf32>
    %cst_157 = arith.constant 3.200000e+01 : f32
    %399 = vector.broadcast %cst_157 : f32 to vector<8x1xf32>
    %400 = arith.divf %398, %399 : vector<8x1xf32>
    %401 = vector.broadcast %393 : vector<8x1xf32> to vector<8x32xf32>
    %402 = arith.subf %389, %401 : vector<8x32xf32>
    %cst_158 = arith.constant 9.99999974E-6 : f32
    %403 = vector.broadcast %cst_158 : f32 to vector<8x1xf32>
    %404 = arith.addf %400, %403 : vector<8x1xf32>
    %405 = math.rsqrt %404 : vector<8x1xf32>
    %406 = vector.broadcast %405 : vector<8x1xf32> to vector<8x32xf32>
    %407 = arith.mulf %402, %406 : vector<8x32xf32>
    %408 = vector.broadcast %6 : vector<1x32xf32> to vector<8x32xf32>
    %409 = arith.mulf %407, %408 : vector<8x32xf32>
    %410 = vector.broadcast %7 : vector<1x32xf32> to vector<8x32xf32>
    %411 = arith.addf %409, %410 : vector<8x32xf32>
    %cst_159 = arith.constant dense<0.000000e+00> : vector<8x32xf32>
    %412 = tpu.matmul %411, %8, %cst_159 {dimension_numbers = #tpu.dot_dimension_numbers<[1], [0], [0], [1], [0, 0, 1, 1], [], []>} : vector<8x32xf32>, vector<32x32xf32>, vector<8x32xf32> -> vector<8x32xf32>
    %413 = vector.broadcast %9 : vector<1x32xf32> to vector<8x32xf32>
    %414 = arith.addf %412, %413 : vector<8x32xf32>
    %cst_160 = arith.constant dense<0.000000e+00> : vector<8x64xf32>
    %415 = tpu.matmul %297, %10, %cst_160 {dimension_numbers = #tpu.dot_dimension_numbers<[1], [0], [0], [1], [0, 0, 1, 1], [], []>} : vector<8x32xf32>, vector<32x64xf32>, vector<8x64xf32> -> vector<8x64xf32>
    %416 = vector.broadcast %11 : vector<1x64xf32> to vector<8x64xf32>
    %417 = arith.addf %415, %416 : vector<8x64xf32>
    %418 = vector.extract_strided_slice %414 {offsets = [0, 0], sizes = [8, 8], strides = [1, 1]} : vector<8x32xf32> to vector<8x8xf32>
    %419 = vector.extract_strided_slice %417 {offsets = [0, 0], sizes = [8, 8], strides = [1, 1]} : vector<8x64xf32> to vector<8x8xf32>
    %420 = vector.extract_strided_slice %417 {offsets = [0, 32], sizes = [8, 8], strides = [1, 1]} : vector<8x64xf32> to vector<8x8xf32>
    %421 = tpu.transpose %419, [1, 0] : vector<8x8xf32> -> vector<8x8xf32>
    %cst_161 = arith.constant dense<0.000000e+00> : vector<8x8xf32>
    %422 = tpu.matmul %418, %421, %cst_161 {dimension_numbers = #tpu.dot_dimension_numbers<[1], [0], [0], [1], [0, 0, 1, 1], [], []>} : vector<8x8xf32>, vector<8x8xf32>, vector<8x8xf32> -> vector<8x8xf32>
    %cst_162 = arith.constant 0.353553385 : f32
    %423 = vector.broadcast %cst_162 : f32 to vector<8x8xf32>
    %424 = arith.mulf %422, %423 : vector<8x8xf32>
    %cst_163 = arith.constant dense<0xFF800000> : vector<8xf32>
    %425 = vector.multi_reduction <maximumf>, %424, %cst_163 [1] : vector<8x8xf32> to vector<8xf32>
    %426 = vector.shape_cast %425 : vector<8xf32> to vector<8x1xf32>
    %427 = vector.broadcast %426 : vector<8x1xf32> to vector<8x8xf32>
    %428 = arith.subf %424, %427 : vector<8x8xf32>
    %429 = math.exp %428 : vector<8x8xf32>
    %cst_164 = arith.constant dense<0.000000e+00> : vector<8xf32>
    %430 = vector.multi_reduction <add>, %429, %cst_164 [1] : vector<8x8xf32> to vector<8xf32>
    %431 = vector.shape_cast %430 : vector<8xf32> to vector<8x1xf32>
    %432 = tpu.reciprocal %431 {approx = true} : vector<8x1xf32> -> vector<8x1xf32>
    %433 = vector.broadcast %432 : vector<8x1xf32> to vector<8x8xf32>
    %434 = arith.mulf %429, %433 : vector<8x8xf32>
    %cst_165 = arith.constant dense<0.000000e+00> : vector<8x8xf32>
    %435 = tpu.matmul %434, %420, %cst_165 {dimension_numbers = #tpu.dot_dimension_numbers<[1], [0], [0], [1], [0, 0, 1, 1], [], []>} : vector<8x8xf32>, vector<8x8xf32>, vector<8x8xf32> -> vector<8x8xf32>
    %436 = vector.extract_strided_slice %12 {offsets = [0, 0], sizes = [8, 32], strides = [1, 1]} : vector<32x32xf32> to vector<8x32xf32>
    %cst_166 = arith.constant dense<0.000000e+00> : vector<8x32xf32>
    %437 = tpu.matmul %435, %436, %cst_166 {dimension_numbers = #tpu.dot_dimension_numbers<[1], [0], [0], [1], [0, 0, 1, 1], [], []>} : vector<8x8xf32>, vector<8x32xf32>, vector<8x32xf32> -> vector<8x32xf32>
    %438 = vector.extract_strided_slice %414 {offsets = [0, 8], sizes = [8, 8], strides = [1, 1]} : vector<8x32xf32> to vector<8x8xf32>
    %439 = vector.extract_strided_slice %417 {offsets = [0, 8], sizes = [8, 8], strides = [1, 1]} : vector<8x64xf32> to vector<8x8xf32>
    %440 = vector.extract_strided_slice %417 {offsets = [0, 40], sizes = [8, 8], strides = [1, 1]} : vector<8x64xf32> to vector<8x8xf32>
    %441 = tpu.transpose %439, [1, 0] : vector<8x8xf32> -> vector<8x8xf32>
    %cst_167 = arith.constant dense<0.000000e+00> : vector<8x8xf32>
    %442 = tpu.matmul %438, %441, %cst_167 {dimension_numbers = #tpu.dot_dimension_numbers<[1], [0], [0], [1], [0, 0, 1, 1], [], []>} : vector<8x8xf32>, vector<8x8xf32>, vector<8x8xf32> -> vector<8x8xf32>
    %cst_168 = arith.constant 0.353553385 : f32
    %443 = vector.broadcast %cst_168 : f32 to vector<8x8xf32>
    %444 = arith.mulf %442, %443 : vector<8x8xf32>
    %cst_169 = arith.constant dense<0xFF800000> : vector<8xf32>
    %445 = vector.multi_reduction <maximumf>, %444, %cst_169 [1] : vector<8x8xf32> to vector<8xf32>
    %446 = vector.shape_cast %445 : vector<8xf32> to vector<8x1xf32>
    %447 = vector.broadcast %446 : vector<8x1xf32> to vector<8x8xf32>
    %448 = arith.subf %444, %447 : vector<8x8xf32>
    %449 = math.exp %448 : vector<8x8xf32>
    %cst_170 = arith.constant dense<0.000000e+00> : vector<8xf32>
    %450 = vector.multi_reduction <add>, %449, %cst_170 [1] : vector<8x8xf32> to vector<8xf32>
    %451 = vector.shape_cast %450 : vector<8xf32> to vector<8x1xf32>
    %452 = tpu.reciprocal %451 {approx = true} : vector<8x1xf32> -> vector<8x1xf32>
    %453 = vector.broadcast %452 : vector<8x1xf32> to vector<8x8xf32>
    %454 = arith.mulf %449, %453 : vector<8x8xf32>
    %cst_171 = arith.constant dense<0.000000e+00> : vector<8x8xf32>
    %455 = tpu.matmul %454, %440, %cst_171 {dimension_numbers = #tpu.dot_dimension_numbers<[1], [0], [0], [1], [0, 0, 1, 1], [], []>} : vector<8x8xf32>, vector<8x8xf32>, vector<8x8xf32> -> vector<8x8xf32>
    %456 = vector.extract_strided_slice %12 {offsets = [8, 0], sizes = [8, 32], strides = [1, 1]} : vector<32x32xf32> to vector<8x32xf32>
    %cst_172 = arith.constant dense<0.000000e+00> : vector<8x32xf32>
    %457 = tpu.matmul %455, %456, %cst_172 {dimension_numbers = #tpu.dot_dimension_numbers<[1], [0], [0], [1], [0, 0, 1, 1], [], []>} : vector<8x8xf32>, vector<8x32xf32>, vector<8x32xf32> -> vector<8x32xf32>
    %458 = arith.addf %437, %457 : vector<8x32xf32>
    %459 = vector.extract_strided_slice %414 {offsets = [0, 16], sizes = [8, 8], strides = [1, 1]} : vector<8x32xf32> to vector<8x8xf32>
    %460 = vector.extract_strided_slice %417 {offsets = [0, 16], sizes = [8, 8], strides = [1, 1]} : vector<8x64xf32> to vector<8x8xf32>
    %461 = vector.extract_strided_slice %417 {offsets = [0, 48], sizes = [8, 8], strides = [1, 1]} : vector<8x64xf32> to vector<8x8xf32>
    %462 = tpu.transpose %460, [1, 0] : vector<8x8xf32> -> vector<8x8xf32>
    %cst_173 = arith.constant dense<0.000000e+00> : vector<8x8xf32>
    %463 = tpu.matmul %459, %462, %cst_173 {dimension_numbers = #tpu.dot_dimension_numbers<[1], [0], [0], [1], [0, 0, 1, 1], [], []>} : vector<8x8xf32>, vector<8x8xf32>, vector<8x8xf32> -> vector<8x8xf32>
    %cst_174 = arith.constant 0.353553385 : f32
    %464 = vector.broadcast %cst_174 : f32 to vector<8x8xf32>
    %465 = arith.mulf %463, %464 : vector<8x8xf32>
    %cst_175 = arith.constant dense<0xFF800000> : vector<8xf32>
    %466 = vector.multi_reduction <maximumf>, %465, %cst_175 [1] : vector<8x8xf32> to vector<8xf32>
    %467 = vector.shape_cast %466 : vector<8xf32> to vector<8x1xf32>
    %468 = vector.broadcast %467 : vector<8x1xf32> to vector<8x8xf32>
    %469 = arith.subf %465, %468 : vector<8x8xf32>
    %470 = math.exp %469 : vector<8x8xf32>
    %cst_176 = arith.constant dense<0.000000e+00> : vector<8xf32>
    %471 = vector.multi_reduction <add>, %470, %cst_176 [1] : vector<8x8xf32> to vector<8xf32>
    %472 = vector.shape_cast %471 : vector<8xf32> to vector<8x1xf32>
    %473 = tpu.reciprocal %472 {approx = true} : vector<8x1xf32> -> vector<8x1xf32>
    %474 = vector.broadcast %473 : vector<8x1xf32> to vector<8x8xf32>
    %475 = arith.mulf %470, %474 : vector<8x8xf32>
    %cst_177 = arith.constant dense<0.000000e+00> : vector<8x8xf32>
    %476 = tpu.matmul %475, %461, %cst_177 {dimension_numbers = #tpu.dot_dimension_numbers<[1], [0], [0], [1], [0, 0, 1, 1], [], []>} : vector<8x8xf32>, vector<8x8xf32>, vector<8x8xf32> -> vector<8x8xf32>
    %477 = vector.extract_strided_slice %12 {offsets = [16, 0], sizes = [8, 32], strides = [1, 1]} : vector<32x32xf32> to vector<8x32xf32>
    %cst_178 = arith.constant dense<0.000000e+00> : vector<8x32xf32>
    %478 = tpu.matmul %476, %477, %cst_178 {dimension_numbers = #tpu.dot_dimension_numbers<[1], [0], [0], [1], [0, 0, 1, 1], [], []>} : vector<8x8xf32>, vector<8x32xf32>, vector<8x32xf32> -> vector<8x32xf32>
    %479 = arith.addf %458, %478 : vector<8x32xf32>
    %480 = vector.extract_strided_slice %414 {offsets = [0, 24], sizes = [8, 8], strides = [1, 1]} : vector<8x32xf32> to vector<8x8xf32>
    %481 = vector.extract_strided_slice %417 {offsets = [0, 24], sizes = [8, 8], strides = [1, 1]} : vector<8x64xf32> to vector<8x8xf32>
    %482 = vector.extract_strided_slice %417 {offsets = [0, 56], sizes = [8, 8], strides = [1, 1]} : vector<8x64xf32> to vector<8x8xf32>
    %483 = tpu.transpose %481, [1, 0] : vector<8x8xf32> -> vector<8x8xf32>
    %cst_179 = arith.constant dense<0.000000e+00> : vector<8x8xf32>
    %484 = tpu.matmul %480, %483, %cst_179 {dimension_numbers = #tpu.dot_dimension_numbers<[1], [0], [0], [1], [0, 0, 1, 1], [], []>} : vector<8x8xf32>, vector<8x8xf32>, vector<8x8xf32> -> vector<8x8xf32>
    %cst_180 = arith.constant 0.353553385 : f32
    %485 = vector.broadcast %cst_180 : f32 to vector<8x8xf32>
    %486 = arith.mulf %484, %485 : vector<8x8xf32>
    %cst_181 = arith.constant dense<0xFF800000> : vector<8xf32>
    %487 = vector.multi_reduction <maximumf>, %486, %cst_181 [1] : vector<8x8xf32> to vector<8xf32>
    %488 = vector.shape_cast %487 : vector<8xf32> to vector<8x1xf32>
    %489 = vector.broadcast %488 : vector<8x1xf32> to vector<8x8xf32>
    %490 = arith.subf %486, %489 : vector<8x8xf32>
    %491 = math.exp %490 : vector<8x8xf32>
    %cst_182 = arith.constant dense<0.000000e+00> : vector<8xf32>
    %492 = vector.multi_reduction <add>, %491, %cst_182 [1] : vector<8x8xf32> to vector<8xf32>
    %493 = vector.shape_cast %492 : vector<8xf32> to vector<8x1xf32>
    %494 = tpu.reciprocal %493 {approx = true} : vector<8x1xf32> -> vector<8x1xf32>
    %495 = vector.broadcast %494 : vector<8x1xf32> to vector<8x8xf32>
    %496 = arith.mulf %491, %495 : vector<8x8xf32>
    %cst_183 = arith.constant dense<0.000000e+00> : vector<8x8xf32>
    %497 = tpu.matmul %496, %482, %cst_183 {dimension_numbers = #tpu.dot_dimension_numbers<[1], [0], [0], [1], [0, 0, 1, 1], [], []>} : vector<8x8xf32>, vector<8x8xf32>, vector<8x8xf32> -> vector<8x8xf32>
    %498 = vector.extract_strided_slice %12 {offsets = [24, 0], sizes = [8, 32], strides = [1, 1]} : vector<32x32xf32> to vector<8x32xf32>
    %cst_184 = arith.constant dense<0.000000e+00> : vector<8x32xf32>
    %499 = tpu.matmul %497, %498, %cst_184 {dimension_numbers = #tpu.dot_dimension_numbers<[1], [0], [0], [1], [0, 0, 1, 1], [], []>} : vector<8x8xf32>, vector<8x32xf32>, vector<8x32xf32> -> vector<8x32xf32>
    %500 = arith.addf %479, %499 : vector<8x32xf32>
    %501 = vector.broadcast %13 : vector<1x32xf32> to vector<8x32xf32>
    %502 = arith.addf %500, %501 : vector<8x32xf32>
    %503 = arith.addf %411, %502 : vector<8x32xf32>
    %cst_185 = arith.constant dense<0.000000e+00> : vector<8xf32>
    %504 = vector.multi_reduction <add>, %503, %cst_185 [1] : vector<8x32xf32> to vector<8xf32>
    %505 = vector.shape_cast %504 : vector<8xf32> to vector<8x1xf32>
    %cst_186 = arith.constant 3.200000e+01 : f32
    %506 = vector.broadcast %cst_186 : f32 to vector<8x1xf32>
    %507 = arith.divf %505, %506 : vector<8x1xf32>
    %508 = vector.broadcast %507 : vector<8x1xf32> to vector<8x32xf32>
    %509 = arith.subf %503, %508 : vector<8x32xf32>
    %510 = arith.mulf %509, %509 : vector<8x32xf32>
    %cst_187 = arith.constant dense<0.000000e+00> : vector<8xf32>
    %511 = vector.multi_reduction <add>, %510, %cst_187 [1] : vector<8x32xf32> to vector<8xf32>
    %512 = vector.shape_cast %511 : vector<8xf32> to vector<8x1xf32>
    %cst_188 = arith.constant 3.200000e+01 : f32
    %513 = vector.broadcast %cst_188 : f32 to vector<8x1xf32>
    %514 = arith.divf %512, %513 : vector<8x1xf32>
    %515 = vector.broadcast %507 : vector<8x1xf32> to vector<8x32xf32>
    %516 = arith.subf %503, %515 : vector<8x32xf32>
    %cst_189 = arith.constant 9.99999974E-6 : f32
    %517 = vector.broadcast %cst_189 : f32 to vector<8x1xf32>
    %518 = arith.addf %514, %517 : vector<8x1xf32>
    %519 = math.rsqrt %518 : vector<8x1xf32>
    %520 = vector.broadcast %519 : vector<8x1xf32> to vector<8x32xf32>
    %521 = arith.mulf %516, %520 : vector<8x32xf32>
    %522 = vector.broadcast %14 : vector<1x32xf32> to vector<8x32xf32>
    %523 = arith.mulf %521, %522 : vector<8x32xf32>
    %524 = vector.broadcast %15 : vector<1x32xf32> to vector<8x32xf32>
    %525 = arith.addf %523, %524 : vector<8x32xf32>
    %cst_190 = arith.constant dense<0.000000e+00> : vector<8x64xf32>
    %526 = tpu.matmul %525, %16, %cst_190 {dimension_numbers = #tpu.dot_dimension_numbers<[1], [0], [0], [1], [0, 0, 1, 1], [], []>} : vector<8x32xf32>, vector<32x64xf32>, vector<8x64xf32> -> vector<8x64xf32>
    %527 = vector.broadcast %17 : vector<1x64xf32> to vector<8x64xf32>
    %528 = arith.addf %526, %527 : vector<8x64xf32>
    %cst_191 = arith.constant 5.000000e-01 : f32
    %529 = vector.broadcast %cst_191 : f32 to vector<8x64xf32>
    %530 = arith.mulf %529, %528 : vector<8x64xf32>
    %cst_192 = arith.constant 0.707106769 : f32
    %531 = vector.broadcast %cst_192 : f32 to vector<8x64xf32>
    %532 = arith.mulf %528, %531 : vector<8x64xf32>
    %533 = math.erf %532 : vector<8x64xf32>
    %cst_193 = arith.constant 1.000000e+00 : f32
    %534 = vector.broadcast %cst_193 : f32 to vector<8x64xf32>
    %535 = arith.addf %534, %533 : vector<8x64xf32>
    %536 = arith.mulf %530, %535 : vector<8x64xf32>
    %cst_194 = arith.constant dense<0.000000e+00> : vector<8x32xf32>
    %537 = tpu.matmul %536, %18, %cst_194 {dimension_numbers = #tpu.dot_dimension_numbers<[1], [0], [0], [1], [0, 0, 1, 1], [], []>} : vector<8x64xf32>, vector<64x32xf32>, vector<8x32xf32> -> vector<8x32xf32>
    %538 = vector.broadcast %19 : vector<1x32xf32> to vector<8x32xf32>
    %539 = arith.addf %537, %538 : vector<8x32xf32>
    %540 = arith.addf %525, %539 : vector<8x32xf32>
    %cst_195 = arith.constant dense<0.000000e+00> : vector<8xf32>
    %541 = vector.multi_reduction <add>, %540, %cst_195 [1] : vector<8x32xf32> to vector<8xf32>
    %542 = vector.shape_cast %541 : vector<8xf32> to vector<8x1xf32>
    %cst_196 = arith.constant 3.200000e+01 : f32
    %543 = vector.broadcast %cst_196 : f32 to vector<8x1xf32>
    %544 = arith.divf %542, %543 : vector<8x1xf32>
    %545 = vector.broadcast %544 : vector<8x1xf32> to vector<8x32xf32>
    %546 = arith.subf %540, %545 : vector<8x32xf32>
    %547 = arith.mulf %546, %546 : vector<8x32xf32>
    %cst_197 = arith.constant dense<0.000000e+00> : vector<8xf32>
    %548 = vector.multi_reduction <add>, %547, %cst_197 [1] : vector<8x32xf32> to vector<8xf32>
    %549 = vector.shape_cast %548 : vector<8xf32> to vector<8x1xf32>
    %cst_198 = arith.constant 3.200000e+01 : f32
    %550 = vector.broadcast %cst_198 : f32 to vector<8x1xf32>
    %551 = arith.divf %549, %550 : vector<8x1xf32>
    %552 = vector.broadcast %544 : vector<8x1xf32> to vector<8x32xf32>
    %553 = arith.subf %540, %552 : vector<8x32xf32>
    %cst_199 = arith.constant 9.99999974E-6 : f32
    %554 = vector.broadcast %cst_199 : f32 to vector<8x1xf32>
    %555 = arith.addf %551, %554 : vector<8x1xf32>
    %556 = math.rsqrt %555 : vector<8x1xf32>
    %557 = vector.broadcast %556 : vector<8x1xf32> to vector<8x32xf32>
    %558 = arith.mulf %553, %557 : vector<8x32xf32>
    %559 = vector.broadcast %20 : vector<1x32xf32> to vector<8x32xf32>
    %560 = arith.mulf %558, %559 : vector<8x32xf32>
    %561 = vector.broadcast %21 : vector<1x32xf32> to vector<8x32xf32>
    %562 = arith.addf %560, %561 : vector<8x32xf32>
    %c1_200 = arith.constant 1 : index
    %c0_201 = arith.constant 0 : index
    %c0_202 = arith.constant 0 : index
    %563 = vector.load %arg24[%c1_200, %c0_201, %c0_202] : memref<2x8x32xf32, #tpu.memory_space<vmem>>, vector<1x8x32xf32>
    %564 = vector.shape_cast %563 : vector<1x8x32xf32> to vector<8x32xf32>
    %565 = vector.shape_cast %562 : vector<8x32xf32> to vector<1x8x32xf32>
    tpu.vector_store %arg24[%c1_200, %c0_201, %c0_202], %565 {strides = array<i32>} : memref<2x8x32xf32, #tpu.memory_space<vmem>>, vector<1x8x32xf32>,
    return
  }
}

module attributes {stable_mosaic.version = 11 : i64} {
  func.func @_decoder_layer_kernel(%arg0: memref<2x8x32xf32, #tpu.memory_space<vmem>>, %arg1: memref<2x8x32xf32, #tpu.memory_space<vmem>>, %arg2: memref<32x32xf32, #tpu.memory_space<vmem>>, %arg3: memref<1x32xf32, #tpu.memory_space<vmem>>, %arg4: memref<32x64xf32, #tpu.memory_space<vmem>>, %arg5: memref<1x64xf32, #tpu.memory_space<vmem>>, %arg6: memref<32x32xf32, #tpu.memory_space<vmem>>, %arg7: memref<1x32xf32, #tpu.memory_space<vmem>>, %arg8: memref<1x32xf32, #tpu.memory_space<vmem>>, %arg9: memref<1x32xf32, #tpu.memory_space<vmem>>, %arg10: memref<32x32xf32, #tpu.memory_space<vmem>>, %arg11: memref<1x32xf32, #tpu.memory_space<vmem>>, %arg12: memref<32x64xf32, #tpu.memory_space<vmem>>, %arg13: memref<1x64xf32, #tpu.memory_space<vmem>>, %arg14: memref<32x32xf32, #tpu.memory_space<vmem>>, %arg15: memref<1x32xf32, #tpu.memory_space<vmem>>, %arg16: memref<1x32xf32, #tpu.memory_space<vmem>>, %arg17: memref<1x32xf32, #tpu.memory_space<vmem>>, %arg18: memref<32x64xf32, #tpu.memory_space<vmem>>, %arg19: memref<1x64xf32, #tpu.memory_space<vmem>>, %arg20: memref<64x32xf32, #tpu.memory_space<vmem>>, %arg21: memref<1x32xf32, #tpu.memory_space<vmem>>, %arg22: memref<1x32xf32, #tpu.memory_space<vmem>>, %arg23: memref<1x32xf32, #tpu.memory_space<vmem>>, %arg24: memref<2x8x32xf32, #tpu.memory_space<vmem>>) attributes {dimension_semantics = [], scalar_prefetch = 0 : i64, scratch_operands = 0 : i64, tpu.core_type = #tpu.core_type<tc>} {
    %c0 = arith.constant 0 : index
    %c0_0 = arith.constant 0 : index
    %0 = vector.load %arg2[%c0, %c0_0] : memref<32x32xf32, #tpu.memory_space<vmem>>, vector<32x32xf32>
    %c0_1 = arith.constant 0 : index
    %c0_2 = arith.constant 0 : index
    %1 = vector.load %arg3[%c0_1, %c0_2] : memref<1x32xf32, #tpu.memory_space<vmem>>, vector<1x32xf32>
    %c0_3 = arith.constant 0 : index
    %c0_4 = arith.constant 0 : index
    %2 = vector.load %arg4[%c0_3, %c0_4] : memref<32x64xf32, #tpu.memory_space<vmem>>, vector<32x64xf32>
    %c0_5 = arith.constant 0 : index
    %c0_6 = arith.constant 0 : index
    %3 = vector.load %arg5[%c0_5, %c0_6] : memref<1x64xf32, #tpu.memory_space<vmem>>, vector<1x64xf32>
    %c0_7 = arith.constant 0 : index
    %c0_8 = arith.constant 0 : index
    %4 = vector.load %arg6[%c0_7, %c0_8] : memref<32x32xf32, #tpu.memory_space<vmem>>, vector<32x32xf32>
    %c0_9 = arith.constant 0 : index
    %c0_10 = arith.constant 0 : index
    %5 = vector.load %arg7[%c0_9, %c0_10] : memref<1x32xf32, #tpu.memory_space<vmem>>, vector<1x32xf32>
    %c0_11 = arith.constant 0 : index
    %c0_12 = arith.constant 0 : index
    %6 = vector.load %arg8[%c0_11, %c0_12] : memref<1x32xf32, #tpu.memory_space<vmem>>, vector<1x32xf32>
    %c0_13 = arith.constant 0 : index
    %c0_14 = arith.constant 0 : index
    %7 = vector.load %arg9[%c0_13, %c0_14] : memref<1x32xf32, #tpu.memory_space<vmem>>, vector<1x32xf32>
    %c0_15 = arith.constant 0 : index
    %c0_16 = arith.constant 0 : index
    %8 = vector.load %arg10[%c0_15, %c0_16] : memref<32x32xf32, #tpu.memory_space<vmem>>, vector<32x32xf32>
    %c0_17 = arith.constant 0 : index
    %c0_18 = arith.constant 0 : index
    %9 = vector.load %arg11[%c0_17, %c0_18] : memref<1x32xf32, #tpu.memory_space<vmem>>, vector<1x32xf32>
    %c0_19 = arith.constant 0 : index
    %c0_20 = arith.constant 0 : index
    %10 = vector.load %arg12[%c0_19, %c0_20] : memref<32x64xf32, #tpu.memory_space<vmem>>, vector<32x64xf32>
    %c0_21 = arith.constant 0 : index
    %c0_22 = arith.constant 0 : index
    %11 = vector.load %arg13[%c0_21, %c0_22] : memref<1x64xf32, #tpu.memory_space<vmem>>, vector<1x64xf32>
    %c0_23 = arith.constant 0 : index
    %c0_24 = arith.constant 0 : index
    %12 = vector.load %arg14[%c0_23, %c0_24] : memref<32x32xf32, #tpu.memory_space<vmem>>, vector<32x32xf32>
    %c0_25 = arith.constant 0 : index
    %c0_26 = arith.constant 0 : index
    %13 = vector.load %arg15[%c0_25, %c0_26] : memref<1x32xf32, #tpu.memory_space<vmem>>, vector<1x32xf32>
    %c0_27 = arith.constant 0 : index
    %c0_28 = arith.constant 0 : index
    %14 = vector.load %arg16[%c0_27, %c0_28] : memref<1x32xf32, #tpu.memory_space<vmem>>, vector<1x32xf32>
    %c0_29 = arith.constant 0 : index
    %c0_30 = arith.constant 0 : index
    %15 = vector.load %arg17[%c0_29, %c0_30] : memref<1x32xf32, #tpu.memory_space<vmem>>, vector<1x32xf32>
    %c0_31 = arith.constant 0 : index
    %c0_32 = arith.constant 0 : index
    %16 = vector.load %arg18[%c0_31, %c0_32] : memref<32x64xf32, #tpu.memory_space<vmem>>, vector<32x64xf32>
    %c0_33 = arith.constant 0 : index
    %c0_34 = arith.constant 0 : index
    %17 = vector.load %arg19[%c0_33, %c0_34] : memref<1x64xf32, #tpu.memory_space<vmem>>, vector<1x64xf32>
    %c0_35 = arith.constant 0 : index
    %c0_36 = arith.constant 0 : index
    %18 = vector.load %arg20[%c0_35, %c0_36] : memref<64x32xf32, #tpu.memory_space<vmem>>, vector<64x32xf32>
    %c0_37 = arith.constant 0 : index
    %c0_38 = arith.constant 0 : index
    %19 = vector.load %arg21[%c0_37, %c0_38] : memref<1x32xf32, #tpu.memory_space<vmem>>, vector<1x32xf32>
    %c0_39 = arith.constant 0 : index
    %c0_40 = arith.constant 0 : index
    %20 = vector.load %arg22[%c0_39, %c0_40] : memref<1x32xf32, #tpu.memory_space<vmem>>, vector<1x32xf32>
    %c0_41 = arith.constant 0 : index
    %c0_42 = arith.constant 0 : index
    %21 = vector.load %arg23[%c0_41, %c0_42] : memref<1x32xf32, #tpu.memory_space<vmem>>, vector<1x32xf32>
    %c0_43 = arith.constant 0 : index
    %c0_44 = arith.constant 0 : index
    %c0_45 = arith.constant 0 : index
    %22 = vector.load %arg0[%c0_43, %c0_44, %c0_45] : memref<2x8x32xf32, #tpu.memory_space<vmem>>, vector<1x8x32xf32>
    %23 = vector.shape_cast %22 : vector<1x8x32xf32> to vector<8x32xf32>
    %c0_46 = arith.constant 0 : index
    %c0_47 = arith.constant 0 : index
    %c0_48 = arith.constant 0 : index
    %24 = vector.load %arg1[%c0_46, %c0_47, %c0_48] : memref<2x8x32xf32, #tpu.memory_space<vmem>>, vector<1x8x32xf32>
    %25 = vector.shape_cast %24 : vector<1x8x32xf32> to vector<8x32xf32>
    %cst = arith.constant dense<0.000000e+00> : vector<8x32xf32>
    %26 = tpu.matmul %23, %0, %cst {dimension_numbers = #tpu.dot_dimension_numbers<[1], [0], [0], [1], [0, 0, 1, 1], [], []>} : vector<8x32xf32>, vector<32x32xf32>, vector<8x32xf32> -> vector<8x32xf32>
    %27 = vector.broadcast %1 : vector<1x32xf32> to vector<8x32xf32>
    %28 = arith.addf %26, %27 : vector<8x32xf32>
    %cst_49 = arith.constant dense<0.000000e+00> : vector<8x64xf32>
    %29 = tpu.matmul %23, %2, %cst_49 {dimension_numbers = #tpu.dot_dimension_numbers<[1], [0], [0], [1], [0, 0, 1, 1], [], []>} : vector<8x32xf32>, vector<32x64xf32>, vector<8x64xf32> -> vector<8x64xf32>
    %30 = vector.broadcast %3 : vector<1x64xf32> to vector<8x64xf32>
    %31 = arith.addf %29, %30 : vector<8x64xf32>
    %32 = vector.extract_strided_slice %28 {offsets = [0, 0], sizes = [8, 8], strides = [1, 1]} : vector<8x32xf32> to vector<8x8xf32>
    %33 = vector.extract_strided_slice %31 {offsets = [0, 0], sizes = [8, 8], strides = [1, 1]} : vector<8x64xf32> to vector<8x8xf32>
    %34 = vector.extract_strided_slice %31 {offsets = [0, 32], sizes = [8, 8], strides = [1, 1]} : vector<8x64xf32> to vector<8x8xf32>
    %35 = tpu.transpose %33, [1, 0] : vector<8x8xf32> -> vector<8x8xf32>
    %cst_50 = arith.constant dense<0.000000e+00> : vector<8x8xf32>
    %36 = tpu.matmul %32, %35, %cst_50 {dimension_numbers = #tpu.dot_dimension_numbers<[1], [0], [0], [1], [0, 0, 1, 1], [], []>} : vector<8x8xf32>, vector<8x8xf32>, vector<8x8xf32> -> vector<8x8xf32>
    %cst_51 = arith.constant 0.353553385 : f32
    %37 = vector.broadcast %cst_51 : f32 to vector<8x8xf32>
    %38 = arith.mulf %36, %37 : vector<8x8xf32>
    %cst_52 = arith.constant dense<0xFF800000> : vector<8xf32>
    %39 = vector.multi_reduction <maximumf>, %38, %cst_52 [1] : vector<8x8xf32> to vector<8xf32>
    %40 = vector.shape_cast %39 : vector<8xf32> to vector<8x1xf32>
    %41 = vector.broadcast %40 : vector<8x1xf32> to vector<8x8xf32>
    %42 = arith.subf %38, %41 : vector<8x8xf32>
    %43 = math.exp %42 : vector<8x8xf32>
    %cst_53 = arith.constant dense<0.000000e+00> : vector<8xf32>
    %44 = vector.multi_reduction <add>, %43, %cst_53 [1] : vector<8x8xf32> to vector<8xf32>
    %45 = vector.shape_cast %44 : vector<8xf32> to vector<8x1xf32>
    %46 = tpu.reciprocal %45 {approx = true} : vector<8x1xf32> -> vector<8x1xf32>
    %47 = vector.broadcast %46 : vector<8x1xf32> to vector<8x8xf32>
    %48 = arith.mulf %43, %47 : vector<8x8xf32>
    %cst_54 = arith.constant dense<0.000000e+00> : vector<8x8xf32>
    %49 = tpu.matmul %48, %34, %cst_54 {dimension_numbers = #tpu.dot_dimension_numbers<[1], [0], [0], [1], [0, 0, 1, 1], [], []>} : vector<8x8xf32>, vector<8x8xf32>, vector<8x8xf32> -> vector<8x8xf32>
    %50 = vector.extract_strided_slice %4 {offsets = [0, 0], sizes = [8, 32], strides = [1, 1]} : vector<32x32xf32> to vector<8x32xf32>
    %cst_55 = arith.constant dense<0.000000e+00> : vector<8x32xf32>
    %51 = tpu.matmul %49, %50, %cst_55 {dimension_numbers = #tpu.dot_dimension_numbers<[1], [0], [0], [1], [0, 0, 1, 1], [], []>} : vector<8x8xf32>, vector<8x32xf32>, vector<8x32xf32> -> vector<8x32xf32>
    %52 = vector.extract_strided_slice %28 {offsets = [0, 8], sizes = [8, 8], strides = [1, 1]} : vector<8x32xf32> to vector<8x8xf32>
    %53 = vector.extract_strided_slice %31 {offsets = [0, 8], sizes = [8, 8], strides = [1, 1]} : vector<8x64xf32> to vector<8x8xf32>
    %54 = vector.extract_strided_slice %31 {offsets = [0, 40], sizes = [8, 8], strides = [1, 1]} : vector<8x64xf32> to vector<8x8xf32>
    %55 = tpu.transpose %53, [1, 0] : vector<8x8xf32> -> vector<8x8xf32>
    %cst_56 = arith.constant dense<0.000000e+00> : vector<8x8xf32>
    %56 = tpu.matmul %52, %55, %cst_56 {dimension_numbers = #tpu.dot_dimension_numbers<[1], [0], [0], [1], [0, 0, 1, 1], [], []>} : vector<8x8xf32>, vector<8x8xf32>, vector<8x8xf32> -> vector<8x8xf32>
    %cst_57 = arith.constant 0.353553385 : f32
    %57 = vector.broadcast %cst_57 : f32 to vector<8x8xf32>
    %58 = arith.mulf %56, %57 : vector<8x8xf32>
    %cst_58 = arith.constant dense<0xFF800000> : vector<8xf32>
    %59 = vector.multi_reduction <maximumf>, %58, %cst_58 [1] : vector<8x8xf32> to vector<8xf32>
    %60 = vector.shape_cast %59 : vector<8xf32> to vector<8x1xf32>
    %61 = vector.broadcast %60 : vector<8x1xf32> to vector<8x8xf32>
    %62 = arith.subf %58, %61 : vector<8x8xf32>
    %63 = math.exp %62 : vector<8x8xf32>
    %cst_59 = arith.constant dense<0.000000e+00> : vector<8xf32>
    %64 = vector.multi_reduction <add>, %63, %cst_59 [1] : vector<8x8xf32> to vector<8xf32>
    %65 = vector.shape_cast %64 : vector<8xf32> to vector<8x1xf32>
    %66 = tpu.reciprocal %65 {approx = true} : vector<8x1xf32> -> vector<8x1xf32>
    %67 = vector.broadcast %66 : vector<8x1xf32> to vector<8x8xf32>
    %68 = arith.mulf %63, %67 : vector<8x8xf32>
    %cst_60 = arith.constant dense<0.000000e+00> : vector<8x8xf32>
    %69 = tpu.matmul %68, %54, %cst_60 {dimension_numbers = #tpu.dot_dimension_numbers<[1], [0], [0], [1], [0, 0, 1, 1], [], []>} : vector<8x8xf32>, vector<8x8xf32>, vector<8x8xf32> -> vector<8x8xf32>
    %70 = vector.extract_strided_slice %4 {offsets = [8, 0], sizes = [8, 32], strides = [1, 1]} : vector<32x32xf32> to vector<8x32xf32>
    %cst_61 = arith.constant dense<0.000000e+00> : vector<8x32xf32>
    %71 = tpu.matmul %69, %70, %cst_61 {dimension_numbers = #tpu.dot_dimension_numbers<[1], [0], [0], [1], [0, 0, 1, 1], [], []>} : vector<8x8xf32>, vector<8x32xf32>, vector<8x32xf32> -> vector<8x32xf32>
    %72 = arith.addf %51, %71 : vector<8x32xf32>
    %73 = vector.extract_strided_slice %28 {offsets = [0, 16], sizes = [8, 8], strides = [1, 1]} : vector<8x32xf32> to vector<8x8xf32>
    %74 = vector.extract_strided_slice %31 {offsets = [0, 16], sizes = [8, 8], strides = [1, 1]} : vector<8x64xf32> to vector<8x8xf32>
    %75 = vector.extract_strided_slice %31 {offsets = [0, 48], sizes = [8, 8], strides = [1, 1]} : vector<8x64xf32> to vector<8x8xf32>
    %76 = tpu.transpose %74, [1, 0] : vector<8x8xf32> -> vector<8x8xf32>
    %cst_62 = arith.constant dense<0.000000e+00> : vector<8x8xf32>
    %77 = tpu.matmul %73, %76, %cst_62 {dimension_numbers = #tpu.dot_dimension_numbers<[1], [0], [0], [1], [0, 0, 1, 1], [], []>} : vector<8x8xf32>, vector<8x8xf32>, vector<8x8xf32> -> vector<8x8xf32>
    %cst_63 = arith.constant 0.353553385 : f32
    %78 = vector.broadcast %cst_63 : f32 to vector<8x8xf32>
    %79 = arith.mulf %77, %78 : vector<8x8xf32>
    %cst_64 = arith.constant dense<0xFF800000> : vector<8xf32>
    %80 = vector.multi_reduction <maximumf>, %79, %cst_64 [1] : vector<8x8xf32> to vector<8xf32>
    %81 = vector.shape_cast %80 : vector<8xf32> to vector<8x1xf32>
    %82 = vector.broadcast %81 : vector<8x1xf32> to vector<8x8xf32>
    %83 = arith.subf %79, %82 : vector<8x8xf32>
    %84 = math.exp %83 : vector<8x8xf32>
    %cst_65 = arith.constant dense<0.000000e+00> : vector<8xf32>
    %85 = vector.multi_reduction <add>, %84, %cst_65 [1] : vector<8x8xf32> to vector<8xf32>
    %86 = vector.shape_cast %85 : vector<8xf32> to vector<8x1xf32>
    %87 = tpu.reciprocal %86 {approx = true} : vector<8x1xf32> -> vector<8x1xf32>
    %88 = vector.broadcast %87 : vector<8x1xf32> to vector<8x8xf32>
    %89 = arith.mulf %84, %88 : vector<8x8xf32>
    %cst_66 = arith.constant dense<0.000000e+00> : vector<8x8xf32>
    %90 = tpu.matmul %89, %75, %cst_66 {dimension_numbers = #tpu.dot_dimension_numbers<[1], [0], [0], [1], [0, 0, 1, 1], [], []>} : vector<8x8xf32>, vector<8x8xf32>, vector<8x8xf32> -> vector<8x8xf32>
    %91 = vector.extract_strided_slice %4 {offsets = [16, 0], sizes = [8, 32], strides = [1, 1]} : vector<32x32xf32> to vector<8x32xf32>
    %cst_67 = arith.constant dense<0.000000e+00> : vector<8x32xf32>
    %92 = tpu.matmul %90, %91, %cst_67 {dimension_numbers = #tpu.dot_dimension_numbers<[1], [0], [0], [1], [0, 0, 1, 1], [], []>} : vector<8x8xf32>, vector<8x32xf32>, vector<8x32xf32> -> vector<8x32xf32>
    %93 = arith.addf %72, %92 : vector<8x32xf32>
    %94 = vector.extract_strided_slice %28 {offsets = [0, 24], sizes = [8, 8], strides = [1, 1]} : vector<8x32xf32> to vector<8x8xf32>
    %95 = vector.extract_strided_slice %31 {offsets = [0, 24], sizes = [8, 8], strides = [1, 1]} : vector<8x64xf32> to vector<8x8xf32>
    %96 = vector.extract_strided_slice %31 {offsets = [0, 56], sizes = [8, 8], strides = [1, 1]} : vector<8x64xf32> to vector<8x8xf32>
    %97 = tpu.transpose %95, [1, 0] : vector<8x8xf32> -> vector<8x8xf32>
    %cst_68 = arith.constant dense<0.000000e+00> : vector<8x8xf32>
    %98 = tpu.matmul %94, %97, %cst_68 {dimension_numbers = #tpu.dot_dimension_numbers<[1], [0], [0], [1], [0, 0, 1, 1], [], []>} : vector<8x8xf32>, vector<8x8xf32>, vector<8x8xf32> -> vector<8x8xf32>
    %cst_69 = arith.constant 0.353553385 : f32
    %99 = vector.broadcast %cst_69 : f32 to vector<8x8xf32>
    %100 = arith.mulf %98, %99 : vector<8x8xf32>
    %cst_70 = arith.constant dense<0xFF800000> : vector<8xf32>
    %101 = vector.multi_reduction <maximumf>, %100, %cst_70 [1] : vector<8x8xf32> to vector<8xf32>
    %102 = vector.shape_cast %101 : vector<8xf32> to vector<8x1xf32>
    %103 = vector.broadcast %102 : vector<8x1xf32> to vector<8x8xf32>
    %104 = arith.subf %100, %103 : vector<8x8xf32>
    %105 = math.exp %104 : vector<8x8xf32>
    %cst_71 = arith.constant dense<0.000000e+00> : vector<8xf32>
    %106 = vector.multi_reduction <add>, %105, %cst_71 [1] : vector<8x8xf32> to vector<8xf32>
    %107 = vector.shape_cast %106 : vector<8xf32> to vector<8x1xf32>
    %108 = tpu.reciprocal %107 {approx = true} : vector<8x1xf32> -> vector<8x1xf32>
    %109 = vector.broadcast %108 : vector<8x1xf32> to vector<8x8xf32>
    %110 = arith.mulf %105, %109 : vector<8x8xf32>
    %cst_72 = arith.constant dense<0.000000e+00> : vector<8x8xf32>
    %111 = tpu.matmul %110, %96, %cst_72 {dimension_numbers = #tpu.dot_dimension_numbers<[1], [0], [0], [1], [0, 0, 1, 1], [], []>} : vector<8x8xf32>, vector<8x8xf32>, vector<8x8xf32> -> vector<8x8xf32>
    %112 = vector.extract_strided_slice %4 {offsets = [24, 0], sizes = [8, 32], strides = [1, 1]} : vector<32x32xf32> to vector<8x32xf32>
    %cst_73 = arith.constant dense<0.000000e+00> : vector<8x32xf32>
    %113 = tpu.matmul %111, %112, %cst_73 {dimension_numbers = #tpu.dot_dimension_numbers<[1], [0], [0], [1], [0, 0, 1, 1], [], []>} : vector<8x8xf32>, vector<8x32xf32>, vector<8x32xf32> -> vector<8x32xf32>
    %114 = arith.addf %93, %113 : vector<8x32xf32>
    %115 = vector.broadcast %5 : vector<1x32xf32> to vector<8x32xf32>
    %116 = arith.addf %114, %115 : vector<8x32xf32>
    %117 = arith.addf %23, %116 : vector<8x32xf32>
    %cst_74 = arith.constant dense<0.000000e+00> : vector<8xf32>
    %118 = vector.multi_reduction <add>, %117, %cst_74 [1] : vector<8x32xf32> to vector<8xf32>
    %119 = vector.shape_cast %118 : vector<8xf32> to vector<8x1xf32>
    %cst_75 = arith.constant 3.200000e+01 : f32
    %120 = vector.broadcast %cst_75 : f32 to vector<8x1xf32>
    %121 = arith.divf %119, %120 : vector<8x1xf32>
    %122 = vector.broadcast %121 : vector<8x1xf32> to vector<8x32xf32>
    %123 = arith.subf %117, %122 : vector<8x32xf32>
    %124 = arith.mulf %123, %123 : vector<8x32xf32>
    %cst_76 = arith.constant dense<0.000000e+00> : vector<8xf32>
    %125 = vector.multi_reduction <add>, %124, %cst_76 [1] : vector<8x32xf32> to vector<8xf32>
    %126 = vector.shape_cast %125 : vector<8xf32> to vector<8x1xf32>
    %cst_77 = arith.constant 3.200000e+01 : f32
    %127 = vector.broadcast %cst_77 : f32 to vector<8x1xf32>
    %128 = arith.divf %126, %127 : vector<8x1xf32>
    %129 = vector.broadcast %121 : vector<8x1xf32> to vector<8x32xf32>
    %130 = arith.subf %117, %129 : vector<8x32xf32>
    %cst_78 = arith.constant 9.99999974E-6 : f32
    %131 = vector.broadcast %cst_78 : f32 to vector<8x1xf32>
    %132 = arith.addf %128, %131 : vector<8x1xf32>
    %133 = math.rsqrt %132 : vector<8x1xf32>
    %134 = vector.broadcast %133 : vector<8x1xf32> to vector<8x32xf32>
    %135 = arith.mulf %130, %134 : vector<8x32xf32>
    %136 = vector.broadcast %6 : vector<1x32xf32> to vector<8x32xf32>
    %137 = arith.mulf %135, %136 : vector<8x32xf32>
    %138 = vector.broadcast %7 : vector<1x32xf32> to vector<8x32xf32>
    %139 = arith.addf %137, %138 : vector<8x32xf32>
    %cst_79 = arith.constant dense<0.000000e+00> : vector<8x32xf32>
    %140 = tpu.matmul %139, %8, %cst_79 {dimension_numbers = #tpu.dot_dimension_numbers<[1], [0], [0], [1], [0, 0, 1, 1], [], []>} : vector<8x32xf32>, vector<32x32xf32>, vector<8x32xf32> -> vector<8x32xf32>
    %141 = vector.broadcast %9 : vector<1x32xf32> to vector<8x32xf32>
    %142 = arith.addf %140, %141 : vector<8x32xf32>
    %cst_80 = arith.constant dense<0.000000e+00> : vector<8x64xf32>
    %143 = tpu.matmul %25, %10, %cst_80 {dimension_numbers = #tpu.dot_dimension_numbers<[1], [0], [0], [1], [0, 0, 1, 1], [], []>} : vector<8x32xf32>, vector<32x64xf32>, vector<8x64xf32> -> vector<8x64xf32>
    %144 = vector.broadcast %11 : vector<1x64xf32> to vector<8x64xf32>
    %145 = arith.addf %143, %144 : vector<8x64xf32>
    %146 = vector.extract_strided_slice %142 {offsets = [0, 0], sizes = [8, 8], strides = [1, 1]} : vector<8x32xf32> to vector<8x8xf32>
    %147 = vector.extract_strided_slice %145 {offsets = [0, 0], sizes = [8, 8], strides = [1, 1]} : vector<8x64xf32> to vector<8x8xf32>
    %148 = vector.extract_strided_slice %145 {offsets = [0, 32], sizes = [8, 8], strides = [1, 1]} : vector<8x64xf32> to vector<8x8xf32>
    %149 = tpu.transpose %147, [1, 0] : vector<8x8xf32> -> vector<8x8xf32>
    %cst_81 = arith.constant dense<0.000000e+00> : vector<8x8xf32>
    %150 = tpu.matmul %146, %149, %cst_81 {dimension_numbers = #tpu.dot_dimension_numbers<[1], [0], [0], [1], [0, 0, 1, 1], [], []>} : vector<8x8xf32>, vector<8x8xf32>, vector<8x8xf32> -> vector<8x8xf32>
    %cst_82 = arith.constant 0.353553385 : f32
    %151 = vector.broadcast %cst_82 : f32 to vector<8x8xf32>
    %152 = arith.mulf %150, %151 : vector<8x8xf32>
    %cst_83 = arith.constant dense<0xFF800000> : vector<8xf32>
    %153 = vector.multi_reduction <maximumf>, %152, %cst_83 [1] : vector<8x8xf32> to vector<8xf32>
    %154 = vector.shape_cast %153 : vector<8xf32> to vector<8x1xf32>
    %155 = vector.broadcast %154 : vector<8x1xf32> to vector<8x8xf32>
    %156 = arith.subf %152, %155 : vector<8x8xf32>
    %157 = math.exp %156 : vector<8x8xf32>
    %cst_84 = arith.constant dense<0.000000e+00> : vector<8xf32>
    %158 = vector.multi_reduction <add>, %157, %cst_84 [1] : vector<8x8xf32> to vector<8xf32>
    %159 = vector.shape_cast %158 : vector<8xf32> to vector<8x1xf32>
    %160 = tpu.reciprocal %159 {approx = true} : vector<8x1xf32> -> vector<8x1xf32>
    %161 = vector.broadcast %160 : vector<8x1xf32> to vector<8x8xf32>
    %162 = arith.mulf %157, %161 : vector<8x8xf32>
    %cst_85 = arith.constant dense<0.000000e+00> : vector<8x8xf32>
    %163 = tpu.matmul %162, %148, %cst_85 {dimension_numbers = #tpu.dot_dimension_numbers<[1], [0], [0], [1], [0, 0, 1, 1], [], []>} : vector<8x8xf32>, vector<8x8xf32>, vector<8x8xf32> -> vector<8x8xf32>
    %164 = vector.extract_strided_slice %12 {offsets = [0, 0], sizes = [8, 32], strides = [1, 1]} : vector<32x32xf32> to vector<8x32xf32>
    %cst_86 = arith.constant dense<0.000000e+00> : vector<8x32xf32>
    %165 = tpu.matmul %163, %164, %cst_86 {dimension_numbers = #tpu.dot_dimension_numbers<[1], [0], [0], [1], [0, 0, 1, 1], [], []>} : vector<8x8xf32>, vector<8x32xf32>, vector<8x32xf32> -> vector<8x32xf32>
    %166 = vector.extract_strided_slice %142 {offsets = [0, 8], sizes = [8, 8], strides = [1, 1]} : vector<8x32xf32> to vector<8x8xf32>
    %167 = vector.extract_strided_slice %145 {offsets = [0, 8], sizes = [8, 8], strides = [1, 1]} : vector<8x64xf32> to vector<8x8xf32>
    %168 = vector.extract_strided_slice %145 {offsets = [0, 40], sizes = [8, 8], strides = [1, 1]} : vector<8x64xf32> to vector<8x8xf32>
    %169 = tpu.transpose %167, [1, 0] : vector<8x8xf32> -> vector<8x8xf32>
    %cst_87 = arith.constant dense<0.000000e+00> : vector<8x8xf32>
    %170 = tpu.matmul %166, %169, %cst_87 {dimension_numbers = #tpu.dot_dimension_numbers<[1], [0], [0], [1], [0, 0, 1, 1], [], []>} : vector<8x8xf32>, vector<8x8xf32>, vector<8x8xf32> -> vector<8x8xf32>
    %cst_88 = arith.constant 0.353553385 : f32
    %171 = vector.broadcast %cst_88 : f32 to vector<8x8xf32>
    %172 = arith.mulf %170, %171 : vector<8x8xf32>
    %cst_89 = arith.constant dense<0xFF800000> : vector<8xf32>
    %173 = vector.multi_reduction <maximumf>, %172, %cst_89 [1] : vector<8x8xf32> to vector<8xf32>
    %174 = vector.shape_cast %173 : vector<8xf32> to vector<8x1xf32>
    %175 = vector.broadcast %174 : vector<8x1xf32> to vector<8x8xf32>
    %176 = arith.subf %172, %175 : vector<8x8xf32>
    %177 = math.exp %176 : vector<8x8xf32>
    %cst_90 = arith.constant dense<0.000000e+00> : vector<8xf32>
    %178 = vector.multi_reduction <add>, %177, %cst_90 [1] : vector<8x8xf32> to vector<8xf32>
    %179 = vector.shape_cast %178 : vector<8xf32> to vector<8x1xf32>
    %180 = tpu.reciprocal %179 {approx = true} : vector<8x1xf32> -> vector<8x1xf32>
    %181 = vector.broadcast %180 : vector<8x1xf32> to vector<8x8xf32>
    %182 = arith.mulf %177, %181 : vector<8x8xf32>
    %cst_91 = arith.constant dense<0.000000e+00> : vector<8x8xf32>
    %183 = tpu.matmul %182, %168, %cst_91 {dimension_numbers = #tpu.dot_dimension_numbers<[1], [0], [0], [1], [0, 0, 1, 1], [], []>} : vector<8x8xf32>, vector<8x8xf32>, vector<8x8xf32> -> vector<8x8xf32>
    %184 = vector.extract_strided_slice %12 {offsets = [8, 0], sizes = [8, 32], strides = [1, 1]} : vector<32x32xf32> to vector<8x32xf32>
    %cst_92 = arith.constant dense<0.000000e+00> : vector<8x32xf32>
    %185 = tpu.matmul %183, %184, %cst_92 {dimension_numbers = #tpu.dot_dimension_numbers<[1], [0], [0], [1], [0, 0, 1, 1], [], []>} : vector<8x8xf32>, vector<8x32xf32>, vector<8x32xf32> -> vector<8x32xf32>
    %186 = arith.addf %165, %185 : vector<8x32xf32>
    %187 = vector.extract_strided_slice %142 {offsets = [0, 16], sizes = [8, 8], strides = [1, 1]} : vector<8x32xf32> to vector<8x8xf32>
    %188 = vector.extract_strided_slice %145 {offsets = [0, 16], sizes = [8, 8], strides = [1, 1]} : vector<8x64xf32> to vector<8x8xf32>
    %189 = vector.extract_strided_slice %145 {offsets = [0, 48], sizes = [8, 8], strides = [1, 1]} : vector<8x64xf32> to vector<8x8xf32>
    %190 = tpu.transpose %188, [1, 0] : vector<8x8xf32> -> vector<8x8xf32>
    %cst_93 = arith.constant dense<0.000000e+00> : vector<8x8xf32>
    %191 = tpu.matmul %187, %190, %cst_93 {dimension_numbers = #tpu.dot_dimension_numbers<[1], [0], [0], [1], [0, 0, 1, 1], [], []>} : vector<8x8xf32>, vector<8x8xf32>, vector<8x8xf32> -> vector<8x8xf32>
    %cst_94 = arith.constant 0.353553385 : f32
    %192 = vector.broadcast %cst_94 : f32 to vector<8x8xf32>
    %193 = arith.mulf %191, %192 : vector<8x8xf32>
    %cst_95 = arith.constant dense<0xFF800000> : vector<8xf32>
    %194 = vector.multi_reduction <maximumf>, %193, %cst_95 [1] : vector<8x8xf32> to vector<8xf32>
    %195 = vector.shape_cast %194 : vector<8xf32> to vector<8x1xf32>
    %196 = vector.broadcast %195 : vector<8x1xf32> to vector<8x8xf32>
    %197 = arith.subf %193, %196 : vector<8x8xf32>
    %198 = math.exp %197 : vector<8x8xf32>
    %cst_96 = arith.constant dense<0.000000e+00> : vector<8xf32>
    %199 = vector.multi_reduction <add>, %198, %cst_96 [1] : vector<8x8xf32> to vector<8xf32>
    %200 = vector.shape_cast %199 : vector<8xf32> to vector<8x1xf32>
    %201 = tpu.reciprocal %200 {approx = true} : vector<8x1xf32> -> vector<8x1xf32>
    %202 = vector.broadcast %201 : vector<8x1xf32> to vector<8x8xf32>
    %203 = arith.mulf %198, %202 : vector<8x8xf32>
    %cst_97 = arith.constant dense<0.000000e+00> : vector<8x8xf32>
    %204 = tpu.matmul %203, %189, %cst_97 {dimension_numbers = #tpu.dot_dimension_numbers<[1], [0], [0], [1], [0, 0, 1, 1], [], []>} : vector<8x8xf32>, vector<8x8xf32>, vector<8x8xf32> -> vector<8x8xf32>
    %205 = vector.extract_strided_slice %12 {offsets = [16, 0], sizes = [8, 32], strides = [1, 1]} : vector<32x32xf32> to vector<8x32xf32>
    %cst_98 = arith.constant dense<0.000000e+00> : vector<8x32xf32>
    %206 = tpu.matmul %204, %205, %cst_98 {dimension_numbers = #tpu.dot_dimension_numbers<[1], [0], [0], [1], [0, 0, 1, 1], [], []>} : vector<8x8xf32>, vector<8x32xf32>, vector<8x32xf32> -> vector<8x32xf32>
    %207 = arith.addf %186, %206 : vector<8x32xf32>
    %208 = vector.extract_strided_slice %142 {offsets = [0, 24], sizes = [8, 8], strides = [1, 1]} : vector<8x32xf32> to vector<8x8xf32>
    %209 = vector.extract_strided_slice %145 {offsets = [0, 24], sizes = [8, 8], strides = [1, 1]} : vector<8x64xf32> to vector<8x8xf32>
    %210 = vector.extract_strided_slice %145 {offsets = [0, 56], sizes = [8, 8], strides = [1, 1]} : vector<8x64xf32> to vector<8x8xf32>
    %211 = tpu.transpose %209, [1, 0] : vector<8x8xf32> -> vector<8x8xf32>
    %cst_99 = arith.constant dense<0.000000e+00> : vector<8x8xf32>
    %212 = tpu.matmul %208, %211, %cst_99 {dimension_numbers = #tpu.dot_dimension_numbers<[1], [0], [0], [1], [0, 0, 1, 1], [], []>} : vector<8x8xf32>, vector<8x8xf32>, vector<8x8xf32> -> vector<8x8xf32>
    %cst_100 = arith.constant 0.353553385 : f32
    %213 = vector.broadcast %cst_100 : f32 to vector<8x8xf32>
    %214 = arith.mulf %212, %213 : vector<8x8xf32>
    %cst_101 = arith.constant dense<0xFF800000> : vector<8xf32>
    %215 = vector.multi_reduction <maximumf>, %214, %cst_101 [1] : vector<8x8xf32> to vector<8xf32>
    %216 = vector.shape_cast %215 : vector<8xf32> to vector<8x1xf32>
    %217 = vector.broadcast %216 : vector<8x1xf32> to vector<8x8xf32>
    %218 = arith.subf %214, %217 : vector<8x8xf32>
    %219 = math.exp %218 : vector<8x8xf32>
    %cst_102 = arith.constant dense<0.000000e+00> : vector<8xf32>
    %220 = vector.multi_reduction <add>, %219, %cst_102 [1] : vector<8x8xf32> to vector<8xf32>
    %221 = vector.shape_cast %220 : vector<8xf32> to vector<8x1xf32>
    %222 = tpu.reciprocal %221 {approx = true} : vector<8x1xf32> -> vector<8x1xf32>
    %223 = vector.broadcast %222 : vector<8x1xf32> to vector<8x8xf32>
    %224 = arith.mulf %219, %223 : vector<8x8xf32>
    %cst_103 = arith.constant dense<0.000000e+00> : vector<8x8xf32>
    %225 = tpu.matmul %224, %210, %cst_103 {dimension_numbers = #tpu.dot_dimension_numbers<[1], [0], [0], [1], [0, 0, 1, 1], [], []>} : vector<8x8xf32>, vector<8x8xf32>, vector<8x8xf32> -> vector<8x8xf32>
    %226 = vector.extract_strided_slice %12 {offsets = [24, 0], sizes = [8, 32], strides = [1, 1]} : vector<32x32xf32> to vector<8x32xf32>
    %cst_104 = arith.constant dense<0.000000e+00> : vector<8x32xf32>
    %227 = tpu.matmul %225, %226, %cst_104 {dimension_numbers = #tpu.dot_dimension_numbers<[1], [0], [0], [1], [0, 0, 1, 1], [], []>} : vector<8x8xf32>, vector<8x32xf32>, vector<8x32xf32> -> vector<8x32xf32>
    %228 = arith.addf %207, %227 : vector<8x32xf32>
    %229 = vector.broadcast %13 : vector<1x32xf32> to vector<8x32xf32>
    %230 = arith.addf %228, %229 : vector<8x32xf32>
    %231 = arith.addf %139, %230 : vector<8x32xf32>
    %cst_105 = arith.constant dense<0.000000e+00> : vector<8xf32>
    %232 = vector.multi_reduction <add>, %231, %cst_105 [1] : vector<8x32xf32> to vector<8xf32>
    %233 = vector.shape_cast %232 : vector<8xf32> to vector<8x1xf32>
    %cst_106 = arith.constant 3.200000e+01 : f32
    %234 = vector.broadcast %cst_106 : f32 to vector<8x1xf32>
    %235 = arith.divf %233, %234 : vector<8x1xf32>
    %236 = vector.broadcast %235 : vector<8x1xf32> to vector<8x32xf32>
    %237 = arith.subf %231, %236 : vector<8x32xf32>
    %238 = arith.mulf %237, %237 : vector<8x32xf32>
    %cst_107 = arith.constant dense<0.000000e+00> : vector<8xf32>
    %239 = vector.multi_reduction <add>, %238, %cst_107 [1] : vector<8x32xf32> to vector<8xf32>
    %240 = vector.shape_cast %239 : vector<8xf32> to vector<8x1xf32>
    %cst_108 = arith.constant 3.200000e+01 : f32
    %241 = vector.broadcast %cst_108 : f32 to vector<8x1xf32>
    %242 = arith.divf %240, %241 : vector<8x1xf32>
    %243 = vector.broadcast %235 : vector<8x1xf32> to vector<8x32xf32>
    %244 = arith.subf %231, %243 : vector<8x32xf32>
    %cst_109 = arith.constant 9.99999974E-6 : f32
    %245 = vector.broadcast %cst_109 : f32 to vector<8x1xf32>
    %246 = arith.addf %242, %245 : vector<8x1xf32>
    %247 = math.rsqrt %246 : vector<8x1xf32>
    %248 = vector.broadcast %247 : vector<8x1xf32> to vector<8x32xf32>
    %249 = arith.mulf %244, %248 : vector<8x32xf32>
    %250 = vector.broadcast %14 : vector<1x32xf32> to vector<8x32xf32>
    %251 = arith.mulf %249, %250 : vector<8x32xf32>
    %252 = vector.broadcast %15 : vector<1x32xf32> to vector<8x32xf32>
    %253 = arith.addf %251, %252 : vector<8x32xf32>
    %cst_110 = arith.constant dense<0.000000e+00> : vector<8x64xf32>
    %254 = tpu.matmul %253, %16, %cst_110 {dimension_numbers = #tpu.dot_dimension_numbers<[1], [0], [0], [1], [0, 0, 1, 1], [], []>} : vector<8x32xf32>, vector<32x64xf32>, vector<8x64xf32> -> vector<8x64xf32>
    %255 = vector.broadcast %17 : vector<1x64xf32> to vector<8x64xf32>
    %256 = arith.addf %254, %255 : vector<8x64xf32>
    %cst_111 = arith.constant 5.000000e-01 : f32
    %257 = vector.broadcast %cst_111 : f32 to vector<8x64xf32>
    %258 = arith.mulf %257, %256 : vector<8x64xf32>
    %cst_112 = arith.constant 0.707106769 : f32
    %259 = vector.broadcast %cst_112 : f32 to vector<8x64xf32>
    %260 = arith.mulf %256, %259 : vector<8x64xf32>
    %261 = math.erf %260 : vector<8x64xf32>
    %cst_113 = arith.constant 1.000000e+00 : f32
    %262 = vector.broadcast %cst_113 : f32 to vector<8x64xf32>
    %263 = arith.addf %262, %261 : vector<8x64xf32>
    %264 = arith.mulf %258, %263 : vector<8x64xf32>
    %cst_114 = arith.constant dense<0.000000e+00> : vector<8x32xf32>
    %265 = tpu.matmul %264, %18, %cst_114 {dimension_numbers = #tpu.dot_dimension_numbers<[1], [0], [0], [1], [0, 0, 1, 1], [], []>} : vector<8x64xf32>, vector<64x32xf32>, vector<8x32xf32> -> vector<8x32xf32>
    %266 = vector.broadcast %19 : vector<1x32xf32> to vector<8x32xf32>
    %267 = arith.addf %265, %266 : vector<8x32xf32>
    %268 = arith.addf %253, %267 : vector<8x32xf32>
    %cst_115 = arith.constant dense<0.000000e+00> : vector<8xf32>
    %269 = vector.multi_reduction <add>, %268, %cst_115 [1] : vector<8x32xf32> to vector<8xf32>
    %270 = vector.shape_cast %269 : vector<8xf32> to vector<8x1xf32>
    %cst_116 = arith.constant 3.200000e+01 : f32
    %271 = vector.broadcast %cst_116 : f32 to vector<8x1xf32>
    %272 = arith.divf %270, %271 : vector<8x1xf32>
    %273 = vector.broadcast %272 : vector<8x1xf32> to vector<8x32xf32>
    %274 = arith.subf %268, %273 : vector<8x32xf32>
    %275 = arith.mulf %274, %274 : vector<8x32xf32>
    %cst_117 = arith.constant dense<0.000000e+00> : vector<8xf32>
    %276 = vector.multi_reduction <add>, %275, %cst_117 [1] : vector<8x32xf32> to vector<8xf32>
    %277 = vector.shape_cast %276 : vector<8xf32> to vector<8x1xf32>
    %cst_118 = arith.constant 3.200000e+01 : f32
    %278 = vector.broadcast %cst_118 : f32 to vector<8x1xf32>
    %279 = arith.divf %277, %278 : vector<8x1xf32>
    %280 = vector.broadcast %272 : vector<8x1xf32> to vector<8x32xf32>
    %281 = arith.subf %268, %280 : vector<8x32xf32>
    %cst_119 = arith.constant 9.99999974E-6 : f32
    %282 = vector.broadcast %cst_119 : f32 to vector<8x1xf32>
    %283 = arith.addf %279, %282 : vector<8x1xf32>
    %284 = math.rsqrt %283 : vector<8x1xf32>
    %285 = vector.broadcast %284 : vector<8x1xf32> to vector<8x32xf32>
    %286 = arith.mulf %281, %285 : vector<8x32xf32>
    %287 = vector.broadcast %20 : vector<1x32xf32> to vector<8x32xf32>
    %288 = arith.mulf %286, %287 : vector<8x32xf32>
    %289 = vector.broadcast %21 : vector<1x32xf32> to vector<8x32xf32>
    %290 = arith.addf %288, %289 : vector<8x32xf32>
    %c0_120 = arith.constant 0 : index
    %c0_121 = arith.constant 0 : index
    %c0_122 = arith.constant 0 : index
    %291 = vector.load %arg24[%c0_120, %c0_121, %c0_122] : memref<2x8x32xf32, #tpu.memory_space<vmem>>, vector<1x8x32xf32>
    %292 = vector.shape_cast %291 : vector<1x8x32xf32> to vector<8x32xf32>
    %293 = vector.shape_cast %290 : vector<8x32xf32> to vector<1x8x32xf32>
    tpu.vector_store %arg24[%c0_120, %c0_121, %c0_122], %293 {strides = array<i32>} : memref<2x8x32xf32, #tpu.memory_space<vmem>>, vector<1x8x32xf32>,
    %c1 = arith.constant 1 : index
    %c0_123 = arith.constant 0 : index
    %c0_124 = arith.constant 0 : index
    %294 = vector.load %arg0[%c1, %c0_123, %c0_124] : memref<2x8x32xf32, #tpu.memory_space<vmem>>, vector<1x8x32xf32>
    %295 = vector.shape_cast %294 : vector<1x8x32xf32> to vector<8x32xf32>
    %c1_125 = arith.constant 1 : index
    %c0_126 = arith.constant 0 : index
    %c0_127 = arith.constant 0 : index
    %296 = vector.load %arg1[%c1_125, %c0_126, %c0_127] : memref<2x8x32xf32, #tpu.memory_space<vmem>>, vector<1x8x32xf32>
    %297 = vector.shape_cast %296 : vector<1x8x32xf32> to vector<8x32xf32>
    %cst_128 = arith.constant dense<0.000000e+00> : vector<8x32xf32>
    %298 = tpu.matmul %295, %0, %cst_128 {dimension_numbers = #tpu.dot_dimension_numbers<[1], [0], [0], [1], [0, 0, 1, 1], [], []>} : vector<8x32xf32>, vector<32x32xf32>, vector<8x32xf32> -> vector<8x32xf32>
    %299 = vector.broadcast %1 : vector<1x32xf32> to vector<8x32xf32>
    %300 = arith.addf %298, %299 : vector<8x32xf32>
    %cst_129 = arith.constant dense<0.000000e+00> : vector<8x64xf32>
    %301 = tpu.matmul %295, %2, %cst_129 {dimension_numbers = #tpu.dot_dimension_numbers<[1], [0], [0], [1], [0, 0, 1, 1], [], []>} : vector<8x32xf32>, vector<32x64xf32>, vector<8x64xf32> -> vector<8x64xf32>
    %302 = vector.broadcast %3 : vector<1x64xf32> to vector<8x64xf32>
    %303 = arith.addf %301, %302 : vector<8x64xf32>
    %304 = vector.extract_strided_slice %300 {offsets = [0, 0], sizes = [8, 8], strides = [1, 1]} : vector<8x32xf32> to vector<8x8xf32>
    %305 = vector.extract_strided_slice %303 {offsets = [0, 0], sizes = [8, 8], strides = [1, 1]} : vector<8x64xf32> to vector<8x8xf32>
    %306 = vector.extract_strided_slice %303 {offsets = [0, 32], sizes = [8, 8], strides = [1, 1]} : vector<8x64xf32> to vector<8x8xf32>
    %307 = tpu.transpose %305, [1, 0] : vector<8x8xf32> -> vector<8x8xf32>
    %cst_130 = arith.constant dense<0.000000e+00> : vector<8x8xf32>
    %308 = tpu.matmul %304, %307, %cst_130 {dimension_numbers = #tpu.dot_dimension_numbers<[1], [0], [0], [1], [0, 0, 1, 1], [], []>} : vector<8x8xf32>, vector<8x8xf32>, vector<8x8xf32> -> vector<8x8xf32>
    %cst_131 = arith.constant 0.353553385 : f32
    %309 = vector.broadcast %cst_131 : f32 to vector<8x8xf32>
    %310 = arith.mulf %308, %309 : vector<8x8xf32>
    %cst_132 = arith.constant dense<0xFF800000> : vector<8xf32>
    %311 = vector.multi_reduction <maximumf>, %310, %cst_132 [1] : vector<8x8xf32> to vector<8xf32>
    %312 = vector.shape_cast %311 : vector<8xf32> to vector<8x1xf32>
    %313 = vector.broadcast %312 : vector<8x1xf32> to vector<8x8xf32>
    %314 = arith.subf %310, %313 : vector<8x8xf32>
    %315 = math.exp %314 : vector<8x8xf32>
    %cst_133 = arith.constant dense<0.000000e+00> : vector<8xf32>
    %316 = vector.multi_reduction <add>, %315, %cst_133 [1] : vector<8x8xf32> to vector<8xf32>
    %317 = vector.shape_cast %316 : vector<8xf32> to vector<8x1xf32>
    %318 = tpu.reciprocal %317 {approx = true} : vector<8x1xf32> -> vector<8x1xf32>
    %319 = vector.broadcast %318 : vector<8x1xf32> to vector<8x8xf32>
    %320 = arith.mulf %315, %319 : vector<8x8xf32>
    %cst_134 = arith.constant dense<0.000000e+00> : vector<8x8xf32>
    %321 = tpu.matmul %320, %306, %cst_134 {dimension_numbers = #tpu.dot_dimension_numbers<[1], [0], [0], [1], [0, 0, 1, 1], [], []>} : vector<8x8xf32>, vector<8x8xf32>, vector<8x8xf32> -> vector<8x8xf32>
    %322 = vector.extract_strided_slice %4 {offsets = [0, 0], sizes = [8, 32], strides = [1, 1]} : vector<32x32xf32> to vector<8x32xf32>
    %cst_135 = arith.constant dense<0.000000e+00> : vector<8x32xf32>
    %323 = tpu.matmul %321, %322, %cst_135 {dimension_numbers = #tpu.dot_dimension_numbers<[1], [0], [0], [1], [0, 0, 1, 1], [], []>} : vector<8x8xf32>, vector<8x32xf32>, vector<8x32xf32> -> vector<8x32xf32>
    %324 = vector.extract_strided_slice %300 {offsets = [0, 8], sizes = [8, 8], strides = [1, 1]} : vector<8x32xf32> to vector<8x8xf32>
    %325 = vector.extract_strided_slice %303 {offsets = [0, 8], sizes = [8, 8], strides = [1, 1]} : vector<8x64xf32> to vector<8x8xf32>
    %326 = vector.extract_strided_slice %303 {offsets = [0, 40], sizes = [8, 8], strides = [1, 1]} : vector<8x64xf32> to vector<8x8xf32>
    %327 = tpu.transpose %325, [1, 0] : vector<8x8xf32> -> vector<8x8xf32>
    %cst_136 = arith.constant dense<0.000000e+00> : vector<8x8xf32>
    %328 = tpu.matmul %324, %327, %cst_136 {dimension_numbers = #tpu.dot_dimension_numbers<[1], [0], [0], [1], [0, 0, 1, 1], [], []>} : vector<8x8xf32>, vector<8x8xf32>, vector<8x8xf32> -> vector<8x8xf32>
    %cst_137 = arith.constant 0.353553385 : f32
    %329 = vector.broadcast %cst_137 : f32 to vector<8x8xf32>
    %330 = arith.mulf %328, %329 : vector<8x8xf32>
    %cst_138 = arith.constant dense<0xFF800000> : vector<8xf32>
    %331 = vector.multi_reduction <maximumf>, %330, %cst_138 [1] : vector<8x8xf32> to vector<8xf32>
    %332 = vector.shape_cast %331 : vector<8xf32> to vector<8x1xf32>
    %333 = vector.broadcast %332 : vector<8x1xf32> to vector<8x8xf32>
    %334 = arith.subf %330, %333 : vector<8x8xf32>
    %335 = math.exp %334 : vector<8x8xf32>
    %cst_139 = arith.constant dense<0.000000e+00> : vector<8xf32>
    %336 = vector.multi_reduction <add>, %335, %cst_139 [1] : vector<8x8xf32> to vector<8xf32>
    %337 = vector.shape_cast %336 : vector<8xf32> to vector<8x1xf32>
    %338 = tpu.reciprocal %337 {approx = true} : vector<8x1xf32> -> vector<8x1xf32>
    %339 = vector.broadcast %338 : vector<8x1xf32> to vector<8x8xf32>
    %340 = arith.mulf %335, %339 : vector<8x8xf32>
    %cst_140 = arith.constant dense<0.000000e+00> : vector<8x8xf32>
    %341 = tpu.matmul %340, %326, %cst_140 {dimension_numbers = #tpu.dot_dimension_numbers<[1], [0], [0], [1], [0, 0, 1, 1], [], []>} : vector<8x8xf32>, vector<8x8xf32>, vector<8x8xf32> -> vector<8x8xf32>
    %342 = vector.extract_strided_slice %4 {offsets = [8, 0], sizes = [8, 32], strides = [1, 1]} : vector<32x32xf32> to vector<8x32xf32>
    %cst_141 = arith.constant dense<0.000000e+00> : vector<8x32xf32>
    %343 = tpu.matmul %341, %342, %cst_141 {dimension_numbers = #tpu.dot_dimension_numbers<[1], [0], [0], [1], [0, 0, 1, 1], [], []>} : vector<8x8xf32>, vector<8x32xf32>, vector<8x32xf32> -> vector<8x32xf32>
    %344 = arith.addf %323, %343 : vector<8x32xf32>
    %345 = vector.extract_strided_slice %300 {offsets = [0, 16], sizes = [8, 8], strides = [1, 1]} : vector<8x32xf32> to vector<8x8xf32>
    %346 = vector.extract_strided_slice %303 {offsets = [0, 16], sizes = [8, 8], strides = [1, 1]} : vector<8x64xf32> to vector<8x8xf32>
    %347 = vector.extract_strided_slice %303 {offsets = [0, 48], sizes = [8, 8], strides = [1, 1]} : vector<8x64xf32> to vector<8x8xf32>
    %348 = tpu.transpose %346, [1, 0] : vector<8x8xf32> -> vector<8x8xf32>
    %cst_142 = arith.constant dense<0.000000e+00> : vector<8x8xf32>
    %349 = tpu.matmul %345, %348, %cst_142 {dimension_numbers = #tpu.dot_dimension_numbers<[1], [0], [0], [1], [0, 0, 1, 1], [], []>} : vector<8x8xf32>, vector<8x8xf32>, vector<8x8xf32> -> vector<8x8xf32>
    %cst_143 = arith.constant 0.353553385 : f32
    %350 = vector.broadcast %cst_143 : f32 to vector<8x8xf32>
    %351 = arith.mulf %349, %350 : vector<8x8xf32>
    %cst_144 = arith.constant dense<0xFF800000> : vector<8xf32>
    %352 = vector.multi_reduction <maximumf>, %351, %cst_144 [1] : vector<8x8xf32> to vector<8xf32>
    %353 = vector.shape_cast %352 : vector<8xf32> to vector<8x1xf32>
    %354 = vector.broadcast %353 : vector<8x1xf32> to vector<8x8xf32>
    %355 = arith.subf %351, %354 : vector<8x8xf32>
    %356 = math.exp %355 : vector<8x8xf32>
    %cst_145 = arith.constant dense<0.000000e+00> : vector<8xf32>
    %357 = vector.multi_reduction <add>, %356, %cst_145 [1] : vector<8x8xf32> to vector<8xf32>
    %358 = vector.shape_cast %357 : vector<8xf32> to vector<8x1xf32>
    %359 = tpu.reciprocal %358 {approx = true} : vector<8x1xf32> -> vector<8x1xf32>
    %360 = vector.broadcast %359 : vector<8x1xf32> to vector<8x8xf32>
    %361 = arith.mulf %356, %360 : vector<8x8xf32>
    %cst_146 = arith.constant dense<0.000000e+00> : vector<8x8xf32>
    %362 = tpu.matmul %361, %347, %cst_146 {dimension_numbers = #tpu.dot_dimension_numbers<[1], [0], [0], [1], [0, 0, 1, 1], [], []>} : vector<8x8xf32>, vector<8x8xf32>, vector<8x8xf32> -> vector<8x8xf32>
    %363 = vector.extract_strided_slice %4 {offsets = [16, 0], sizes = [8, 32], strides = [1, 1]} : vector<32x32xf32> to vector<8x32xf32>
    %cst_147 = arith.constant dense<0.000000e+00> : vector<8x32xf32>
    %364 = tpu.matmul %362, %363, %cst_147 {dimension_numbers = #tpu.dot_dimension_numbers<[1], [0], [0], [1], [0, 0, 1, 1], [], []>} : vector<8x8xf32>, vector<8x32xf32>, vector<8x32xf32> -> vector<8x32xf32>
    %365 = arith.addf %344, %364 : vector<8x32xf32>
    %366 = vector.extract_strided_slice %300 {offsets = [0, 24], sizes = [8, 8], strides = [1, 1]} : vector<8x32xf32> to vector<8x8xf32>
    %367 = vector.extract_strided_slice %303 {offsets = [0, 24], sizes = [8, 8], strides = [1, 1]} : vector<8x64xf32> to vector<8x8xf32>
    %368 = vector.extract_strided_slice %303 {offsets = [0, 56], sizes = [8, 8], strides = [1, 1]} : vector<8x64xf32> to vector<8x8xf32>
    %369 = tpu.transpose %367, [1, 0] : vector<8x8xf32> -> vector<8x8xf32>
    %cst_148 = arith.constant dense<0.000000e+00> : vector<8x8xf32>
    %370 = tpu.matmul %366, %369, %cst_148 {dimension_numbers = #tpu.dot_dimension_numbers<[1], [0], [0], [1], [0, 0, 1, 1], [], []>} : vector<8x8xf32>, vector<8x8xf32>, vector<8x8xf32> -> vector<8x8xf32>
    %cst_149 = arith.constant 0.353553385 : f32
    %371 = vector.broadcast %cst_149 : f32 to vector<8x8xf32>
    %372 = arith.mulf %370, %371 : vector<8x8xf32>
    %cst_150 = arith.constant dense<0xFF800000> : vector<8xf32>
    %373 = vector.multi_reduction <maximumf>, %372, %cst_150 [1] : vector<8x8xf32> to vector<8xf32>
    %374 = vector.shape_cast %373 : vector<8xf32> to vector<8x1xf32>
    %375 = vector.broadcast %374 : vector<8x1xf32> to vector<8x8xf32>
    %376 = arith.subf %372, %375 : vector<8x8xf32>
    %377 = math.exp %376 : vector<8x8xf32>
    %cst_151 = arith.constant dense<0.000000e+00> : vector<8xf32>
    %378 = vector.multi_reduction <add>, %377, %cst_151 [1] : vector<8x8xf32> to vector<8xf32>
    %379 = vector.shape_cast %378 : vector<8xf32> to vector<8x1xf32>
    %380 = tpu.reciprocal %379 {approx = true} : vector<8x1xf32> -> vector<8x1xf32>
    %381 = vector.broadcast %380 : vector<8x1xf32> to vector<8x8xf32>
    %382 = arith.mulf %377, %381 : vector<8x8xf32>
    %cst_152 = arith.constant dense<0.000000e+00> : vector<8x8xf32>
    %383 = tpu.matmul %382, %368, %cst_152 {dimension_numbers = #tpu.dot_dimension_numbers<[1], [0], [0], [1], [0, 0, 1, 1], [], []>} : vector<8x8xf32>, vector<8x8xf32>, vector<8x8xf32> -> vector<8x8xf32>
    %384 = vector.extract_strided_slice %4 {offsets = [24, 0], sizes = [8, 32], strides = [1, 1]} : vector<32x32xf32> to vector<8x32xf32>
    %cst_153 = arith.constant dense<0.000000e+00> : vector<8x32xf32>
    %385 = tpu.matmul %383, %384, %cst_153 {dimension_numbers = #tpu.dot_dimension_numbers<[1], [0], [0], [1], [0, 0, 1, 1], [], []>} : vector<8x8xf32>, vector<8x32xf32>, vector<8x32xf32> -> vector<8x32xf32>
    %386 = arith.addf %365, %385 : vector<8x32xf32>
    %387 = vector.broadcast %5 : vector<1x32xf32> to vector<8x32xf32>
    %388 = arith.addf %386, %387 : vector<8x32xf32>
    %389 = arith.addf %295, %388 : vector<8x32xf32>
    %cst_154 = arith.constant dense<0.000000e+00> : vector<8xf32>
    %390 = vector.multi_reduction <add>, %389, %cst_154 [1] : vector<8x32xf32> to vector<8xf32>
    %391 = vector.shape_cast %390 : vector<8xf32> to vector<8x1xf32>
    %cst_155 = arith.constant 3.200000e+01 : f32
    %392 = vector.broadcast %cst_155 : f32 to vector<8x1xf32>
    %393 = arith.divf %391, %392 : vector<8x1xf32>
    %394 = vector.broadcast %393 : vector<8x1xf32> to vector<8x32xf32>
    %395 = arith.subf %389, %394 : vector<8x32xf32>
    %396 = arith.mulf %395, %395 : vector<8x32xf32>
    %cst_156 = arith.constant dense<0.000000e+00> : vector<8xf32>
    %397 = vector.multi_reduction <add>, %396, %cst_156 [1] : vector<8x32xf32> to vector<8xf32>
    %398 = vector.shape_cast %397 : vector<8xf32> to vector<8x1xf32>
    %cst_157 = arith.constant 3.200000e+01 : f32
    %399 = vector.broadcast %cst_157 : f32 to vector<8x1xf32>
    %400 = arith.divf %398, %399 : vector<8x1xf32>
    %401 = vector.broadcast %393 : vector<8x1xf32> to vector<8x32xf32>
    %402 = arith.subf %389, %401 : vector<8x32xf32>
    %cst_158 = arith.constant 9.99999974E-6 : f32
    %403 = vector.broadcast %cst_158 : f32 to vector<8x1xf32>
    %404 = arith.addf %400, %403 : vector<8x1xf32>
    %405 = math.rsqrt %404 : vector<8x1xf32>
    %406 = vector.broadcast %405 : vector<8x1xf32> to vector<8x32xf32>
    %407 = arith.mulf %402, %406 : vector<8x32xf32>
    %408 = vector.broadcast %6 : vector<1x32xf32> to vector<8x32xf32>
    %409 = arith.mulf %407, %408 : vector<8x32xf32>
    %410 = vector.broadcast %7 : vector<1x32xf32> to vector<8x32xf32>
    %411 = arith.addf %409, %410 : vector<8x32xf32>
    %cst_159 = arith.constant dense<0.000000e+00> : vector<8x32xf32>
    %412 = tpu.matmul %411, %8, %cst_159 {dimension_numbers = #tpu.dot_dimension_numbers<[1], [0], [0], [1], [0, 0, 1, 1], [], []>} : vector<8x32xf32>, vector<32x32xf32>, vector<8x32xf32> -> vector<8x32xf32>
    %413 = vector.broadcast %9 : vector<1x32xf32> to vector<8x32xf32>
    %414 = arith.addf %412, %413 : vector<8x32xf32>
    %cst_160 = arith.constant dense<0.000000e+00> : vector<8x64xf32>
    %415 = tpu.matmul %297, %10, %cst_160 {dimension_numbers = #tpu.dot_dimension_numbers<[1], [0], [0], [1], [0, 0, 1, 1], [], []>} : vector<8x32xf32>, vector<32x64xf32>, vector<8x64xf32> -> vector<8x64xf32>
    %416 = vector.broadcast %11 : vector<1x64xf32> to vector<8x64xf32>
    %417 = arith.addf %415, %416 : vector<8x64xf32>
    %418 = vector.extract_strided_slice %414 {offsets = [0, 0], sizes = [8, 8], strides = [1, 1]} : vector<8x32xf32> to vector<8x8xf32>
    %419 = vector.extract_strided_slice %417 {offsets = [0, 0], sizes = [8, 8], strides = [1, 1]} : vector<8x64xf32> to vector<8x8xf32>
    %420 = vector.extract_strided_slice %417 {offsets = [0, 32], sizes = [8, 8], strides = [1, 1]} : vector<8x64xf32> to vector<8x8xf32>
    %421 = tpu.transpose %419, [1, 0] : vector<8x8xf32> -> vector<8x8xf32>
    %cst_161 = arith.constant dense<0.000000e+00> : vector<8x8xf32>
    %422 = tpu.matmul %418, %421, %cst_161 {dimension_numbers = #tpu.dot_dimension_numbers<[1], [0], [0], [1], [0, 0, 1, 1], [], []>} : vector<8x8xf32>, vector<8x8xf32>, vector<8x8xf32> -> vector<8x8xf32>
    %cst_162 = arith.constant 0.353553385 : f32
    %423 = vector.broadcast %cst_162 : f32 to vector<8x8xf32>
    %424 = arith.mulf %422, %423 : vector<8x8xf32>
    %cst_163 = arith.constant dense<0xFF800000> : vector<8xf32>
    %425 = vector.multi_reduction <maximumf>, %424, %cst_163 [1] : vector<8x8xf32> to vector<8xf32>
    %426 = vector.shape_cast %425 : vector<8xf32> to vector<8x1xf32>
    %427 = vector.broadcast %426 : vector<8x1xf32> to vector<8x8xf32>
    %428 = arith.subf %424, %427 : vector<8x8xf32>
    %429 = math.exp %428 : vector<8x8xf32>
    %cst_164 = arith.constant dense<0.000000e+00> : vector<8xf32>
    %430 = vector.multi_reduction <add>, %429, %cst_164 [1] : vector<8x8xf32> to vector<8xf32>
    %431 = vector.shape_cast %430 : vector<8xf32> to vector<8x1xf32>
    %432 = tpu.reciprocal %431 {approx = true} : vector<8x1xf32> -> vector<8x1xf32>
    %433 = vector.broadcast %432 : vector<8x1xf32> to vector<8x8xf32>
    %434 = arith.mulf %429, %433 : vector<8x8xf32>
    %cst_165 = arith.constant dense<0.000000e+00> : vector<8x8xf32>
    %435 = tpu.matmul %434, %420, %cst_165 {dimension_numbers = #tpu.dot_dimension_numbers<[1], [0], [0], [1], [0, 0, 1, 1], [], []>} : vector<8x8xf32>, vector<8x8xf32>, vector<8x8xf32> -> vector<8x8xf32>
    %436 = vector.extract_strided_slice %12 {offsets = [0, 0], sizes = [8, 32], strides = [1, 1]} : vector<32x32xf32> to vector<8x32xf32>
    %cst_166 = arith.constant dense<0.000000e+00> : vector<8x32xf32>
    %437 = tpu.matmul %435, %436, %cst_166 {dimension_numbers = #tpu.dot_dimension_numbers<[1], [0], [0], [1], [0, 0, 1, 1], [], []>} : vector<8x8xf32>, vector<8x32xf32>, vector<8x32xf32> -> vector<8x32xf32>
    %438 = vector.extract_strided_slice %414 {offsets = [0, 8], sizes = [8, 8], strides = [1, 1]} : vector<8x32xf32> to vector<8x8xf32>
    %439 = vector.extract_strided_slice %417 {offsets = [0, 8], sizes = [8, 8], strides = [1, 1]} : vector<8x64xf32> to vector<8x8xf32>
    %440 = vector.extract_strided_slice %417 {offsets = [0, 40], sizes = [8, 8], strides = [1, 1]} : vector<8x64xf32> to vector<8x8xf32>
    %441 = tpu.transpose %439, [1, 0] : vector<8x8xf32> -> vector<8x8xf32>
    %cst_167 = arith.constant dense<0.000000e+00> : vector<8x8xf32>
    %442 = tpu.matmul %438, %441, %cst_167 {dimension_numbers = #tpu.dot_dimension_numbers<[1], [0], [0], [1], [0, 0, 1, 1], [], []>} : vector<8x8xf32>, vector<8x8xf32>, vector<8x8xf32> -> vector<8x8xf32>
    %cst_168 = arith.constant 0.353553385 : f32
    %443 = vector.broadcast %cst_168 : f32 to vector<8x8xf32>
    %444 = arith.mulf %442, %443 : vector<8x8xf32>
    %cst_169 = arith.constant dense<0xFF800000> : vector<8xf32>
    %445 = vector.multi_reduction <maximumf>, %444, %cst_169 [1] : vector<8x8xf32> to vector<8xf32>
    %446 = vector.shape_cast %445 : vector<8xf32> to vector<8x1xf32>
    %447 = vector.broadcast %446 : vector<8x1xf32> to vector<8x8xf32>
    %448 = arith.subf %444, %447 : vector<8x8xf32>
    %449 = math.exp %448 : vector<8x8xf32>
    %cst_170 = arith.constant dense<0.000000e+00> : vector<8xf32>
    %450 = vector.multi_reduction <add>, %449, %cst_170 [1] : vector<8x8xf32> to vector<8xf32>
    %451 = vector.shape_cast %450 : vector<8xf32> to vector<8x1xf32>
    %452 = tpu.reciprocal %451 {approx = true} : vector<8x1xf32> -> vector<8x1xf32>
    %453 = vector.broadcast %452 : vector<8x1xf32> to vector<8x8xf32>
    %454 = arith.mulf %449, %453 : vector<8x8xf32>
    %cst_171 = arith.constant dense<0.000000e+00> : vector<8x8xf32>
    %455 = tpu.matmul %454, %440, %cst_171 {dimension_numbers = #tpu.dot_dimension_numbers<[1], [0], [0], [1], [0, 0, 1, 1], [], []>} : vector<8x8xf32>, vector<8x8xf32>, vector<8x8xf32> -> vector<8x8xf32>
    %456 = vector.extract_strided_slice %12 {offsets = [8, 0], sizes = [8, 32], strides = [1, 1]} : vector<32x32xf32> to vector<8x32xf32>
    %cst_172 = arith.constant dense<0.000000e+00> : vector<8x32xf32>
    %457 = tpu.matmul %455, %456, %cst_172 {dimension_numbers = #tpu.dot_dimension_numbers<[1], [0], [0], [1], [0, 0, 1, 1], [], []>} : vector<8x8xf32>, vector<8x32xf32>, vector<8x32xf32> -> vector<8x32xf32>
    %458 = arith.addf %437, %457 : vector<8x32xf32>
    %459 = vector.extract_strided_slice %414 {offsets = [0, 16], sizes = [8, 8], strides = [1, 1]} : vector<8x32xf32> to vector<8x8xf32>
    %460 = vector.extract_strided_slice %417 {offsets = [0, 16], sizes = [8, 8], strides = [1, 1]} : vector<8x64xf32> to vector<8x8xf32>
    %461 = vector.extract_strided_slice %417 {offsets = [0, 48], sizes = [8, 8], strides = [1, 1]} : vector<8x64xf32> to vector<8x8xf32>
    %462 = tpu.transpose %460, [1, 0] : vector<8x8xf32> -> vector<8x8xf32>
    %cst_173 = arith.constant dense<0.000000e+00> : vector<8x8xf32>
    %463 = tpu.matmul %459, %462, %cst_173 {dimension_numbers = #tpu.dot_dimension_numbers<[1], [0], [0], [1], [0, 0, 1, 1], [], []>} : vector<8x8xf32>, vector<8x8xf32>, vector<8x8xf32> -> vector<8x8xf32>
    %cst_174 = arith.constant 0.353553385 : f32
    %464 = vector.broadcast %cst_174 : f32 to vector<8x8xf32>
    %465 = arith.mulf %463, %464 : vector<8x8xf32>
    %cst_175 = arith.constant dense<0xFF800000> : vector<8xf32>
    %466 = vector.multi_reduction <maximumf>, %465, %cst_175 [1] : vector<8x8xf32> to vector<8xf32>
    %467 = vector.shape_cast %466 : vector<8xf32> to vector<8x1xf32>
    %468 = vector.broadcast %467 : vector<8x1xf32> to vector<8x8xf32>
    %469 = arith.subf %465, %468 : vector<8x8xf32>
    %470 = math.exp %469 : vector<8x8xf32>
    %cst_176 = arith.constant dense<0.000000e+00> : vector<8xf32>
    %471 = vector.multi_reduction <add>, %470, %cst_176 [1] : vector<8x8xf32> to vector<8xf32>
    %472 = vector.shape_cast %471 : vector<8xf32> to vector<8x1xf32>
    %473 = tpu.reciprocal %472 {approx = true} : vector<8x1xf32> -> vector<8x1xf32>
    %474 = vector.broadcast %473 : vector<8x1xf32> to vector<8x8xf32>
    %475 = arith.mulf %470, %474 : vector<8x8xf32>
    %cst_177 = arith.constant dense<0.000000e+00> : vector<8x8xf32>
    %476 = tpu.matmul %475, %461, %cst_177 {dimension_numbers = #tpu.dot_dimension_numbers<[1], [0], [0], [1], [0, 0, 1, 1], [], []>} : vector<8x8xf32>, vector<8x8xf32>, vector<8x8xf32> -> vector<8x8xf32>
    %477 = vector.extract_strided_slice %12 {offsets = [16, 0], sizes = [8, 32], strides = [1, 1]} : vector<32x32xf32> to vector<8x32xf32>
    %cst_178 = arith.constant dense<0.000000e+00> : vector<8x32xf32>
    %478 = tpu.matmul %476, %477, %cst_178 {dimension_numbers = #tpu.dot_dimension_numbers<[1], [0], [0], [1], [0, 0, 1, 1], [], []>} : vector<8x8xf32>, vector<8x32xf32>, vector<8x32xf32> -> vector<8x32xf32>
    %479 = arith.addf %458, %478 : vector<8x32xf32>
    %480 = vector.extract_strided_slice %414 {offsets = [0, 24], sizes = [8, 8], strides = [1, 1]} : vector<8x32xf32> to vector<8x8xf32>
    %481 = vector.extract_strided_slice %417 {offsets = [0, 24], sizes = [8, 8], strides = [1, 1]} : vector<8x64xf32> to vector<8x8xf32>
    %482 = vector.extract_strided_slice %417 {offsets = [0, 56], sizes = [8, 8], strides = [1, 1]} : vector<8x64xf32> to vector<8x8xf32>
    %483 = tpu.transpose %481, [1, 0] : vector<8x8xf32> -> vector<8x8xf32>
    %cst_179 = arith.constant dense<0.000000e+00> : vector<8x8xf32>
    %484 = tpu.matmul %480, %483, %cst_179 {dimension_numbers = #tpu.dot_dimension_numbers<[1], [0], [0], [1], [0, 0, 1, 1], [], []>} : vector<8x8xf32>, vector<8x8xf32>, vector<8x8xf32> -> vector<8x8xf32>
    %cst_180 = arith.constant 0.353553385 : f32
    %485 = vector.broadcast %cst_180 : f32 to vector<8x8xf32>
    %486 = arith.mulf %484, %485 : vector<8x8xf32>
    %cst_181 = arith.constant dense<0xFF800000> : vector<8xf32>
    %487 = vector.multi_reduction <maximumf>, %486, %cst_181 [1] : vector<8x8xf32> to vector<8xf32>
    %488 = vector.shape_cast %487 : vector<8xf32> to vector<8x1xf32>
    %489 = vector.broadcast %488 : vector<8x1xf32> to vector<8x8xf32>
    %490 = arith.subf %486, %489 : vector<8x8xf32>
    %491 = math.exp %490 : vector<8x8xf32>
    %cst_182 = arith.constant dense<0.000000e+00> : vector<8xf32>
    %492 = vector.multi_reduction <add>, %491, %cst_182 [1] : vector<8x8xf32> to vector<8xf32>
    %493 = vector.shape_cast %492 : vector<8xf32> to vector<8x1xf32>
    %494 = tpu.reciprocal %493 {approx = true} : vector<8x1xf32> -> vector<8x1xf32>
    %495 = vector.broadcast %494 : vector<8x1xf32> to vector<8x8xf32>
    %496 = arith.mulf %491, %495 : vector<8x8xf32>
    %cst_183 = arith.constant dense<0.000000e+00> : vector<8x8xf32>
    %497 = tpu.matmul %496, %482, %cst_183 {dimension_numbers = #tpu.dot_dimension_numbers<[1], [0], [0], [1], [0, 0, 1, 1], [], []>} : vector<8x8xf32>, vector<8x8xf32>, vector<8x8xf32> -> vector<8x8xf32>
    %498 = vector.extract_strided_slice %12 {offsets = [24, 0], sizes = [8, 32], strides = [1, 1]} : vector<32x32xf32> to vector<8x32xf32>
    %cst_184 = arith.constant dense<0.000000e+00> : vector<8x32xf32>
    %499 = tpu.matmul %497, %498, %cst_184 {dimension_numbers = #tpu.dot_dimension_numbers<[1], [0], [0], [1], [0, 0, 1, 1], [], []>} : vector<8x8xf32>, vector<8x32xf32>, vector<8x32xf32> -> vector<8x32xf32>
    %500 = arith.addf %479, %499 : vector<8x32xf32>
    %501 = vector.broadcast %13 : vector<1x32xf32> to vector<8x32xf32>
    %502 = arith.addf %500, %501 : vector<8x32xf32>
    %503 = arith.addf %411, %502 : vector<8x32xf32>
    %cst_185 = arith.constant dense<0.000000e+00> : vector<8xf32>
    %504 = vector.multi_reduction <add>, %503, %cst_185 [1] : vector<8x32xf32> to vector<8xf32>
    %505 = vector.shape_cast %504 : vector<8xf32> to vector<8x1xf32>
    %cst_186 = arith.constant 3.200000e+01 : f32
    %506 = vector.broadcast %cst_186 : f32 to vector<8x1xf32>
    %507 = arith.divf %505, %506 : vector<8x1xf32>
    %508 = vector.broadcast %507 : vector<8x1xf32> to vector<8x32xf32>
    %509 = arith.subf %503, %508 : vector<8x32xf32>
    %510 = arith.mulf %509, %509 : vector<8x32xf32>
    %cst_187 = arith.constant dense<0.000000e+00> : vector<8xf32>
    %511 = vector.multi_reduction <add>, %510, %cst_187 [1] : vector<8x32xf32> to vector<8xf32>
    %512 = vector.shape_cast %511 : vector<8xf32> to vector<8x1xf32>
    %cst_188 = arith.constant 3.200000e+01 : f32
    %513 = vector.broadcast %cst_188 : f32 to vector<8x1xf32>
    %514 = arith.divf %512, %513 : vector<8x1xf32>
    %515 = vector.broadcast %507 : vector<8x1xf32> to vector<8x32xf32>
    %516 = arith.subf %503, %515 : vector<8x32xf32>
    %cst_189 = arith.constant 9.99999974E-6 : f32
    %517 = vector.broadcast %cst_189 : f32 to vector<8x1xf32>
    %518 = arith.addf %514, %517 : vector<8x1xf32>
    %519 = math.rsqrt %518 : vector<8x1xf32>
    %520 = vector.broadcast %519 : vector<8x1xf32> to vector<8x32xf32>
    %521 = arith.mulf %516, %520 : vector<8x32xf32>
    %522 = vector.broadcast %14 : vector<1x32xf32> to vector<8x32xf32>
    %523 = arith.mulf %521, %522 : vector<8x32xf32>
    %524 = vector.broadcast %15 : vector<1x32xf32> to vector<8x32xf32>
    %525 = arith.addf %523, %524 : vector<8x32xf32>
    %cst_190 = arith.constant dense<0.000000e+00> : vector<8x64xf32>
    %526 = tpu.matmul %525, %16, %cst_190 {dimension_numbers = #tpu.dot_dimension_numbers<[1], [0], [0], [1], [0, 0, 1, 1], [], []>} : vector<8x32xf32>, vector<32x64xf32>, vector<8x64xf32> -> vector<8x64xf32>
    %527 = vector.broadcast %17 : vector<1x64xf32> to vector<8x64xf32>
    %528 = arith.addf %526, %527 : vector<8x64xf32>
    %cst_191 = arith.constant 5.000000e-01 : f32
    %529 = vector.broadcast %cst_191 : f32 to vector<8x64xf32>
    %530 = arith.mulf %529, %528 : vector<8x64xf32>
    %cst_192 = arith.constant 0.707106769 : f32
    %531 = vector.broadcast %cst_192 : f32 to vector<8x64xf32>
    %532 = arith.mulf %528, %531 : vector<8x64xf32>
    %533 = math.erf %532 : vector<8x64xf32>
    %cst_193 = arith.constant 1.000000e+00 : f32
    %534 = vector.broadcast %cst_193 : f32 to vector<8x64xf32>
    %535 = arith.addf %534, %533 : vector<8x64xf32>
    %536 = arith.mulf %530, %535 : vector<8x64xf32>
    %cst_194 = arith.constant dense<0.000000e+00> : vector<8x32xf32>
    %537 = tpu.matmul %536, %18, %cst_194 {dimension_numbers = #tpu.dot_dimension_numbers<[1], [0], [0], [1], [0, 0, 1, 1], [], []>} : vector<8x64xf32>, vector<64x32xf32>, vector<8x32xf32> -> vector<8x32xf32>
    %538 = vector.broadcast %19 : vector<1x32xf32> to vector<8x32xf32>
    %539 = arith.addf %537, %538 : vector<8x32xf32>
    %540 = arith.addf %525, %539 : vector<8x32xf32>
    %cst_195 = arith.constant dense<0.000000e+00> : vector<8xf32>
    %541 = vector.multi_reduction <add>, %540, %cst_195 [1] : vector<8x32xf32> to vector<8xf32>
    %542 = vector.shape_cast %541 : vector<8xf32> to vector<8x1xf32>
    %cst_196 = arith.constant 3.200000e+01 : f32
    %543 = vector.broadcast %cst_196 : f32 to vector<8x1xf32>
    %544 = arith.divf %542, %543 : vector<8x1xf32>
    %545 = vector.broadcast %544 : vector<8x1xf32> to vector<8x32xf32>
    %546 = arith.subf %540, %545 : vector<8x32xf32>
    %547 = arith.mulf %546, %546 : vector<8x32xf32>
    %cst_197 = arith.constant dense<0.000000e+00> : vector<8xf32>
    %548 = vector.multi_reduction <add>, %547, %cst_197 [1] : vector<8x32xf32> to vector<8xf32>
    %549 = vector.shape_cast %548 : vector<8xf32> to vector<8x1xf32>
    %cst_198 = arith.constant 3.200000e+01 : f32
    %550 = vector.broadcast %cst_198 : f32 to vector<8x1xf32>
    %551 = arith.divf %549, %550 : vector<8x1xf32>
    %552 = vector.broadcast %544 : vector<8x1xf32> to vector<8x32xf32>
    %553 = arith.subf %540, %552 : vector<8x32xf32>
    %cst_199 = arith.constant 9.99999974E-6 : f32
    %554 = vector.broadcast %cst_199 : f32 to vector<8x1xf32>
    %555 = arith.addf %551, %554 : vector<8x1xf32>
    %556 = math.rsqrt %555 : vector<8x1xf32>
    %557 = vector.broadcast %556 : vector<8x1xf32> to vector<8x32xf32>
    %558 = arith.mulf %553, %557 : vector<8x32xf32>
    %559 = vector.broadcast %20 : vector<1x32xf32> to vector<8x32xf32>
    %560 = arith.mulf %558, %559 : vector<8x32xf32>
    %561 = vector.broadcast %21 : vector<1x32xf32> to vector<8x32xf32>
    %562 = arith.addf %560, %561 : vector<8x32xf32>
    %c1_200 = arith.constant 1 : index
    %c0_201 = arith.constant 0 : index
    %c0_202 = arith.constant 0 : index
    %563 = vector.load %arg24[%c1_200, %c0_201, %c0_202] : memref<2x8x32xf32, #tpu.memory_space<vmem>>, vector<1x8x32xf32>
    %564 = vector.shape_cast %563 : vector<1x8x32xf32> to vector<8x32xf32>
    %565 = vector.shape_cast %562 : vector<8x32xf32> to vector<1x8x32xf32>
    tpu.vector_store %arg24[%c1_200, %c0_201, %c0_202], %565 {strides = array<i32>} : memref<2x8x32xf32, #tpu.memory_space<vmem>>, vector<1x8x32xf32>,
    return
  }
}

module attributes {stable_mosaic.version = 11 : i64} {
  func.func @_classifier_kernel(%arg0: memref<2x256xf32, #tpu.memory_space<vmem>>, %arg1: memref<256x8xf32, #tpu.memory_space<vmem>>, %arg2: memref<1x8xf32, #tpu.memory_space<vmem>>, %arg3: memref<2x8xf32, #tpu.memory_space<vmem>>) attributes {dimension_semantics = [], scalar_prefetch = 0 : i64, scratch_operands = 0 : i64, tpu.core_type = #tpu.core_type<tc>} {
    %c0 = arith.constant 0 : index
    %c0_0 = arith.constant 0 : index
    %0 = vector.load %arg0[%c0, %c0_0] : memref<2x256xf32, #tpu.memory_space<vmem>>, vector<2x256xf32>
    %c0_1 = arith.constant 0 : index
    %c0_2 = arith.constant 0 : index
    %1 = vector.load %arg1[%c0_1, %c0_2] : memref<256x8xf32, #tpu.memory_space<vmem>>, vector<256x8xf32>
    %cst = arith.constant dense<0.000000e+00> : vector<2x8xf32>
    %2 = tpu.matmul %0, %1, %cst {dimension_numbers = #tpu.dot_dimension_numbers<[1], [0], [0], [1], [0, 0, 1, 1], [], []>} : vector<2x256xf32>, vector<256x8xf32>, vector<2x8xf32> -> vector<2x8xf32>
    %c0_3 = arith.constant 0 : index
    %c0_4 = arith.constant 0 : index
    %3 = vector.load %arg2[%c0_3, %c0_4] : memref<1x8xf32, #tpu.memory_space<vmem>>, vector<1x8xf32>
    %4 = vector.broadcast %3 : vector<1x8xf32> to vector<2x8xf32>
    %5 = arith.addf %2, %4 : vector<2x8xf32>
    %c0_5 = arith.constant 0 : index
    %c0_6 = arith.constant 0 : index
    %6 = vector.load %arg3[%c0_5, %c0_6] : memref<2x8xf32, #tpu.memory_space<vmem>>, vector<2x8xf32>
    tpu.vector_store %arg3[%c0_5, %c0_6], %5 {strides = array<i32>} : memref<2x8xf32, #tpu.memory_space<vmem>>, vector<2x8xf32>,
    return
  }
}

</mosaic_0001>

<bundles_post_ra>
// kernel: transformer_seq2seq_de_forward.6
= control target key start
LH: loop header
LB: loop body
LE: loop exit
PB: predicated region body
PF: predicated region fallthrough
CT: control target
= control target key end

     0   :  { %v52_v0 = vmov 0   ;;  %vm30_vm0 = vcmask 261120   ;;  %s91_s0 = inlined_call_operand.vmem [shape: f32[2,8,1], index: 0, kind: input, shape index: {}]   ;;  %s92_s1 = inlined_call_operand.vmem [shape: f32[1,32], index: 1, kind: input, shape index: {}]   ;;  %s93_s2 = inlined_call_operand.vmem [shape: f32[8,32], index: 2, kind: input, shape index: {}]   ;;  %s94_s3 = inlined_call_operand.vmem [shape: f32[2,8,32], index: 3, kind: output, shape index: {}]  }
   0x1   :  { %51 = vset.pattern.permute.xlu0 %v52_v0  ;;  %v16_v1 = vld [vmem:[%s91_s0] sm:$0xff]  ;;  %v48_v2 = vld [vmem:[%s91_s0 + $0x8] sm:$0xff] }
   0x2   :  { %19 = vperm.xlu0 %51, %v16_v1   ;;  %v47_v3 = vld [vmem:[%s92_s1] ss:$0 sm:$0xff] }
   0x3   :  { %v15_v4 = vld [vmem:[%s93_s2] sm:$0xff] }
   0x6   :  { %36 = vperm.xlu0 %51, %v48_v2  }
  0x7d   :  { %v20_v5 = vpop.permute.xlu0 %19 }
  0x7e   :  { %v28_v6 = vmul.f32 %v47_v3, %v20_v5 }
  0x80   :  { %v29_v7 = vadd.f32 %v28_v6, %v15_v4 }
  0x81   :  { %v37_v8 = vpop.permute.xlu0 %36 }
  0x82   :  { %31 = vst.msk [vmem:[%s94_s3] sm:$0xff] %vm30_vm0, %v29_v7  ;;  %v39_v9 = vmul.f32 %v47_v3, %v37_v8 }
  0x84   :  { %v40_v10 = vadd.f32 %v39_v9, %v15_v4 }
  0x86   :  { %49 = vst.msk [vmem:[%s94_s3 + $0x8] sm:$0xff] %vm30_vm0, %v40_v10 }

// kernel: transformer_seq2seq_de_forward.11
= control target key start
LH: loop header
LB: loop body
LE: loop exit
PB: predicated region body
PF: predicated region fallthrough
CT: control target
= control target key end

     0   :  { %s338_s0 = inlined_call_operand.vmem [shape: f32[2,256], index: 0, kind: input, shape index: {}]   ;;  %s339_s1 = inlined_call_operand.vmem [shape: f32[256,8], index: 1, kind: input, shape index: {}]   ;;  %s340_s2 = inlined_call_operand.vmem [shape: f32[1,8], index: 2, kind: input, shape index: {}]   ;;  %s341_s3 = inlined_call_operand.hbm [shape: f32[2,8], index: 3, kind: output, shape index: {}]  }
   0x1   :  { %v47_v0 = vld [vmem:[%s339_s1 + $0xf8] sm:$0xff]  ;;  %v46_v2 = vld [vmem:[%s339_s1 + $0xf0] sm:$0xff]  ;;  %v45_v4 = vld [vmem:[%s339_s1 + $0xe8] sm:$0xff] }
   0x2   :  { %v31_v1 = vld [vmem:[%s339_s1 + $0x78] sm:$0xff]  ;;  %154 = vmatprep.subr.mxu0 %v47_v0  ;;  %v30_v3 = vld [vmem:[%s339_s1 + $0x70] sm:$0xff]  ;;  %v29_v5 = vld [vmem:[%s339_s1 + $0x68] sm:$0xff] }
   0x3   :  { %155 = vmatpush3.msra.mxu0 %v31_v1  ;;  %v44_v6 = vld [vmem:[%s339_s1 + $0xe0] sm:$0xff]  ;;  %v43_v8 = vld [vmem:[%s339_s1 + $0xd8] sm:$0xff]  ;;  %v42_v10 = vld [vmem:[%s339_s1 + $0xd0] sm:$0xff] }
   0x4   :  { %156 = vmatprep.subr.mxu0 %v46_v2  ;;  %v28_v7 = vld [vmem:[%s339_s1 + $0x60] sm:$0xff]  ;;  %v27_v9 = vld [vmem:[%s339_s1 + $0x58] sm:$0xff]  ;;  %v26_v11 = vld [vmem:[%s339_s1 + $0x50] sm:$0xff] }
   0x5   :  { %157 = vmatpush3.msra.mxu0 %v30_v3  ;;  %v41_v12 = vld [vmem:[%s339_s1 + $0xc8] sm:$0xff]  ;;  %v153_v13 = vld.sshfl [vmem:[%s338_s0] sm:$0x33 pattern:$0x76325410] }
   0x6   :  { %158 = vmatprep.subr.mxu0 %v45_v4  ;;  %v25_v14 = vld [vmem:[%s339_s1 + $0x48] sm:$0xff]  ;;  %v63_v15 = vcombine.high %v153_v13, %v153_v13 }
   0x7   :  { %159 = vmatpush3.msra.mxu0 %v29_v5 }
   0x8   :  { %160 = vmatprep.subr.mxu0 %v44_v6 }
   0x9   :  { %161 = vmatpush3.msra.mxu0 %v28_v7 }
   0xa   :  { %162 = vmatprep.subr.mxu0 %v43_v8 }
   0xb   :  { %163 = vmatpush3.msra.mxu0 %v27_v9 }
   0xc   :  { %164 = vmatprep.subr.mxu0 %v42_v10 }
   0xd   :  { %8 = vsyncpa [#allocation3], 0  ;;  %165 = vmatpush3.msra.mxu0 %v26_v11  ;;  %v40_v16 = vld [vmem:[%s339_s1 + $0xc0] sm:$0xff]  ;;  %130 = vmatprep.mubr.f32.mxu0 %v63_v15  ;;  %v39_v18 = vld [vmem:[%s339_s1 + $0xb8] sm:$0xff]  ;;  %s212_s24 = smov [#allocation2]   ;;  %vm136_vm0 = vcmask 58368  }
   0xe   :  { %166 = vmatprep.subr.mxu0 %v41_v12  ;;  %v24_v17 = vld [vmem:[%s339_s1 + $0x40] sm:$0xff]  ;;  %v23_v19 = vld [vmem:[%s339_s1 + $0x38] sm:$0xff]  ;;  %v38_v20 = vld [vmem:[%s339_s1 + $0xb0] sm:$0xff]  ;;  %s144_s25 = sshll.u32 %s212_s24, 4  ;;  %s145_s25 = int_to_ptr.vmem [resolvable:$true] %s144_s25 }
   0xf   :  { %167 = vmatpush3.msra.mxu0 %v25_v14  ;;  %v22_v21 = vld [vmem:[%s339_s1 + $0x30] sm:$0xff]  ;;  %v37_v22 = vld [vmem:[%s339_s1 + $0xa8] sm:$0xff]  ;;  %v36_v24 = vld [vmem:[%s339_s1 + $0xa0] sm:$0xff]  ;;  %s190_s26 = scalar_lea.vmem %s145_s25, 32  ;;  %p195_p1 = scmp.lt.s32.totalorder %s145_s25, %s145_s25 }
  0x10   :  { %168 = vmatprep.subr.mxu0 %v40_v16  ;;  %v21_v23 = vld [vmem:[%s339_s1 + $0x28] sm:$0xff]  ;;  %v20_v25 = vld [vmem:[%s339_s1 + $0x20] sm:$0xff]  ;;  %v35_v26 = vld [vmem:[%s339_s1 + $0x98] sm:$0xff]  ;;  %p191_p0 = scmp.ne.s32.totalorder %s145_s25, %s190_s26  ;;  %p196_p2 = scmp.lt.s32.totalorder %s190_s26, %s190_s26 }
  0x11   :  { %169 = vmatpush3.msra.mxu0 %v24_v17  ;;  %v19_v27 = vld [vmem:[%s339_s1 + $0x18] sm:$0xff]  ;;  %v34_v28 = vld [vmem:[%s339_s1 + $0x90] sm:$0xff]  ;;  %v33_v30 = vld [vmem:[%s339_s1 + $0x88] sm:$0xff] }
  0x12   :  { %170 = vmatprep.subr.mxu0 %v39_v18  ;;  %v18_v29 = vld [vmem:[%s339_s1 + $0x10] sm:$0xff]  ;;  %v17_v31 = vld [vmem:[%s339_s1 + $0x8] sm:$0xff]  ;;  %v32_v32 = vld [vmem:[%s339_s1 + $0x80] sm:$0xff]  ;;  %p197_p3 = por %p196_p2, %p195_p1 }
  0x13   :  { %171 = vmatpush3.msra.mxu0 %v23_v19  ;;  %v16_v33 = vld [vmem:[%s339_s1] sm:$0xff] }
  0x14   :  { %172 = vmatprep.subr.mxu0 %v38_v20  ;;  %v152_v35 = vld [vmem:[%s340_s2] ss:$0 sm:$0xff]  ;;  %p198_p4 = pnand %p197_p3, %p191_p0 }
  0x15   :  { %173 = vmatpush3.msra.mxu0 %v22_v21 }
  0x16   :  { %174 = vmatprep.subr.mxu0 %v37_v22 }
  0x17   :  { %175 = vmatpush3.msra.mxu0 %v21_v23 }
  0x18   :  { %176 = vmatprep.subr.mxu0 %v36_v24 }
  0x19   :  { %177 = vmatpush3.msra.mxu0 %v20_v25 }
  0x1a   :  { %178 = vmatprep.subr.mxu0 %v35_v26 }
  0x1b   :  { %179 = vmatpush3.msra.mxu0 %v19_v27 }
  0x1c   :  { %180 = vmatprep.subr.mxu0 %v34_v28 }
  0x1d   :  { %181 = vmatpush3.msra.mxu0 %v18_v29 }
  0x1e   :  { %182 = vmatprep.subr.mxu0 %v33_v30 }
  0x1f   :  { %183 = vmatpush3.msra.mxu0 %v17_v31 }
  0x20   :  { %184 = vmatprep.subr.mxu0 %v32_v32 }
  0x21   :  { %185 = vmatpush3.msra.mxu0 %v16_v33 }
  0x22   :  { %131 = vmatmul.mubr.f32.vlgmr.msra.gmra.mxu0 %v153_v13 }
  0xe2   :  { %v186_v34 = vpop.f32.mrf.mxu0 }
  0xe4   :  { %v187_v36 = vpop.f32.mrf.mxu0 }
  0xe5   :  { %v188_v37 = vadd.f32 %v187_v36, %v186_v34 }
  0xe7   :  { %v133_v38 = vadd.f32 %v188_v37, %v152_v35 }
  0xe9   :  { %137 = vst.msk [vmem:[#allocation2] sm:$0x3] %vm136_vm0, %v133_v38 }
  0xea   :  { %201 = shalt.err (!%p198_p4)
}
  0xeb   :  { %147 = dma.vmem_to_hbm [thread:$0]  %s145_s25, 32, %s341_s3, [#allocation3]  }
  0xec   :  { %210 = dma.done.wait [#allocation3], 32  }
  0xed   :  { %211 = vsyncadd [#allocation3], 4294967264 }
  0xee   :  { %151 = vsyncpa [#allocation3], 1 }

// kernel: transformer_seq2seq_de_forward.7
= control target key start
LH: loop header
LB: loop body
LE: loop exit
PB: predicated region body
PF: predicated region fallthrough
CT: control target
= control target key end

     0   :  { %v3176_v0 = vmov 0.0   ;;  %vm3177_vm0 = vmmov 0   ;;  %vm98_vm1 = vcmask 261120   ;;  %vm248_vm2 = vcmask 64512   ;;  %s3178_s23 = smov 96   ;;  %s3181_s24 = smov 112   ;;  %s3837_s1 = inlined_call_operand.vmem [shape: f32[32,32], index: 1, kind: input, shape index: {}]   ;;  %s3838_s0 = inlined_call_operand.vmem [shape: f32[2,8,32], index: 0, kind: input, shape index: {}]   ;;  %s3839_s3 = inlined_call_operand.vmem [shape: f32[32,64], index: 3, kind: input, shape index: {}]   ;;  %s3840_s4 = inlined_call_operand.vmem [shape: f32[1,64], index: 4, kind: input, shape index: {}]   ;;  %s3841_s2 = inlined_call_operand.vmem [shape: f32[1,32], index: 2, kind: input, shape index: {}]   ;;  %s3842_s5 = inlined_call_operand.vmem [shape: f32[32,32], index: 5, kind: input, shape index: {}]   ;;  %s3843_s6 = inlined_call_operand.vmem [shape: f32[1,32], index: 6, kind: input, shape index: {}]   ;;  %s3844_s9 = inlined_call_operand.vmem [shape: f32[32,128], index: 9, kind: input, shape index: {}]   ;;  %s3845_s11 = inlined_call_operand.vmem [shape: f32[128,32], index: 11, kind: input, shape index: {}]   ;;  %s3846_s7 = inlined_call_operand.vmem [shape: f32[1,32], index: 7, kind: input, shape index: {}]   ;;  %s3847_s8 = inlined_call_operand.vmem [shape: f32[1,32], index: 8, kind: input, shape index: {}]   ;;  %s3848_s10 = inlined_call_operand.vmem [shape: f32[1,128], index: 10, kind: input, shape index: {}]   ;;  %s3849_s12 = inlined_call_operand.vmem [shape: f32[1,32], index: 12, kind: input, shape index: {}]   ;;  %s3850_s13 = inlined_call_operand.vmem [shape: f32[1,32], index: 13, kind: input, shape index: {}]   ;;  %s3851_s14 = inlined_call_operand.vmem [shape: f32[1,32], index: 14, kind: input, shape index: {}]   ;;  %s3852_s15 = inlined_call_operand.vmem [shape: f32[2,8,32], index: 15, kind: output, shape index: {}]  }
   0x1   :  { %2871 = vmatprep.subr.mxu0 %v3176_v0  ;;  %v3269_v1 = vld [vmem:[%s3837_s1 + $0x18] sm:$0xff]  ;;  %v3274_v2 = vld [vmem:[%s3837_s1 + $0x10] sm:$0xff]  ;;  %2879 = vmatprep.mubr.msk.f32.mxu0 %vm3177_vm0, %v3176_v0  ;;  %v3284_v3 = vld [vmem:[%s3837_s1 + $0x8] sm:$0xff]  ;;  %s3182_s29 = smov 80   ;;  %s3184_s17 = smov 72  }
   0x2   :  { %2872 = vmatpush3.msra.mxu0 %v3269_v1  ;;  %2908 = vmatprep.subr.mxu1 %v3176_v0  ;;  %v3293_v4 = vld [vmem:[%s3837_s1] sm:$0xff]  ;;  %v3305_v6 = vld [vmem:[%s3839_s3 + $0x18] sm:$0xff]  ;;  %v3314_v7 = vld [vmem:[%s3839_s3 + $0x10] sm:$0xff]  ;;  %s3183_s1 = smov 104  }
   0x3   :  { %2873 = vmatprep.subr.mxu0 %v3176_v0  ;;  %2910 = vmatprep.mubr.msk.f32.mxu1 %vm3177_vm0, %v3176_v0  ;;  %v3299_v5 = vld [vmem:[%s3838_s0] sm:$0xff]  ;;  %v3323_v8 = vld [vmem:[%s3839_s3 + $0x8] sm:$0xff] }
   0x4   :  { %2874 = vmatpush3.msra.mxu0 %v3274_v2  ;;  %v3330_v9 = vld [vmem:[%s3839_s3] sm:$0xff]  ;;  %v3392_v45 = vld [vmem:[%s3842_s5 + $0x8] sm:$0xff] }
   0x5   :  { %2875 = vmatprep.subr.mxu0 %v3176_v0  ;;  %v3343_v12 = vld [vmem:[%s3840_s4] ss:$0 sm:$0xff]  ;;  %s3180_s4 = smov 88  }
   0x6   :  { %2876 = vmatpush3.msra.mxu0 %v3284_v3  ;;  %v3348_v14 = vld [vmem:[%s3841_s2] ss:$0 sm:$0xff]  ;;  %s3179_s2 = smov 120  }
   0x7   :  { %2877 = vmatprep.subr.mxu0 %v3176_v0  ;;  %v3399_v49 = vld [vmem:[%s3842_s5] sm:$0xff] }
   0x8   :  { %2878 = vmatpush3.msra.mxu0 %v3293_v4 }
   0x9   :  { %2880 = vmatmul.mubr.msk.f32.vlgmr.msra.gmra.mxu0 %vm98_vm1, %v3299_v5  ;;  %2882 = vmatprep.subr.mxu0 %v3176_v0 }
   0xa   :  { %2883 = vmatpush3.msra.mxu0 %v3305_v6  ;;  %2890 = vmatprep.mubr.msk.f32.mxu0 %vm3177_vm0, %v3176_v0 }
   0xb   :  { %2884 = vmatprep.subr.mxu0 %v3176_v0 }
   0xc   :  { %2885 = vmatpush3.msra.mxu0 %v3314_v7 }
   0xd   :  { %2886 = vmatprep.subr.mxu0 %v3176_v0 }
   0xe   :  { %2887 = vmatpush3.msra.mxu0 %v3323_v8 }
   0xf   :  { %2888 = vmatprep.subr.mxu0 %v3176_v0 }
  0x10   :  { %2889 = vmatpush3.msra.mxu0 %v3330_v9 }
  0x11   :  { %2891 = vmatmul.mubr.msk.f32.vlgmr.msra.gmra.mxu0 %vm98_vm1, %v3299_v5  ;;  %2893 = vmatprep.subr.mxu0 %v3176_v0 }
  0x12   :  { %2895 = vmatprep.mubr.msk.f32.mxu0 %vm3177_vm0, %v3176_v0 }
  0xc9   :  { %v168_v10 = vpop.f32.mrf.mxu0 }
  0xca   :  { %v3358_v17 = vadd.f32 %v3348_v14, %v168_v10 }
  0xcb   :  { %v2881_v11 = vpop.f32.mrf.mxu0 }
  0xd1   :  { %v244_v13 = vpop.f32.mrf.mxu0 }
  0xd2   :  { %v3351_v15 = vadd.f32 %v3343_v12, %v244_v13 }
  0xd3   :  { %v2892_v16 = vpop.f32.mrf.mxu0 }
  0xd4   :  { %337 = vrot.lane.b32.xlu1 %v3351_v15, %s3178_s23  ;;  %2894 = vmatpush3.xpose.msk.msra.mxu0 %vm248_vm2, %v3351_v15 }
  0xd5   :  { %2898 = vmatprep.subr.mxu0 %v3176_v0 }
  0xd7   :  { %2896 = vmatmul.mubr.msk.f32.vlgmr.msra.gmra.mxu0 %vm248_vm2, %v3358_v17 }
  0xd8   :  { %415 = vrot.lane.b32.xlu1 %v3351_v15, %s3179_s2  ;;  %2900 = vmatprep.mubr.msk.f32.mxu0 %vm3177_vm0, %v3176_v0 }
 0x146   :  { %v338_v18 = vpop.permute.xlu1 %337 }
 0x147   :  { %2899 = vmatpush3.msra.mxu0 %v338_v18 }
 0x148   :  { %2903 = vmatprep.subr.mxu0 %v3176_v0 }
 0x14a   :  { %v416_v31 = vpop.permute.xlu1 %415 }
 0x197   :  { %v321_v19 = vpop.f32.mrf.mxu0 }
 0x198   :  { %v325_v20 = vmul.f32 0.35355338, %v321_v19 }
 0x199   :  { %v2897_v21 = vpop.f32.mrf.mxu0 }
 0x19a   :  { %v326_v22 = vsel %vm248_vm2, %v325_v20, -inf }
 0x19b   :  { %327 = vmax.xlane.f32.xlu0 %v326_v22  ;;  %v3439_v22 = vld [vmem:[%s3842_s5 + $0x10] sm:$0xff] }
 0x224   :  { %v328_v23 = vpop.xlane.xlu0 %327 }
 0x225   :  { %v329_v24 = vsub.f32 %v325_v20, %v328_v23 }
 0x227   :  { %v330_v25 = vmul.f32 1.442695, %v329_v24 }
 0x229   :  { %3136 = vpow2.f32 %v330_v25 }
 0x236   :  { %v3137_v26 = vpop.eup %3136 }
 0x237   :  { %v332_v27 = vsel %vm248_vm2, %v3137_v26, 0.0 }
 0x238   :  { %333 = vadd.xlane.f32.xlu0 %v332_v27 }
 0x24e   :  { %413 = vrot.lane.b32.xlu0 %v3358_v17, %s3179_s2 }
 0x2c1   :  { %v334_v28 = vpop.xlane.xlu0 %333 }
 0x2c2   :  { %3138 = vrcp.f32 %v334_v28 }
 0x2c5   :  { %v414_v32 = vpop.permute.xlu0 %413 }
 0x2cf   :  { %v3139_v29 = vpop.eup %3138 }
 0x2d0   :  { %v336_v30 = vmul.f32 %v3139_v29, %v3137_v26 }
 0x2d2   :  { %2901 = vmatmul.mubr.msk.f32.vlgmr.msra.gmra.mxu0 %vm248_vm2, %v336_v30 }
 0x2d3   :  { %2904 = vmatpush3.xpose.msk.msra.mxu0 %vm248_vm2, %v416_v31  ;;  %2905 = vmatprep.mubr.msk.f32.mxu0 %vm3177_vm0, %v3176_v0 }
 0x2d4   :  { %2913 = vmatprep.subr.mxu0 %v3176_v0 }
 0x2d6   :  { %2906 = vmatmul.mubr.msk.f32.vlgmr.msra.gmra.mxu0 %vm248_vm2, %v414_v32 }
 0x2d7   :  { %2915 = vmatprep.mubr.msk.f32.mxu0 %vm3177_vm0, %v3176_v0  ;;  %2914 = vmatpush3.msra.mxu0 %v3392_v45 }
 0x2d8   :  { %2923 = vmatprep.subr.mxu0 %v3176_v0 }
 0x392   :  { %v409_v33 = vpop.f32.mrf.mxu0 }
 0x394   :  { %v2902_v34 = vpop.f32.mrf.mxu0 }
 0x396   :  { %v487_v35 = vpop.f32.mrf.mxu0 }
 0x397   :  { %v491_v36 = vmul.f32 0.35355338, %v487_v35  ;;  %v3454_v35 = vld [vmem:[%s3842_s5 + $0x18] sm:$0xff] }
 0x398   :  { %v2907_v37 = vpop.f32.mrf.mxu0 }
 0x399   :  { %v492_v38 = vsel %vm248_vm2, %v491_v36, -inf }
 0x39a   :  { %493 = vmax.xlane.f32.xlu1 %v492_v38 }
 0x3ab   :  { %503 = vrot.lane.b32.xlu1 %v3351_v15, %s3180_s4 }
 0x3af   :  { %725 = vrot.lane.b32.xlu1 %v3358_v17, %s3181_s24 }
 0x423   :  { %v494_v39 = vpop.xlane.xlu1 %493 }
 0x424   :  { %v495_v40 = vsub.f32 %v491_v36, %v494_v39 }
 0x426   :  { %v496_v41 = vmul.f32 1.442695, %v495_v40 }
 0x427   :  { %v504_v42 = vpop.permute.xlu1 %503 }
 0x428   :  { %3140 = vpow2.f32 %v496_v41  ;;  %2909 = vmatpush3.msra.mxu1 %v504_v42 }
 0x429   :  { %2918 = vmatprep.subr.mxu1 %v3176_v0 }
 0x42b   :  { %v726_v53 = vpop.permute.xlu1 %725 }
 0x435   :  { %v3141_v43 = vpop.eup %3140 }
 0x436   :  { %v498_v44 = vsel %vm248_vm2, %v3141_v43, 0.0 }
 0x437   :  { %499 = vadd.xlane.f32.xlu0 %v498_v44  ;;  %v3468_v44 = vld [vmem:[%s3843_s6] ss:$0 sm:$0xff] }
 0x44d   :  { %727 = vrot.lane.b32.xlu0 %v3351_v15, %s3181_s24 }
 0x4c0   :  { %v500_v46 = vpop.xlane.xlu0 %499 }
 0x4c1   :  { %3142 = vrcp.f32 %v500_v46 }
 0x4c4   :  { %v728_v51 = vpop.permute.xlu0 %727 }
 0x4ce   :  { %v3143_v47 = vpop.eup %3142 }
 0x4cf   :  { %v502_v48 = vmul.f32 %v3143_v47, %v3141_v43 }
 0x4d1   :  { %2911 = vmatmul.mubr.msk.f32.vlgmr.msra.gmra.mxu1 %vm248_vm2, %v502_v48 }
 0x4d2   :  { %2919 = vmatpush3.msra.mxu1 %v3399_v49  ;;  %2920 = vmatprep.mubr.msk.f32.mxu1 %vm3177_vm0, %v3176_v0 }
 0x4d3   :  { %2928 = vmatprep.subr.mxu1 %v3176_v0 }
 0x4d5   :  { %2921 = vmatmul.mubr.msk.f32.vlgmr.msra.gmra.mxu1 %vm248_vm2, %v409_v33 }
 0x4d6   :  { %2930 = vmatprep.mubr.msk.f32.mxu1 %vm3177_vm0, %v3176_v0 }
 0x591   :  { %v575_v50 = vpop.f32.mrf.mxu1 }
 0x592   :  { %2916 = vmatmul.mubr.msk.f32.vlgmr.msra.gmra.mxu0 %vm248_vm2, %v575_v50 }
 0x593   :  { %2924 = vmatpush3.xpose.msk.msra.mxu0 %vm248_vm2, %v728_v51  ;;  %v2912_v52 = vpop.f32.mrf.mxu1  ;;  %2925 = vmatprep.mubr.msk.f32.mxu0 %vm3177_vm0, %v3176_v0 }
 0x594   :  { %2933 = vmatprep.subr.mxu0 %v3176_v0 }
 0x595   :  { %v3414_v54 = vpop.f32.mrf.mxu1 }
 0x596   :  { %2926 = vmatmul.mubr.msk.f32.vlgmr.msra.gmra.mxu0 %vm248_vm2, %v726_v53 }
 0x597   :  { %v2922_v55 = vpop.f32.mrf.mxu1  ;;  %2935 = vmatprep.mubr.msk.f32.mxu0 %vm3177_vm0, %v3176_v0  ;;  %2934 = vmatpush3.msra.mxu0 %v3439_v22 }
 0x598   :  { %2943 = vmatprep.subr.mxu0 %v3176_v0 }
 0x652   :  { %v648_v56 = vpop.f32.mrf.mxu0 }
 0x653   :  { %v722_v36 = vadd.f32 %v3414_v54, %v648_v56 }
 0x654   :  { %v2917_v57 = vpop.f32.mrf.mxu0 }
 0x656   :  { %v799_v58 = vpop.f32.mrf.mxu0 }
 0x657   :  { %v803_v59 = vmul.f32 0.35355338, %v799_v58  ;;  %v3481_v58 = vld [vmem:[%s3844_s9 + $0x18] sm:$0xff] }
 0x658   :  { %v2927_v60 = vpop.f32.mrf.mxu0 }
 0x659   :  { %v804_v61 = vsel %vm248_vm2, %v803_v59, -inf  ;;  %v3500_v60 = vld [vmem:[%s3844_s9] sm:$0xff] }
 0x65a   :  { %805 = vmax.xlane.f32.xlu1 %v804_v61  ;;  %v3509_v61 = vld [vmem:[%s3845_s11 + $0x78] sm:$0xff] }
 0x66b   :  { %815 = vrot.lane.b32.xlu1 %v3351_v15, %s3182_s29 }
 0x66f   :  { %965 = vrot.lane.b32.xlu1 %v3358_v17, %s3183_s1 }
 0x6e3   :  { %v806_v62 = vpop.xlane.xlu1 %805 }
 0x6e4   :  { %v807_v63 = vsub.f32 %v803_v59, %v806_v62  ;;  %v3493_v59 = vld [vmem:[%s3844_s9 + $0x8] sm:$0xff]  ;;  %v3514_v62 = vld [vmem:[%s3845_s11 + $0x70] sm:$0xff] }
 0x6e6   :  { %v808_v10 = vmul.f32 1.442695, %v807_v63  ;;  %v3521_v63 = vld [vmem:[%s3845_s11 + $0x68] sm:$0xff] }
 0x6e7   :  { %v816_v11 = vpop.permute.xlu1 %815 }
 0x6e8   :  { %3144 = vpow2.f32 %v808_v10  ;;  %2929 = vmatpush3.msra.mxu1 %v816_v11  ;;  %v3528_v10 = vld [vmem:[%s3845_s11 + $0x60] sm:$0xff]  ;;  %v3535_v11 = vld [vmem:[%s3845_s11 + $0x58] sm:$0xff] }
 0x6e9   :  { %2938 = vmatprep.subr.mxu1 %v3176_v0 }
 0x6eb   :  { %v966_v21 = vpop.permute.xlu1 %965 }
 0x6f5   :  { %v3145_v13 = vpop.eup %3144 }
 0x6f6   :  { %v810_v16 = vsel %vm248_vm2, %v3145_v13, 0.0 }
 0x6f7   :  { %811 = vadd.xlane.f32.xlu0 %v810_v16  ;;  %v3549_v16 = vld [vmem:[%s3845_s11 + $0x48] sm:$0xff] }
 0x70d   :  { %967 = vrot.lane.b32.xlu0 %v3351_v15, %s3183_s1 }
 0x780   :  { %v812_v18 = vpop.xlane.xlu0 %811 }
 0x781   :  { %3146 = vrcp.f32 %v812_v18  ;;  %v3556_v18 = vld [vmem:[%s3845_s11 + $0x40] sm:$0xff] }
 0x784   :  { %v968_v17 = vpop.permute.xlu0 %967 }
 0x78e   :  { %v3147_v19 = vpop.eup %3146 }
 0x78f   :  { %v814_v20 = vmul.f32 %v3147_v19, %v3145_v13  ;;  %v3542_v13 = vld [vmem:[%s3845_s11 + $0x50] sm:$0xff]  ;;  %v3563_v19 = vld [vmem:[%s3845_s11 + $0x38] sm:$0xff] }
 0x791   :  { %2931 = vmatmul.mubr.msk.f32.vlgmr.msra.gmra.mxu1 %vm248_vm2, %v814_v20  ;;  %v3570_v20 = vld [vmem:[%s3845_s11 + $0x30] sm:$0xff] }
 0x792   :  { %2939 = vmatpush3.xpose.msk.msra.mxu1 %vm248_vm2, %v968_v17  ;;  %2940 = vmatprep.mubr.msk.f32.mxu1 %vm3177_vm0, %v3176_v0  ;;  %v3577_v17 = vld [vmem:[%s3845_s11 + $0x28] sm:$0xff] }
 0x793   :  { %2948 = vmatprep.subr.mxu1 %v3176_v0 }
 0x795   :  { %2941 = vmatmul.mubr.msk.f32.vlgmr.msra.gmra.mxu1 %vm248_vm2, %v966_v21  ;;  %v3584_v21 = vld [vmem:[%s3845_s11 + $0x20] sm:$0xff] }
 0x796   :  { %2950 = vmatprep.mubr.msk.f32.mxu1 %vm3177_vm0, %v3176_v0  ;;  %2949 = vmatpush3.msra.mxu1 %v3454_v35 }
 0x797   :  { %2964 = vmatprep.subr.mxu1 %v3176_v0 }
 0x851   :  { %v887_v23 = vpop.f32.mrf.mxu1 }
 0x852   :  { %2936 = vmatmul.mubr.msk.f32.vlgmr.msra.gmra.mxu0 %vm248_vm2, %v887_v23  ;;  %v3591_v23 = vld [vmem:[%s3845_s11 + $0x18] sm:$0xff] }
 0x853   :  { %v2932_v24 = vpop.f32.mrf.mxu1  ;;  %2945 = vmatprep.mubr.msk.f32.mxu0 %vm3177_vm0, %v3176_v0 }
 0x855   :  { %v1039_v25 = vpop.f32.mrf.mxu1 }
 0x856   :  { %v1043_v26 = vmul.f32 0.35355338, %v1039_v25 }
 0x857   :  { %v2942_v27 = vpop.f32.mrf.mxu1 }
 0x858   :  { %v1044_v28 = vsel %vm248_vm2, %v1043_v26, -inf }
 0x859   :  { %1045 = vmax.xlane.f32.xlu1 %v1044_v28  ;;  %v3600_v28 = vld [vmem:[%s3846_s7] ss:$0 sm:$0xff] }
 0x86a   :  { %1055 = vrot.lane.b32.xlu1 %v3351_v15, %s3184_s17 }
 0x8e2   :  { %v1046_v29 = vpop.xlane.xlu1 %1045 }
 0x8e3   :  { %v1047_v30 = vsub.f32 %v1043_v26, %v1046_v29 }
 0x8e5   :  { %v1048_v31 = vmul.f32 1.442695, %v1047_v30  ;;  %v3606_v30 = vld [vmem:[%s3847_s8] ss:$0 sm:$0xff] }
 0x8e6   :  { %v1056_v32 = vpop.permute.xlu1 %1055 }
 0x8e7   :  { %3148 = vpow2.f32 %v1048_v31  ;;  %2944 = vmatpush3.msra.mxu0 %v1056_v32 }
 0x8e8   :  { %2953 = vmatprep.subr.mxu0 %v3176_v0 }
 0x8f4   :  { %v3149_v33 = vpop.eup %3148 }
 0x8f5   :  { %v1050_v34 = vsel %vm248_vm2, %v3149_v33, 0.0 }
 0x8f6   :  { %1051 = vadd.xlane.f32.xlu0 %v1050_v34 }
 0x912   :  { %v960_v15 = vpop.f32.mrf.mxu0 }
 0x913   :  { %v964_v37 = vadd.f32 %v960_v15, %v722_v36 }
 0x914   :  { %v2937_v38 = vpop.f32.mrf.mxu0 }
 0x97f   :  { %v1052_v39 = vpop.xlane.xlu0 %1051 }
 0x980   :  { %3150 = vrcp.f32 %v1052_v39 }
 0x98d   :  { %v3151_v40 = vpop.eup %3150 }
 0x98e   :  { %v1054_v41 = vmul.f32 %v3151_v40, %v3149_v33  ;;  %v3623_v33 = vld [vmem:[%s3838_s0 + $0x8] sm:$0xff] }
 0x990   :  { %2946 = vmatmul.mubr.msk.f32.vlgmr.msra.gmra.mxu0 %vm248_vm2, %v1054_v41 }
 0x991   :  { %2961 = vmatprep.mubr.msk.f32.mxu0 %vm3177_vm0, %v3176_v0  ;;  %2954 = vmatpush3.msra.mxu0 %v3481_v58 }
 0x992   :  { %2955 = vmatprep.subr.mxu0 %v3176_v0 }
 0xa50   :  { %v1127_v42 = vpop.f32.mrf.mxu0 }
 0xa51   :  { %2951 = vmatmul.mubr.msk.f32.vlgmr.msra.gmra.mxu1 %vm248_vm2, %v1127_v42 }
 0xa52   :  { %v2947_v43 = vpop.f32.mrf.mxu0  ;;  %2996 = vmatprep.mubr.msk.f32.mxu1 %vm3177_vm0, %v3176_v0  ;;  %2965 = vmatpush3.msra.mxu1 %v3509_v61 }
 0xa53   :  { %2966 = vmatprep.subr.mxu1 %v3176_v0 }
 0xa54   :  { %2967 = vmatpush3.msra.mxu1 %v3514_v62 }
 0xa55   :  { %2968 = vmatprep.subr.mxu1 %v3176_v0 }
 0xa56   :  { %2969 = vmatpush3.msra.mxu1 %v3521_v63 }
 0xa57   :  { %2970 = vmatprep.subr.mxu1 %v3176_v0 }
 0xa58   :  { %2971 = vmatpush3.msra.mxu1 %v3528_v10 }
 0xa59   :  { %2972 = vmatprep.subr.mxu1 %v3176_v0 }
 0xa5a   :  { %2973 = vmatpush3.msra.mxu1 %v3535_v11 }
 0xa5b   :  { %2974 = vmatprep.subr.mxu1 %v3176_v0 }
 0xa5c   :  { %2975 = vmatpush3.msra.mxu1 %v3542_v13 }
 0xa5d   :  { %2976 = vmatprep.subr.mxu1 %v3176_v0 }
 0xa5e   :  { %2977 = vmatpush3.msra.mxu1 %v3549_v16 }
 0xa5f   :  { %2978 = vmatprep.subr.mxu1 %v3176_v0 }
 0xa60   :  { %2979 = vmatpush3.msra.mxu1 %v3556_v18 }
 0xa61   :  { %2980 = vmatprep.subr.mxu1 %v3176_v0 }
 0xa62   :  { %2981 = vmatpush3.msra.mxu1 %v3563_v19 }
 0xa63   :  { %2982 = vmatprep.subr.mxu1 %v3176_v0 }
 0xa64   :  { %2983 = vmatpush3.msra.mxu1 %v3570_v20 }
 0xa65   :  { %2984 = vmatprep.subr.mxu1 %v3176_v0 }
 0xa66   :  { %2985 = vmatpush3.msra.mxu1 %v3577_v17 }
 0xa67   :  { %2986 = vmatprep.subr.mxu1 %v3176_v0 }
 0xa68   :  { %2987 = vmatpush3.msra.mxu1 %v3584_v21 }
 0xa69   :  { %2988 = vmatprep.subr.mxu1 %v3176_v0 }
 0xa6a   :  { %2989 = vmatpush3.msra.mxu1 %v3591_v23 }
 0xa6b   :  { %2990 = vmatprep.subr.mxu1 %v3176_v0 }
 0xb11   :  { %v1200_v46 = vpop.f32.mrf.mxu1 }
 0xb12   :  { %v1204_v47 = vadd.f32 %v1200_v46, %v964_v37 }
 0xb13   :  { %v2952_v48 = vpop.f32.mrf.mxu1 }
 0xb14   :  { %v1211_v50 = vadd.f32 %v3468_v44, %v1204_v47 }
 0xb16   :  { %v1212_v51 = vadd.f32 %v1211_v50, %v3299_v5  ;;  %v3488_v5 = vld [vmem:[%s3844_s9 + $0x10] sm:$0xff] }
 0xb17   :  { %2956 = vmatpush3.msra.mxu0 %v3488_v5 }
 0xb18   :  { %v1213_v52 = vsel %vm98_vm1, %v1212_v51, 0.0  ;;  %2957 = vmatprep.subr.mxu0 %v3176_v0 }
 0xb19   :  { %1214 = vadd.xlane.f32.xlu0 %v1213_v52  ;;  %2958 = vmatpush3.msra.mxu0 %v3493_v59 }
 0xb1a   :  { %2959 = vmatprep.subr.mxu0 %v3176_v0 }
 0xb1b   :  { %2960 = vmatpush3.msra.mxu0 %v3500_v60 }
 0xb1c   :  { %2999 = vmatprep.subr.mxu0 %v3176_v0 }
 0xba2   :  { %v1215_v53 = vpop.xlane.xlu0 %1214 }
 0xba3   :  { %v1217_v54 = vmul.f32 0.03125, %v1215_v53 }
 0xba5   :  { %v3473_v55 = vsub.f32 %v1212_v51, %v1217_v54 }
 0xba7   :  { %v1219_v56 = vmul.f32 %v3473_v55, %v3473_v55 }
 0xba9   :  { %v1220_v57 = vsel %vm98_vm1, %v1219_v56, 0.0 }
 0xbaa   :  { %1221 = vadd.xlane.f32.xlu0 %v1220_v57 }
 0xc33   :  { %v1222_v24 = vpop.xlane.xlu0 %1221 }
 0xc34   :  { %v1223_v25 = vmul.f32 0.03125, %v1222_v24 }
 0xc36   :  { %v1224_v26 = vadd.f32 1e-05, %v1223_v25 }
 0xc38   :  { %3152 = vrsqrt.f32 %v1224_v26 }
 0xc45   :  { %v3153_v27 = vpop.eup %3152 }
 0xc46   :  { %v1226_v29 = vmul.f32 %v3153_v27, %v3473_v55 }
 0xc48   :  { %v1233_v31 = vmul.f32 %v3600_v28, %v1226_v29 }
 0xc4a   :  { %v3610_v32 = vadd.f32 %v3606_v30, %v1233_v31 }
 0xc4c   :  { %2962 = vmatmul.mubr.msk.f32.vlgmr.msra.gmra.mxu0 %vm98_vm1, %v3610_v32 }
 0xc4d   :  { %3000 = vmatpush3.msra.mxu0 %v3269_v1  ;;  %3007 = vmatprep.mubr.msk.f32.mxu0 %vm3177_vm0, %v3176_v0  ;;  %v3648_v1 = vld [vmem:[%s3845_s11 + $0x10] sm:$0xff] }
 0xc4e   :  { %3001 = vmatprep.subr.mxu0 %v3176_v0  ;;  %2991 = vmatpush3.msra.mxu1 %v3648_v1 }
 0xc4f   :  { %3002 = vmatpush3.msra.mxu0 %v3274_v2  ;;  %2992 = vmatprep.subr.mxu1 %v3176_v0  ;;  %v3655_v2 = vld [vmem:[%s3845_s11 + $0x8] sm:$0xff] }
 0xc50   :  { %3003 = vmatprep.subr.mxu0 %v3176_v0  ;;  %2993 = vmatpush3.msra.mxu1 %v3655_v2 }
 0xc51   :  { %3004 = vmatpush3.msra.mxu0 %v3284_v3  ;;  %v3661_v3 = vld [vmem:[%s3845_s11] sm:$0xff]  ;;  %2994 = vmatprep.subr.mxu1 %v3176_v0 }
 0xc52   :  { %3005 = vmatprep.subr.mxu0 %v3176_v0  ;;  %2995 = vmatpush3.msra.mxu1 %v3661_v3 }
 0xc53   :  { %3006 = vmatpush3.msra.mxu0 %v3293_v4  ;;  %3036 = vmatprep.subr.mxu1 %v3176_v0  ;;  %v3669_v4 = vld [vmem:[%s3848_s10] ss:$0 sm:$0xff] }
 0xc54   :  { %3008 = vmatmul.mubr.msk.f32.vlgmr.msra.gmra.mxu0 %vm98_vm1, %v3623_v33  ;;  %3010 = vmatprep.subr.mxu0 %v3176_v0 }
 0xc55   :  { %3011 = vmatpush3.msra.mxu0 %v3305_v6  ;;  %3018 = vmatprep.mubr.msk.f32.mxu0 %vm3177_vm0, %v3176_v0 }
 0xc56   :  { %3012 = vmatprep.subr.mxu0 %v3176_v0 }
 0xc57   :  { %3013 = vmatpush3.msra.mxu0 %v3314_v7 }
 0xc58   :  { %3014 = vmatprep.subr.mxu0 %v3176_v0 }
 0xc59   :  { %3015 = vmatpush3.msra.mxu0 %v3323_v8 }
 0xc5a   :  { %3016 = vmatprep.subr.mxu0 %v3176_v0 }
 0xc5b   :  { %3017 = vmatpush3.msra.mxu0 %v3330_v9 }
 0xc5c   :  { %3019 = vmatmul.mubr.msk.f32.vlgmr.msra.gmra.mxu0 %vm98_vm1, %v3623_v33  ;;  %3021 = vmatprep.subr.mxu0 %v3176_v0 }
 0xc5d   :  { %3023 = vmatprep.mubr.msk.f32.mxu0 %vm3177_vm0, %v3176_v0 }
 0xd0c   :  { %v1316_v6 = vpop.f32.mrf.mxu0 }
 0xd0d   :  { %v1317_v7 = vadd.f32 %v3669_v4, %v1316_v6 }
 0xd0e   :  { %v2963_v8 = vpop.f32.mrf.mxu0 }
 0xd0f   :  { %v1320_v9 = vmax.f32 %v1317_v7, 0.0 }
 0xd11   :  { %2997 = vmatmul.mubr.f32.vlgmr.msra.gmra.mxu1 %v1320_v9 }
 0xd12   :  { %3038 = vmatprep.mubr.msk.f32.mxu1 %vm3177_vm0, %v3176_v0 }
 0xd14   :  { %v1497_v34 = vpop.f32.mrf.mxu0 }
 0xd15   :  { %v3680_v39 = vadd.f32 %v3348_v14, %v1497_v34 }
 0xd16   :  { %v3009_v36 = vpop.f32.mrf.mxu0 }
 0xd1c   :  { %v1567_v15 = vpop.f32.mrf.mxu0 }
 0xd1d   :  { %v3675_v37 = vadd.f32 %v3343_v12, %v1567_v15 }
 0xd1e   :  { %v3020_v38 = vpop.f32.mrf.mxu0 }
 0xd1f   :  { %3022 = vmatpush3.xpose.msk.msra.mxu0 %vm248_vm2, %v3675_v37 }
 0xd20   :  { %3026 = vmatprep.subr.mxu0 %v3176_v0 }
 0xd22   :  { %3024 = vmatmul.mubr.msk.f32.vlgmr.msra.gmra.mxu0 %vm248_vm2, %v3680_v39 }
 0xd23   :  { %3028 = vmatprep.mubr.msk.f32.mxu0 %vm3177_vm0, %v3176_v0 }
 0xdd1   :  { %v3687_v40 = vpop.f32.mrf.mxu1 }
 0xdd3   :  { %v2998_v41 = vpop.f32.mrf.mxu1 }
 0xde2   :  { %v1643_v12 = vpop.f32.mrf.mxu0 }
 0xde3   :  { %v1647_v42 = vmul.f32 0.35355338, %v1643_v12 }
 0xde4   :  { %v3025_v43 = vpop.f32.mrf.mxu0 }
 0xde5   :  { %v1648_v46 = vsel %vm248_vm2, %v1647_v42, -inf }
 0xde6   :  { %1649 = vmax.xlane.f32.xlu0 %v1648_v46 }
 0xdfc   :  { %1659 = vrot.lane.b32.xlu0 %v3675_v37, %s3178_s23 }
 0xe00   :  { %1737 = vrot.lane.b32.xlu0 %v3675_v37, %s3179_s2 }
 0xe04   :  { %1735 = vrot.lane.b32.xlu0 %v3680_v39, %s3179_s2 }
 0xe6f   :  { %v1650_v14 = vpop.xlane.xlu0 %1649 }
 0xe70   :  { %v1651_v47 = vsub.f32 %v1647_v42, %v1650_v14 }
 0xe72   :  { %v1652_v48 = vmul.f32 1.442695, %v1651_v47 }
 0xe73   :  { %v1660_v50 = vpop.permute.xlu0 %1659 }
 0xe74   :  { %3154 = vpow2.f32 %v1652_v48  ;;  %3027 = vmatpush3.msra.mxu0 %v1660_v50 }
 0xe75   :  { %3031 = vmatprep.subr.mxu0 %v3176_v0 }
 0xe77   :  { %v1738_v55 = vpop.permute.xlu0 %1737 }
 0xe7b   :  { %v1736_v57 = vpop.permute.xlu0 %1735 }
 0xe81   :  { %v3155_v51 = vpop.eup %3154 }
 0xe82   :  { %v1654_v52 = vsel %vm248_vm2, %v3155_v51, 0.0 }
 0xe83   :  { %1655 = vadd.xlane.f32.xlu1 %v1654_v52 }
 0xf0c   :  { %v1656_v53 = vpop.xlane.xlu1 %1655 }
 0xf0d   :  { %3156 = vrcp.f32 %v1656_v53 }
 0xf1a   :  { %v3157_v54 = vpop.eup %3156 }
 0xf1b   :  { %v1658_v56 = vmul.f32 %v3157_v54, %v3155_v51 }
 0xf1d   :  { %3029 = vmatmul.mubr.msk.f32.vlgmr.msra.gmra.mxu0 %vm248_vm2, %v1658_v56 }
 0xf1e   :  { %3032 = vmatpush3.xpose.msk.msra.mxu0 %vm248_vm2, %v1738_v55  ;;  %3033 = vmatprep.mubr.msk.f32.mxu0 %vm3177_vm0, %v3176_v0 }
 0xf1f   :  { %3041 = vmatprep.subr.mxu0 %v3176_v0 }
 0xf21   :  { %3034 = vmatmul.mubr.msk.f32.vlgmr.msra.gmra.mxu0 %vm248_vm2, %v1736_v57 }
 0xf22   :  { %3042 = vmatpush3.msra.mxu0 %v3392_v45  ;;  %3043 = vmatprep.mubr.msk.f32.mxu0 %vm3177_vm0, %v3176_v0 }
 0xf23   :  { %3051 = vmatprep.subr.mxu0 %v3176_v0 }
 0xfdd   :  { %v1731_v24 = vpop.f32.mrf.mxu0 }
 0xfdf   :  { %v3030_v25 = vpop.f32.mrf.mxu0 }
 0xfe1   :  { %v1809_v26 = vpop.f32.mrf.mxu0 }
 0xfe2   :  { %v1813_v27 = vmul.f32 0.35355338, %v1809_v26 }
 0xfe3   :  { %v3035_v29 = vpop.f32.mrf.mxu0 }
 0xfe4   :  { %v1814_v31 = vsel %vm248_vm2, %v1813_v27, -inf }
 0xfe5   :  { %1815 = vmax.xlane.f32.xlu0 %v1814_v31 }
0x106e   :  { %v1816_v6 = vpop.xlane.xlu0 %1815 }
0x106f   :  { %v1817_v7 = vsub.f32 %v1813_v27, %v1816_v6 }
0x1071   :  { %v1818_v8 = vmul.f32 1.442695, %v1817_v7 }
0x1073   :  { %3158 = vpow2.f32 %v1818_v8 }
0x1080   :  { %v3159_v9 = vpop.eup %3158 }
0x1081   :  { %v1820_v45 = vsel %vm248_vm2, %v3159_v9, 0.0 }
0x1082   :  { %1821 = vadd.xlane.f32.xlu1 %v1820_v45 }
0x1093   :  { %1825 = vrot.lane.b32.xlu1 %v3675_v37, %s3180_s4 }
0x1097   :  { %2049 = vrot.lane.b32.xlu1 %v3675_v37, %s3181_s24 }
0x109b   :  { %2047 = vrot.lane.b32.xlu1 %v3680_v39, %s3181_s24 }
0x110b   :  { %v1822_v34 = vpop.xlane.xlu1 %1821 }
0x110c   :  { %3160 = vrcp.f32 %v1822_v34 }
0x110f   :  { %v1826_v36 = vpop.permute.xlu1 %1825 }
0x1110   :  { %3037 = vmatpush3.msra.mxu1 %v1826_v36 }
0x1111   :  { %3046 = vmatprep.subr.mxu1 %v3176_v0 }
0x1113   :  { %v2050_v41 = vpop.permute.xlu1 %2049 }
0x1119   :  { %v3161_v15 = vpop.eup %3160 }
0x111a   :  { %v1824_v38 = vmul.f32 %v3161_v15, %v3159_v9 }
0x111c   :  { %3039 = vmatmul.mubr.msk.f32.vlgmr.msra.gmra.mxu1 %vm248_vm2, %v1824_v38 }
0x111d   :  { %3047 = vmatpush3.msra.mxu1 %v3399_v49  ;;  %3048 = vmatprep.mubr.msk.f32.mxu1 %vm3177_vm0, %v3176_v0  ;;  %v2048_v49 = vpop.permute.xlu1 %2047 }
0x111e   :  { %3056 = vmatprep.subr.mxu1 %v3176_v0 }
0x1120   :  { %3049 = vmatmul.mubr.msk.f32.vlgmr.msra.gmra.mxu1 %vm248_vm2, %v1731_v24 }
0x1121   :  { %3058 = vmatprep.mubr.msk.f32.mxu1 %vm3177_vm0, %v3176_v0 }
0x11dc   :  { %v1897_v12 = vpop.f32.mrf.mxu1 }
0x11dd   :  { %3044 = vmatmul.mubr.msk.f32.vlgmr.msra.gmra.mxu0 %vm248_vm2, %v1897_v12 }
0x11de   :  { %3052 = vmatpush3.xpose.msk.msra.mxu0 %vm248_vm2, %v2050_v41  ;;  %v3040_v42 = vpop.f32.mrf.mxu1  ;;  %3053 = vmatprep.mubr.msk.f32.mxu0 %vm3177_vm0, %v3176_v0 }
0x11df   :  { %3061 = vmatprep.subr.mxu0 %v3176_v0 }
0x11e0   :  { %v2043_v43 = vpop.f32.mrf.mxu1 }
0x11e1   :  { %3054 = vmatmul.mubr.msk.f32.vlgmr.msra.gmra.mxu0 %vm248_vm2, %v2048_v49 }
0x11e2   :  { %v3050_v46 = vpop.f32.mrf.mxu1  ;;  %3062 = vmatpush3.msra.mxu0 %v3439_v22  ;;  %3063 = vmatprep.mubr.msk.f32.mxu0 %vm3177_vm0, %v3176_v0 }
0x11e3   :  { %3071 = vmatprep.subr.mxu0 %v3176_v0 }
0x129d   :  { %v1970_v14 = vpop.f32.mrf.mxu0 }
0x129e   :  { %v2044_v38 = vadd.f32 %v2043_v43, %v1970_v14 }
0x129f   :  { %v3045_v47 = vpop.f32.mrf.mxu0 }
0x12a1   :  { %v2121_v48 = vpop.f32.mrf.mxu0 }
0x12a2   :  { %v2125_v50 = vmul.f32 0.35355338, %v2121_v48 }
0x12a3   :  { %v3055_v51 = vpop.f32.mrf.mxu0 }
0x12a4   :  { %v2126_v52 = vsel %vm248_vm2, %v2125_v50, -inf }
0x12a5   :  { %2127 = vmax.xlane.f32.xlu0 %v2126_v52 }
0x12bb   :  { %2137 = vrot.lane.b32.xlu0 %v3675_v37, %s3182_s29 }
0x12bf   :  { %2289 = vrot.lane.b32.xlu0 %v3675_v37, %s3183_s1 }
0x12c3   :  { %2287 = vrot.lane.b32.xlu0 %v3680_v39, %s3183_s1 }
0x132e   :  { %v2128_v22 = vpop.xlane.xlu0 %2127 }
0x132f   :  { %v2129_v53 = vsub.f32 %v2125_v50, %v2128_v22 }
0x1331   :  { %v2130_v54 = vmul.f32 1.442695, %v2129_v53 }
0x1332   :  { %v2138_v55 = vpop.permute.xlu0 %2137 }
0x1333   :  { %3162 = vpow2.f32 %v2130_v54  ;;  %3057 = vmatpush3.msra.mxu1 %v2138_v55 }
0x1334   :  { %3066 = vmatprep.subr.mxu1 %v3176_v0 }
0x1336   :  { %v2290_v26 = vpop.permute.xlu0 %2289 }
0x133a   :  { %v2288_v39 = vpop.permute.xlu0 %2287 }
0x1340   :  { %v3163_v56 = vpop.eup %3162 }
0x1341   :  { %v2132_v57 = vsel %vm248_vm2, %v3163_v56, 0.0 }
0x1342   :  { %2133 = vadd.xlane.f32.xlu1 %v2132_v57 }
0x13cb   :  { %v2134_v24 = vpop.xlane.xlu1 %2133 }
0x13cc   :  { %3164 = vrcp.f32 %v2134_v24 }
0x13d9   :  { %v3165_v25 = vpop.eup %3164 }
0x13da   :  { %v2136_v27 = vmul.f32 %v3165_v25, %v3163_v56 }
0x13dc   :  { %3059 = vmatmul.mubr.msk.f32.vlgmr.msra.gmra.mxu1 %vm248_vm2, %v2136_v27 }
0x13dd   :  { %3067 = vmatpush3.xpose.msk.msra.mxu1 %vm248_vm2, %v2290_v26  ;;  %3068 = vmatprep.mubr.msk.f32.mxu1 %vm3177_vm0, %v3176_v0 }
0x13de   :  { %3076 = vmatprep.subr.mxu1 %v3176_v0 }
0x13e0   :  { %3069 = vmatmul.mubr.msk.f32.vlgmr.msra.gmra.mxu1 %vm248_vm2, %v2288_v39 }
0x13e1   :  { %3077 = vmatpush3.msra.mxu1 %v3454_v35  ;;  %3078 = vmatprep.mubr.msk.f32.mxu1 %vm3177_vm0, %v3176_v0 }
0x13e2   :  { %3092 = vmatprep.subr.mxu1 %v3176_v0 }
0x149c   :  { %v2209_v29 = vpop.f32.mrf.mxu1 }
0x149d   :  { %3064 = vmatmul.mubr.msk.f32.vlgmr.msra.gmra.mxu0 %vm248_vm2, %v2209_v29 }
0x149e   :  { %v3060_v31 = vpop.f32.mrf.mxu1  ;;  %3073 = vmatprep.mubr.msk.f32.mxu0 %vm3177_vm0, %v3176_v0 }
0x14a0   :  { %v2361_v6 = vpop.f32.mrf.mxu1 }
0x14a1   :  { %v2365_v7 = vmul.f32 0.35355338, %v2361_v6  ;;  %v2736_v6 = vld [vmem:[%s3850_s13] ss:$0 sm:$0xff] }
0x14a2   :  { %v3070_v8 = vpop.f32.mrf.mxu1 }
0x14a3   :  { %v2366_v9 = vsel %vm248_vm2, %v2365_v7, -inf  ;;  %v2737_v8 = vld [vmem:[%s3851_s14] ss:$0 sm:$0xff] }
0x14a4   :  { %2367 = vmax.xlane.f32.xlu0 %v2366_v9 }
0x152d   :  { %v2368_v45 = vpop.xlane.xlu0 %2367 }
0x152e   :  { %v2369_v35 = vsub.f32 %v2365_v7, %v2368_v45 }
0x1530   :  { %v2370_v34 = vmul.f32 1.442695, %v2369_v35 }
0x1532   :  { %3166 = vpow2.f32 %v2370_v34 }
0x153f   :  { %v3167_v36 = vpop.eup %3166 }
0x1540   :  { %v2372_v15 = vsel %vm248_vm2, %v3167_v36, 0.0 }
0x1541   :  { %2373 = vadd.xlane.f32.xlu1 %v2372_v15 }
0x1552   :  { %2377 = vrot.lane.b32.xlu1 %v3675_v37, %s3184_s17 }
0x155d   :  { %v2282_v41 = vpop.f32.mrf.mxu0 }
0x155e   :  { %v2286_v12 = vadd.f32 %v2282_v41, %v2044_v38 }
0x155f   :  { %v3065_v42 = vpop.f32.mrf.mxu0 }
0x15ca   :  { %v2374_v49 = vpop.xlane.xlu1 %2373 }
0x15cb   :  { %3168 = vrcp.f32 %v2374_v49 }
0x15ce   :  { %v2378_v46 = vpop.permute.xlu1 %2377 }
0x15cf   :  { %3072 = vmatpush3.msra.mxu0 %v2378_v46 }
0x15d0   :  { %3081 = vmatprep.subr.mxu0 %v3176_v0 }
0x15d8   :  { %v3169_v47 = vpop.eup %3168 }
0x15d9   :  { %v2376_v48 = vmul.f32 %v3169_v47, %v3167_v36 }
0x15db   :  { %3074 = vmatmul.mubr.msk.f32.vlgmr.msra.gmra.mxu0 %vm248_vm2, %v2376_v48 }
0x15dc   :  { %3082 = vmatpush3.msra.mxu0 %v3481_v58  ;;  %3089 = vmatprep.mubr.msk.f32.mxu0 %vm3177_vm0, %v3176_v0 }
0x15dd   :  { %3083 = vmatprep.subr.mxu0 %v3176_v0 }
0x15de   :  { %3084 = vmatpush3.msra.mxu0 %v3488_v5 }
0x15df   :  { %3085 = vmatprep.subr.mxu0 %v3176_v0 }
0x15e0   :  { %3086 = vmatpush3.msra.mxu0 %v3493_v59 }
0x15e1   :  { %3087 = vmatprep.subr.mxu0 %v3176_v0 }
0x15e2   :  { %3088 = vmatpush3.msra.mxu0 %v3500_v60 }
0x169b   :  { %v2449_v37 = vpop.f32.mrf.mxu0 }
0x169c   :  { %3079 = vmatmul.mubr.msk.f32.vlgmr.msra.gmra.mxu1 %vm248_vm2, %v2449_v37 }
0x169d   :  { %v3075_v43 = vpop.f32.mrf.mxu0  ;;  %3093 = vmatpush3.msra.mxu1 %v3509_v61  ;;  %3124 = vmatprep.mubr.msk.f32.mxu1 %vm3177_vm0, %v3176_v0 }
0x169e   :  { %3094 = vmatprep.subr.mxu1 %v3176_v0 }
0x169f   :  { %3095 = vmatpush3.msra.mxu1 %v3514_v62 }
0x16a0   :  { %3096 = vmatprep.subr.mxu1 %v3176_v0 }
0x16a1   :  { %3097 = vmatpush3.msra.mxu1 %v3521_v63  ;;  %v2735_v63 = vld [vmem:[%s3849_s12] ss:$0 sm:$0xff] }
0x16a2   :  { %3098 = vmatprep.subr.mxu1 %v3176_v0 }
0x16a3   :  { %3099 = vmatpush3.msra.mxu1 %v3528_v10 }
0x16a4   :  { %3100 = vmatprep.subr.mxu1 %v3176_v0 }
0x16a5   :  { %3101 = vmatpush3.msra.mxu1 %v3535_v11 }
0x16a6   :  { %3102 = vmatprep.subr.mxu1 %v3176_v0 }
0x16a7   :  { %3103 = vmatpush3.msra.mxu1 %v3542_v13 }
0x16a8   :  { %3104 = vmatprep.subr.mxu1 %v3176_v0 }
0x16a9   :  { %3105 = vmatpush3.msra.mxu1 %v3549_v16 }
0x16aa   :  { %3106 = vmatprep.subr.mxu1 %v3176_v0 }
0x16ab   :  { %3107 = vmatpush3.msra.mxu1 %v3556_v18 }
0x16ac   :  { %3108 = vmatprep.subr.mxu1 %v3176_v0 }
0x16ad   :  { %3109 = vmatpush3.msra.mxu1 %v3563_v19 }
0x16ae   :  { %3110 = vmatprep.subr.mxu1 %v3176_v0 }
0x16af   :  { %3111 = vmatpush3.msra.mxu1 %v3570_v20 }
0x16b0   :  { %3112 = vmatprep.subr.mxu1 %v3176_v0 }
0x16b1   :  { %3113 = vmatpush3.msra.mxu1 %v3577_v17 }
0x16b2   :  { %3114 = vmatprep.subr.mxu1 %v3176_v0 }
0x16b3   :  { %3115 = vmatpush3.msra.mxu1 %v3584_v21 }
0x16b4   :  { %3116 = vmatprep.subr.mxu1 %v3176_v0 }
0x16b5   :  { %3117 = vmatpush3.msra.mxu1 %v3591_v23 }
0x16b6   :  { %3118 = vmatprep.subr.mxu1 %v3176_v0 }
0x16b7   :  { %3119 = vmatpush3.msra.mxu1 %v3648_v1 }
0x16b8   :  { %3120 = vmatprep.subr.mxu1 %v3176_v0 }
0x16b9   :  { %3121 = vmatpush3.msra.mxu1 %v3655_v2 }
0x16ba   :  { %3122 = vmatprep.subr.mxu1 %v3176_v0  ;;  %v1394_v0 = vadd.f32 %v2735_v63, %v3687_v40 }
0x16bb   :  { %3123 = vmatpush3.msra.mxu1 %v3661_v3 }
0x16bc   :  { %v1397_v19 = vadd.f32 %v1394_v0, %v3610_v32 }
0x175c   :  { %v2522_v58 = vpop.f32.mrf.mxu1 }
0x175d   :  { %v2526_v5 = vadd.f32 %v2522_v58, %v2286_v12 }
0x175e   :  { %v3080_v59 = vpop.f32.mrf.mxu1 }
0x175f   :  { %v2527_v60 = vadd.f32 %v3468_v44, %v2526_v5  ;;  %v1398_v44 = vsel %vm98_vm1, %v1397_v19, 0.0 }
0x1761   :  { %v2528_v61 = vadd.f32 %v3623_v33, %v2527_v60 }
0x1763   :  { %v2529_v62 = vsel %vm98_vm1, %v2528_v61, 0.0 }
0x1764   :  { %2530 = vadd.xlane.f32.xlu1 %v2529_v62 }
0x17ed   :  { %v2531_v10 = vpop.xlane.xlu1 %2530 }
0x17ee   :  { %v2532_v11 = vmul.f32 0.03125, %v2531_v10 }
0x17f0   :  { %v2533_v13 = vsub.f32 %v2528_v61, %v2532_v11 }
0x17f2   :  { %v2534_v16 = vmul.f32 %v2533_v13, %v2533_v13 }
0x17f4   :  { %v2535_v18 = vsel %vm98_vm1, %v2534_v16, 0.0 }
0x17f5   :  { %2536 = vadd.xlane.f32.xlu0 %v2535_v18 }
0x17f9   :  { %1399 = vadd.xlane.f32.xlu0 %v1398_v44 }
0x187e   :  { %v2537_v20 = vpop.xlane.xlu0 %2536 }
0x187f   :  { %v2538_v17 = vmul.f32 0.03125, %v2537_v20 }
0x1881   :  { %v2539_v21 = vadd.f32 1e-05, %v2538_v17 }
0x1882   :  { %v1400_v50 = vpop.xlane.xlu0 %1399 }
0x1883   :  { %3170 = vrsqrt.f32 %v2539_v21  ;;  %v1401_v51 = vmul.f32 0.03125, %v1400_v50 }
0x1885   :  { %v1402_v22 = vsub.f32 %v1397_v19, %v1401_v51 }
0x1890   :  { %v3171_v23 = vpop.eup %3170 }
0x1891   :  { %v2541_v33 = vmul.f32 %v3171_v23, %v2533_v13 }
0x1893   :  { %v2542_v1 = vmul.f32 %v3600_v28, %v2541_v33  ;;  %v1403_v28 = vmul.f32 %v1402_v22, %v1402_v22 }
0x1895   :  { %v2543_v2 = vadd.f32 %v3606_v30, %v2542_v1  ;;  %v1404_v30 = vsel %vm98_vm1, %v1403_v28, 0.0 }
0x1897   :  { %3090 = vmatmul.mubr.msk.f32.vlgmr.msra.gmra.mxu0 %vm98_vm1, %v2543_v2 }
0x1957   :  { %v2613_v3 = vpop.f32.mrf.mxu0 }
0x1958   :  { %v2614_v40 = vadd.f32 %v3669_v4, %v2613_v3 }
0x1959   :  { %v3091_v32 = vpop.f32.mrf.mxu0 }
0x195a   :  { %v2617_v14 = vmax.f32 %v2614_v40, 0.0 }
0x195c   :  { %3125 = vmatmul.mubr.f32.vlgmr.msra.gmra.mxu1 %v2617_v14 }
0x1a1c   :  { %v2684_v52 = vpop.f32.mrf.mxu1 }
0x1a1d   :  { %v2685_v53 = vadd.f32 %v2735_v63, %v2684_v52 }
0x1a1e   :  { %v3126_v54 = vpop.f32.mrf.mxu1 }
0x1a1f   :  { %v2688_v55 = vadd.f32 %v2685_v53, %v2543_v2 }
0x1a21   :  { %v2689_v56 = vsel %vm98_vm1, %v2688_v55, 0.0 }
0x1a22   :  { %2690 = vadd.xlane.f32.xlu0 %v2689_v56 }
0x1a26   :  { %1405 = vadd.xlane.f32.xlu0 %v1404_v30 }
0x1aab   :  { %v2691_v57 = vpop.xlane.xlu0 %2690 }
0x1aac   :  { %v2692_v24 = vmul.f32 0.03125, %v2691_v57 }
0x1aae   :  { %v2693_v4 = vsub.f32 %v2688_v55, %v2692_v24 }
0x1aaf   :  { %v1406_v25 = vpop.xlane.xlu0 %1405 }
0x1ab0   :  { %v1407_v26 = vmul.f32 0.03125, %v1406_v25  ;;  %v2694_v27 = vmul.f32 %v2693_v4, %v2693_v4 }
0x1ab2   :  { %v1408_v39 = vadd.f32 1e-05, %v1407_v26  ;;  %v2695_v29 = vsel %vm98_vm1, %v2694_v27, 0.0 }
0x1ab3   :  { %2696 = vadd.xlane.f32.xlu0 %v2695_v29 }
0x1ab4   :  { %3172 = vrsqrt.f32 %v1408_v39 }
0x1ac1   :  { %v3173_v31 = vpop.eup %3172 }
0x1ac2   :  { %v1410_v7 = vmul.f32 %v3173_v31, %v1402_v22 }
0x1ac4   :  { %v1417_v9 = vmul.f32 %v2736_v6, %v1410_v7 }
0x1ac6   :  { %v1424_v45 = vadd.f32 %v2737_v8, %v1417_v9 }
0x1ac8   :  { %1425 = vst.msk [vmem:[%s3852_s15] sm:$0xff] %vm98_vm1, %v1424_v45 }
0x1b3c   :  { %v2697_v35 = vpop.xlane.xlu0 %2696 }
0x1b3d   :  { %v2698_v34 = vmul.f32 0.03125, %v2697_v35 }
0x1b3f   :  { %v2699_v36 = vadd.f32 1e-05, %v2698_v34 }
0x1b41   :  { %3174 = vrsqrt.f32 %v2699_v36 }
0x1b4e   :  { %v3175_v15 = vpop.eup %3174 }
0x1b4f   :  { %v2701_v38 = vmul.f32 %v3175_v15, %v2693_v4 }
0x1b51   :  { %v2702_v41 = vmul.f32 %v2736_v6, %v2701_v38 }
0x1b53   :  { %v2703_v12 = vadd.f32 %v2737_v8, %v2702_v41 }
0x1b55   :  { %2758 = vst.msk [vmem:[%s3852_s15 + $0x8] sm:$0xff] %vm98_vm1, %v2703_v12 }

// kernel: transformer_seq2seq_de_forward.10
= control target key start
LH: loop header
LB: loop body
LE: loop exit
PB: predicated region body
PF: predicated region fallthrough
CT: control target
= control target key end

     0   :  { %s6878_s0 = inlined_call_operand.vmem [shape: f32[2,8,32], index: 0, kind: input, shape index: {}]   ;;  %s6879_s1 = inlined_call_operand.vmem [shape: f32[2,8,32], index: 1, kind: input, shape index: {}]   ;;  %s6880_s2 = inlined_call_operand.vmem [shape: f32[32,32], index: 2, kind: input, shape index: {}]   ;;  %s6881_s3 = inlined_call_operand.vmem [shape: f32[1,32], index: 3, kind: input, shape index: {}]   ;;  %s6882_s4 = inlined_call_operand.vmem [shape: f32[32,64], index: 4, kind: input, shape index: {}]   ;;  %s6883_s5 = inlined_call_operand.vmem [shape: f32[1,64], index: 5, kind: input, shape index: {}]   ;;  %s6884_s6 = inlined_call_operand.vmem [shape: f32[32,32], index: 6, kind: input, shape index: {}]   ;;  %s6885_s7 = inlined_call_operand.vmem [shape: f32[1,32], index: 7, kind: input, shape index: {}]   ;;  %s6886_s8 = inlined_call_operand.vmem [shape: f32[1,32], index: 8, kind: input, shape index: {}]   ;;  %s6887_s9 = inlined_call_operand.vmem [shape: f32[1,32], index: 9, kind: input, shape index: {}]   ;;  %s6888_s10 = inlined_call_operand.vmem [shape: f32[32,32], index: 10, kind: input, shape index: {}]   ;;  %s6889_s11 = inlined_call_operand.vmem [shape: f32[1,32], index: 11, kind: input, shape index: {}]   ;;  %s6890_s12 = inlined_call_operand.vmem [shape: f32[32,64], index: 12, kind: input, shape index: {}]   ;;  %s6891_s13 = inlined_call_operand.vmem [shape: f32[1,64], index: 13, kind: input, shape index: {}]   ;;  %s6892_s14 = inlined_call_operand.vmem [shape: f32[32,32], index: 14, kind: input, shape index: {}]   ;;  %s6893_s15 = inlined_call_operand.vmem [shape: f32[1,32], index: 15, kind: input, shape index: {}]   ;;  %s6894_s16 = inlined_call_operand.vmem [shape: f32[1,32], index: 16, kind: input, shape index: {}]   ;;  %s6895_s17 = inlined_call_operand.vmem [shape: f32[1,32], index: 17, kind: input, shape index: {}]   ;;  %s6896_s18 = inlined_call_operand.vmem [shape: f32[32,64], index: 18, kind: input, shape index: {}]   ;;  %s6897_s19 = inlined_call_operand.hbm [shape: f32[1,64], index: 19, kind: input, shape index: {}]   ;;  %s6898_s20 = inlined_call_operand.vmem [shape: f32[64,32], index: 20, kind: input, shape index: {}]   ;;  %s6899_s21 = inlined_call_operand.hbm [shape: f32[1,32], index: 21, kind: input, shape index: {}]   ;;  %s6900_s22 = inlined_call_operand.hbm [shape: f32[1,32], index: 22, kind: input, shape index: {}]   ;;  %s6901_s23 = inlined_call_operand.hbm [shape: f32[1,32], index: 23, kind: input, shape index: {}]   ;;  %s6902_s24 = inlined_call_operand.vmem [shape: f32[2,8,32], index: 24, kind: output, shape index: {}]  }
   0x1   :  { %6908 = sst [smem:[#allocation12_spill]] %s6878_s0 }
   0x2   :  { %6909 = sst [smem:[#allocation13_spill]] %s6879_s1 }
   0x3   :  { %6910 = sst [smem:[#allocation14_spill]] %s6880_s2 }
   0x4   :  { %6911 = sst [smem:[#allocation15_spill]] %s6881_s3 }
   0x5   :  { %6912 = sst [smem:[#allocation16_spill]] %s6882_s4 }
   0x6   :  { %6913 = sst [smem:[#allocation17_spill]] %s6883_s5 }
   0x7   :  { %6914 = sst [smem:[#allocation18_spill]] %s6884_s6 }
   0x8   :  { %6915 = sst [smem:[#allocation19_spill]] %s6885_s7 }
   0x9   :  { %6916 = sst [smem:[#allocation20_spill]] %s6886_s8 }
   0xa   :  { %29 = vsyncpa [#allocation3], 0 }
   0xb   :  { %30 = vsyncpa [#allocation5], 0 }
   0xc   :  { %31 = vsyncpa [#allocation8], 0  ;;  %s5906_s5 = smov [#allocation4]   ;;  %s5907_s27 = smov [#allocation2]  }
   0xd   :  { %s88_s26 = sshll.u32 %s5906_s5, 4  ;;  %s76_s28 = sshll.u32 %s5907_s27, 4  ;;  %s89_s26 = int_to_ptr.vmem [resolvable:$true] %s88_s26  ;;  %s77_s28 = int_to_ptr.vmem [resolvable:$true] %s76_s28 }
   0xe   :  { %s5828_s6 = scalar_lea.vmem %s89_s26, 16  ;;  %s5832_s2 = scalar_lea.vmem %s89_s26, 32 }
   0xf   :  { %p5829_p0 = scmp.ne.s32.totalorder %s89_s26, %s5828_s6  ;;  %p5833_p1 = scmp.lt.s32.totalorder %s89_s26, %s89_s26 }
  0x10   :  { %p5834_p2 = scmp.lt.s32.totalorder %s5832_s2, %s5828_s6 }
  0x12   :  { %p5835_p3 = por %p5834_p2, %p5833_p1 }
  0x14   :  { %p5836_p4 = pnand %p5835_p3, %p5829_p0 }
  0x16   :  { %5839 = shalt.err (!%p5836_p4)
}
  0x17   :  { %91 = dma.hbm_to_vmem [thread:$0]  %s6899_s21, 16, %s89_s26, [#allocation5]  }
  0x18   :  { %s5848_s7 = scalar_lea.vmem %s77_s28, 16  ;;  %s5852_s30 = scalar_lea.vmem %s77_s28, 32 }
  0x19   :  { %p5849_p5 = scmp.ne.s32.totalorder %s77_s28, %s5848_s7  ;;  %p5853_p6 = scmp.lt.s32.totalorder %s77_s28, %s77_s28 }
  0x1a   :  { %p5854_p7 = scmp.lt.s32.totalorder %s5852_s30, %s5848_s7 }
  0x1c   :  { %p5855_p8 = por %p5854_p7, %p5853_p6 }
  0x1e   :  { %p5856_p9 = pnand %p5855_p8, %p5849_p5 }
  0x20   :  { %5859 = shalt.err (!%p5856_p9)
}
  0x21   :  { %79 = dma.hbm_to_vmem [thread:$0]  %s6897_s19, 16, %s77_s28, [#allocation3]  }
  0x22   :  { %s5908_s8 = smov [#allocation6]   ;;  %s5909_s1 = smov [#allocation7]  }
  0x23   :  { %s98_s4 = sshll.u32 %s5908_s8, 4  ;;  %s108_s5 = sshll.u32 %s5909_s1, 4  ;;  %s99_s4 = int_to_ptr.vmem [resolvable:$true] %s98_s4  ;;  %s109_s5 = int_to_ptr.vmem [resolvable:$true] %s108_s5 }
  0x24   :  { %s5868_s27 = scalar_lea.vmem %s99_s4, 16  ;;  %s5872_s21 = scalar_lea.vmem %s99_s4, 32 }
  0x25   :  { %p5869_p10 = scmp.ne.s32.totalorder %s99_s4, %s5868_s27  ;;  %p5873_p11 = scmp.lt.s32.totalorder %s99_s4, %s99_s4 }
  0x26   :  { %p5874_p12 = scmp.lt.s32.totalorder %s5872_s21, %s5868_s27 }
  0x28   :  { %p5875_p13 = por %p5874_p12, %p5873_p11 }
  0x2a   :  { %p5876_p0 = pnand %p5875_p13, %p5869_p10 }
  0x2c   :  { %5879 = shalt.err (!%p5876_p0)
}
  0x2d   :  { %101 = dma.hbm_to_vmem [thread:$0]  %s6900_s22, 16, %s99_s4, [#allocation5]  }
  0x2e   :  { %s5888_s2 = scalar_lea.vmem %s109_s5, 16  ;;  %s5892_s19 = scalar_lea.vmem %s109_s5, 32 }
  0x2f   :  { %p5889_p1 = scmp.ne.s32.totalorder %s109_s5, %s5888_s2  ;;  %p5893_p2 = scmp.lt.s32.totalorder %s109_s5, %s109_s5 }
  0x30   :  { %p5894_p3 = scmp.lt.s32.totalorder %s5892_s19, %s5888_s2 }
  0x32   :  { %p5895_p4 = por %p5894_p3, %p5893_p2 }
  0x34   :  { %p5896_p5 = pnand %p5895_p4, %p5889_p1 }
  0x36   :  { %5899 = shalt.err (!%p5896_p5)
}
  0x37   :  { %111 = dma.hbm_to_vmem [thread:$0]  %s6901_s23, 16, %s109_s5, [#allocation8]  }
  0x38   :  { %5900 = dma.done.wait [#allocation3], 16  }
  0x39   :  { %5901 = vsyncadd [#allocation3], 4294967280 }
  0x3a   :  { %5902 = dma.done.wait [#allocation5], 32  }
  0x3b   :  { %5903 = vsyncadd [#allocation5], 4294967264 }
  0x3c   :  { %5904 = dma.done.wait [#allocation8], 16  }
  0x3d   :  { %5905 = vsyncadd [#allocation8], 4294967280  ;;  %v5910_v0 = vmov 0.0   ;;  %vm5911_vm0 = vmmov 0   ;;  %s6917_s0 = sld [smem:[#allocation16_spill]]  ;;  %vm182_vm1 = vcmask 261120  }
  0x3e   :  { %5350 = vmatprep.subr.mxu1 %v5910_v0  ;;  %5339 = vmatprep.subr.mxu0 %v5910_v0  ;;  %s6918_s3 = sld [smem:[#allocation14_spill]]  ;;  %vm332_vm2 = vcmask 64512   ;;  %s5912_s4 = smov 96   ;;  %vm2564_vm3 = vcmask 523264  }
  0x3f   :  { %5358 = vmatprep.mubr.msk.f32.mxu1 %vm5911_vm0, %v5910_v0  ;;  %5347 = vmatprep.mubr.msk.f32.mxu0 %vm5911_vm0, %v5910_v0  ;;  %s6919_s23 = sld [smem:[#allocation12_spill]]  ;;  %s5913_s1 = smov 120  }
  0x40   :  { %s6920_s30 = sld [smem:[#allocation17_spill]]  ;;  %s5914_s5 = smov 88  }
  0x41   :  { %s6921_s8 = sld [smem:[#allocation15_spill]]  ;;  %s5915_s27 = smov 112  }
  0x42   :  { %s6922_s6 = sld [smem:[#allocation18_spill]]  ;;  %s5916_s28 = smov 80  }
  0x43   :  { %v6065_v1 = vld [vmem:[%s6917_s0 + $0x18] sm:$0xff]  ;;  %v6075_v3 = vld [vmem:[%s6917_s0 + $0x10] sm:$0xff]  ;;  %v6089_v5 = vld [vmem:[%s6917_s0 + $0x8] sm:$0xff]  ;;  %s5917_s29 = smov 104   ;;  %s5918_s7 = smov 72  }
  0x44   :  { %v6070_v2 = vld [vmem:[%s6918_s3 + $0x18] sm:$0xff]  ;;  %5351 = vmatpush3.msra.mxu1 %v6065_v1  ;;  %v6082_v4 = vld [vmem:[%s6918_s3 + $0x10] sm:$0xff]  ;;  %v6094_v6 = vld [vmem:[%s6918_s3 + $0x8] sm:$0xff]  ;;  %s6923_s21 = sld [smem:[#allocation19_spill]] }
  0x45   :  { %5340 = vmatpush3.msra.mxu0 %v6070_v2  ;;  %5352 = vmatprep.subr.mxu1 %v5910_v0  ;;  %v6103_v7 = vld [vmem:[%s6917_s0] sm:$0xff]  ;;  %s6924_s19 = sld [smem:[#allocation13_spill]] }
  0x46   :  { %5341 = vmatprep.subr.mxu0 %v5910_v0  ;;  %5353 = vmatpush3.msra.mxu1 %v6075_v3  ;;  %v6108_v8 = vld [vmem:[%s6918_s3] sm:$0xff]  ;;  %s6925_s25 = sld [smem:[#allocation20_spill]] }
  0x47   :  { %5342 = vmatpush3.msra.mxu0 %v6082_v4  ;;  %5354 = vmatprep.subr.mxu1 %v5910_v0  ;;  %v6115_v9 = vld [vmem:[%s6919_s23] sm:$0xff] }
  0x48   :  { %5343 = vmatprep.subr.mxu0 %v5910_v0  ;;  %5355 = vmatpush3.msra.mxu1 %v6089_v5  ;;  %v6134_v10 = vld [vmem:[%s6920_s30] ss:$0 sm:$0xff]  ;;  %v6183_v45 = vld [vmem:[%s6922_s6 + $0x8] sm:$0xff] }
  0x49   :  { %5344 = vmatpush3.msra.mxu0 %v6094_v6  ;;  %5356 = vmatprep.subr.mxu1 %v5910_v0  ;;  %v6139_v11 = vld [vmem:[%s6921_s8] ss:$0 sm:$0xff] }
  0x4a   :  { %5345 = vmatprep.subr.mxu0 %v5910_v0  ;;  %5357 = vmatpush3.msra.mxu1 %v6103_v7  ;;  %v6190_v49 = vld [vmem:[%s6922_s6] sm:$0xff] }
  0x4b   :  { %5346 = vmatpush3.msra.mxu0 %v6108_v8  ;;  %5359 = vmatmul.mubr.msk.f32.vlgmr.msra.gmra.mxu1 %vm182_vm1, %v6115_v9 }
  0x4c   :  { %5348 = vmatmul.mubr.msk.f32.vlgmr.msra.gmra.mxu0 %vm182_vm1, %v6115_v9  ;;  %5361 = vmatprep.subr.mxu0 %v5910_v0 }
  0x4d   :  { %5363 = vmatprep.mubr.msk.f32.mxu0 %vm5911_vm0, %v5910_v0  ;;  %5376 = vmatprep.subr.mxu1 %v5910_v0 }
  0x4e   :  { %5378 = vmatprep.mubr.msk.f32.mxu1 %vm5911_vm0, %v5910_v0 }
 0x10b   :  { %v328_v12 = vpop.f32.mrf.mxu1 }
 0x10c   :  { %v252_v13 = vpop.f32.mrf.mxu0  ;;  %v6142_v14 = vadd.f32 %v6134_v10, %v328_v12 }
 0x10d   :  { %v6145_v15 = vadd.f32 %v6139_v11, %v252_v13  ;;  %v5360_v16 = vpop.f32.mrf.mxu1 }
 0x10e   :  { %v5349_v17 = vpop.f32.mrf.mxu0  ;;  %421 = vrot.lane.b32.xlu1 %v6142_v14, %s5912_s4  ;;  %5362 = vmatpush3.xpose.msk.msra.mxu0 %vm332_vm2, %v6142_v14 }
 0x10f   :  { %5366 = vmatprep.subr.mxu0 %v5910_v0 }
 0x111   :  { %5364 = vmatmul.mubr.msk.f32.vlgmr.msra.gmra.mxu0 %vm332_vm2, %v6145_v15 }
 0x112   :  { %499 = vrot.lane.b32.xlu1 %v6142_v14, %s5913_s1  ;;  %5368 = vmatprep.mubr.msk.f32.mxu0 %vm5911_vm0, %v5910_v0 }
 0x180   :  { %v422_v18 = vpop.permute.xlu1 %421 }
 0x181   :  { %5367 = vmatpush3.msra.mxu0 %v422_v18 }
 0x182   :  { %5371 = vmatprep.subr.mxu0 %v5910_v0 }
 0x184   :  { %v500_v31 = vpop.permute.xlu1 %499 }
 0x1d1   :  { %v405_v19 = vpop.f32.mrf.mxu0 }
 0x1d2   :  { %v409_v20 = vmul.f32 0.35355338, %v405_v19 }
 0x1d3   :  { %v5365_v21 = vpop.f32.mrf.mxu0 }
 0x1d4   :  { %v410_v22 = vsel %vm332_vm2, %v409_v20, -inf }
 0x1d5   :  { %411 = vmax.xlane.f32.xlu0 %v410_v22  ;;  %v6230_v22 = vld [vmem:[%s6922_s6 + $0x10] sm:$0xff] }
 0x25e   :  { %v412_v23 = vpop.xlane.xlu0 %411 }
 0x25f   :  { %v413_v24 = vsub.f32 %v409_v20, %v412_v23 }
 0x261   :  { %v414_v25 = vmul.f32 1.442695, %v413_v24 }
 0x263   :  { %5740 = vpow2.f32 %v414_v25 }
 0x270   :  { %v5741_v26 = vpop.eup %5740 }
 0x271   :  { %v416_v27 = vsel %vm332_vm2, %v5741_v26, 0.0 }
 0x272   :  { %417 = vadd.xlane.f32.xlu0 %v416_v27 }
 0x288   :  { %497 = vrot.lane.b32.xlu0 %v6145_v15, %s5913_s1 }
 0x2fb   :  { %v418_v28 = vpop.xlane.xlu0 %417 }
 0x2fc   :  { %5742 = vrcp.f32 %v418_v28 }
 0x2ff   :  { %v498_v32 = vpop.permute.xlu0 %497 }
 0x309   :  { %v5743_v29 = vpop.eup %5742 }
 0x30a   :  { %v420_v30 = vmul.f32 %v5743_v29, %v5741_v26 }
 0x30c   :  { %5369 = vmatmul.mubr.msk.f32.vlgmr.msra.gmra.mxu0 %vm332_vm2, %v420_v30 }
 0x30d   :  { %5372 = vmatpush3.xpose.msk.msra.mxu0 %vm332_vm2, %v500_v31  ;;  %5373 = vmatprep.mubr.msk.f32.mxu0 %vm5911_vm0, %v5910_v0 }
 0x30e   :  { %5381 = vmatprep.subr.mxu0 %v5910_v0 }
 0x310   :  { %5374 = vmatmul.mubr.msk.f32.vlgmr.msra.gmra.mxu0 %vm332_vm2, %v498_v32 }
 0x311   :  { %5383 = vmatprep.mubr.msk.f32.mxu0 %vm5911_vm0, %v5910_v0  ;;  %5382 = vmatpush3.msra.mxu0 %v6183_v45 }
 0x312   :  { %5391 = vmatprep.subr.mxu0 %v5910_v0 }
 0x3cc   :  { %v493_v33 = vpop.f32.mrf.mxu0 }
 0x3ce   :  { %v5370_v34 = vpop.f32.mrf.mxu0 }
 0x3d0   :  { %v571_v35 = vpop.f32.mrf.mxu0 }
 0x3d1   :  { %v575_v36 = vmul.f32 0.35355338, %v571_v35  ;;  %v6245_v35 = vld [vmem:[%s6922_s6 + $0x18] sm:$0xff] }
 0x3d2   :  { %v5375_v37 = vpop.f32.mrf.mxu0 }
 0x3d3   :  { %v576_v38 = vsel %vm332_vm2, %v575_v36, -inf }
 0x3d4   :  { %577 = vmax.xlane.f32.xlu1 %v576_v38 }
 0x3e5   :  { %587 = vrot.lane.b32.xlu1 %v6142_v14, %s5914_s5 }
 0x3e9   :  { %809 = vrot.lane.b32.xlu1 %v6145_v15, %s5915_s27 }
 0x45d   :  { %v578_v39 = vpop.xlane.xlu1 %577 }
 0x45e   :  { %v579_v40 = vsub.f32 %v575_v36, %v578_v39 }
 0x460   :  { %v580_v41 = vmul.f32 1.442695, %v579_v40 }
 0x461   :  { %v588_v42 = vpop.permute.xlu1 %587 }
 0x462   :  { %5744 = vpow2.f32 %v580_v41  ;;  %5377 = vmatpush3.msra.mxu1 %v588_v42 }
 0x463   :  { %5386 = vmatprep.subr.mxu1 %v5910_v0 }
 0x465   :  { %v810_v53 = vpop.permute.xlu1 %809 }
 0x46f   :  { %v5745_v43 = vpop.eup %5744 }
 0x470   :  { %v582_v44 = vsel %vm332_vm2, %v5745_v43, 0.0 }
 0x471   :  { %583 = vadd.xlane.f32.xlu0 %v582_v44  ;;  %v6259_v44 = vld [vmem:[%s6923_s21] ss:$0 sm:$0xff] }
 0x487   :  { %811 = vrot.lane.b32.xlu0 %v6142_v14, %s5915_s27 }
 0x4fa   :  { %v584_v46 = vpop.xlane.xlu0 %583 }
 0x4fb   :  { %5746 = vrcp.f32 %v584_v46 }
 0x4fe   :  { %v812_v51 = vpop.permute.xlu0 %811 }
 0x508   :  { %v5747_v47 = vpop.eup %5746 }
 0x509   :  { %v586_v48 = vmul.f32 %v5747_v47, %v5745_v43 }
 0x50b   :  { %5379 = vmatmul.mubr.msk.f32.vlgmr.msra.gmra.mxu1 %vm332_vm2, %v586_v48 }
 0x50c   :  { %5387 = vmatpush3.msra.mxu1 %v6190_v49  ;;  %5388 = vmatprep.mubr.msk.f32.mxu1 %vm5911_vm0, %v5910_v0 }
 0x50d   :  { %5396 = vmatprep.subr.mxu1 %v5910_v0 }
 0x50f   :  { %5389 = vmatmul.mubr.msk.f32.vlgmr.msra.gmra.mxu1 %vm332_vm2, %v493_v33 }
 0x510   :  { %5398 = vmatprep.mubr.msk.f32.mxu1 %vm5911_vm0, %v5910_v0 }
 0x5cb   :  { %v659_v50 = vpop.f32.mrf.mxu1 }
 0x5cc   :  { %5384 = vmatmul.mubr.msk.f32.vlgmr.msra.gmra.mxu0 %vm332_vm2, %v659_v50 }
 0x5cd   :  { %5392 = vmatpush3.xpose.msk.msra.mxu0 %vm332_vm2, %v812_v51  ;;  %v5380_v52 = vpop.f32.mrf.mxu1  ;;  %5393 = vmatprep.mubr.msk.f32.mxu0 %vm5911_vm0, %v5910_v0 }
 0x5ce   :  { %5401 = vmatprep.subr.mxu0 %v5910_v0 }
 0x5cf   :  { %v6205_v54 = vpop.f32.mrf.mxu1 }
 0x5d0   :  { %5394 = vmatmul.mubr.msk.f32.vlgmr.msra.gmra.mxu0 %vm332_vm2, %v810_v53 }
 0x5d1   :  { %v5390_v55 = vpop.f32.mrf.mxu1  ;;  %5403 = vmatprep.mubr.msk.f32.mxu0 %vm5911_vm0, %v5910_v0  ;;  %5402 = vmatpush3.msra.mxu0 %v6230_v22 }
 0x5d2   :  { %5411 = vmatprep.subr.mxu0 %v5910_v0 }
 0x68c   :  { %v732_v56 = vpop.f32.mrf.mxu0 }
 0x68d   :  { %v806_v36 = vadd.f32 %v6205_v54, %v732_v56 }
 0x68e   :  { %v5385_v57 = vpop.f32.mrf.mxu0 }
 0x690   :  { %v883_v58 = vpop.f32.mrf.mxu0 }
 0x691   :  { %v887_v59 = vmul.f32 0.35355338, %v883_v58  ;;  %v6268_v58 = vld [vmem:[%s6890_s12 + $0x18] sm:$0xff] }
 0x692   :  { %v5395_v60 = vpop.f32.mrf.mxu0 }
 0x693   :  { %v888_v61 = vsel %vm332_vm2, %v887_v59, -inf  ;;  %v6288_v60 = vld [vmem:[%s6888_s10 + $0x18] sm:$0xff] }
 0x694   :  { %889 = vmax.xlane.f32.xlu1 %v888_v61  ;;  %v6295_v61 = vld [vmem:[%s6890_s12] sm:$0xff] }
 0x6a5   :  { %899 = vrot.lane.b32.xlu1 %v6142_v14, %s5916_s28 }
 0x6a9   :  { %1049 = vrot.lane.b32.xlu1 %v6145_v15, %s5917_s29 }
 0x71d   :  { %v890_v62 = vpop.xlane.xlu1 %889 }
 0x71e   :  { %v891_v63 = vsub.f32 %v887_v59, %v890_v62  ;;  %v6282_v59 = vld [vmem:[%s6890_s12 + $0x8] sm:$0xff]  ;;  %v6300_v62 = vld [vmem:[%s6888_s10 + $0x10] sm:$0xff] }
 0x720   :  { %v892_v12 = vmul.f32 1.442695, %v891_v63  ;;  %v175_v63 = vld [vmem:[%s6924_s19] sm:$0xff] }
 0x721   :  { %v900_v13 = vpop.permute.xlu1 %899 }
 0x722   :  { %5748 = vpow2.f32 %v892_v12  ;;  %5397 = vmatpush3.msra.mxu1 %v900_v13  ;;  %v6310_v12 = vld [vmem:[%s6888_s10 + $0x8] sm:$0xff]  ;;  %v6318_v13 = vld [vmem:[%s6888_s10] sm:$0xff] }
 0x723   :  { %5406 = vmatprep.subr.mxu1 %v5910_v0 }
 0x725   :  { %v1050_v21 = vpop.permute.xlu1 %1049 }
 0x72f   :  { %v5749_v16 = vpop.eup %5748 }
 0x730   :  { %v894_v17 = vsel %vm332_vm2, %v5749_v16, 0.0 }
 0x731   :  { %895 = vadd.xlane.f32.xlu0 %v894_v17 }
 0x747   :  { %1051 = vrot.lane.b32.xlu0 %v6142_v14, %s5917_s29 }
 0x7ba   :  { %v896_v18 = vpop.xlane.xlu0 %895 }
 0x7bb   :  { %5750 = vrcp.f32 %v896_v18 }
 0x7be   :  { %v1052_v15 = vpop.permute.xlu0 %1051 }
 0x7c8   :  { %v5751_v19 = vpop.eup %5750 }
 0x7c9   :  { %v898_v20 = vmul.f32 %v5751_v19, %v5749_v16 }
 0x7cb   :  { %5399 = vmatmul.mubr.msk.f32.vlgmr.msra.gmra.mxu1 %vm332_vm2, %v898_v20  ;;  %v6330_v20 = vld [vmem:[%s6925_s25] ss:$0 sm:$0xff] }
 0x7cc   :  { %5407 = vmatpush3.xpose.msk.msra.mxu1 %vm332_vm2, %v1052_v15  ;;  %5408 = vmatprep.mubr.msk.f32.mxu1 %vm5911_vm0, %v5910_v0 }
 0x7cd   :  { %5416 = vmatprep.subr.mxu1 %v5910_v0 }
 0x7cf   :  { %5409 = vmatmul.mubr.msk.f32.vlgmr.msra.gmra.mxu1 %vm332_vm2, %v1050_v21  ;;  %v6335_v21 = vld [vmem:[%s6887_s9] ss:$0 sm:$0xff] }
 0x7d0   :  { %5418 = vmatprep.mubr.msk.f32.mxu1 %vm5911_vm0, %v5910_v0  ;;  %5417 = vmatpush3.msra.mxu1 %v6245_v35 }
 0x7d1   :  { %5432 = vmatprep.subr.mxu1 %v5910_v0 }
 0x88b   :  { %v971_v23 = vpop.f32.mrf.mxu1 }
 0x88c   :  { %5404 = vmatmul.mubr.msk.f32.vlgmr.msra.gmra.mxu0 %vm332_vm2, %v971_v23 }
 0x88d   :  { %v5400_v24 = vpop.f32.mrf.mxu1  ;;  %5413 = vmatprep.mubr.msk.f32.mxu0 %vm5911_vm0, %v5910_v0 }
 0x88f   :  { %v1123_v25 = vpop.f32.mrf.mxu1 }
 0x890   :  { %v1127_v26 = vmul.f32 0.35355338, %v1123_v25  ;;  %v6348_v25 = vld [vmem:[%s6891_s13] ss:$0 sm:$0xff] }
 0x891   :  { %v5410_v27 = vpop.f32.mrf.mxu1 }
 0x892   :  { %v1128_v28 = vsel %vm332_vm2, %v1127_v26, -inf }
 0x893   :  { %1129 = vmax.xlane.f32.xlu1 %v1128_v28 }
 0x8a4   :  { %1139 = vrot.lane.b32.xlu1 %v6142_v14, %s5918_s7 }
 0x91c   :  { %v1130_v29 = vpop.xlane.xlu1 %1129 }
 0x91d   :  { %v1131_v30 = vsub.f32 %v1127_v26, %v1130_v29  ;;  %v6361_v29 = vld [vmem:[%s6889_s11] ss:$0 sm:$0xff] }
 0x91f   :  { %v1132_v31 = vmul.f32 1.442695, %v1131_v30 }
 0x920   :  { %v1140_v32 = vpop.permute.xlu1 %1139 }
 0x921   :  { %5752 = vpow2.f32 %v1132_v31  ;;  %5412 = vmatpush3.msra.mxu0 %v1140_v32 }
 0x922   :  { %5421 = vmatprep.subr.mxu0 %v5910_v0 }
 0x92e   :  { %v5753_v33 = vpop.eup %5752 }
 0x92f   :  { %v1134_v34 = vsel %vm332_vm2, %v5753_v33, 0.0 }
 0x930   :  { %1135 = vadd.xlane.f32.xlu0 %v1134_v34 }
 0x94c   :  { %v1044_v14 = vpop.f32.mrf.mxu0 }
 0x94d   :  { %v1048_v37 = vadd.f32 %v1044_v14, %v806_v36 }
 0x94e   :  { %v5405_v38 = vpop.f32.mrf.mxu0 }
 0x9b9   :  { %v1136_v39 = vpop.xlane.xlu0 %1135 }
 0x9ba   :  { %5754 = vrcp.f32 %v1136_v39 }
 0x9c7   :  { %v5755_v40 = vpop.eup %5754 }
 0x9c8   :  { %v1138_v41 = vmul.f32 %v5755_v40, %v5753_v33 }
 0x9ca   :  { %5414 = vmatmul.mubr.msk.f32.vlgmr.msra.gmra.mxu0 %vm332_vm2, %v1138_v41 }
 0x9cb   :  { %5429 = vmatprep.mubr.msk.f32.mxu0 %vm5911_vm0, %v5910_v0  ;;  %5422 = vmatpush3.msra.mxu0 %v6288_v60 }
 0x9cc   :  { %5423 = vmatprep.subr.mxu0 %v5910_v0 }
 0x9cd   :  { %5424 = vmatpush3.msra.mxu0 %v6300_v62 }
 0x9ce   :  { %5425 = vmatprep.subr.mxu0 %v5910_v0 }
 0x9cf   :  { %5426 = vmatpush3.msra.mxu0 %v6310_v12 }
 0x9d0   :  { %5427 = vmatprep.subr.mxu0 %v5910_v0 }
 0x9d1   :  { %5428 = vmatpush3.msra.mxu0 %v6318_v13 }
 0x9d2   :  { %5443 = vmatprep.subr.mxu0 %v5910_v0 }
 0xa8a   :  { %v1211_v42 = vpop.f32.mrf.mxu0 }
 0xa8b   :  { %5419 = vmatmul.mubr.msk.f32.vlgmr.msra.gmra.mxu1 %vm332_vm2, %v1211_v42 }
 0xa8c   :  { %v5415_v43 = vpop.f32.mrf.mxu0  ;;  %5440 = vmatprep.mubr.msk.f32.mxu1 %vm5911_vm0, %v5910_v0  ;;  %5433 = vmatpush3.msra.mxu1 %v6268_v58 }
 0xa8d   :  { %5434 = vmatprep.subr.mxu1 %v5910_v0 }
 0xb4b   :  { %v1284_v46 = vpop.f32.mrf.mxu1 }
 0xb4c   :  { %v1288_v47 = vadd.f32 %v1284_v46, %v1048_v37 }
 0xb4d   :  { %v5420_v48 = vpop.f32.mrf.mxu1 }
 0xb4e   :  { %v1295_v50 = vadd.f32 %v6259_v44, %v1288_v47 }
 0xb50   :  { %v1296_v51 = vadd.f32 %v1295_v50, %v6115_v9  ;;  %v6275_v9 = vld [vmem:[%s6890_s12 + $0x10] sm:$0xff] }
 0xb51   :  { %5435 = vmatpush3.msra.mxu1 %v6275_v9 }
 0xb52   :  { %v1297_v52 = vsel %vm182_vm1, %v1296_v51, 0.0  ;;  %5436 = vmatprep.subr.mxu1 %v5910_v0 }
 0xb53   :  { %1298 = vadd.xlane.f32.xlu0 %v1297_v52  ;;  %5437 = vmatpush3.msra.mxu1 %v6282_v59 }
 0xb54   :  { %5438 = vmatprep.subr.mxu1 %v5910_v0 }
 0xb55   :  { %5439 = vmatpush3.msra.mxu1 %v6295_v61 }
 0xb56   :  { %5441 = vmatmul.mubr.msk.f32.vlgmr.msra.gmra.mxu1 %vm182_vm1, %v175_v63  ;;  %5448 = vmatprep.subr.mxu1 %v5910_v0 }
 0xb57   :  { %5450 = vmatprep.mubr.msk.f32.mxu1 %vm5911_vm0, %v5910_v0 }
 0xbdc   :  { %v1299_v53 = vpop.xlane.xlu0 %1298 }
 0xbdd   :  { %v1301_v54 = vmul.f32 0.03125, %v1299_v53 }
 0xbdf   :  { %v1302_v55 = vsub.f32 %v1296_v51, %v1301_v54 }
 0xbe1   :  { %v1303_v56 = vmul.f32 %v1302_v55, %v1302_v55 }
 0xbe3   :  { %v1304_v57 = vsel %vm182_vm1, %v1303_v56, 0.0 }
 0xbe4   :  { %1305 = vadd.xlane.f32.xlu0 %v1304_v57 }
 0xc16   :  { %v1479_v26 = vpop.f32.mrf.mxu1 }
 0xc17   :  { %v6351_v27 = vadd.f32 %v6348_v25, %v1479_v26  ;;  %v6406_v26 = vld [vmem:[%s6892_s14 + $0x8] sm:$0xff] }
 0xc18   :  { %v5442_v28 = vpop.f32.mrf.mxu1 }
 0xc19   :  { %1649 = vrot.lane.b32.xlu0 %v6351_v27, %s5913_s1 }
 0xc6d   :  { %v1306_v16 = vpop.xlane.xlu0 %1305 }
 0xc6e   :  { %v1307_v17 = vmul.f32 0.03125, %v1306_v16 }
 0xc70   :  { %v1308_v18 = vadd.f32 1e-05, %v1307_v17 }
 0xc72   :  { %5756 = vrsqrt.f32 %v1308_v18 }
 0xc7f   :  { %v5757_v19 = vpop.eup %5756 }
 0xc80   :  { %v1310_v15 = vmul.f32 %v5757_v19, %v1302_v55 }
 0xc82   :  { %v1317_v23 = vmul.f32 %v6330_v20, %v1310_v15 }
 0xc84   :  { %v6339_v24 = vadd.f32 %v6335_v21, %v1317_v23  ;;  %v6400_v23 = vld [vmem:[%s6892_s14] sm:$0xff] }
 0xc86   :  { %5430 = vmatmul.mubr.msk.f32.vlgmr.msra.gmra.mxu0 %vm182_vm1, %v6339_v24 }
 0xc87   :  { %5445 = vmatprep.mubr.msk.f32.mxu0 %vm5911_vm0, %v5910_v0  ;;  %5444 = vmatpush3.xpose.msk.msra.mxu0 %vm332_vm2, %v6351_v27 }
 0xc88   :  { %5453 = vmatprep.subr.mxu0 %v5910_v0 }
 0xc8b   :  { %v1650_v32 = vpop.permute.xlu0 %1649 }
 0xd46   :  { %v1400_v30 = vpop.f32.mrf.mxu0 }
 0xd47   :  { %v6364_v31 = vadd.f32 %v6361_v29, %v1400_v30 }
 0xd48   :  { %v5431_v33 = vpop.f32.mrf.mxu0 }
 0xd49   :  { %1647 = vrot.lane.b32.xlu1 %v6364_v31, %s5913_s1  ;;  %5446 = vmatmul.mubr.msk.f32.vlgmr.msra.gmra.mxu0 %vm332_vm2, %v6364_v31 }
 0xd4a   :  { %5454 = vmatpush3.xpose.msk.msra.mxu0 %vm332_vm2, %v1650_v32  ;;  %5455 = vmatprep.mubr.msk.f32.mxu0 %vm5911_vm0, %v5910_v0 }
 0xd4b   :  { %5463 = vmatprep.subr.mxu0 %v5910_v0 }
 0xdbb   :  { %v1648_v34 = vpop.permute.xlu1 %1647 }
 0xdbc   :  { %5456 = vmatmul.mubr.msk.f32.vlgmr.msra.gmra.mxu0 %vm332_vm2, %v1648_v34 }
 0xdbd   :  { %5465 = vmatprep.mubr.msk.f32.mxu0 %vm5911_vm0, %v5910_v0  ;;  %5464 = vmatpush3.msra.mxu0 %v6406_v26 }
 0xdbe   :  { %5473 = vmatprep.subr.mxu0 %v5910_v0 }
 0xe09   :  { %v1555_v36 = vpop.f32.mrf.mxu0 }
 0xe0a   :  { %v1559_v14 = vmul.f32 0.35355338, %v1555_v36 }
 0xe0b   :  { %v5447_v37 = vpop.f32.mrf.mxu0 }
 0xe0c   :  { %v1560_v38 = vsel %vm332_vm2, %v1559_v14, -inf }
 0xe0d   :  { %1561 = vmax.xlane.f32.xlu1 %v1560_v38 }
 0xe7c   :  { %v1721_v39 = vpop.f32.mrf.mxu0 }
 0xe7d   :  { %v1725_v40 = vmul.f32 0.35355338, %v1721_v39 }
 0xe7e   :  { %v5457_v41 = vpop.f32.mrf.mxu0 }
 0xe7f   :  { %v1726_v42 = vsel %vm332_vm2, %v1725_v40, -inf }
 0xe80   :  { %1727 = vmax.xlane.f32.xlu0 %v1726_v42 }
 0xe96   :  { %v1562_v43 = vpop.xlane.xlu1 %1561  ;;  %1737 = vrot.lane.b32.xlu0 %v6351_v27, %s5914_s5 }
 0xe97   :  { %v1563_v46 = vsub.f32 %v1559_v14, %v1562_v43 }
 0xe99   :  { %v1564_v47 = vmul.f32 1.442695, %v1563_v46 }
 0xe9b   :  { %5758 = vpow2.f32 %v1564_v47 }
 0xea8   :  { %v5759_v48 = vpop.eup %5758 }
 0xea9   :  { %v1566_v50 = vsel %vm332_vm2, %v5759_v48, 0.0 }
 0xeaa   :  { %1567 = vadd.xlane.f32.xlu1 %v1566_v50 }
 0xf09   :  { %v1728_v51 = vpop.xlane.xlu0 %1727 }
 0xf0a   :  { %v1729_v52 = vsub.f32 %v1725_v40, %v1728_v51 }
 0xf0c   :  { %v1730_v53 = vmul.f32 1.442695, %v1729_v52 }
 0xf0d   :  { %v1738_v18 = vpop.permute.xlu0 %1737 }
 0xf0e   :  { %5760 = vpow2.f32 %v1730_v53 }
 0xf1b   :  { %v5761_v54 = vpop.eup %5760 }
 0xf1c   :  { %v1732_v55 = vsel %vm332_vm2, %v5761_v54, 0.0 }
 0xf1d   :  { %1733 = vadd.xlane.f32.xlu1 %v1732_v55 }
 0xf2e   :  { %1571 = vrot.lane.b32.xlu1 %v6351_v27, %s5912_s4 }
 0xf32   :  { %1961 = vrot.lane.b32.xlu1 %v6351_v27, %s5915_s27 }
 0xf33   :  { %v1568_v56 = vpop.xlane.xlu1 %1567 }
 0xf34   :  { %5762 = vrcp.f32 %v1568_v56 }
 0xf36   :  { %1959 = vrot.lane.b32.xlu1 %v6364_v31, %s5915_s27 }
 0xf41   :  { %v5763_v63 = vpop.eup %5762 }
 0xf42   :  { %v1570_v17 = vmul.f32 %v5763_v63, %v5759_v48  ;;  %v6442_v63 = vld [vmem:[%s6892_s14 + $0x10] sm:$0xff] }
 0xfa6   :  { %v1734_v57 = vpop.xlane.xlu1 %1733 }
 0xfa7   :  { %5764 = vrcp.f32 %v1734_v57 }
 0xfaa   :  { %v1572_v16 = vpop.permute.xlu1 %1571 }
 0xfab   :  { %5449 = vmatpush3.msra.mxu1 %v1572_v16 }
 0xfac   :  { %5451 = vmatmul.mubr.msk.f32.vlgmr.msra.gmra.mxu1 %vm332_vm2, %v1570_v17  ;;  %5458 = vmatprep.subr.mxu1 %v5910_v0 }
 0xfad   :  { %5459 = vmatpush3.msra.mxu1 %v1738_v18  ;;  %5460 = vmatprep.mubr.msk.f32.mxu1 %vm5911_vm0, %v5910_v0 }
 0xfae   :  { %5468 = vmatprep.subr.mxu1 %v5910_v0  ;;  %v1962_v32 = vpop.permute.xlu1 %1961 }
 0xfb2   :  { %v1960_v36 = vpop.permute.xlu1 %1959 }
 0xfb4   :  { %v5765_v19 = vpop.eup %5764 }
 0xfb5   :  { %v1736_v15 = vmul.f32 %v5765_v19, %v5761_v54 }
 0xfb7   :  { %5461 = vmatmul.mubr.msk.f32.vlgmr.msra.gmra.mxu1 %vm332_vm2, %v1736_v15 }
 0xfb8   :  { %5470 = vmatprep.mubr.msk.f32.mxu1 %vm5911_vm0, %v5910_v0  ;;  %5469 = vmatpush3.msra.mxu1 %v6400_v23 }
 0xfb9   :  { %5478 = vmatprep.subr.mxu1 %v5910_v0 }
0x106c   :  { %v1643_v28 = vpop.f32.mrf.mxu1 }
0x106d   :  { %5471 = vmatmul.mubr.msk.f32.vlgmr.msra.gmra.mxu1 %vm332_vm2, %v1643_v28 }
0x106e   :  { %v5452_v30 = vpop.f32.mrf.mxu1  ;;  %5480 = vmatprep.mubr.msk.f32.mxu1 %vm5911_vm0, %v5910_v0 }
0x1077   :  { %v1809_v33 = vpop.f32.mrf.mxu1 }
0x1078   :  { %5466 = vmatmul.mubr.msk.f32.vlgmr.msra.gmra.mxu0 %vm332_vm2, %v1809_v33 }
0x1079   :  { %5474 = vmatpush3.xpose.msk.msra.mxu0 %vm332_vm2, %v1962_v32  ;;  %v5462_v34 = vpop.f32.mrf.mxu1  ;;  %5475 = vmatprep.mubr.msk.f32.mxu0 %vm5911_vm0, %v5910_v0 }
0x107a   :  { %5483 = vmatprep.subr.mxu0 %v5910_v0 }
0x107c   :  { %5476 = vmatmul.mubr.msk.f32.vlgmr.msra.gmra.mxu0 %vm332_vm2, %v1960_v36 }
0x107d   :  { %5485 = vmatprep.mubr.msk.f32.mxu0 %vm5911_vm0, %v5910_v0  ;;  %5484 = vmatpush3.msra.mxu0 %v6442_v63 }
0x107e   :  { %5493 = vmatprep.subr.mxu0 %v5910_v0 }
0x112d   :  { %v1955_v14 = vpop.f32.mrf.mxu1 }
0x112f   :  { %v5472_v37 = vpop.f32.mrf.mxu1 }
0x1130   :  { %v6457_v37 = vld [vmem:[%s6892_s14 + $0x18] sm:$0xff] }
0x1138   :  { %v1882_v38 = vpop.f32.mrf.mxu0 }
0x1139   :  { %v1956_v39 = vadd.f32 %v1955_v14, %v1882_v38 }
0x113a   :  { %v5467_v40 = vpop.f32.mrf.mxu0 }
0x113c   :  { %v2033_v41 = vpop.f32.mrf.mxu0 }
0x113d   :  { %v2037_v42 = vmul.f32 0.35355338, %v2033_v41 }
0x113e   :  { %v5477_v43 = vpop.f32.mrf.mxu0 }
0x113f   :  { %v2038_v46 = vsel %vm332_vm2, %v2037_v42, -inf }
0x1140   :  { %2039 = vmax.xlane.f32.xlu1 %v2038_v46 }
0x1151   :  { %2201 = vrot.lane.b32.xlu1 %v6351_v27, %s5917_s29 }
0x1155   :  { %2199 = vrot.lane.b32.xlu1 %v6364_v31, %s5917_s29 }
0x11c9   :  { %v2040_v47 = vpop.xlane.xlu1 %2039 }
0x11ca   :  { %v2041_v48 = vsub.f32 %v2037_v42, %v2040_v47 }
0x11cc   :  { %v2042_v50 = vmul.f32 1.442695, %v2041_v48 }
0x11cd   :  { %v2202_v56 = vpop.permute.xlu1 %2201 }
0x11ce   :  { %5766 = vpow2.f32 %v2042_v50 }
0x11d1   :  { %v2200_v57 = vpop.permute.xlu1 %2199 }
0x11db   :  { %v5767_v51 = vpop.eup %5766 }
0x11dc   :  { %v2044_v52 = vsel %vm332_vm2, %v5767_v51, 0.0 }
0x11dd   :  { %2045 = vadd.xlane.f32.xlu0 %v2044_v52 }
0x11f3   :  { %2049 = vrot.lane.b32.xlu0 %v6351_v27, %s5916_s28 }
0x1266   :  { %v2046_v53 = vpop.xlane.xlu0 %2045 }
0x1267   :  { %5768 = vrcp.f32 %v2046_v53 }
0x126a   :  { %v2050_v54 = vpop.permute.xlu0 %2049 }
0x126b   :  { %5479 = vmatpush3.msra.mxu1 %v2050_v54 }
0x126c   :  { %5488 = vmatprep.subr.mxu1 %v5910_v0 }
0x1274   :  { %v5769_v55 = vpop.eup %5768 }
0x1275   :  { %v2048_v31 = vmul.f32 %v5769_v55, %v5767_v51 }
0x1277   :  { %5481 = vmatmul.mubr.msk.f32.vlgmr.msra.gmra.mxu1 %vm332_vm2, %v2048_v31 }
0x1278   :  { %5489 = vmatpush3.xpose.msk.msra.mxu1 %vm332_vm2, %v2202_v56  ;;  %5490 = vmatprep.mubr.msk.f32.mxu1 %vm5911_vm0, %v5910_v0 }
0x1279   :  { %5498 = vmatprep.subr.mxu1 %v5910_v0 }
0x127b   :  { %5491 = vmatmul.mubr.msk.f32.vlgmr.msra.gmra.mxu1 %vm332_vm2, %v2200_v57 }
0x127c   :  { %5500 = vmatprep.mubr.msk.f32.mxu1 %vm5911_vm0, %v5910_v0  ;;  %5499 = vmatpush3.msra.mxu1 %v6457_v37 }
0x127d   :  { %5514 = vmatprep.subr.mxu1 %v5910_v0 }
0x1337   :  { %v2121_v16 = vpop.f32.mrf.mxu1 }
0x1338   :  { %5486 = vmatmul.mubr.msk.f32.vlgmr.msra.gmra.mxu0 %vm332_vm2, %v2121_v16 }
0x1339   :  { %v5482_v17 = vpop.f32.mrf.mxu1  ;;  %5495 = vmatprep.mubr.msk.f32.mxu0 %vm5911_vm0, %v5910_v0 }
0x133a   :  { %v6479_v17 = vld [vmem:[%s6896_s18 + $0x18] sm:$0xff] }
0x133b   :  { %v2273_v18 = vpop.f32.mrf.mxu1 }
0x133c   :  { %v2277_v19 = vmul.f32 0.35355338, %v2273_v18  ;;  %v6491_v18 = vld [vmem:[%s6896_s18 + $0x8] sm:$0xff] }
0x133d   :  { %v5492_v15 = vpop.f32.mrf.mxu1 }
0x133e   :  { %v2278_v28 = vsel %vm332_vm2, %v2277_v19, -inf }
0x133f   :  { %2279 = vmax.xlane.f32.xlu0 %v2278_v28 }
0x1355   :  { %2289 = vrot.lane.b32.xlu0 %v6351_v27, %s5918_s7 }
0x13c8   :  { %v2280_v30 = vpop.xlane.xlu0 %2279 }
0x13c9   :  { %v2281_v32 = vsub.f32 %v2277_v19, %v2280_v30  ;;  %v6498_v19 = vld [vmem:[%s6896_s18] sm:$0xff] }
0x13cb   :  { %v2282_v33 = vmul.f32 1.442695, %v2281_v32 }
0x13cc   :  { %v2290_v34 = vpop.permute.xlu0 %2289 }
0x13cd   :  { %5770 = vpow2.f32 %v2282_v33  ;;  %5494 = vmatpush3.msra.mxu0 %v2290_v34  ;;  %v6507_v33 = vld [vmem:[%s6894_s16] ss:$0 sm:$0xff] }
0x13ce   :  { %5503 = vmatprep.subr.mxu0 %v5910_v0 }
0x13da   :  { %v5771_v36 = vpop.eup %5770 }
0x13db   :  { %v2284_v14 = vsel %vm332_vm2, %v5771_v36, 0.0 }
0x13dc   :  { %2285 = vadd.xlane.f32.xlu1 %v2284_v14 }
0x13f8   :  { %v2194_v27 = vpop.f32.mrf.mxu0 }
0x13f9   :  { %v2198_v38 = vadd.f32 %v2194_v27, %v1956_v39  ;;  %v6470_v39 = vld [vmem:[%s6893_s15] ss:$0 sm:$0xff] }
0x13fa   :  { %v5487_v40 = vpop.f32.mrf.mxu0 }
0x13fb   :  { %v6607_v40 = vld [vmem:[#allocation2] ss:$0 sm:$0xff] }
0x1465   :  { %v2286_v41 = vpop.xlane.xlu1 %2285 }
0x1466   :  { %5772 = vrcp.f32 %v2286_v41 }
0x1473   :  { %v5773_v42 = vpop.eup %5772 }
0x1474   :  { %v2288_v43 = vmul.f32 %v5773_v42, %v5771_v36  ;;  %v6512_v36 = vld [vmem:[%s6895_s17] ss:$0 sm:$0xff] }
0x1476   :  { %5496 = vmatmul.mubr.msk.f32.vlgmr.msra.gmra.mxu0 %vm332_vm2, %v2288_v43 }
0x1477   :  { %5511 = vmatprep.mubr.msk.f32.mxu0 %vm5911_vm0, %v5910_v0  ;;  %5504 = vmatpush3.msra.mxu0 %v6479_v17 }
0x1478   :  { %5505 = vmatprep.subr.mxu0 %v5910_v0 }
0x1536   :  { %v2361_v46 = vpop.f32.mrf.mxu0 }
0x1537   :  { %5501 = vmatmul.mubr.msk.f32.vlgmr.msra.gmra.mxu1 %vm332_vm2, %v2361_v46 }
0x1538   :  { %v5497_v47 = vpop.f32.mrf.mxu0  ;;  %5530 = vmatprep.mubr.msk.f32.mxu1 %vm5911_vm0, %v5910_v0 }
0x15f7   :  { %v2434_v48 = vpop.f32.mrf.mxu1 }
0x15f8   :  { %v2438_v50 = vadd.f32 %v2434_v48, %v2198_v38  ;;  %v6530_v38 = vld [vmem:[%s6919_s23 + $0x8] sm:$0xff] }
0x15f9   :  { %v5502_v51 = vpop.f32.mrf.mxu1 }
0x15fa   :  { %v2445_v52 = vadd.f32 %v6470_v39, %v2438_v50 }
0x15fc   :  { %v2446_v53 = vadd.f32 %v2445_v52, %v6339_v24  ;;  %v6486_v24 = vld [vmem:[%s6896_s18 + $0x10] sm:$0xff] }
0x15fd   :  { %5506 = vmatpush3.msra.mxu0 %v6486_v24 }
0x15fe   :  { %v2447_v54 = vsel %vm182_vm1, %v2446_v53, 0.0  ;;  %5507 = vmatprep.subr.mxu0 %v5910_v0 }
0x15ff   :  { %2448 = vadd.xlane.f32.xlu1 %v2447_v54  ;;  %5508 = vmatpush3.msra.mxu0 %v6491_v18 }
0x1600   :  { %5509 = vmatprep.subr.mxu0 %v5910_v0 }
0x1601   :  { %5510 = vmatpush3.msra.mxu0 %v6498_v19 }
0x1602   :  { %5533 = vmatprep.subr.mxu0 %v5910_v0 }
0x1688   :  { %v2449_v55 = vpop.xlane.xlu1 %2448 }
0x1689   :  { %v2450_v56 = vmul.f32 0.03125, %v2449_v55 }
0x168b   :  { %v2451_v31 = vsub.f32 %v2446_v53, %v2450_v56 }
0x168d   :  { %v2452_v57 = vmul.f32 %v2451_v31, %v2451_v31 }
0x168f   :  { %v2453_v16 = vsel %vm182_vm1, %v2452_v57, 0.0 }
0x1690   :  { %2454 = vadd.xlane.f32.xlu1 %v2453_v16 }
0x1719   :  { %v2455_v15 = vpop.xlane.xlu1 %2454 }
0x171a   :  { %v2456_v28 = vmul.f32 0.03125, %v2455_v15 }
0x171c   :  { %v2457_v30 = vadd.f32 1e-05, %v2456_v28 }
0x171e   :  { %5774 = vrsqrt.f32 %v2457_v30 }
0x172b   :  { %v5775_v32 = vpop.eup %5774 }
0x172c   :  { %v2459_v34 = vmul.f32 %v5775_v32, %v2451_v31 }
0x172e   :  { %v2466_v14 = vmul.f32 %v6507_v33, %v2459_v34 }
0x1730   :  { %v6516_v27 = vadd.f32 %v6512_v36, %v2466_v14 }
0x1732   :  { %5512 = vmatmul.mubr.msk.f32.vlgmr.msra.gmra.mxu0 %vm182_vm1, %v6516_v27 }
0x1733   :  { %5534 = vmatpush3.msra.mxu0 %v6070_v2  ;;  %5541 = vmatprep.mubr.msk.f32.mxu0 %vm5911_vm0, %v5910_v0  ;;  %v6561_v2 = vld [vmem:[%s6898_s20 + $0x30] sm:$0xff] }
0x1734   :  { %5535 = vmatprep.subr.mxu0 %v5910_v0 }
0x1735   :  { %5536 = vmatpush3.msra.mxu0 %v6082_v4  ;;  %v6575_v4 = vld [vmem:[%s6898_s20 + $0x20] sm:$0xff] }
0x1736   :  { %5537 = vmatprep.subr.mxu0 %v5910_v0 }
0x1737   :  { %5538 = vmatpush3.msra.mxu0 %v6094_v6  ;;  %v6589_v6 = vld [vmem:[%s6898_s20 + $0x10] sm:$0xff] }
0x1738   :  { %5539 = vmatprep.subr.mxu0 %v5910_v0 }
0x1739   :  { %5540 = vmatpush3.msra.mxu0 %v6108_v8  ;;  %v6603_v8 = vld [vmem:[%s6898_s20] sm:$0xff] }
0x173a   :  { %5542 = vmatmul.mubr.msk.f32.vlgmr.msra.gmra.mxu0 %vm182_vm1, %v6530_v38  ;;  %5544 = vmatprep.subr.mxu0 %v5910_v0 }
0x173b   :  { %5545 = vmatpush3.msra.mxu0 %v6065_v1  ;;  %5552 = vmatprep.mubr.msk.f32.mxu0 %vm5911_vm0, %v5910_v0  ;;  %v6554_v1 = vld [vmem:[%s6898_s20 + $0x38] sm:$0xff] }
0x173c   :  { %5546 = vmatprep.subr.mxu0 %v5910_v0  ;;  %5515 = vmatpush3.msra.mxu1 %v6554_v1 }
0x173d   :  { %5547 = vmatpush3.msra.mxu0 %v6075_v3  ;;  %5516 = vmatprep.subr.mxu1 %v5910_v0  ;;  %v6568_v3 = vld [vmem:[%s6898_s20 + $0x28] sm:$0xff] }
0x173e   :  { %5548 = vmatprep.subr.mxu0 %v5910_v0  ;;  %5517 = vmatpush3.msra.mxu1 %v6561_v2 }
0x173f   :  { %5549 = vmatpush3.msra.mxu0 %v6089_v5  ;;  %5518 = vmatprep.subr.mxu1 %v5910_v0  ;;  %v6582_v5 = vld [vmem:[%s6898_s20 + $0x18] sm:$0xff] }
0x1740   :  { %5550 = vmatprep.subr.mxu0 %v5910_v0  ;;  %5519 = vmatpush3.msra.mxu1 %v6568_v3 }
0x1741   :  { %5551 = vmatpush3.msra.mxu0 %v6103_v7  ;;  %5520 = vmatprep.subr.mxu1 %v5910_v0  ;;  %v6596_v7 = vld [vmem:[%s6898_s20 + $0x8] sm:$0xff] }
0x1742   :  { %5553 = vmatmul.mubr.msk.f32.vlgmr.msra.gmra.mxu0 %vm182_vm1, %v6530_v38  ;;  %5565 = vmatprep.subr.mxu0 %v5910_v0 }
0x1743   :  { %5567 = vmatprep.mubr.msk.f32.mxu0 %vm5911_vm0, %v5910_v0  ;;  %5521 = vmatpush3.msra.mxu1 %v6575_v4 }
0x1744   :  { %5522 = vmatprep.subr.mxu1 %v5910_v0 }
0x1745   :  { %5523 = vmatpush3.msra.mxu1 %v6582_v5 }
0x1746   :  { %5524 = vmatprep.subr.mxu1 %v5910_v0 }
0x1747   :  { %5525 = vmatpush3.msra.mxu1 %v6589_v6 }
0x1748   :  { %5526 = vmatprep.subr.mxu1 %v5910_v0 }
0x1749   :  { %5527 = vmatpush3.msra.mxu1 %v6596_v7 }
0x174a   :  { %5528 = vmatprep.subr.mxu1 %v5910_v0 }
0x174b   :  { %5529 = vmatpush3.msra.mxu1 %v6603_v8 }
0x174c   :  { %5555 = vmatprep.subr.mxu1 %v5910_v0 }
0x17f2   :  { %v2549_v41 = vpop.f32.mrf.mxu0 }
0x17f3   :  { %v2550_v42 = vadd.f32 %v6607_v40, %v2549_v41 }
0x17f4   :  { %v5513_v43 = vpop.f32.mrf.mxu0 }
0x17f5   :  { %v2554_v46 = vmul.f32 0.70710677, %v2550_v42  ;;  %v2553_v55 = vmul.f32 0.5, %v2550_v42 }
0x17f7   :  { %5776 = verf.f32 %v2554_v46 }
0x17fa   :  { %v2740_v47 = vpop.f32.mrf.mxu0 }
0x17fb   :  { %v6611_v48 = vadd.f32 %v6139_v11, %v2740_v47 }
0x17fc   :  { %v5543_v50 = vpop.f32.mrf.mxu0 }
0x17fd   :  { %2978 = vrot.lane.b32.xlu0 %v6611_v48, %s5913_s1 }
0x1802   :  { %v2810_v51 = vpop.f32.mrf.mxu0 }
0x1803   :  { %v6616_v52 = vadd.f32 %v6134_v10, %v2810_v51 }
0x1804   :  { %v5777_v53 = vpop.eup %5776  ;;  %v5554_v54 = vpop.f32.mrf.mxu0 }
0x1805   :  { %v2556_v56 = vadd.f32 1.0, %v5777_v53  ;;  %2980 = vrot.lane.b32.xlu1 %v6616_v52, %s5913_s1 }
0x1807   :  { %v2557_v31 = vmul.f32 %v2556_v56, %v2553_v55 }
0x1809   :  { %5531 = vmatmul.mubr.msk.f32.vlgmr.msra.gmra.mxu1 %vm2564_vm3, %v2557_v31 }
0x180a   :  { %5556 = vmatpush3.xpose.msk.msra.mxu1 %vm332_vm2, %v6616_v52  ;;  %5557 = vmatprep.mubr.msk.f32.mxu1 %vm5911_vm0, %v5910_v0 }
0x180b   :  { %5560 = vmatprep.subr.mxu1 %v5910_v0 }
0x180d   :  { %5558 = vmatmul.mubr.msk.f32.vlgmr.msra.gmra.mxu1 %vm332_vm2, %v6611_v48 }
0x180e   :  { %5562 = vmatprep.mubr.msk.f32.mxu1 %vm5911_vm0, %v5910_v0 }
0x186f   :  { %v2979_v11 = vpop.permute.xlu0 %2978 }
0x1877   :  { %v2981_v10 = vpop.permute.xlu1 %2980 }
0x1878   :  { %5566 = vmatpush3.xpose.msk.msra.mxu0 %vm332_vm2, %v2981_v10 }
0x1879   :  { %5575 = vmatprep.subr.mxu0 %v5910_v0 }
0x187b   :  { %5568 = vmatmul.mubr.msk.f32.vlgmr.msra.gmra.mxu0 %vm332_vm2, %v2979_v11 }
0x187c   :  { %5576 = vmatpush3.msra.mxu0 %v6183_v45  ;;  %5577 = vmatprep.mubr.msk.f32.mxu0 %vm5911_vm0, %v5910_v0 }
0x187d   :  { %5585 = vmatprep.subr.mxu0 %v5910_v0 }
0x18c9   :  { %v6637_v57 = vpop.f32.mrf.mxu1 }
0x18cb   :  { %v5532_v16 = vpop.f32.mrf.mxu1 }
0x18cd   :  { %v2886_v15 = vpop.f32.mrf.mxu1 }
0x18ce   :  { %v2890_v28 = vmul.f32 0.35355338, %v2886_v15 }
0x18cf   :  { %v5559_v30 = vpop.f32.mrf.mxu1 }
0x18d0   :  { %v2891_v32 = vsel %vm332_vm2, %v2890_v28, -inf }
0x18d1   :  { %2892 = vmax.xlane.f32.xlu0 %v2891_v32 }
0x193b   :  { %v3052_v34 = vpop.f32.mrf.mxu0 }
0x193c   :  { %v3056_v14 = vmul.f32 0.35355338, %v3052_v34 }
0x193d   :  { %v5569_v41 = vpop.f32.mrf.mxu0 }
0x193e   :  { %v3057_v42 = vsel %vm332_vm2, %v3056_v14, -inf }
0x193f   :  { %3058 = vmax.xlane.f32.xlu1 %v3057_v42 }
0x1950   :  { %3068 = vrot.lane.b32.xlu1 %v6616_v52, %s5914_s5 }
0x1954   :  { %3292 = vrot.lane.b32.xlu1 %v6616_v52, %s5915_s27 }
0x195a   :  { %v2893_v45 = vpop.xlane.xlu0 %2892 }
0x195b   :  { %v2894_v43 = vsub.f32 %v2890_v28, %v2893_v45 }
0x195d   :  { %v2895_v46 = vmul.f32 1.442695, %v2894_v43 }
0x195f   :  { %5778 = vpow2.f32 %v2895_v46 }
0x196c   :  { %v5779_v47 = vpop.eup %5778 }
0x196d   :  { %v2897_v50 = vsel %vm332_vm2, %v5779_v47, 0.0 }
0x196e   :  { %2898 = vadd.xlane.f32.xlu0 %v2897_v50 }
0x19c8   :  { %v3059_v51 = vpop.xlane.xlu1 %3058 }
0x19c9   :  { %v3060_v53 = vsub.f32 %v3056_v14, %v3059_v51 }
0x19cb   :  { %v3061_v54 = vmul.f32 1.442695, %v3060_v53 }
0x19cc   :  { %v3069_v28 = vpop.permute.xlu1 %3068 }
0x19cd   :  { %5780 = vpow2.f32 %v3061_v54 }
0x19d0   :  { %v3293_v42 = vpop.permute.xlu1 %3292 }
0x19da   :  { %v5781_v55 = vpop.eup %5780 }
0x19db   :  { %v3063_v56 = vsel %vm332_vm2, %v5781_v55, 0.0 }
0x19dc   :  { %3064 = vadd.xlane.f32.xlu0 %v3063_v56 }
0x19f2   :  { %2902 = vrot.lane.b32.xlu0 %v6616_v52, %s5912_s4 }
0x19f6   :  { %3290 = vrot.lane.b32.xlu0 %v6611_v48, %s5915_s27 }
0x19f7   :  { %v2899_v31 = vpop.xlane.xlu0 %2898 }
0x19f8   :  { %5782 = vrcp.f32 %v2899_v31 }
0x1a05   :  { %v5783_v11 = vpop.eup %5782 }
0x1a06   :  { %v2901_v15 = vmul.f32 %v5783_v11, %v5779_v47 }
0x1a65   :  { %v3065_v10 = vpop.xlane.xlu0 %3064 }
0x1a66   :  { %5784 = vrcp.f32 %v3065_v10 }
0x1a69   :  { %v2903_v16 = vpop.permute.xlu0 %2902 }
0x1a6a   :  { %5561 = vmatpush3.msra.mxu1 %v2903_v16 }
0x1a6b   :  { %5563 = vmatmul.mubr.msk.f32.vlgmr.msra.gmra.mxu1 %vm332_vm2, %v2901_v15  ;;  %5570 = vmatprep.subr.mxu1 %v5910_v0 }
0x1a6c   :  { %5571 = vmatpush3.msra.mxu1 %v3069_v28  ;;  %5572 = vmatprep.mubr.msk.f32.mxu1 %vm5911_vm0, %v5910_v0 }
0x1a6d   :  { %5580 = vmatprep.subr.mxu1 %v5910_v0 }
0x1a73   :  { %v5785_v30 = vpop.eup %5784 }
0x1a74   :  { %v3067_v32 = vmul.f32 %v5785_v30, %v5781_v55 }
0x1a76   :  { %5573 = vmatmul.mubr.msk.f32.vlgmr.msra.gmra.mxu1 %vm332_vm2, %v3067_v32 }
0x1a77   :  { %5581 = vmatpush3.msra.mxu1 %v6190_v49  ;;  %5582 = vmatprep.mubr.msk.f32.mxu1 %vm5911_vm0, %v5910_v0  ;;  %v3291_v49 = vpop.permute.xlu0 %3290 }
0x1a78   :  { %5590 = vmatprep.subr.mxu1 %v5910_v0 }
0x1b2b   :  { %v2974_v34 = vpop.f32.mrf.mxu1 }
0x1b2c   :  { %5583 = vmatmul.mubr.msk.f32.vlgmr.msra.gmra.mxu1 %vm332_vm2, %v2974_v34 }
0x1b2d   :  { %v5564_v14 = vpop.f32.mrf.mxu1  ;;  %5592 = vmatprep.mubr.msk.f32.mxu1 %vm5911_vm0, %v5910_v0 }
0x1b36   :  { %v3140_v41 = vpop.f32.mrf.mxu1 }
0x1b37   :  { %5578 = vmatmul.mubr.msk.f32.vlgmr.msra.gmra.mxu0 %vm332_vm2, %v3140_v41 }
0x1b38   :  { %5586 = vmatpush3.xpose.msk.msra.mxu0 %vm332_vm2, %v3293_v42  ;;  %v5574_v45 = vpop.f32.mrf.mxu1  ;;  %5587 = vmatprep.mubr.msk.f32.mxu0 %vm5911_vm0, %v5910_v0 }
0x1b39   :  { %5595 = vmatprep.subr.mxu0 %v5910_v0 }
0x1b3b   :  { %5588 = vmatmul.mubr.msk.f32.vlgmr.msra.gmra.mxu0 %vm332_vm2, %v3291_v49 }
0x1b3c   :  { %5596 = vmatpush3.msra.mxu0 %v6230_v22  ;;  %5597 = vmatprep.mubr.msk.f32.mxu0 %vm5911_vm0, %v5910_v0 }
0x1b3d   :  { %5605 = vmatprep.subr.mxu0 %v5910_v0 }
0x1bec   :  { %v3286_v43 = vpop.f32.mrf.mxu1 }
0x1bee   :  { %v5584_v46 = vpop.f32.mrf.mxu1 }
0x1bf7   :  { %v3213_v47 = vpop.f32.mrf.mxu0 }
0x1bf8   :  { %v3287_v50 = vadd.f32 %v3286_v43, %v3213_v47 }
0x1bf9   :  { %v5579_v51 = vpop.f32.mrf.mxu0 }
0x1bfb   :  { %v3364_v53 = vpop.f32.mrf.mxu0 }
0x1bfc   :  { %v3368_v54 = vmul.f32 0.35355338, %v3364_v53 }
0x1bfd   :  { %v5589_v55 = vpop.f32.mrf.mxu0 }
0x1bfe   :  { %v3369_v56 = vsel %vm332_vm2, %v3368_v54, -inf }
0x1bff   :  { %3370 = vmax.xlane.f32.xlu1 %v3369_v56 }
0x1c10   :  { %3532 = vrot.lane.b32.xlu1 %v6616_v52, %s5917_s29 }
0x1c14   :  { %3530 = vrot.lane.b32.xlu1 %v6611_v48, %s5917_s29 }
0x1c88   :  { %v3371_v22 = vpop.xlane.xlu1 %3370 }
0x1c89   :  { %v3372_v31 = vsub.f32 %v3368_v54, %v3371_v22 }
0x1c8b   :  { %v3373_v10 = vmul.f32 1.442695, %v3372_v31 }
0x1c8c   :  { %v3533_v32 = vpop.permute.xlu1 %3532 }
0x1c8d   :  { %5786 = vpow2.f32 %v3373_v10 }
0x1c90   :  { %v3531_v34 = vpop.permute.xlu1 %3530 }
0x1c9a   :  { %v5787_v11 = vpop.eup %5786 }
0x1c9b   :  { %v3375_v16 = vsel %vm332_vm2, %v5787_v11, 0.0 }
0x1c9c   :  { %3376 = vadd.xlane.f32.xlu0 %v3375_v16 }
0x1cb2   :  { %3380 = vrot.lane.b32.xlu0 %v6616_v52, %s5916_s28 }
0x1d25   :  { %v3377_v15 = vpop.xlane.xlu0 %3376 }
0x1d26   :  { %5788 = vrcp.f32 %v3377_v15 }
0x1d29   :  { %v3381_v28 = vpop.permute.xlu0 %3380 }
0x1d2a   :  { %5591 = vmatpush3.msra.mxu1 %v3381_v28 }
0x1d2b   :  { %5600 = vmatprep.subr.mxu1 %v5910_v0 }
0x1d33   :  { %v5789_v30 = vpop.eup %5788 }
0x1d34   :  { %v3379_v48 = vmul.f32 %v5789_v30, %v5787_v11 }
0x1d36   :  { %5593 = vmatmul.mubr.msk.f32.vlgmr.msra.gmra.mxu1 %vm332_vm2, %v3379_v48 }
0x1d37   :  { %5601 = vmatpush3.xpose.msk.msra.mxu1 %vm332_vm2, %v3533_v32  ;;  %5602 = vmatprep.mubr.msk.f32.mxu1 %vm5911_vm0, %v5910_v0 }
0x1d38   :  { %5610 = vmatprep.subr.mxu1 %v5910_v0 }
0x1d3a   :  { %5603 = vmatmul.mubr.msk.f32.vlgmr.msra.gmra.mxu1 %vm332_vm2, %v3531_v34 }
0x1d3b   :  { %5611 = vmatpush3.msra.mxu1 %v6245_v35  ;;  %5612 = vmatprep.mubr.msk.f32.mxu1 %vm5911_vm0, %v5910_v0 }
0x1d3c   :  { %5626 = vmatprep.subr.mxu1 %v5910_v0 }
0x1df6   :  { %v3452_v14 = vpop.f32.mrf.mxu1 }
0x1df7   :  { %5598 = vmatmul.mubr.msk.f32.vlgmr.msra.gmra.mxu0 %vm332_vm2, %v3452_v14 }
0x1df8   :  { %v5594_v41 = vpop.f32.mrf.mxu1  ;;  %5607 = vmatprep.mubr.msk.f32.mxu0 %vm5911_vm0, %v5910_v0 }
0x1dfa   :  { %v3604_v42 = vpop.f32.mrf.mxu1 }
0x1dfb   :  { %v3608_v45 = vmul.f32 0.35355338, %v3604_v42 }
0x1dfc   :  { %v5604_v49 = vpop.f32.mrf.mxu1 }
0x1dfd   :  { %v3609_v43 = vsel %vm332_vm2, %v3608_v45, -inf }
0x1dfe   :  { %3610 = vmax.xlane.f32.xlu0 %v3609_v43 }
0x1e14   :  { %3620 = vrot.lane.b32.xlu0 %v6616_v52, %s5918_s7 }
0x1e87   :  { %v3611_v35 = vpop.xlane.xlu0 %3610 }
0x1e88   :  { %v3612_v46 = vsub.f32 %v3608_v45, %v3611_v35 }
0x1e8a   :  { %v3613_v47 = vmul.f32 1.442695, %v3612_v46 }
0x1e8b   :  { %v3621_v51 = vpop.permute.xlu0 %3620 }
0x1e8c   :  { %5790 = vpow2.f32 %v3613_v47  ;;  %5606 = vmatpush3.msra.mxu0 %v3621_v51 }
0x1e8d   :  { %5615 = vmatprep.subr.mxu0 %v5910_v0 }
0x1e99   :  { %v5791_v53 = vpop.eup %5790 }
0x1e9a   :  { %v3615_v54 = vsel %vm332_vm2, %v5791_v53, 0.0 }
0x1e9b   :  { %3616 = vadd.xlane.f32.xlu1 %v3615_v54 }
0x1eb7   :  { %v3525_v55 = vpop.f32.mrf.mxu0 }
0x1eb8   :  { %v3529_v56 = vadd.f32 %v3525_v55, %v3287_v50 }
0x1eb9   :  { %v5599_v22 = vpop.f32.mrf.mxu0 }
0x1f24   :  { %v3617_v31 = vpop.xlane.xlu1 %3616 }
0x1f25   :  { %5792 = vrcp.f32 %v3617_v31 }
0x1f32   :  { %v5793_v10 = vpop.eup %5792 }
0x1f33   :  { %v3619_v11 = vmul.f32 %v5793_v10, %v5791_v53 }
0x1f35   :  { %5608 = vmatmul.mubr.msk.f32.vlgmr.msra.gmra.mxu0 %vm332_vm2, %v3619_v11 }
0x1f36   :  { %5616 = vmatpush3.msra.mxu0 %v6288_v60  ;;  %5623 = vmatprep.mubr.msk.f32.mxu0 %vm5911_vm0, %v5910_v0 }
0x1f37   :  { %5617 = vmatprep.subr.mxu0 %v5910_v0 }
0x1f38   :  { %5618 = vmatpush3.msra.mxu0 %v6300_v62 }
0x1f39   :  { %5619 = vmatprep.subr.mxu0 %v5910_v0 }
0x1f3a   :  { %5620 = vmatpush3.msra.mxu0 %v6310_v12 }
0x1f3b   :  { %5621 = vmatprep.subr.mxu0 %v5910_v0 }
0x1f3c   :  { %5622 = vmatpush3.msra.mxu0 %v6318_v13 }
0x1f3d   :  { %5637 = vmatprep.subr.mxu0 %v5910_v0 }
0x1ff5   :  { %v3692_v52 = vpop.f32.mrf.mxu0 }
0x1ff6   :  { %5613 = vmatmul.mubr.msk.f32.vlgmr.msra.gmra.mxu1 %vm332_vm2, %v3692_v52 }
0x1ff7   :  { %v5609_v60 = vpop.f32.mrf.mxu0  ;;  %5627 = vmatpush3.msra.mxu1 %v6268_v58  ;;  %5634 = vmatprep.mubr.msk.f32.mxu1 %vm5911_vm0, %v5910_v0 }
0x1ff8   :  { %5628 = vmatprep.subr.mxu1 %v5910_v0 }
0x1ff9   :  { %5629 = vmatpush3.msra.mxu1 %v6275_v9 }
0x1ffa   :  { %5630 = vmatprep.subr.mxu1 %v5910_v0 }
0x1ffb   :  { %5631 = vmatpush3.msra.mxu1 %v6282_v59 }
0x1ffc   :  { %5632 = vmatprep.subr.mxu1 %v5910_v0 }
0x1ffd   :  { %5633 = vmatpush3.msra.mxu1 %v6295_v61  ;;  %v5135_v61 = vld [vmem:[%s6924_s19 + $0x8] sm:$0xff] }
0x1ffe   :  { %5642 = vmatprep.subr.mxu1 %v5910_v0  ;;  %5635 = vmatmul.mubr.msk.f32.vlgmr.msra.gmra.mxu1 %vm182_vm1, %v5135_v61 }
0x1fff   :  { %5644 = vmatprep.mubr.msk.f32.mxu1 %vm5911_vm0, %v5910_v0 }
0x20b6   :  { %v3765_v62 = vpop.f32.mrf.mxu1 }
0x20b7   :  { %v3769_v12 = vadd.f32 %v3765_v62, %v3529_v56 }
0x20b8   :  { %v5614_v58 = vpop.f32.mrf.mxu1 }
0x20b9   :  { %v3770_v13 = vadd.f32 %v6259_v44, %v3769_v12 }
0x20bb   :  { %v3771_v50 = vadd.f32 %v6530_v38, %v3770_v13 }
0x20bd   :  { %v3772_v16 = vsel %vm182_vm1, %v3771_v50, 0.0 }
0x20be   :  { %3773 = vadd.xlane.f32.xlu1 %v3772_v16  ;;  %v3929_v42 = vpop.f32.mrf.mxu1 }
0x20bf   :  { %v6742_v45 = vadd.f32 %v6348_v25, %v3929_v42 }
0x20c0   :  { %v5636_v49 = vpop.f32.mrf.mxu1 }
0x2147   :  { %v3774_v9 = vpop.xlane.xlu1 %3773 }
0x2148   :  { %v3775_v15 = vmul.f32 0.03125, %v3774_v9 }
0x214a   :  { %v3776_v28 = vsub.f32 %v3771_v50, %v3775_v15 }
0x214c   :  { %v3777_v59 = vmul.f32 %v3776_v28, %v3776_v28 }
0x214e   :  { %v3778_v30 = vsel %vm182_vm1, %v3777_v59, 0.0 }
0x214f   :  { %3779 = vadd.xlane.f32.xlu1 %v3778_v30 }
0x2160   :  { %4099 = vrot.lane.b32.xlu1 %v6742_v45, %s5913_s1 }
0x21d8   :  { %v3780_v44 = vpop.xlane.xlu1 %3779 }
0x21d9   :  { %v3781_v38 = vmul.f32 0.03125, %v3780_v44 }
0x21db   :  { %v3782_v32 = vadd.f32 1e-05, %v3781_v38 }
0x21dc   :  { %v4100_v43 = vpop.permute.xlu1 %4099 }
0x21dd   :  { %5794 = vrsqrt.f32 %v3782_v32 }
0x21ea   :  { %v5795_v48 = vpop.eup %5794 }
0x21eb   :  { %v3784_v34 = vmul.f32 %v5795_v48, %v3776_v28 }
0x21ed   :  { %v3785_v14 = vmul.f32 %v6330_v20, %v3784_v34 }
0x21ef   :  { %v6735_v41 = vadd.f32 %v6335_v21, %v3785_v14 }
0x21f1   :  { %5624 = vmatmul.mubr.msk.f32.vlgmr.msra.gmra.mxu0 %vm182_vm1, %v6735_v41 }
0x21f2   :  { %5639 = vmatprep.mubr.msk.f32.mxu0 %vm5911_vm0, %v5910_v0  ;;  %5638 = vmatpush3.xpose.msk.msra.mxu0 %vm332_vm2, %v6742_v45 }
0x21f3   :  { %5647 = vmatprep.subr.mxu0 %v5910_v0 }
0x22b1   :  { %v3856_v20 = vpop.f32.mrf.mxu0 }
0x22b2   :  { %v6750_v21 = vadd.f32 %v6361_v29, %v3856_v20 }
0x22b3   :  { %v5625_v35 = vpop.f32.mrf.mxu0 }
0x22b4   :  { %4097 = vrot.lane.b32.xlu0 %v6750_v21, %s5913_s1  ;;  %5640 = vmatmul.mubr.msk.f32.vlgmr.msra.gmra.mxu0 %vm332_vm2, %v6750_v21 }
0x22b5   :  { %5648 = vmatpush3.xpose.msk.msra.mxu0 %vm332_vm2, %v4100_v43  ;;  %5649 = vmatprep.mubr.msk.f32.mxu0 %vm5911_vm0, %v5910_v0 }
0x22b6   :  { %5657 = vmatprep.subr.mxu0 %v5910_v0 }
0x2326   :  { %v4098_v25 = vpop.permute.xlu0 %4097 }
0x2327   :  { %5650 = vmatmul.mubr.msk.f32.vlgmr.msra.gmra.mxu0 %vm332_vm2, %v4098_v25 }
0x2328   :  { %5658 = vmatpush3.msra.mxu0 %v6406_v26  ;;  %5659 = vmatprep.mubr.msk.f32.mxu0 %vm5911_vm0, %v5910_v0 }
0x2329   :  { %5667 = vmatprep.subr.mxu0 %v5910_v0 }
0x2374   :  { %v4005_v29 = vpop.f32.mrf.mxu0 }
0x2375   :  { %v4009_v46 = vmul.f32 0.35355338, %v4005_v29 }
0x2376   :  { %v5641_v47 = vpop.f32.mrf.mxu0 }
0x2377   :  { %v4010_v51 = vsel %vm332_vm2, %v4009_v46, -inf }
0x2378   :  { %4011 = vmax.xlane.f32.xlu0 %v4010_v51 }
0x23e7   :  { %v4171_v53 = vpop.f32.mrf.mxu0 }
0x23e8   :  { %v4175_v54 = vmul.f32 0.35355338, %v4171_v53 }
0x23e9   :  { %v5651_v55 = vpop.f32.mrf.mxu0 }
0x23ea   :  { %v4176_v56 = vsel %vm332_vm2, %v4175_v54, -inf }
0x23eb   :  { %4177 = vmax.xlane.f32.xlu1 %v4176_v56 }
0x23fc   :  { %4187 = vrot.lane.b32.xlu1 %v6742_v45, %s5914_s5 }
0x2400   :  { %4411 = vrot.lane.b32.xlu1 %v6742_v45, %s5915_s27 }
0x2401   :  { %v4012_v26 = vpop.xlane.xlu0 %4011 }
0x2402   :  { %v4013_v22 = vsub.f32 %v4009_v46, %v4012_v26 }
0x2404   :  { %v4014_v31 = vmul.f32 1.442695, %v4013_v22 }
0x2406   :  { %5796 = vpow2.f32 %v4014_v31 }
0x2413   :  { %v5797_v10 = vpop.eup %5796 }
0x2414   :  { %v4016_v11 = vsel %vm332_vm2, %v5797_v10, 0.0 }
0x2415   :  { %4017 = vadd.xlane.f32.xlu0 %v4016_v11 }
0x2474   :  { %v4178_v52 = vpop.xlane.xlu1 %4177 }
0x2475   :  { %v4179_v60 = vsub.f32 %v4175_v54, %v4178_v52 }
0x2477   :  { %v4180_v62 = vmul.f32 1.442695, %v4179_v60 }
0x2478   :  { %v4188_v28 = vpop.permute.xlu1 %4187 }
0x2479   :  { %5798 = vpow2.f32 %v4180_v62 }
0x247c   :  { %v4412_v32 = vpop.permute.xlu1 %4411 }
0x2486   :  { %v5799_v12 = vpop.eup %5798 }
0x2487   :  { %v4182_v58 = vsel %vm332_vm2, %v5799_v12, 0.0 }
0x2488   :  { %4183 = vadd.xlane.f32.xlu0 %v4182_v58 }
0x249e   :  { %4021 = vrot.lane.b32.xlu0 %v6742_v45, %s5912_s4  ;;  %v4018_v13 = vpop.xlane.xlu0 %4017 }
0x249f   :  { %5800 = vrcp.f32 %v4018_v13 }
0x24a2   :  { %4409 = vrot.lane.b32.xlu0 %v6750_v21, %s5915_s27 }
0x24ac   :  { %v5801_v16 = vpop.eup %5800 }
0x24ad   :  { %v4020_v15 = vmul.f32 %v5801_v16, %v5797_v10 }
0x2511   :  { %v4184_v50 = vpop.xlane.xlu0 %4183 }
0x2512   :  { %5802 = vrcp.f32 %v4184_v50 }
0x2515   :  { %v4022_v9 = vpop.permute.xlu0 %4021 }
0x2516   :  { %5643 = vmatpush3.msra.mxu1 %v4022_v9 }
0x2517   :  { %5645 = vmatmul.mubr.msk.f32.vlgmr.msra.gmra.mxu1 %vm332_vm2, %v4020_v15  ;;  %5652 = vmatprep.subr.mxu1 %v5910_v0 }
0x2518   :  { %5653 = vmatpush3.msra.mxu1 %v4188_v28  ;;  %5654 = vmatprep.mubr.msk.f32.mxu1 %vm5911_vm0, %v5910_v0 }
0x2519   :  { %5662 = vmatprep.subr.mxu1 %v5910_v0 }
0x251f   :  { %v5803_v59 = vpop.eup %5802 }
0x2520   :  { %v4186_v30 = vmul.f32 %v5803_v59, %v5799_v12 }
0x2522   :  { %5655 = vmatmul.mubr.msk.f32.vlgmr.msra.gmra.mxu1 %vm332_vm2, %v4186_v30 }
0x2523   :  { %5663 = vmatpush3.msra.mxu1 %v6400_v23  ;;  %5664 = vmatprep.mubr.msk.f32.mxu1 %vm5911_vm0, %v5910_v0  ;;  %v4410_v23 = vpop.permute.xlu0 %4409 }
0x2524   :  { %5672 = vmatprep.subr.mxu1 %v5910_v0 }
0x25d7   :  { %v4093_v61 = vpop.f32.mrf.mxu1 }
0x25d8   :  { %5665 = vmatmul.mubr.msk.f32.vlgmr.msra.gmra.mxu1 %vm332_vm2, %v4093_v61 }
0x25d9   :  { %v5646_v44 = vpop.f32.mrf.mxu1  ;;  %5674 = vmatprep.mubr.msk.f32.mxu1 %vm5911_vm0, %v5910_v0 }
0x25e2   :  { %v4259_v38 = vpop.f32.mrf.mxu1 }
0x25e3   :  { %5660 = vmatmul.mubr.msk.f32.vlgmr.msra.gmra.mxu0 %vm332_vm2, %v4259_v38 }
0x25e4   :  { %5668 = vmatpush3.xpose.msk.msra.mxu0 %vm332_vm2, %v4412_v32  ;;  %v5656_v48 = vpop.f32.mrf.mxu1  ;;  %5669 = vmatprep.mubr.msk.f32.mxu0 %vm5911_vm0, %v5910_v0 }
0x25e5   :  { %5677 = vmatprep.subr.mxu0 %v5910_v0 }
0x25e7   :  { %5670 = vmatmul.mubr.msk.f32.vlgmr.msra.gmra.mxu0 %vm332_vm2, %v4410_v23 }
0x25e8   :  { %5678 = vmatpush3.msra.mxu0 %v6442_v63  ;;  %5679 = vmatprep.mubr.msk.f32.mxu0 %vm5911_vm0, %v5910_v0 }
0x25e9   :  { %5687 = vmatprep.subr.mxu0 %v5910_v0 }
0x2698   :  { %v4405_v34 = vpop.f32.mrf.mxu1 }
0x269a   :  { %v5666_v14 = vpop.f32.mrf.mxu1 }
0x26a3   :  { %v4332_v42 = vpop.f32.mrf.mxu0 }
0x26a4   :  { %v4406_v49 = vadd.f32 %v4405_v34, %v4332_v42 }
0x26a5   :  { %v5661_v20 = vpop.f32.mrf.mxu0 }
0x26a7   :  { %v4483_v43 = vpop.f32.mrf.mxu0 }
0x26a8   :  { %v4487_v35 = vmul.f32 0.35355338, %v4483_v43 }
0x26a9   :  { %v5671_v25 = vpop.f32.mrf.mxu0 }
0x26aa   :  { %v4488_v29 = vsel %vm332_vm2, %v4487_v35, -inf }
0x26ab   :  { %4489 = vmax.xlane.f32.xlu1 %v4488_v29 }
0x26bc   :  { %4651 = vrot.lane.b32.xlu1 %v6742_v45, %s5917_s29 }
0x26c0   :  { %4649 = vrot.lane.b32.xlu1 %v6750_v21, %s5917_s29 }
0x2734   :  { %v4490_v63 = vpop.xlane.xlu1 %4489 }
0x2735   :  { %v4491_v46 = vsub.f32 %v4487_v35, %v4490_v63 }
0x2737   :  { %v4492_v47 = vmul.f32 1.442695, %v4491_v46  ;;  %v5132_v46 = vld [vmem:[#allocation6] ss:$0 sm:$0xff] }
0x2738   :  { %v4652_v26 = vpop.permute.xlu1 %4651 }
0x2739   :  { %5804 = vpow2.f32 %v4492_v47 }
0x273c   :  { %v4650_v22 = vpop.permute.xlu1 %4649 }
0x2746   :  { %v5805_v51 = vpop.eup %5804 }
0x2747   :  { %v4494_v53 = vsel %vm332_vm2, %v5805_v51, 0.0 }
0x2748   :  { %4495 = vadd.xlane.f32.xlu0 %v4494_v53 }
0x275e   :  { %4499 = vrot.lane.b32.xlu0 %v6742_v45, %s5916_s28 }
0x27d1   :  { %v4496_v54 = vpop.xlane.xlu0 %4495 }
0x27d2   :  { %5806 = vrcp.f32 %v4496_v54 }
0x27d5   :  { %v4500_v55 = vpop.permute.xlu0 %4499 }
0x27d6   :  { %5673 = vmatpush3.msra.mxu1 %v4500_v55 }
0x27d7   :  { %5682 = vmatprep.subr.mxu1 %v5910_v0 }
0x27df   :  { %v5807_v56 = vpop.eup %5806 }
0x27e0   :  { %v4498_v21 = vmul.f32 %v5807_v56, %v5805_v51  ;;  %v5133_v51 = vld [vmem:[#allocation7] ss:$0 sm:$0xff] }
0x27e2   :  { %5675 = vmatmul.mubr.msk.f32.vlgmr.msra.gmra.mxu1 %vm332_vm2, %v4498_v21 }
0x27e3   :  { %5683 = vmatpush3.xpose.msk.msra.mxu1 %vm332_vm2, %v4652_v26  ;;  %5684 = vmatprep.mubr.msk.f32.mxu1 %vm5911_vm0, %v5910_v0 }
0x27e4   :  { %5692 = vmatprep.subr.mxu1 %v5910_v0 }
0x27e6   :  { %5685 = vmatmul.mubr.msk.f32.vlgmr.msra.gmra.mxu1 %vm332_vm2, %v4650_v22 }
0x27e7   :  { %5693 = vmatpush3.msra.mxu1 %v6457_v37  ;;  %5694 = vmatprep.mubr.msk.f32.mxu1 %vm5911_vm0, %v5910_v0 }
0x27e8   :  { %5708 = vmatprep.subr.mxu1 %v5910_v0 }
0x28a2   :  { %v4571_v31 = vpop.f32.mrf.mxu1 }
0x28a3   :  { %5680 = vmatmul.mubr.msk.f32.vlgmr.msra.gmra.mxu0 %vm332_vm2, %v4571_v31 }
0x28a4   :  { %v5676_v10 = vpop.f32.mrf.mxu1  ;;  %5689 = vmatprep.mubr.msk.f32.mxu0 %vm5911_vm0, %v5910_v0 }
0x28a6   :  { %v4723_v11 = vpop.f32.mrf.mxu1 }
0x28a7   :  { %v4727_v52 = vmul.f32 0.35355338, %v4723_v11 }
0x28a8   :  { %v5686_v60 = vpop.f32.mrf.mxu1 }
0x28a9   :  { %v4728_v62 = vsel %vm332_vm2, %v4727_v52, -inf }
0x28aa   :  { %4729 = vmax.xlane.f32.xlu0 %v4728_v62 }
0x28c0   :  { %4739 = vrot.lane.b32.xlu0 %v6742_v45, %s5918_s7 }
0x2933   :  { %v4730_v37 = vpop.xlane.xlu0 %4729 }
0x2934   :  { %v4731_v12 = vsub.f32 %v4727_v52, %v4730_v37 }
0x2936   :  { %v4732_v58 = vmul.f32 1.442695, %v4731_v12 }
0x2937   :  { %v4740_v13 = vpop.permute.xlu0 %4739 }
0x2938   :  { %5808 = vpow2.f32 %v4732_v58  ;;  %5688 = vmatpush3.msra.mxu0 %v4740_v13 }
0x2939   :  { %5697 = vmatprep.subr.mxu0 %v5910_v0 }
0x2945   :  { %v5809_v50 = vpop.eup %5808 }
0x2946   :  { %v4734_v16 = vsel %vm332_vm2, %v5809_v50, 0.0 }
0x2947   :  { %4735 = vadd.xlane.f32.xlu1 %v4734_v16 }
0x2963   :  { %v4644_v9 = vpop.f32.mrf.mxu0 }
0x2964   :  { %v4648_v15 = vadd.f32 %v4644_v9, %v4406_v49 }
0x2965   :  { %v5681_v28 = vpop.f32.mrf.mxu0 }
0x29d0   :  { %v4736_v59 = vpop.xlane.xlu1 %4735 }
0x29d1   :  { %5810 = vrcp.f32 %v4736_v59 }
0x29de   :  { %v5811_v30 = vpop.eup %5810 }
0x29df   :  { %v4738_v61 = vmul.f32 %v5811_v30, %v5809_v50 }
0x29e1   :  { %5690 = vmatmul.mubr.msk.f32.vlgmr.msra.gmra.mxu0 %vm332_vm2, %v4738_v61 }
0x29e2   :  { %5698 = vmatpush3.msra.mxu0 %v6479_v17  ;;  %5705 = vmatprep.mubr.msk.f32.mxu0 %vm5911_vm0, %v5910_v0 }
0x29e3   :  { %5699 = vmatprep.subr.mxu0 %v5910_v0 }
0x29e4   :  { %5700 = vmatpush3.msra.mxu0 %v6486_v24 }
0x29e5   :  { %5701 = vmatprep.subr.mxu0 %v5910_v0 }
0x29e6   :  { %5702 = vmatpush3.msra.mxu0 %v6491_v18 }
0x29e7   :  { %5703 = vmatprep.subr.mxu0 %v5910_v0 }
0x29e8   :  { %5704 = vmatpush3.msra.mxu0 %v6498_v19 }
0x2aa1   :  { %v4811_v45 = vpop.f32.mrf.mxu0 }
0x2aa2   :  { %5695 = vmatmul.mubr.msk.f32.vlgmr.msra.gmra.mxu1 %vm332_vm2, %v4811_v45 }
0x2aa3   :  { %v5691_v44 = vpop.f32.mrf.mxu0  ;;  %5709 = vmatpush3.msra.mxu1 %v6554_v1  ;;  %5724 = vmatprep.mubr.msk.f32.mxu1 %vm5911_vm0, %v5910_v0 }
0x2aa4   :  { %5710 = vmatprep.subr.mxu1 %v5910_v0 }
0x2aa5   :  { %5711 = vmatpush3.msra.mxu1 %v6561_v2 }
0x2aa6   :  { %5712 = vmatprep.subr.mxu1 %v5910_v0 }
0x2aa7   :  { %5713 = vmatpush3.msra.mxu1 %v6568_v3  ;;  %v5130_v3 = vld [vmem:[#allocation4] ss:$0 sm:$0xff] }
0x2aa8   :  { %5714 = vmatprep.subr.mxu1 %v5910_v0 }
0x2aa9   :  { %5715 = vmatpush3.msra.mxu1 %v6575_v4 }
0x2aaa   :  { %5716 = vmatprep.subr.mxu1 %v5910_v0 }
0x2aab   :  { %5717 = vmatpush3.msra.mxu1 %v6582_v5 }
0x2aac   :  { %5718 = vmatprep.subr.mxu1 %v5910_v0 }
0x2aad   :  { %5719 = vmatpush3.msra.mxu1 %v6589_v6  ;;  %v2635_v6 = vadd.f32 %v5130_v3, %v6637_v57 }
0x2aae   :  { %5720 = vmatprep.subr.mxu1 %v5910_v0 }
0x2aaf   :  { %5721 = vmatpush3.msra.mxu1 %v6596_v7 }
0x2ab0   :  { %5722 = vmatprep.subr.mxu1 %v5910_v0 }
0x2ab1   :  { %5723 = vmatpush3.msra.mxu1 %v6603_v8  ;;  %v2638_v8 = vadd.f32 %v2635_v6, %v6516_v27 }
0x2ab3   :  { %v2639_v32 = vsel %vm182_vm1, %v2638_v8, 0.0 }
0x2b62   :  { %v4884_v17 = vpop.f32.mrf.mxu1 }
0x2b63   :  { %v4888_v24 = vadd.f32 %v4884_v17, %v4648_v15 }
0x2b64   :  { %v5696_v18 = vpop.f32.mrf.mxu1 }
0x2b65   :  { %v4889_v19 = vadd.f32 %v6470_v39, %v4888_v24 }
0x2b67   :  { %v4890_v1 = vadd.f32 %v4889_v19, %v6735_v41 }
0x2b69   :  { %v4891_v2 = vsel %vm182_vm1, %v4890_v1, 0.0 }
0x2b6a   :  { %4892 = vadd.xlane.f32.xlu1 %v4891_v2 }
0x2bf3   :  { %v4893_v4 = vpop.xlane.xlu1 %4892 }
0x2bf4   :  { %v4894_v5 = vmul.f32 0.03125, %v4893_v4 }
0x2bf6   :  { %v4895_v7 = vsub.f32 %v4890_v1, %v4894_v5 }
0x2bf8   :  { %v4896_v38 = vmul.f32 %v4895_v7, %v4895_v7 }
0x2bfa   :  { %v4897_v0 = vsel %vm182_vm1, %v4896_v38, 0.0 }
0x2bfb   :  { %4898 = vadd.xlane.f32.xlu1 %v4897_v0 }
0x2bff   :  { %2640 = vadd.xlane.f32.xlu1 %v2639_v32 }
0x2c84   :  { %v4899_v39 = vpop.xlane.xlu1 %4898 }
0x2c85   :  { %v4900_v41 = vmul.f32 0.03125, %v4899_v39 }
0x2c87   :  { %v4901_v48 = vadd.f32 1e-05, %v4900_v41 }
0x2c88   :  { %v2641_v23 = vpop.xlane.xlu1 %2640 }
0x2c89   :  { %5812 = vrsqrt.f32 %v4901_v48  ;;  %v2642_v34 = vmul.f32 0.03125, %v2641_v23 }
0x2c8b   :  { %v2643_v14 = vsub.f32 %v2638_v8, %v2642_v34 }
0x2c8d   :  { %v2644_v42 = vmul.f32 %v2643_v14, %v2643_v14 }
0x2c8f   :  { %v2645_v57 = vsel %vm182_vm1, %v2644_v42, 0.0 }
0x2c90   :  { %2646 = vadd.xlane.f32.xlu0 %v2645_v57 }
0x2c96   :  { %v5813_v49 = vpop.eup %5812 }
0x2c97   :  { %v4903_v20 = vmul.f32 %v5813_v49, %v4895_v7 }
0x2c99   :  { %v4904_v43 = vmul.f32 %v6507_v33, %v4903_v20 }
0x2c9b   :  { %v4905_v27 = vadd.f32 %v6512_v36, %v4904_v43 }
0x2c9d   :  { %5706 = vmatmul.mubr.msk.f32.vlgmr.msra.gmra.mxu0 %vm182_vm1, %v4905_v27 }
0x2d19   :  { %v2647_v35 = vpop.xlane.xlu0 %2646 }
0x2d1a   :  { %v2648_v25 = vmul.f32 0.03125, %v2647_v35 }
0x2d1c   :  { %v2649_v29 = vadd.f32 1e-05, %v2648_v25 }
0x2d1e   :  { %5814 = vrsqrt.f32 %v2649_v29 }
0x2d2b   :  { %v5815_v63 = vpop.eup %5814 }
0x2d2c   :  { %v2651_v47 = vmul.f32 %v5815_v63, %v2643_v14 }
0x2d2e   :  { %v2658_v53 = vmul.f32 %v5132_v46, %v2651_v47 }
0x2d30   :  { %v2665_v54 = vadd.f32 %v5133_v51, %v2658_v53 }
0x2d32   :  { %2666 = vst.msk [vmem:[%s6902_s24] sm:$0xff] %vm182_vm1, %v2665_v54 }
0x2d5d   :  { %v4975_v33 = vpop.f32.mrf.mxu0 }
0x2d5e   :  { %v4976_v36 = vadd.f32 %v6607_v40, %v4975_v33 }
0x2d5f   :  { %v5707_v55 = vpop.f32.mrf.mxu0 }
0x2d60   :  { %v4980_v56 = vmul.f32 0.70710677, %v4976_v36  ;;  %v4979_v21 = vmul.f32 0.5, %v4976_v36 }
0x2d62   :  { %5816 = verf.f32 %v4980_v56 }
0x2d6f   :  { %v5817_v26 = vpop.eup %5816 }
0x2d70   :  { %v4982_v22 = vadd.f32 1.0, %v5817_v26 }
0x2d72   :  { %v4983_v31 = vmul.f32 %v4982_v22, %v4979_v21 }
0x2d74   :  { %5725 = vmatmul.mubr.msk.f32.vlgmr.msra.gmra.mxu1 %vm2564_vm3, %v4983_v31 }
0x2e34   :  { %v5053_v10 = vpop.f32.mrf.mxu1 }
0x2e35   :  { %v5054_v11 = vadd.f32 %v5130_v3, %v5053_v10 }
0x2e36   :  { %v5726_v52 = vpop.f32.mrf.mxu1 }
0x2e37   :  { %v5057_v60 = vadd.f32 %v5054_v11, %v4905_v27 }
0x2e39   :  { %v5058_v62 = vsel %vm182_vm1, %v5057_v60, 0.0 }
0x2e3a   :  { %5059 = vadd.xlane.f32.xlu1 %v5058_v62 }
0x2ec3   :  { %v5060_v37 = vpop.xlane.xlu1 %5059 }
0x2ec4   :  { %v5061_v12 = vmul.f32 0.03125, %v5060_v37 }
0x2ec6   :  { %v5062_v58 = vsub.f32 %v5057_v60, %v5061_v12 }
0x2ec8   :  { %v5063_v40 = vmul.f32 %v5062_v58, %v5062_v58 }
0x2eca   :  { %v5064_v13 = vsel %vm182_vm1, %v5063_v40, 0.0 }
0x2ecb   :  { %5065 = vadd.xlane.f32.xlu1 %v5064_v13 }
0x2f54   :  { %v5066_v50 = vpop.xlane.xlu1 %5065 }
0x2f55   :  { %v5067_v16 = vmul.f32 0.03125, %v5066_v50 }
0x2f57   :  { %v5068_v9 = vadd.f32 1e-05, %v5067_v16 }
0x2f59   :  { %5818 = vrsqrt.f32 %v5068_v9 }
0x2f66   :  { %v5819_v15 = vpop.eup %5818 }
0x2f67   :  { %v5070_v28 = vmul.f32 %v5819_v15, %v5062_v58 }
0x2f69   :  { %v5071_v59 = vmul.f32 %v5132_v46, %v5070_v28 }
0x2f6b   :  { %v5072_v30 = vadd.f32 %v5133_v51, %v5071_v59 }
0x2f6d   :  { %5174 = vst.msk [vmem:[%s6902_s24 + $0x8] sm:$0xff] %vm182_vm1, %v5072_v30 }
0x2f6e   :  { %5079 = vsyncpa [#allocation3], 1 }
0x2f6f   :  { %5080 = vsyncpa [#allocation5], 1 }
0x2f70   :  { %5081 = vsyncpa [#allocation8], 1 }

// kernel: transformer_seq2seq_de_forward.9
= control target key start
LH: loop header
LB: loop body
LE: loop exit
PB: predicated region body
PF: predicated region fallthrough
CT: control target
= control target key end

     0   :  { %v5766_v0 = vmov 0.0   ;;  %vm135_vm0 = vcmask 261120   ;;  %vm5767_vm1 = vmmov 0   ;;  %vm285_vm2 = vcmask 64512   ;;  %s6791_s28 = smov 72   ;;  %s6734_s4 = inlined_call_operand.vmem [shape: f32[32,64], index: 4, kind: input, shape index: {}]   ;;  %s6735_s2 = inlined_call_operand.vmem [shape: f32[32,32], index: 2, kind: input, shape index: {}]   ;;  %s6736_s0 = inlined_call_operand.vmem [shape: f32[2,8,32], index: 0, kind: input, shape index: {}]   ;;  %s6737_s5 = inlined_call_operand.vmem [shape: f32[1,64], index: 5, kind: input, shape index: {}]   ;;  %s6738_s3 = inlined_call_operand.vmem [shape: f32[1,32], index: 3, kind: input, shape index: {}]   ;;  %s6739_s6 = inlined_call_operand.vmem [shape: f32[32,32], index: 6, kind: input, shape index: {}]   ;;  %s6740_s7 = inlined_call_operand.vmem [shape: f32[1,32], index: 7, kind: input, shape index: {}]   ;;  %s6741_s12 = inlined_call_operand.vmem [shape: f32[32,64], index: 12, kind: input, shape index: {}]   ;;  %s6742_s10 = inlined_call_operand.vmem [shape: f32[32,32], index: 10, kind: input, shape index: {}]   ;;  %s6743_s1 = inlined_call_operand.vmem [shape: f32[2,8,32], index: 1, kind: input, shape index: {}]   ;;  %s6744_s8 = inlined_call_operand.vmem [shape: f32[1,32], index: 8, kind: input, shape index: {}]   ;;  %s6745_s9 = inlined_call_operand.vmem [shape: f32[1,32], index: 9, kind: input, shape index: {}]   ;;  %s6746_s13 = inlined_call_operand.vmem [shape: f32[1,64], index: 13, kind: input, shape index: {}]   ;;  %s6747_s11 = inlined_call_operand.vmem [shape: f32[1,32], index: 11, kind: input, shape index: {}]   ;;  %s6748_s14 = inlined_call_operand.vmem [shape: f32[32,32], index: 14, kind: input, shape index: {}]   ;;  %s6749_s15 = inlined_call_operand.vmem [shape: f32[1,32], index: 15, kind: input, shape index: {}]   ;;  %s6750_s18 = inlined_call_operand.vmem [shape: f32[32,64], index: 18, kind: input, shape index: {}]   ;;  %s6751_s16 = inlined_call_operand.vmem [shape: f32[1,32], index: 16, kind: input, shape index: {}]   ;;  %s6752_s17 = inlined_call_operand.vmem [shape: f32[1,32], index: 17, kind: input, shape index: {}]   ;;  %s6753_s20 = inlined_call_operand.vmem [shape: f32[64,32], index: 20, kind: input, shape index: {}]   ;;  %s6754_s19 = inlined_call_operand.vmem [shape: f32[1,64], index: 19, kind: input, shape index: {}]   ;;  %s6755_s21 = inlined_call_operand.vmem [shape: f32[1,32], index: 21, kind: input, shape index: {}]   ;;  %s6756_s22 = inlined_call_operand.vmem [shape: f32[1,32], index: 22, kind: input, shape index: {}]   ;;  %s6757_s23 = inlined_call_operand.vmem [shape: f32[1,32], index: 23, kind: input, shape index: {}]   ;;  %s6758_s24 = inlined_call_operand.vmem [shape: f32[2,8,32], index: 24, kind: output, shape index: {}]  }
   0x1   :  { %6771 = sst [smem:[#allocation2_spill]] %s6734_s4  ;;  %5300 = vmatprep.subr.mxu1 %v5766_v0  ;;  %5289 = vmatprep.subr.mxu0 %v5766_v0  ;;  %vm2517_vm3 = vcmask 523264  }
   0x2   :  { %6772 = sst [smem:[#allocation3_spill]] %s6735_s2  ;;  %5308 = vmatprep.mubr.msk.f32.mxu1 %vm5767_vm1, %v5766_v0  ;;  %5297 = vmatprep.mubr.msk.f32.mxu0 %vm5767_vm1, %v5766_v0  ;;  %s5770_s2 = smov 88  }
   0x3   :  { %6773 = sst [smem:[#allocation4_spill]] %s6736_s0 }
   0x4   :  { %6774 = sst [smem:[#allocation5_spill]] %s6737_s5 }
   0x5   :  { %6775 = sst [smem:[#allocation6_spill]] %s6738_s3  ;;  %s5769_s3 = smov 120  }
   0x6   :  { %6776 = sst [smem:[#allocation7_spill]] %s6739_s6  ;;  %s5771_s6 = smov 112  }
   0x7   :  { %6777 = sst [smem:[#allocation8_spill]] %s6740_s7 }
   0x8   :  { %6778 = sst [smem:[#allocation9_spill]] %s6741_s12 }
   0x9   :  { %6779 = sst [smem:[#allocation10_spill]] %s6742_s10  ;;  %s5768_s10 = smov 96  }
   0xa   :  { %s6780_s27 = sld [smem:[#allocation2_spill]] }
   0xb   :  { %s6781_s0 = sld [smem:[#allocation3_spill]] }
   0xc   :  { %s6782_s4 = sld [smem:[#allocation4_spill]] }
   0xd   :  { %s6783_s12 = sld [smem:[#allocation5_spill]] }
   0xe   :  { %s6784_s25 = sld [smem:[#allocation6_spill]] }
   0xf   :  { %s6785_s7 = sld [smem:[#allocation7_spill]] }
  0x10   :  { %v5905_v1 = vld [vmem:[%s6780_s27 + $0x18] sm:$0xff]  ;;  %v5915_v3 = vld [vmem:[%s6780_s27 + $0x10] sm:$0xff]  ;;  %v5929_v5 = vld [vmem:[%s6780_s27 + $0x8] sm:$0xff]  ;;  %s6787_s26 = sld [smem:[#allocation9_spill]] }
  0x11   :  { %v5910_v2 = vld [vmem:[%s6781_s0 + $0x18] sm:$0xff]  ;;  %5301 = vmatpush3.msra.mxu1 %v5905_v1  ;;  %v5922_v4 = vld [vmem:[%s6781_s0 + $0x10] sm:$0xff]  ;;  %v5934_v6 = vld [vmem:[%s6781_s0 + $0x8] sm:$0xff] }
  0x12   :  { %5290 = vmatpush3.msra.mxu0 %v5910_v2  ;;  %5302 = vmatprep.subr.mxu1 %v5766_v0  ;;  %v5943_v7 = vld [vmem:[%s6780_s27] sm:$0xff]  ;;  %s6786_s27 = sld [smem:[#allocation8_spill]] }
  0x13   :  { %5291 = vmatprep.subr.mxu0 %v5766_v0  ;;  %5303 = vmatpush3.msra.mxu1 %v5915_v3  ;;  %v5950_v8 = vld [vmem:[%s6781_s0] sm:$0xff]  ;;  %s6767_s0 = smov 80  }
  0x14   :  { %5292 = vmatpush3.msra.mxu0 %v5922_v4  ;;  %5304 = vmatprep.subr.mxu1 %v5766_v0  ;;  %v5957_v9 = vld [vmem:[%s6782_s4] sm:$0xff] }
  0x15   :  { %5293 = vmatprep.subr.mxu0 %v5766_v0  ;;  %5305 = vmatpush3.msra.mxu1 %v5929_v5  ;;  %v5978_v10 = vld [vmem:[%s6783_s12] ss:$0 sm:$0xff]  ;;  %v6027_v45 = vld [vmem:[%s6785_s7 + $0x8] sm:$0xff]  ;;  %s6769_s12 = smov 104  }
  0x16   :  { %5294 = vmatpush3.msra.mxu0 %v5934_v6  ;;  %5306 = vmatprep.subr.mxu1 %v5766_v0  ;;  %v5983_v11 = vld [vmem:[%s6784_s25] ss:$0 sm:$0xff]  ;;  %s6765_s25 = smov 72  }
  0x17   :  { %5295 = vmatprep.subr.mxu0 %v5766_v0  ;;  %5307 = vmatpush3.msra.mxu1 %v5943_v7  ;;  %v6034_v49 = vld [vmem:[%s6785_s7] sm:$0xff] }
  0x18   :  { %5296 = vmatpush3.msra.mxu0 %v5950_v8  ;;  %5309 = vmatmul.mubr.msk.f32.vlgmr.msra.gmra.mxu1 %vm135_vm0, %v5957_v9 }
  0x19   :  { %5298 = vmatmul.mubr.msk.f32.vlgmr.msra.gmra.mxu0 %vm135_vm0, %v5957_v9  ;;  %5311 = vmatprep.subr.mxu0 %v5766_v0 }
  0x1a   :  { %5313 = vmatprep.mubr.msk.f32.mxu0 %vm5767_vm1, %v5766_v0  ;;  %5326 = vmatprep.subr.mxu1 %v5766_v0 }
  0x1b   :  { %5328 = vmatprep.mubr.msk.f32.mxu1 %vm5767_vm1, %v5766_v0 }
  0xd8   :  { %v281_v12 = vpop.f32.mrf.mxu1 }
  0xd9   :  { %v205_v13 = vpop.f32.mrf.mxu0  ;;  %v5986_v14 = vadd.f32 %v5978_v10, %v281_v12 }
  0xda   :  { %v5989_v15 = vadd.f32 %v5983_v11, %v205_v13  ;;  %v5310_v16 = vpop.f32.mrf.mxu1 }
  0xdb   :  { %v5299_v17 = vpop.f32.mrf.mxu0  ;;  %374 = vrot.lane.b32.xlu1 %v5986_v14, %s5768_s10  ;;  %5312 = vmatpush3.xpose.msk.msra.mxu0 %vm285_vm2, %v5986_v14 }
  0xdc   :  { %5316 = vmatprep.subr.mxu0 %v5766_v0 }
  0xde   :  { %5314 = vmatmul.mubr.msk.f32.vlgmr.msra.gmra.mxu0 %vm285_vm2, %v5989_v15 }
  0xdf   :  { %452 = vrot.lane.b32.xlu1 %v5986_v14, %s5769_s3  ;;  %5318 = vmatprep.mubr.msk.f32.mxu0 %vm5767_vm1, %v5766_v0 }
 0x14d   :  { %v375_v18 = vpop.permute.xlu1 %374 }
 0x14e   :  { %5317 = vmatpush3.msra.mxu0 %v375_v18 }
 0x14f   :  { %5321 = vmatprep.subr.mxu0 %v5766_v0 }
 0x151   :  { %v453_v31 = vpop.permute.xlu1 %452 }
 0x19e   :  { %v358_v19 = vpop.f32.mrf.mxu0 }
 0x19f   :  { %v362_v20 = vmul.f32 0.35355338, %v358_v19 }
 0x1a0   :  { %v5315_v21 = vpop.f32.mrf.mxu0 }
 0x1a1   :  { %v363_v22 = vsel %vm285_vm2, %v362_v20, -inf }
 0x1a2   :  { %364 = vmax.xlane.f32.xlu0 %v363_v22  ;;  %v6074_v22 = vld [vmem:[%s6785_s7 + $0x10] sm:$0xff] }
 0x22b   :  { %v365_v23 = vpop.xlane.xlu0 %364 }
 0x22c   :  { %v366_v24 = vsub.f32 %v362_v20, %v365_v23 }
 0x22e   :  { %v367_v25 = vmul.f32 1.442695, %v366_v24 }
 0x230   :  { %5686 = vpow2.f32 %v367_v25 }
 0x23d   :  { %v5687_v26 = vpop.eup %5686 }
 0x23e   :  { %v369_v27 = vsel %vm285_vm2, %v5687_v26, 0.0 }
 0x23f   :  { %370 = vadd.xlane.f32.xlu0 %v369_v27 }
 0x255   :  { %450 = vrot.lane.b32.xlu0 %v5989_v15, %s5769_s3 }
 0x2c8   :  { %v371_v28 = vpop.xlane.xlu0 %370 }
 0x2c9   :  { %5688 = vrcp.f32 %v371_v28 }
 0x2cc   :  { %v451_v32 = vpop.permute.xlu0 %450 }
 0x2d6   :  { %v5689_v29 = vpop.eup %5688 }
 0x2d7   :  { %v373_v30 = vmul.f32 %v5689_v29, %v5687_v26 }
 0x2d9   :  { %5319 = vmatmul.mubr.msk.f32.vlgmr.msra.gmra.mxu0 %vm285_vm2, %v373_v30 }
 0x2da   :  { %5322 = vmatpush3.xpose.msk.msra.mxu0 %vm285_vm2, %v453_v31  ;;  %5323 = vmatprep.mubr.msk.f32.mxu0 %vm5767_vm1, %v5766_v0 }
 0x2db   :  { %5331 = vmatprep.subr.mxu0 %v5766_v0 }
 0x2dd   :  { %5324 = vmatmul.mubr.msk.f32.vlgmr.msra.gmra.mxu0 %vm285_vm2, %v451_v32 }
 0x2de   :  { %5333 = vmatprep.mubr.msk.f32.mxu0 %vm5767_vm1, %v5766_v0  ;;  %5332 = vmatpush3.msra.mxu0 %v6027_v45 }
 0x2df   :  { %5341 = vmatprep.subr.mxu0 %v5766_v0 }
 0x399   :  { %v446_v33 = vpop.f32.mrf.mxu0 }
 0x39b   :  { %v5320_v34 = vpop.f32.mrf.mxu0 }
 0x39d   :  { %v524_v35 = vpop.f32.mrf.mxu0 }
 0x39e   :  { %v528_v36 = vmul.f32 0.35355338, %v524_v35  ;;  %v6089_v35 = vld [vmem:[%s6785_s7 + $0x18] sm:$0xff] }
 0x39f   :  { %v5325_v37 = vpop.f32.mrf.mxu0 }
 0x3a0   :  { %v529_v38 = vsel %vm285_vm2, %v528_v36, -inf }
 0x3a1   :  { %530 = vmax.xlane.f32.xlu1 %v529_v38 }
 0x3b2   :  { %540 = vrot.lane.b32.xlu1 %v5986_v14, %s5770_s2 }
 0x3b6   :  { %762 = vrot.lane.b32.xlu1 %v5989_v15, %s5771_s6 }
 0x42a   :  { %v531_v39 = vpop.xlane.xlu1 %530 }
 0x42b   :  { %v532_v40 = vsub.f32 %v528_v36, %v531_v39 }
 0x42d   :  { %v533_v41 = vmul.f32 1.442695, %v532_v40 }
 0x42e   :  { %v541_v42 = vpop.permute.xlu1 %540 }
 0x42f   :  { %5690 = vpow2.f32 %v533_v41  ;;  %5327 = vmatpush3.msra.mxu1 %v541_v42 }
 0x430   :  { %5336 = vmatprep.subr.mxu1 %v5766_v0 }
 0x432   :  { %v763_v53 = vpop.permute.xlu1 %762 }
 0x43c   :  { %v5691_v43 = vpop.eup %5690 }
 0x43d   :  { %v535_v44 = vsel %vm285_vm2, %v5691_v43, 0.0 }
 0x43e   :  { %536 = vadd.xlane.f32.xlu0 %v535_v44  ;;  %v6103_v44 = vld [vmem:[%s6786_s27] ss:$0 sm:$0xff] }
 0x454   :  { %764 = vrot.lane.b32.xlu0 %v5986_v14, %s5771_s6 }
 0x4c7   :  { %v537_v46 = vpop.xlane.xlu0 %536 }
 0x4c8   :  { %5692 = vrcp.f32 %v537_v46 }
 0x4cb   :  { %v765_v51 = vpop.permute.xlu0 %764 }
 0x4d5   :  { %v5693_v47 = vpop.eup %5692 }
 0x4d6   :  { %v539_v48 = vmul.f32 %v5693_v47, %v5691_v43 }
 0x4d8   :  { %5329 = vmatmul.mubr.msk.f32.vlgmr.msra.gmra.mxu1 %vm285_vm2, %v539_v48 }
 0x4d9   :  { %5337 = vmatpush3.msra.mxu1 %v6034_v49  ;;  %5338 = vmatprep.mubr.msk.f32.mxu1 %vm5767_vm1, %v5766_v0 }
 0x4da   :  { %5346 = vmatprep.subr.mxu1 %v5766_v0 }
 0x4dc   :  { %5339 = vmatmul.mubr.msk.f32.vlgmr.msra.gmra.mxu1 %vm285_vm2, %v446_v33 }
 0x4dd   :  { %5348 = vmatprep.mubr.msk.f32.mxu1 %vm5767_vm1, %v5766_v0 }
 0x598   :  { %v612_v50 = vpop.f32.mrf.mxu1 }
 0x599   :  { %5334 = vmatmul.mubr.msk.f32.vlgmr.msra.gmra.mxu0 %vm285_vm2, %v612_v50 }
 0x59a   :  { %5342 = vmatpush3.xpose.msk.msra.mxu0 %vm285_vm2, %v765_v51  ;;  %v5330_v52 = vpop.f32.mrf.mxu1  ;;  %5343 = vmatprep.mubr.msk.f32.mxu0 %vm5767_vm1, %v5766_v0 }
 0x59b   :  { %5351 = vmatprep.subr.mxu0 %v5766_v0 }
 0x59c   :  { %v6049_v54 = vpop.f32.mrf.mxu1 }
 0x59d   :  { %5344 = vmatmul.mubr.msk.f32.vlgmr.msra.gmra.mxu0 %vm285_vm2, %v763_v53 }
 0x59e   :  { %v5340_v55 = vpop.f32.mrf.mxu1  ;;  %5353 = vmatprep.mubr.msk.f32.mxu0 %vm5767_vm1, %v5766_v0  ;;  %5352 = vmatpush3.msra.mxu0 %v6074_v22 }
 0x59f   :  { %5361 = vmatprep.subr.mxu0 %v5766_v0 }
 0x659   :  { %v685_v56 = vpop.f32.mrf.mxu0 }
 0x65a   :  { %v759_v36 = vadd.f32 %v6049_v54, %v685_v56 }
 0x65b   :  { %v5335_v57 = vpop.f32.mrf.mxu0 }
 0x65d   :  { %v836_v58 = vpop.f32.mrf.mxu0 }
 0x65e   :  { %v840_v59 = vmul.f32 0.35355338, %v836_v58  ;;  %v6112_v58 = vld [vmem:[%s6787_s26 + $0x18] sm:$0xff] }
 0x65f   :  { %v5345_v60 = vpop.f32.mrf.mxu0 }
 0x660   :  { %v841_v61 = vsel %vm285_vm2, %v840_v59, -inf }
 0x661   :  { %842 = vmax.xlane.f32.xlu1 %v841_v61  ;;  %v6139_v61 = vld [vmem:[%s6787_s26] sm:$0xff] }
 0x672   :  { %852 = vrot.lane.b32.xlu1 %v5986_v14, %s6767_s0  ;;  %s6789_s0 = smov 104  }
 0x676   :  { %1002 = vrot.lane.b32.xlu1 %v5989_v15, %s6769_s12 }
 0x6ea   :  { %v843_v62 = vpop.xlane.xlu1 %842 }
 0x6eb   :  { %v844_v63 = vsub.f32 %v840_v59, %v843_v62  ;;  %v6126_v59 = vld [vmem:[%s6787_s26 + $0x8] sm:$0xff] }
 0x6ed   :  { %v845_v12 = vmul.f32 1.442695, %v844_v63  ;;  %v128_v63 = vld [vmem:[%s6743_s1] sm:$0xff] }
 0x6ee   :  { %v853_v13 = vpop.permute.xlu1 %852 }
 0x6ef   :  { %5694 = vpow2.f32 %v845_v12  ;;  %5347 = vmatpush3.msra.mxu1 %v853_v13 }
 0x6f0   :  { %5356 = vmatprep.subr.mxu1 %v5766_v0 }
 0x6f2   :  { %v1003_v21 = vpop.permute.xlu1 %1002 }
 0x6fc   :  { %v5695_v16 = vpop.eup %5694 }
 0x6fd   :  { %v847_v17 = vsel %vm285_vm2, %v5695_v16, 0.0 }
 0x6fe   :  { %848 = vadd.xlane.f32.xlu0 %v847_v17 }
 0x714   :  { %1004 = vrot.lane.b32.xlu0 %v5986_v14, %s6769_s12 }
 0x787   :  { %v849_v18 = vpop.xlane.xlu0 %848 }
 0x788   :  { %5696 = vrcp.f32 %v849_v18 }
 0x78b   :  { %v1005_v15 = vpop.permute.xlu0 %1004 }
 0x795   :  { %v5697_v19 = vpop.eup %5696 }
 0x796   :  { %v851_v20 = vmul.f32 %v5697_v19, %v5695_v16 }
 0x798   :  { %5349 = vmatmul.mubr.msk.f32.vlgmr.msra.gmra.mxu1 %vm285_vm2, %v851_v20  ;;  %v6174_v20 = vld [vmem:[%s6744_s8] ss:$0 sm:$0xff] }
 0x799   :  { %5357 = vmatpush3.xpose.msk.msra.mxu1 %vm285_vm2, %v1005_v15  ;;  %5358 = vmatprep.mubr.msk.f32.mxu1 %vm5767_vm1, %v5766_v0 }
 0x79a   :  { %5366 = vmatprep.subr.mxu1 %v5766_v0 }
 0x79c   :  { %5359 = vmatmul.mubr.msk.f32.vlgmr.msra.gmra.mxu1 %vm285_vm2, %v1003_v21  ;;  %v6179_v21 = vld [vmem:[%s6745_s9] ss:$0 sm:$0xff] }
 0x79d   :  { %5368 = vmatprep.mubr.msk.f32.mxu1 %vm5767_vm1, %v5766_v0  ;;  %5367 = vmatpush3.msra.mxu1 %v6089_v35 }
 0x79e   :  { %5382 = vmatprep.subr.mxu1 %v5766_v0 }
 0x858   :  { %v924_v23 = vpop.f32.mrf.mxu1 }
 0x859   :  { %5354 = vmatmul.mubr.msk.f32.vlgmr.msra.gmra.mxu0 %vm285_vm2, %v924_v23 }
 0x85a   :  { %v5350_v24 = vpop.f32.mrf.mxu1  ;;  %5363 = vmatprep.mubr.msk.f32.mxu0 %vm5767_vm1, %v5766_v0 }
 0x85c   :  { %v1076_v25 = vpop.f32.mrf.mxu1 }
 0x85d   :  { %v1080_v26 = vmul.f32 0.35355338, %v1076_v25  ;;  %v6192_v25 = vld [vmem:[%s6746_s13] ss:$0 sm:$0xff] }
 0x85e   :  { %v5360_v27 = vpop.f32.mrf.mxu1 }
 0x85f   :  { %v1081_v28 = vsel %vm285_vm2, %v1080_v26, -inf }
 0x860   :  { %1082 = vmax.xlane.f32.xlu1 %v1081_v28 }
 0x871   :  { %1092 = vrot.lane.b32.xlu1 %v5986_v14, %s6765_s25  ;;  %s6788_s25 = sld [smem:[#allocation10_spill]] }
 0x877   :  { %v6132_v60 = vld [vmem:[%s6788_s25 + $0x18] sm:$0xff]  ;;  %v6144_v62 = vld [vmem:[%s6788_s25 + $0x10] sm:$0xff]  ;;  %v6154_v12 = vld [vmem:[%s6788_s25 + $0x8] sm:$0xff] }
 0x878   :  { %v6162_v13 = vld [vmem:[%s6788_s25] sm:$0xff] }
 0x8e9   :  { %v1083_v29 = vpop.xlane.xlu1 %1082 }
 0x8ea   :  { %v1084_v30 = vsub.f32 %v1080_v26, %v1083_v29  ;;  %v6205_v29 = vld [vmem:[%s6747_s11] ss:$0 sm:$0xff] }
 0x8ec   :  { %v1085_v31 = vmul.f32 1.442695, %v1084_v30 }
 0x8ed   :  { %v1093_v32 = vpop.permute.xlu1 %1092 }
 0x8ee   :  { %5698 = vpow2.f32 %v1085_v31  ;;  %5362 = vmatpush3.msra.mxu0 %v1093_v32 }
 0x8ef   :  { %5371 = vmatprep.subr.mxu0 %v5766_v0 }
 0x8fb   :  { %v5699_v33 = vpop.eup %5698 }
 0x8fc   :  { %v1087_v34 = vsel %vm285_vm2, %v5699_v33, 0.0 }
 0x8fd   :  { %1088 = vadd.xlane.f32.xlu0 %v1087_v34 }
 0x919   :  { %v997_v14 = vpop.f32.mrf.mxu0 }
 0x91a   :  { %v1001_v37 = vadd.f32 %v997_v14, %v759_v36 }
 0x91b   :  { %v5355_v38 = vpop.f32.mrf.mxu0 }
 0x986   :  { %v1089_v39 = vpop.xlane.xlu0 %1088 }
 0x987   :  { %5700 = vrcp.f32 %v1089_v39 }
 0x994   :  { %v5701_v40 = vpop.eup %5700 }
 0x995   :  { %v1091_v41 = vmul.f32 %v5701_v40, %v5699_v33 }
 0x997   :  { %5364 = vmatmul.mubr.msk.f32.vlgmr.msra.gmra.mxu0 %vm285_vm2, %v1091_v41 }
 0x998   :  { %5379 = vmatprep.mubr.msk.f32.mxu0 %vm5767_vm1, %v5766_v0  ;;  %5372 = vmatpush3.msra.mxu0 %v6132_v60 }
 0x999   :  { %5373 = vmatprep.subr.mxu0 %v5766_v0 }
 0x99a   :  { %5374 = vmatpush3.msra.mxu0 %v6144_v62 }
 0x99b   :  { %5375 = vmatprep.subr.mxu0 %v5766_v0 }
 0x99c   :  { %5376 = vmatpush3.msra.mxu0 %v6154_v12 }
 0x99d   :  { %5377 = vmatprep.subr.mxu0 %v5766_v0 }
 0x99e   :  { %5378 = vmatpush3.msra.mxu0 %v6162_v13 }
 0x99f   :  { %5393 = vmatprep.subr.mxu0 %v5766_v0 }
 0xa57   :  { %v1164_v42 = vpop.f32.mrf.mxu0 }
 0xa58   :  { %5369 = vmatmul.mubr.msk.f32.vlgmr.msra.gmra.mxu1 %vm285_vm2, %v1164_v42 }
 0xa59   :  { %v5365_v43 = vpop.f32.mrf.mxu0  ;;  %5390 = vmatprep.mubr.msk.f32.mxu1 %vm5767_vm1, %v5766_v0  ;;  %5383 = vmatpush3.msra.mxu1 %v6112_v58 }
 0xa5a   :  { %5384 = vmatprep.subr.mxu1 %v5766_v0 }
 0xb18   :  { %v1237_v46 = vpop.f32.mrf.mxu1 }
 0xb19   :  { %v1241_v47 = vadd.f32 %v1237_v46, %v1001_v37 }
 0xb1a   :  { %v5370_v48 = vpop.f32.mrf.mxu1 }
 0xb1b   :  { %v1248_v50 = vadd.f32 %v6103_v44, %v1241_v47 }
 0xb1d   :  { %v1249_v51 = vadd.f32 %v1248_v50, %v5957_v9  ;;  %v6119_v9 = vld [vmem:[%s6787_s26 + $0x10] sm:$0xff]  ;;  %s6790_s26 = smov 80  }
 0xb1e   :  { %5385 = vmatpush3.msra.mxu1 %v6119_v9 }
 0xb1f   :  { %v1250_v52 = vsel %vm135_vm0, %v1249_v51, 0.0  ;;  %5386 = vmatprep.subr.mxu1 %v5766_v0 }
 0xb20   :  { %1251 = vadd.xlane.f32.xlu0 %v1250_v52  ;;  %5387 = vmatpush3.msra.mxu1 %v6126_v59 }
 0xb21   :  { %5388 = vmatprep.subr.mxu1 %v5766_v0 }
 0xb22   :  { %5389 = vmatpush3.msra.mxu1 %v6139_v61 }
 0xb23   :  { %5391 = vmatmul.mubr.msk.f32.vlgmr.msra.gmra.mxu1 %vm135_vm0, %v128_v63  ;;  %5398 = vmatprep.subr.mxu1 %v5766_v0 }
 0xb24   :  { %5400 = vmatprep.mubr.msk.f32.mxu1 %vm5767_vm1, %v5766_v0 }
 0xba9   :  { %v1252_v53 = vpop.xlane.xlu0 %1251 }
 0xbaa   :  { %v1254_v54 = vmul.f32 0.03125, %v1252_v53 }
 0xbac   :  { %v1255_v55 = vsub.f32 %v1249_v51, %v1254_v54 }
 0xbae   :  { %v1256_v56 = vmul.f32 %v1255_v55, %v1255_v55 }
 0xbb0   :  { %v1257_v57 = vsel %vm135_vm0, %v1256_v56, 0.0 }
 0xbb1   :  { %1258 = vadd.xlane.f32.xlu0 %v1257_v57 }
 0xbe3   :  { %v1432_v26 = vpop.f32.mrf.mxu1 }
 0xbe4   :  { %v6195_v27 = vadd.f32 %v6192_v25, %v1432_v26  ;;  %v6250_v26 = vld [vmem:[%s6748_s14 + $0x8] sm:$0xff] }
 0xbe5   :  { %v5392_v28 = vpop.f32.mrf.mxu1 }
 0xbe6   :  { %1602 = vrot.lane.b32.xlu0 %v6195_v27, %s5769_s3 }
 0xc3a   :  { %v1259_v16 = vpop.xlane.xlu0 %1258 }
 0xc3b   :  { %v1260_v17 = vmul.f32 0.03125, %v1259_v16 }
 0xc3d   :  { %v1261_v18 = vadd.f32 1e-05, %v1260_v17 }
 0xc3f   :  { %5702 = vrsqrt.f32 %v1261_v18 }
 0xc4c   :  { %v5703_v19 = vpop.eup %5702 }
 0xc4d   :  { %v1263_v15 = vmul.f32 %v5703_v19, %v1255_v55 }
 0xc4f   :  { %v1270_v23 = vmul.f32 %v6174_v20, %v1263_v15 }
 0xc51   :  { %v6183_v24 = vadd.f32 %v6179_v21, %v1270_v23  ;;  %v6244_v23 = vld [vmem:[%s6748_s14] sm:$0xff] }
 0xc53   :  { %5380 = vmatmul.mubr.msk.f32.vlgmr.msra.gmra.mxu0 %vm135_vm0, %v6183_v24 }
 0xc54   :  { %5395 = vmatprep.mubr.msk.f32.mxu0 %vm5767_vm1, %v5766_v0  ;;  %5394 = vmatpush3.xpose.msk.msra.mxu0 %vm285_vm2, %v6195_v27 }
 0xc55   :  { %5403 = vmatprep.subr.mxu0 %v5766_v0 }
 0xc58   :  { %v1603_v32 = vpop.permute.xlu0 %1602 }
 0xd13   :  { %v1353_v30 = vpop.f32.mrf.mxu0 }
 0xd14   :  { %v6208_v31 = vadd.f32 %v6205_v29, %v1353_v30 }
 0xd15   :  { %v5381_v33 = vpop.f32.mrf.mxu0 }
 0xd16   :  { %1600 = vrot.lane.b32.xlu1 %v6208_v31, %s5769_s3  ;;  %5396 = vmatmul.mubr.msk.f32.vlgmr.msra.gmra.mxu0 %vm285_vm2, %v6208_v31 }
 0xd17   :  { %5404 = vmatpush3.xpose.msk.msra.mxu0 %vm285_vm2, %v1603_v32  ;;  %5405 = vmatprep.mubr.msk.f32.mxu0 %vm5767_vm1, %v5766_v0 }
 0xd18   :  { %5413 = vmatprep.subr.mxu0 %v5766_v0 }
 0xd88   :  { %v1601_v34 = vpop.permute.xlu1 %1600 }
 0xd89   :  { %5406 = vmatmul.mubr.msk.f32.vlgmr.msra.gmra.mxu0 %vm285_vm2, %v1601_v34 }
 0xd8a   :  { %5415 = vmatprep.mubr.msk.f32.mxu0 %vm5767_vm1, %v5766_v0  ;;  %5414 = vmatpush3.msra.mxu0 %v6250_v26 }
 0xd8b   :  { %5423 = vmatprep.subr.mxu0 %v5766_v0 }
 0xdd6   :  { %v1508_v36 = vpop.f32.mrf.mxu0 }
 0xdd7   :  { %v1512_v14 = vmul.f32 0.35355338, %v1508_v36 }
 0xdd8   :  { %v5397_v37 = vpop.f32.mrf.mxu0 }
 0xdd9   :  { %v1513_v38 = vsel %vm285_vm2, %v1512_v14, -inf }
 0xdda   :  { %1514 = vmax.xlane.f32.xlu1 %v1513_v38 }
 0xe49   :  { %v1674_v39 = vpop.f32.mrf.mxu0 }
 0xe4a   :  { %v1678_v40 = vmul.f32 0.35355338, %v1674_v39 }
 0xe4b   :  { %v5407_v41 = vpop.f32.mrf.mxu0 }
 0xe4c   :  { %v1679_v42 = vsel %vm285_vm2, %v1678_v40, -inf }
 0xe4d   :  { %1680 = vmax.xlane.f32.xlu0 %v1679_v42 }
 0xe63   :  { %v1515_v43 = vpop.xlane.xlu1 %1514  ;;  %1690 = vrot.lane.b32.xlu0 %v6195_v27, %s5770_s2 }
 0xe64   :  { %v1516_v46 = vsub.f32 %v1512_v14, %v1515_v43 }
 0xe66   :  { %v1517_v47 = vmul.f32 1.442695, %v1516_v46 }
 0xe68   :  { %5704 = vpow2.f32 %v1517_v47 }
 0xe75   :  { %v5705_v48 = vpop.eup %5704 }
 0xe76   :  { %v1519_v50 = vsel %vm285_vm2, %v5705_v48, 0.0 }
 0xe77   :  { %1520 = vadd.xlane.f32.xlu1 %v1519_v50 }
 0xed6   :  { %v1681_v51 = vpop.xlane.xlu0 %1680 }
 0xed7   :  { %v1682_v52 = vsub.f32 %v1678_v40, %v1681_v51 }
 0xed9   :  { %v1683_v53 = vmul.f32 1.442695, %v1682_v52 }
 0xeda   :  { %v1691_v18 = vpop.permute.xlu0 %1690 }
 0xedb   :  { %5706 = vpow2.f32 %v1683_v53 }
 0xee8   :  { %v5707_v54 = vpop.eup %5706 }
 0xee9   :  { %v1685_v55 = vsel %vm285_vm2, %v5707_v54, 0.0 }
 0xeea   :  { %1686 = vadd.xlane.f32.xlu1 %v1685_v55 }
 0xefb   :  { %1524 = vrot.lane.b32.xlu1 %v6195_v27, %s5768_s10 }
 0xeff   :  { %1914 = vrot.lane.b32.xlu1 %v6195_v27, %s5771_s6 }
 0xf00   :  { %v1521_v56 = vpop.xlane.xlu1 %1520 }
 0xf01   :  { %5708 = vrcp.f32 %v1521_v56 }
 0xf03   :  { %1912 = vrot.lane.b32.xlu1 %v6208_v31, %s5771_s6 }
 0xf0e   :  { %v5709_v63 = vpop.eup %5708 }
 0xf0f   :  { %v1523_v17 = vmul.f32 %v5709_v63, %v5705_v48  ;;  %v6286_v63 = vld [vmem:[%s6748_s14 + $0x10] sm:$0xff] }
 0xf73   :  { %v1687_v57 = vpop.xlane.xlu1 %1686 }
 0xf74   :  { %5710 = vrcp.f32 %v1687_v57 }
 0xf77   :  { %v1525_v16 = vpop.permute.xlu1 %1524 }
 0xf78   :  { %5399 = vmatpush3.msra.mxu1 %v1525_v16 }
 0xf79   :  { %5401 = vmatmul.mubr.msk.f32.vlgmr.msra.gmra.mxu1 %vm285_vm2, %v1523_v17  ;;  %5408 = vmatprep.subr.mxu1 %v5766_v0 }
 0xf7a   :  { %5409 = vmatpush3.msra.mxu1 %v1691_v18  ;;  %5410 = vmatprep.mubr.msk.f32.mxu1 %vm5767_vm1, %v5766_v0 }
 0xf7b   :  { %5418 = vmatprep.subr.mxu1 %v5766_v0  ;;  %v1915_v32 = vpop.permute.xlu1 %1914 }
 0xf7f   :  { %v1913_v36 = vpop.permute.xlu1 %1912 }
 0xf81   :  { %v5711_v19 = vpop.eup %5710 }
 0xf82   :  { %v1689_v15 = vmul.f32 %v5711_v19, %v5707_v54 }
 0xf84   :  { %5411 = vmatmul.mubr.msk.f32.vlgmr.msra.gmra.mxu1 %vm285_vm2, %v1689_v15 }
 0xf85   :  { %5420 = vmatprep.mubr.msk.f32.mxu1 %vm5767_vm1, %v5766_v0  ;;  %5419 = vmatpush3.msra.mxu1 %v6244_v23 }
 0xf86   :  { %5428 = vmatprep.subr.mxu1 %v5766_v0 }
0x1039   :  { %v1596_v28 = vpop.f32.mrf.mxu1 }
0x103a   :  { %5421 = vmatmul.mubr.msk.f32.vlgmr.msra.gmra.mxu1 %vm285_vm2, %v1596_v28 }
0x103b   :  { %v5402_v30 = vpop.f32.mrf.mxu1  ;;  %5430 = vmatprep.mubr.msk.f32.mxu1 %vm5767_vm1, %v5766_v0 }
0x1044   :  { %v1762_v33 = vpop.f32.mrf.mxu1 }
0x1045   :  { %5416 = vmatmul.mubr.msk.f32.vlgmr.msra.gmra.mxu0 %vm285_vm2, %v1762_v33 }
0x1046   :  { %5424 = vmatpush3.xpose.msk.msra.mxu0 %vm285_vm2, %v1915_v32  ;;  %v5412_v34 = vpop.f32.mrf.mxu1  ;;  %5425 = vmatprep.mubr.msk.f32.mxu0 %vm5767_vm1, %v5766_v0 }
0x1047   :  { %5433 = vmatprep.subr.mxu0 %v5766_v0 }
0x1049   :  { %5426 = vmatmul.mubr.msk.f32.vlgmr.msra.gmra.mxu0 %vm285_vm2, %v1913_v36 }
0x104a   :  { %5435 = vmatprep.mubr.msk.f32.mxu0 %vm5767_vm1, %v5766_v0  ;;  %5434 = vmatpush3.msra.mxu0 %v6286_v63 }
0x104b   :  { %5443 = vmatprep.subr.mxu0 %v5766_v0 }
0x10fa   :  { %v1908_v14 = vpop.f32.mrf.mxu1 }
0x10fc   :  { %v5422_v37 = vpop.f32.mrf.mxu1 }
0x10fd   :  { %v6301_v37 = vld [vmem:[%s6748_s14 + $0x18] sm:$0xff] }
0x1105   :  { %v1835_v38 = vpop.f32.mrf.mxu0 }
0x1106   :  { %v1909_v39 = vadd.f32 %v1908_v14, %v1835_v38 }
0x1107   :  { %v5417_v40 = vpop.f32.mrf.mxu0 }
0x1109   :  { %v1986_v41 = vpop.f32.mrf.mxu0 }
0x110a   :  { %v1990_v42 = vmul.f32 0.35355338, %v1986_v41 }
0x110b   :  { %v5427_v43 = vpop.f32.mrf.mxu0 }
0x110c   :  { %v1991_v46 = vsel %vm285_vm2, %v1990_v42, -inf }
0x110d   :  { %1992 = vmax.xlane.f32.xlu1 %v1991_v46 }
0x111e   :  { %2154 = vrot.lane.b32.xlu1 %v6195_v27, %s6789_s0 }
0x1122   :  { %2152 = vrot.lane.b32.xlu1 %v6208_v31, %s6789_s0 }
0x1196   :  { %v1993_v47 = vpop.xlane.xlu1 %1992 }
0x1197   :  { %v1994_v48 = vsub.f32 %v1990_v42, %v1993_v47 }
0x1199   :  { %v1995_v50 = vmul.f32 1.442695, %v1994_v48 }
0x119a   :  { %v2155_v56 = vpop.permute.xlu1 %2154 }
0x119b   :  { %5712 = vpow2.f32 %v1995_v50 }
0x119e   :  { %v2153_v57 = vpop.permute.xlu1 %2152 }
0x11a8   :  { %v5713_v51 = vpop.eup %5712 }
0x11a9   :  { %v1997_v52 = vsel %vm285_vm2, %v5713_v51, 0.0 }
0x11aa   :  { %1998 = vadd.xlane.f32.xlu0 %v1997_v52 }
0x11c0   :  { %2002 = vrot.lane.b32.xlu0 %v6195_v27, %s6790_s26 }
0x1233   :  { %v1999_v53 = vpop.xlane.xlu0 %1998 }
0x1234   :  { %5714 = vrcp.f32 %v1999_v53 }
0x1237   :  { %v2003_v54 = vpop.permute.xlu0 %2002 }
0x1238   :  { %5429 = vmatpush3.msra.mxu1 %v2003_v54 }
0x1239   :  { %5438 = vmatprep.subr.mxu1 %v5766_v0 }
0x1241   :  { %v5715_v55 = vpop.eup %5714 }
0x1242   :  { %v2001_v31 = vmul.f32 %v5715_v55, %v5713_v51 }
0x1244   :  { %5431 = vmatmul.mubr.msk.f32.vlgmr.msra.gmra.mxu1 %vm285_vm2, %v2001_v31 }
0x1245   :  { %5439 = vmatpush3.xpose.msk.msra.mxu1 %vm285_vm2, %v2155_v56  ;;  %5440 = vmatprep.mubr.msk.f32.mxu1 %vm5767_vm1, %v5766_v0 }
0x1246   :  { %5448 = vmatprep.subr.mxu1 %v5766_v0 }
0x1248   :  { %5441 = vmatmul.mubr.msk.f32.vlgmr.msra.gmra.mxu1 %vm285_vm2, %v2153_v57 }
0x1249   :  { %5450 = vmatprep.mubr.msk.f32.mxu1 %vm5767_vm1, %v5766_v0  ;;  %5449 = vmatpush3.msra.mxu1 %v6301_v37 }
0x124a   :  { %5464 = vmatprep.subr.mxu1 %v5766_v0 }
0x1304   :  { %v2074_v16 = vpop.f32.mrf.mxu1 }
0x1305   :  { %5436 = vmatmul.mubr.msk.f32.vlgmr.msra.gmra.mxu0 %vm285_vm2, %v2074_v16 }
0x1306   :  { %v5432_v17 = vpop.f32.mrf.mxu1  ;;  %5445 = vmatprep.mubr.msk.f32.mxu0 %vm5767_vm1, %v5766_v0 }
0x1307   :  { %v6323_v17 = vld [vmem:[%s6750_s18 + $0x18] sm:$0xff] }
0x1308   :  { %v2226_v18 = vpop.f32.mrf.mxu1 }
0x1309   :  { %v2230_v19 = vmul.f32 0.35355338, %v2226_v18  ;;  %v6335_v18 = vld [vmem:[%s6750_s18 + $0x8] sm:$0xff] }
0x130a   :  { %v5442_v15 = vpop.f32.mrf.mxu1 }
0x130b   :  { %v2231_v28 = vsel %vm285_vm2, %v2230_v19, -inf }
0x130c   :  { %2232 = vmax.xlane.f32.xlu0 %v2231_v28 }
0x1322   :  { %2242 = vrot.lane.b32.xlu0 %v6195_v27, %s6791_s28 }
0x1395   :  { %v2233_v30 = vpop.xlane.xlu0 %2232 }
0x1396   :  { %v2234_v32 = vsub.f32 %v2230_v19, %v2233_v30  ;;  %v6342_v19 = vld [vmem:[%s6750_s18] sm:$0xff] }
0x1398   :  { %v2235_v33 = vmul.f32 1.442695, %v2234_v32 }
0x1399   :  { %v2243_v34 = vpop.permute.xlu0 %2242 }
0x139a   :  { %5716 = vpow2.f32 %v2235_v33  ;;  %5444 = vmatpush3.msra.mxu0 %v2243_v34  ;;  %v6351_v33 = vld [vmem:[%s6751_s16] ss:$0 sm:$0xff] }
0x139b   :  { %5453 = vmatprep.subr.mxu0 %v5766_v0 }
0x13a7   :  { %v5717_v36 = vpop.eup %5716 }
0x13a8   :  { %v2237_v14 = vsel %vm285_vm2, %v5717_v36, 0.0 }
0x13a9   :  { %2238 = vadd.xlane.f32.xlu1 %v2237_v14 }
0x13c5   :  { %v2147_v27 = vpop.f32.mrf.mxu0 }
0x13c6   :  { %v2151_v38 = vadd.f32 %v2147_v27, %v1909_v39  ;;  %v6314_v39 = vld [vmem:[%s6749_s15] ss:$0 sm:$0xff] }
0x13c7   :  { %v5437_v40 = vpop.f32.mrf.mxu0 }
0x13c8   :  { %v6454_v40 = vld [vmem:[%s6754_s19] ss:$0 sm:$0xff] }
0x1432   :  { %v2239_v41 = vpop.xlane.xlu1 %2238 }
0x1433   :  { %5718 = vrcp.f32 %v2239_v41 }
0x1440   :  { %v5719_v42 = vpop.eup %5718 }
0x1441   :  { %v2241_v43 = vmul.f32 %v5719_v42, %v5717_v36  ;;  %v6356_v36 = vld [vmem:[%s6752_s17] ss:$0 sm:$0xff] }
0x1443   :  { %5446 = vmatmul.mubr.msk.f32.vlgmr.msra.gmra.mxu0 %vm285_vm2, %v2241_v43 }
0x1444   :  { %5461 = vmatprep.mubr.msk.f32.mxu0 %vm5767_vm1, %v5766_v0  ;;  %5454 = vmatpush3.msra.mxu0 %v6323_v17 }
0x1445   :  { %5455 = vmatprep.subr.mxu0 %v5766_v0 }
0x1503   :  { %v2314_v46 = vpop.f32.mrf.mxu0 }
0x1504   :  { %5451 = vmatmul.mubr.msk.f32.vlgmr.msra.gmra.mxu1 %vm285_vm2, %v2314_v46 }
0x1505   :  { %v5447_v47 = vpop.f32.mrf.mxu0  ;;  %5480 = vmatprep.mubr.msk.f32.mxu1 %vm5767_vm1, %v5766_v0 }
0x15c4   :  { %v2387_v48 = vpop.f32.mrf.mxu1 }
0x15c5   :  { %v2391_v50 = vadd.f32 %v2387_v48, %v2151_v38  ;;  %v6373_v38 = vld [vmem:[%s6782_s4 + $0x8] sm:$0xff] }
0x15c6   :  { %v5452_v51 = vpop.f32.mrf.mxu1 }
0x15c7   :  { %v2398_v52 = vadd.f32 %v6314_v39, %v2391_v50 }
0x15c9   :  { %v2399_v53 = vadd.f32 %v2398_v52, %v6183_v24  ;;  %v6330_v24 = vld [vmem:[%s6750_s18 + $0x10] sm:$0xff] }
0x15ca   :  { %5456 = vmatpush3.msra.mxu0 %v6330_v24 }
0x15cb   :  { %v2400_v54 = vsel %vm135_vm0, %v2399_v53, 0.0  ;;  %5457 = vmatprep.subr.mxu0 %v5766_v0 }
0x15cc   :  { %2401 = vadd.xlane.f32.xlu1 %v2400_v54  ;;  %5458 = vmatpush3.msra.mxu0 %v6335_v18 }
0x15cd   :  { %5459 = vmatprep.subr.mxu0 %v5766_v0 }
0x15ce   :  { %5460 = vmatpush3.msra.mxu0 %v6342_v19 }
0x15cf   :  { %5483 = vmatprep.subr.mxu0 %v5766_v0 }
0x1655   :  { %v2402_v55 = vpop.xlane.xlu1 %2401 }
0x1656   :  { %v2403_v56 = vmul.f32 0.03125, %v2402_v55 }
0x1658   :  { %v2404_v31 = vsub.f32 %v2399_v53, %v2403_v56 }
0x165a   :  { %v2405_v57 = vmul.f32 %v2404_v31, %v2404_v31 }
0x165c   :  { %v2406_v16 = vsel %vm135_vm0, %v2405_v57, 0.0 }
0x165d   :  { %2407 = vadd.xlane.f32.xlu1 %v2406_v16 }
0x16e6   :  { %v2408_v15 = vpop.xlane.xlu1 %2407 }
0x16e7   :  { %v2409_v28 = vmul.f32 0.03125, %v2408_v15 }
0x16e9   :  { %v2410_v30 = vadd.f32 1e-05, %v2409_v28 }
0x16eb   :  { %5720 = vrsqrt.f32 %v2410_v30 }
0x16f8   :  { %v5721_v32 = vpop.eup %5720 }
0x16f9   :  { %v2412_v34 = vmul.f32 %v5721_v32, %v2404_v31 }
0x16fb   :  { %v2419_v14 = vmul.f32 %v6351_v33, %v2412_v34 }
0x16fd   :  { %v6360_v27 = vadd.f32 %v6356_v36, %v2419_v14 }
0x16ff   :  { %5462 = vmatmul.mubr.msk.f32.vlgmr.msra.gmra.mxu0 %vm135_vm0, %v6360_v27 }
0x1700   :  { %5484 = vmatpush3.msra.mxu0 %v5910_v2  ;;  %5491 = vmatprep.mubr.msk.f32.mxu0 %vm5767_vm1, %v5766_v0  ;;  %v6405_v2 = vld [vmem:[%s6753_s20 + $0x30] sm:$0xff] }
0x1701   :  { %5485 = vmatprep.subr.mxu0 %v5766_v0 }
0x1702   :  { %5486 = vmatpush3.msra.mxu0 %v5922_v4  ;;  %v6419_v4 = vld [vmem:[%s6753_s20 + $0x20] sm:$0xff] }
0x1703   :  { %5487 = vmatprep.subr.mxu0 %v5766_v0 }
0x1704   :  { %5488 = vmatpush3.msra.mxu0 %v5934_v6  ;;  %v6433_v6 = vld [vmem:[%s6753_s20 + $0x10] sm:$0xff] }
0x1705   :  { %5489 = vmatprep.subr.mxu0 %v5766_v0 }
0x1706   :  { %5490 = vmatpush3.msra.mxu0 %v5950_v8  ;;  %v6447_v8 = vld [vmem:[%s6753_s20] sm:$0xff] }
0x1707   :  { %5492 = vmatmul.mubr.msk.f32.vlgmr.msra.gmra.mxu0 %vm135_vm0, %v6373_v38  ;;  %5494 = vmatprep.subr.mxu0 %v5766_v0 }
0x1708   :  { %5495 = vmatpush3.msra.mxu0 %v5905_v1  ;;  %5502 = vmatprep.mubr.msk.f32.mxu0 %vm5767_vm1, %v5766_v0  ;;  %v6398_v1 = vld [vmem:[%s6753_s20 + $0x38] sm:$0xff] }
0x1709   :  { %5496 = vmatprep.subr.mxu0 %v5766_v0  ;;  %5465 = vmatpush3.msra.mxu1 %v6398_v1 }
0x170a   :  { %5497 = vmatpush3.msra.mxu0 %v5915_v3  ;;  %5466 = vmatprep.subr.mxu1 %v5766_v0  ;;  %v6412_v3 = vld [vmem:[%s6753_s20 + $0x28] sm:$0xff] }
0x170b   :  { %5498 = vmatprep.subr.mxu0 %v5766_v0  ;;  %5467 = vmatpush3.msra.mxu1 %v6405_v2 }
0x170c   :  { %5499 = vmatpush3.msra.mxu0 %v5929_v5  ;;  %5468 = vmatprep.subr.mxu1 %v5766_v0  ;;  %v6426_v5 = vld [vmem:[%s6753_s20 + $0x18] sm:$0xff] }
0x170d   :  { %5500 = vmatprep.subr.mxu0 %v5766_v0  ;;  %5469 = vmatpush3.msra.mxu1 %v6412_v3 }
0x170e   :  { %5501 = vmatpush3.msra.mxu0 %v5943_v7  ;;  %5470 = vmatprep.subr.mxu1 %v5766_v0  ;;  %v6440_v7 = vld [vmem:[%s6753_s20 + $0x8] sm:$0xff] }
0x170f   :  { %5503 = vmatmul.mubr.msk.f32.vlgmr.msra.gmra.mxu0 %vm135_vm0, %v6373_v38  ;;  %5515 = vmatprep.subr.mxu0 %v5766_v0 }
0x1710   :  { %5517 = vmatprep.mubr.msk.f32.mxu0 %vm5767_vm1, %v5766_v0  ;;  %5471 = vmatpush3.msra.mxu1 %v6419_v4 }
0x1711   :  { %5472 = vmatprep.subr.mxu1 %v5766_v0 }
0x1712   :  { %5473 = vmatpush3.msra.mxu1 %v6426_v5 }
0x1713   :  { %5474 = vmatprep.subr.mxu1 %v5766_v0 }
0x1714   :  { %5475 = vmatpush3.msra.mxu1 %v6433_v6 }
0x1715   :  { %5476 = vmatprep.subr.mxu1 %v5766_v0 }
0x1716   :  { %5477 = vmatpush3.msra.mxu1 %v6440_v7 }
0x1717   :  { %5478 = vmatprep.subr.mxu1 %v5766_v0 }
0x1718   :  { %5479 = vmatpush3.msra.mxu1 %v6447_v8 }
0x1719   :  { %5505 = vmatprep.subr.mxu1 %v5766_v0 }
0x17bf   :  { %v2502_v41 = vpop.f32.mrf.mxu0 }
0x17c0   :  { %v2503_v42 = vadd.f32 %v6454_v40, %v2502_v41 }
0x17c1   :  { %v5463_v43 = vpop.f32.mrf.mxu0 }
0x17c2   :  { %v2507_v46 = vmul.f32 0.70710677, %v2503_v42  ;;  %v2506_v55 = vmul.f32 0.5, %v2503_v42 }
0x17c4   :  { %5722 = verf.f32 %v2507_v46 }
0x17c7   :  { %v2693_v47 = vpop.f32.mrf.mxu0 }
0x17c8   :  { %v6458_v48 = vadd.f32 %v5983_v11, %v2693_v47 }
0x17c9   :  { %v5493_v50 = vpop.f32.mrf.mxu0 }
0x17ca   :  { %2931 = vrot.lane.b32.xlu0 %v6458_v48, %s5769_s3 }
0x17cf   :  { %v2763_v51 = vpop.f32.mrf.mxu0 }
0x17d0   :  { %v6463_v52 = vadd.f32 %v5978_v10, %v2763_v51 }
0x17d1   :  { %v5723_v53 = vpop.eup %5722  ;;  %v5504_v54 = vpop.f32.mrf.mxu0 }
0x17d2   :  { %v2509_v56 = vadd.f32 1.0, %v5723_v53  ;;  %2933 = vrot.lane.b32.xlu1 %v6463_v52, %s5769_s3 }
0x17d4   :  { %v2510_v31 = vmul.f32 %v2509_v56, %v2506_v55 }
0x17d6   :  { %5481 = vmatmul.mubr.msk.f32.vlgmr.msra.gmra.mxu1 %vm2517_vm3, %v2510_v31 }
0x17d7   :  { %5506 = vmatpush3.xpose.msk.msra.mxu1 %vm285_vm2, %v6463_v52  ;;  %5507 = vmatprep.mubr.msk.f32.mxu1 %vm5767_vm1, %v5766_v0 }
0x17d8   :  { %5510 = vmatprep.subr.mxu1 %v5766_v0 }
0x17da   :  { %5508 = vmatmul.mubr.msk.f32.vlgmr.msra.gmra.mxu1 %vm285_vm2, %v6458_v48 }
0x17db   :  { %5512 = vmatprep.mubr.msk.f32.mxu1 %vm5767_vm1, %v5766_v0 }
0x183c   :  { %v2932_v11 = vpop.permute.xlu0 %2931 }
0x1844   :  { %v2934_v10 = vpop.permute.xlu1 %2933 }
0x1845   :  { %5516 = vmatpush3.xpose.msk.msra.mxu0 %vm285_vm2, %v2934_v10 }
0x1846   :  { %5525 = vmatprep.subr.mxu0 %v5766_v0 }
0x1848   :  { %5518 = vmatmul.mubr.msk.f32.vlgmr.msra.gmra.mxu0 %vm285_vm2, %v2932_v11 }
0x1849   :  { %5526 = vmatpush3.msra.mxu0 %v6027_v45  ;;  %5527 = vmatprep.mubr.msk.f32.mxu0 %vm5767_vm1, %v5766_v0 }
0x184a   :  { %5535 = vmatprep.subr.mxu0 %v5766_v0 }
0x1896   :  { %v6484_v57 = vpop.f32.mrf.mxu1 }
0x1898   :  { %v5482_v16 = vpop.f32.mrf.mxu1 }
0x189a   :  { %v2839_v15 = vpop.f32.mrf.mxu1 }
0x189b   :  { %v2843_v28 = vmul.f32 0.35355338, %v2839_v15 }
0x189c   :  { %v5509_v30 = vpop.f32.mrf.mxu1 }
0x189d   :  { %v2844_v32 = vsel %vm285_vm2, %v2843_v28, -inf }
0x189e   :  { %2845 = vmax.xlane.f32.xlu0 %v2844_v32 }
0x1908   :  { %v3005_v34 = vpop.f32.mrf.mxu0 }
0x1909   :  { %v3009_v14 = vmul.f32 0.35355338, %v3005_v34 }
0x190a   :  { %v5519_v41 = vpop.f32.mrf.mxu0 }
0x190b   :  { %v3010_v42 = vsel %vm285_vm2, %v3009_v14, -inf }
0x190c   :  { %3011 = vmax.xlane.f32.xlu1 %v3010_v42 }
0x191d   :  { %3021 = vrot.lane.b32.xlu1 %v6463_v52, %s5770_s2 }
0x1921   :  { %3245 = vrot.lane.b32.xlu1 %v6463_v52, %s5771_s6 }
0x1927   :  { %v2846_v45 = vpop.xlane.xlu0 %2845 }
0x1928   :  { %v2847_v43 = vsub.f32 %v2843_v28, %v2846_v45 }
0x192a   :  { %v2848_v46 = vmul.f32 1.442695, %v2847_v43 }
0x192c   :  { %5724 = vpow2.f32 %v2848_v46 }
0x1939   :  { %v5725_v47 = vpop.eup %5724 }
0x193a   :  { %v2850_v50 = vsel %vm285_vm2, %v5725_v47, 0.0 }
0x193b   :  { %2851 = vadd.xlane.f32.xlu0 %v2850_v50 }
0x1995   :  { %v3012_v51 = vpop.xlane.xlu1 %3011 }
0x1996   :  { %v3013_v53 = vsub.f32 %v3009_v14, %v3012_v51 }
0x1998   :  { %v3014_v54 = vmul.f32 1.442695, %v3013_v53 }
0x1999   :  { %v3022_v28 = vpop.permute.xlu1 %3021 }
0x199a   :  { %5726 = vpow2.f32 %v3014_v54 }
0x199d   :  { %v3246_v42 = vpop.permute.xlu1 %3245 }
0x19a7   :  { %v5727_v55 = vpop.eup %5726 }
0x19a8   :  { %v3016_v56 = vsel %vm285_vm2, %v5727_v55, 0.0 }
0x19a9   :  { %3017 = vadd.xlane.f32.xlu0 %v3016_v56 }
0x19bf   :  { %2855 = vrot.lane.b32.xlu0 %v6463_v52, %s5768_s10 }
0x19c3   :  { %3243 = vrot.lane.b32.xlu0 %v6458_v48, %s5771_s6 }
0x19c4   :  { %v2852_v31 = vpop.xlane.xlu0 %2851 }
0x19c5   :  { %5728 = vrcp.f32 %v2852_v31 }
0x19d2   :  { %v5729_v11 = vpop.eup %5728 }
0x19d3   :  { %v2854_v15 = vmul.f32 %v5729_v11, %v5725_v47 }
0x1a32   :  { %v3018_v10 = vpop.xlane.xlu0 %3017 }
0x1a33   :  { %5730 = vrcp.f32 %v3018_v10 }
0x1a36   :  { %v2856_v16 = vpop.permute.xlu0 %2855 }
0x1a37   :  { %5511 = vmatpush3.msra.mxu1 %v2856_v16 }
0x1a38   :  { %5513 = vmatmul.mubr.msk.f32.vlgmr.msra.gmra.mxu1 %vm285_vm2, %v2854_v15  ;;  %5520 = vmatprep.subr.mxu1 %v5766_v0 }
0x1a39   :  { %5521 = vmatpush3.msra.mxu1 %v3022_v28  ;;  %5522 = vmatprep.mubr.msk.f32.mxu1 %vm5767_vm1, %v5766_v0 }
0x1a3a   :  { %5530 = vmatprep.subr.mxu1 %v5766_v0 }
0x1a40   :  { %v5731_v30 = vpop.eup %5730 }
0x1a41   :  { %v3020_v32 = vmul.f32 %v5731_v30, %v5727_v55 }
0x1a43   :  { %5523 = vmatmul.mubr.msk.f32.vlgmr.msra.gmra.mxu1 %vm285_vm2, %v3020_v32 }
0x1a44   :  { %5531 = vmatpush3.msra.mxu1 %v6034_v49  ;;  %5532 = vmatprep.mubr.msk.f32.mxu1 %vm5767_vm1, %v5766_v0  ;;  %v3244_v49 = vpop.permute.xlu0 %3243 }
0x1a45   :  { %5540 = vmatprep.subr.mxu1 %v5766_v0 }
0x1af8   :  { %v2927_v34 = vpop.f32.mrf.mxu1 }
0x1af9   :  { %5533 = vmatmul.mubr.msk.f32.vlgmr.msra.gmra.mxu1 %vm285_vm2, %v2927_v34 }
0x1afa   :  { %v5514_v14 = vpop.f32.mrf.mxu1  ;;  %5542 = vmatprep.mubr.msk.f32.mxu1 %vm5767_vm1, %v5766_v0 }
0x1b03   :  { %v3093_v41 = vpop.f32.mrf.mxu1 }
0x1b04   :  { %5528 = vmatmul.mubr.msk.f32.vlgmr.msra.gmra.mxu0 %vm285_vm2, %v3093_v41 }
0x1b05   :  { %5536 = vmatpush3.xpose.msk.msra.mxu0 %vm285_vm2, %v3246_v42  ;;  %v5524_v45 = vpop.f32.mrf.mxu1  ;;  %5537 = vmatprep.mubr.msk.f32.mxu0 %vm5767_vm1, %v5766_v0 }
0x1b06   :  { %5545 = vmatprep.subr.mxu0 %v5766_v0 }
0x1b08   :  { %5538 = vmatmul.mubr.msk.f32.vlgmr.msra.gmra.mxu0 %vm285_vm2, %v3244_v49 }
0x1b09   :  { %5546 = vmatpush3.msra.mxu0 %v6074_v22  ;;  %5547 = vmatprep.mubr.msk.f32.mxu0 %vm5767_vm1, %v5766_v0 }
0x1b0a   :  { %5555 = vmatprep.subr.mxu0 %v5766_v0 }
0x1bb9   :  { %v3239_v43 = vpop.f32.mrf.mxu1 }
0x1bbb   :  { %v5534_v46 = vpop.f32.mrf.mxu1 }
0x1bc4   :  { %v3166_v47 = vpop.f32.mrf.mxu0 }
0x1bc5   :  { %v3240_v50 = vadd.f32 %v3239_v43, %v3166_v47 }
0x1bc6   :  { %v5529_v51 = vpop.f32.mrf.mxu0 }
0x1bc8   :  { %v3317_v53 = vpop.f32.mrf.mxu0 }
0x1bc9   :  { %v3321_v54 = vmul.f32 0.35355338, %v3317_v53 }
0x1bca   :  { %v5539_v55 = vpop.f32.mrf.mxu0 }
0x1bcb   :  { %v3322_v56 = vsel %vm285_vm2, %v3321_v54, -inf }
0x1bcc   :  { %3323 = vmax.xlane.f32.xlu1 %v3322_v56 }
0x1bdd   :  { %3485 = vrot.lane.b32.xlu1 %v6463_v52, %s6789_s0 }
0x1be1   :  { %3483 = vrot.lane.b32.xlu1 %v6458_v48, %s6789_s0 }
0x1c55   :  { %v3324_v22 = vpop.xlane.xlu1 %3323 }
0x1c56   :  { %v3325_v31 = vsub.f32 %v3321_v54, %v3324_v22 }
0x1c58   :  { %v3326_v10 = vmul.f32 1.442695, %v3325_v31 }
0x1c59   :  { %v3486_v32 = vpop.permute.xlu1 %3485 }
0x1c5a   :  { %5732 = vpow2.f32 %v3326_v10 }
0x1c5d   :  { %v3484_v34 = vpop.permute.xlu1 %3483 }
0x1c67   :  { %v5733_v11 = vpop.eup %5732 }
0x1c68   :  { %v3328_v16 = vsel %vm285_vm2, %v5733_v11, 0.0 }
0x1c69   :  { %3329 = vadd.xlane.f32.xlu0 %v3328_v16 }
0x1c7f   :  { %3333 = vrot.lane.b32.xlu0 %v6463_v52, %s6790_s26 }
0x1cf2   :  { %v3330_v15 = vpop.xlane.xlu0 %3329 }
0x1cf3   :  { %5734 = vrcp.f32 %v3330_v15 }
0x1cf6   :  { %v3334_v28 = vpop.permute.xlu0 %3333 }
0x1cf7   :  { %5541 = vmatpush3.msra.mxu1 %v3334_v28 }
0x1cf8   :  { %5550 = vmatprep.subr.mxu1 %v5766_v0 }
0x1d00   :  { %v5735_v30 = vpop.eup %5734 }
0x1d01   :  { %v3332_v48 = vmul.f32 %v5735_v30, %v5733_v11 }
0x1d03   :  { %5543 = vmatmul.mubr.msk.f32.vlgmr.msra.gmra.mxu1 %vm285_vm2, %v3332_v48 }
0x1d04   :  { %5551 = vmatpush3.xpose.msk.msra.mxu1 %vm285_vm2, %v3486_v32  ;;  %5552 = vmatprep.mubr.msk.f32.mxu1 %vm5767_vm1, %v5766_v0 }
0x1d05   :  { %5560 = vmatprep.subr.mxu1 %v5766_v0 }
0x1d07   :  { %5553 = vmatmul.mubr.msk.f32.vlgmr.msra.gmra.mxu1 %vm285_vm2, %v3484_v34 }
0x1d08   :  { %5561 = vmatpush3.msra.mxu1 %v6089_v35  ;;  %5562 = vmatprep.mubr.msk.f32.mxu1 %vm5767_vm1, %v5766_v0 }
0x1d09   :  { %5576 = vmatprep.subr.mxu1 %v5766_v0 }
0x1dc3   :  { %v3405_v14 = vpop.f32.mrf.mxu1 }
0x1dc4   :  { %5548 = vmatmul.mubr.msk.f32.vlgmr.msra.gmra.mxu0 %vm285_vm2, %v3405_v14 }
0x1dc5   :  { %v5544_v41 = vpop.f32.mrf.mxu1  ;;  %5557 = vmatprep.mubr.msk.f32.mxu0 %vm5767_vm1, %v5766_v0 }
0x1dc7   :  { %v3557_v42 = vpop.f32.mrf.mxu1 }
0x1dc8   :  { %v3561_v45 = vmul.f32 0.35355338, %v3557_v42 }
0x1dc9   :  { %v5554_v49 = vpop.f32.mrf.mxu1 }
0x1dca   :  { %v3562_v43 = vsel %vm285_vm2, %v3561_v45, -inf }
0x1dcb   :  { %3563 = vmax.xlane.f32.xlu0 %v3562_v43 }
0x1de1   :  { %3573 = vrot.lane.b32.xlu0 %v6463_v52, %s6791_s28 }
0x1e54   :  { %v3564_v35 = vpop.xlane.xlu0 %3563 }
0x1e55   :  { %v3565_v46 = vsub.f32 %v3561_v45, %v3564_v35 }
0x1e57   :  { %v3566_v47 = vmul.f32 1.442695, %v3565_v46 }
0x1e58   :  { %v3574_v51 = vpop.permute.xlu0 %3573 }
0x1e59   :  { %5736 = vpow2.f32 %v3566_v47  ;;  %5556 = vmatpush3.msra.mxu0 %v3574_v51 }
0x1e5a   :  { %5565 = vmatprep.subr.mxu0 %v5766_v0 }
0x1e66   :  { %v5737_v53 = vpop.eup %5736 }
0x1e67   :  { %v3568_v54 = vsel %vm285_vm2, %v5737_v53, 0.0 }
0x1e68   :  { %3569 = vadd.xlane.f32.xlu1 %v3568_v54 }
0x1e84   :  { %v3478_v55 = vpop.f32.mrf.mxu0 }
0x1e85   :  { %v3482_v56 = vadd.f32 %v3478_v55, %v3240_v50 }
0x1e86   :  { %v5549_v22 = vpop.f32.mrf.mxu0 }
0x1ef1   :  { %v3570_v31 = vpop.xlane.xlu1 %3569 }
0x1ef2   :  { %5738 = vrcp.f32 %v3570_v31 }
0x1eff   :  { %v5739_v10 = vpop.eup %5738 }
0x1f00   :  { %v3572_v11 = vmul.f32 %v5739_v10, %v5737_v53 }
0x1f02   :  { %5558 = vmatmul.mubr.msk.f32.vlgmr.msra.gmra.mxu0 %vm285_vm2, %v3572_v11 }
0x1f03   :  { %5566 = vmatpush3.msra.mxu0 %v6132_v60  ;;  %5573 = vmatprep.mubr.msk.f32.mxu0 %vm5767_vm1, %v5766_v0 }
0x1f04   :  { %5567 = vmatprep.subr.mxu0 %v5766_v0 }
0x1f05   :  { %5568 = vmatpush3.msra.mxu0 %v6144_v62 }
0x1f06   :  { %5569 = vmatprep.subr.mxu0 %v5766_v0 }
0x1f07   :  { %5570 = vmatpush3.msra.mxu0 %v6154_v12 }
0x1f08   :  { %5571 = vmatprep.subr.mxu0 %v5766_v0 }
0x1f09   :  { %5572 = vmatpush3.msra.mxu0 %v6162_v13 }
0x1f0a   :  { %5587 = vmatprep.subr.mxu0 %v5766_v0 }
0x1fc2   :  { %v3645_v52 = vpop.f32.mrf.mxu0 }
0x1fc3   :  { %5563 = vmatmul.mubr.msk.f32.vlgmr.msra.gmra.mxu1 %vm285_vm2, %v3645_v52 }
0x1fc4   :  { %v5559_v60 = vpop.f32.mrf.mxu0  ;;  %5577 = vmatpush3.msra.mxu1 %v6112_v58  ;;  %5584 = vmatprep.mubr.msk.f32.mxu1 %vm5767_vm1, %v5766_v0 }
0x1fc5   :  { %5578 = vmatprep.subr.mxu1 %v5766_v0 }
0x1fc6   :  { %5579 = vmatpush3.msra.mxu1 %v6119_v9 }
0x1fc7   :  { %5580 = vmatprep.subr.mxu1 %v5766_v0 }
0x1fc8   :  { %5581 = vmatpush3.msra.mxu1 %v6126_v59 }
0x1fc9   :  { %5582 = vmatprep.subr.mxu1 %v5766_v0 }
0x1fca   :  { %5583 = vmatpush3.msra.mxu1 %v6139_v61  ;;  %v5085_v61 = vld [vmem:[%s6743_s1 + $0x8] sm:$0xff] }
0x1fcb   :  { %5592 = vmatprep.subr.mxu1 %v5766_v0  ;;  %5585 = vmatmul.mubr.msk.f32.vlgmr.msra.gmra.mxu1 %vm135_vm0, %v5085_v61 }
0x1fcc   :  { %5594 = vmatprep.mubr.msk.f32.mxu1 %vm5767_vm1, %v5766_v0 }
0x2083   :  { %v3718_v62 = vpop.f32.mrf.mxu1 }
0x2084   :  { %v3722_v12 = vadd.f32 %v3718_v62, %v3482_v56 }
0x2085   :  { %v5564_v58 = vpop.f32.mrf.mxu1 }
0x2086   :  { %v3723_v13 = vadd.f32 %v6103_v44, %v3722_v12 }
0x2088   :  { %v3724_v50 = vadd.f32 %v6373_v38, %v3723_v13 }
0x208a   :  { %v3725_v16 = vsel %vm135_vm0, %v3724_v50, 0.0 }
0x208b   :  { %3726 = vadd.xlane.f32.xlu1 %v3725_v16  ;;  %v3882_v42 = vpop.f32.mrf.mxu1 }
0x208c   :  { %v6589_v45 = vadd.f32 %v6192_v25, %v3882_v42 }
0x208d   :  { %v5586_v49 = vpop.f32.mrf.mxu1 }
0x2114   :  { %v3727_v9 = vpop.xlane.xlu1 %3726 }
0x2115   :  { %v3728_v15 = vmul.f32 0.03125, %v3727_v9 }
0x2117   :  { %v3729_v28 = vsub.f32 %v3724_v50, %v3728_v15 }
0x2119   :  { %v3730_v59 = vmul.f32 %v3729_v28, %v3729_v28 }
0x211b   :  { %v3731_v30 = vsel %vm135_vm0, %v3730_v59, 0.0 }
0x211c   :  { %3732 = vadd.xlane.f32.xlu1 %v3731_v30 }
0x212d   :  { %4052 = vrot.lane.b32.xlu1 %v6589_v45, %s5769_s3 }
0x21a5   :  { %v3733_v44 = vpop.xlane.xlu1 %3732 }
0x21a6   :  { %v3734_v38 = vmul.f32 0.03125, %v3733_v44 }
0x21a8   :  { %v3735_v32 = vadd.f32 1e-05, %v3734_v38 }
0x21a9   :  { %v4053_v43 = vpop.permute.xlu1 %4052 }
0x21aa   :  { %5740 = vrsqrt.f32 %v3735_v32 }
0x21b7   :  { %v5741_v48 = vpop.eup %5740 }
0x21b8   :  { %v3737_v34 = vmul.f32 %v5741_v48, %v3729_v28 }
0x21ba   :  { %v3738_v14 = vmul.f32 %v6174_v20, %v3737_v34 }
0x21bc   :  { %v6582_v41 = vadd.f32 %v6179_v21, %v3738_v14 }
0x21be   :  { %5574 = vmatmul.mubr.msk.f32.vlgmr.msra.gmra.mxu0 %vm135_vm0, %v6582_v41 }
0x21bf   :  { %5589 = vmatprep.mubr.msk.f32.mxu0 %vm5767_vm1, %v5766_v0  ;;  %5588 = vmatpush3.xpose.msk.msra.mxu0 %vm285_vm2, %v6589_v45 }
0x21c0   :  { %5597 = vmatprep.subr.mxu0 %v5766_v0 }
0x227e   :  { %v3809_v20 = vpop.f32.mrf.mxu0 }
0x227f   :  { %v6597_v21 = vadd.f32 %v6205_v29, %v3809_v20 }
0x2280   :  { %v5575_v35 = vpop.f32.mrf.mxu0 }
0x2281   :  { %4050 = vrot.lane.b32.xlu0 %v6597_v21, %s5769_s3  ;;  %5590 = vmatmul.mubr.msk.f32.vlgmr.msra.gmra.mxu0 %vm285_vm2, %v6597_v21 }
0x2282   :  { %5598 = vmatpush3.xpose.msk.msra.mxu0 %vm285_vm2, %v4053_v43  ;;  %5599 = vmatprep.mubr.msk.f32.mxu0 %vm5767_vm1, %v5766_v0 }
0x2283   :  { %5607 = vmatprep.subr.mxu0 %v5766_v0 }
0x22f3   :  { %v4051_v25 = vpop.permute.xlu0 %4050 }
0x22f4   :  { %5600 = vmatmul.mubr.msk.f32.vlgmr.msra.gmra.mxu0 %vm285_vm2, %v4051_v25 }
0x22f5   :  { %5608 = vmatpush3.msra.mxu0 %v6250_v26  ;;  %5609 = vmatprep.mubr.msk.f32.mxu0 %vm5767_vm1, %v5766_v0 }
0x22f6   :  { %5617 = vmatprep.subr.mxu0 %v5766_v0 }
0x2341   :  { %v3958_v29 = vpop.f32.mrf.mxu0 }
0x2342   :  { %v3962_v46 = vmul.f32 0.35355338, %v3958_v29 }
0x2343   :  { %v5591_v47 = vpop.f32.mrf.mxu0 }
0x2344   :  { %v3963_v51 = vsel %vm285_vm2, %v3962_v46, -inf }
0x2345   :  { %3964 = vmax.xlane.f32.xlu0 %v3963_v51 }
0x23b4   :  { %v4124_v53 = vpop.f32.mrf.mxu0 }
0x23b5   :  { %v4128_v54 = vmul.f32 0.35355338, %v4124_v53 }
0x23b6   :  { %v5601_v55 = vpop.f32.mrf.mxu0 }
0x23b7   :  { %v4129_v56 = vsel %vm285_vm2, %v4128_v54, -inf }
0x23b8   :  { %4130 = vmax.xlane.f32.xlu1 %v4129_v56 }
0x23c9   :  { %4140 = vrot.lane.b32.xlu1 %v6589_v45, %s5770_s2 }
0x23cd   :  { %4364 = vrot.lane.b32.xlu1 %v6589_v45, %s5771_s6 }
0x23ce   :  { %v3965_v26 = vpop.xlane.xlu0 %3964 }
0x23cf   :  { %v3966_v22 = vsub.f32 %v3962_v46, %v3965_v26 }
0x23d1   :  { %v3967_v31 = vmul.f32 1.442695, %v3966_v22 }
0x23d3   :  { %5742 = vpow2.f32 %v3967_v31 }
0x23e0   :  { %v5743_v10 = vpop.eup %5742 }
0x23e1   :  { %v3969_v11 = vsel %vm285_vm2, %v5743_v10, 0.0 }
0x23e2   :  { %3970 = vadd.xlane.f32.xlu0 %v3969_v11 }
0x2441   :  { %v4131_v52 = vpop.xlane.xlu1 %4130 }
0x2442   :  { %v4132_v60 = vsub.f32 %v4128_v54, %v4131_v52 }
0x2444   :  { %v4133_v62 = vmul.f32 1.442695, %v4132_v60 }
0x2445   :  { %v4141_v28 = vpop.permute.xlu1 %4140 }
0x2446   :  { %5744 = vpow2.f32 %v4133_v62 }
0x2449   :  { %v4365_v32 = vpop.permute.xlu1 %4364 }
0x2453   :  { %v5745_v12 = vpop.eup %5744 }
0x2454   :  { %v4135_v58 = vsel %vm285_vm2, %v5745_v12, 0.0 }
0x2455   :  { %4136 = vadd.xlane.f32.xlu0 %v4135_v58 }
0x246b   :  { %3974 = vrot.lane.b32.xlu0 %v6589_v45, %s5768_s10  ;;  %v3971_v13 = vpop.xlane.xlu0 %3970 }
0x246c   :  { %5746 = vrcp.f32 %v3971_v13 }
0x246f   :  { %4362 = vrot.lane.b32.xlu0 %v6597_v21, %s5771_s6 }
0x2479   :  { %v5747_v16 = vpop.eup %5746 }
0x247a   :  { %v3973_v15 = vmul.f32 %v5747_v16, %v5743_v10 }
0x24de   :  { %v4137_v50 = vpop.xlane.xlu0 %4136 }
0x24df   :  { %5748 = vrcp.f32 %v4137_v50 }
0x24e2   :  { %v3975_v9 = vpop.permute.xlu0 %3974 }
0x24e3   :  { %5593 = vmatpush3.msra.mxu1 %v3975_v9 }
0x24e4   :  { %5595 = vmatmul.mubr.msk.f32.vlgmr.msra.gmra.mxu1 %vm285_vm2, %v3973_v15  ;;  %5602 = vmatprep.subr.mxu1 %v5766_v0 }
0x24e5   :  { %5603 = vmatpush3.msra.mxu1 %v4141_v28  ;;  %5604 = vmatprep.mubr.msk.f32.mxu1 %vm5767_vm1, %v5766_v0 }
0x24e6   :  { %5612 = vmatprep.subr.mxu1 %v5766_v0 }
0x24ec   :  { %v5749_v59 = vpop.eup %5748 }
0x24ed   :  { %v4139_v30 = vmul.f32 %v5749_v59, %v5745_v12 }
0x24ef   :  { %5605 = vmatmul.mubr.msk.f32.vlgmr.msra.gmra.mxu1 %vm285_vm2, %v4139_v30 }
0x24f0   :  { %5613 = vmatpush3.msra.mxu1 %v6244_v23  ;;  %5614 = vmatprep.mubr.msk.f32.mxu1 %vm5767_vm1, %v5766_v0  ;;  %v4363_v23 = vpop.permute.xlu0 %4362 }
0x24f1   :  { %5622 = vmatprep.subr.mxu1 %v5766_v0 }
0x25a4   :  { %v4046_v61 = vpop.f32.mrf.mxu1 }
0x25a5   :  { %5615 = vmatmul.mubr.msk.f32.vlgmr.msra.gmra.mxu1 %vm285_vm2, %v4046_v61 }
0x25a6   :  { %v5596_v44 = vpop.f32.mrf.mxu1  ;;  %5624 = vmatprep.mubr.msk.f32.mxu1 %vm5767_vm1, %v5766_v0 }
0x25af   :  { %v4212_v38 = vpop.f32.mrf.mxu1 }
0x25b0   :  { %5610 = vmatmul.mubr.msk.f32.vlgmr.msra.gmra.mxu0 %vm285_vm2, %v4212_v38 }
0x25b1   :  { %5618 = vmatpush3.xpose.msk.msra.mxu0 %vm285_vm2, %v4365_v32  ;;  %v5606_v48 = vpop.f32.mrf.mxu1  ;;  %5619 = vmatprep.mubr.msk.f32.mxu0 %vm5767_vm1, %v5766_v0 }
0x25b2   :  { %5627 = vmatprep.subr.mxu0 %v5766_v0 }
0x25b4   :  { %5620 = vmatmul.mubr.msk.f32.vlgmr.msra.gmra.mxu0 %vm285_vm2, %v4363_v23 }
0x25b5   :  { %5628 = vmatpush3.msra.mxu0 %v6286_v63  ;;  %5629 = vmatprep.mubr.msk.f32.mxu0 %vm5767_vm1, %v5766_v0 }
0x25b6   :  { %5637 = vmatprep.subr.mxu0 %v5766_v0 }
0x2665   :  { %v4358_v34 = vpop.f32.mrf.mxu1 }
0x2667   :  { %v5616_v14 = vpop.f32.mrf.mxu1 }
0x2670   :  { %v4285_v42 = vpop.f32.mrf.mxu0 }
0x2671   :  { %v4359_v49 = vadd.f32 %v4358_v34, %v4285_v42 }
0x2672   :  { %v5611_v20 = vpop.f32.mrf.mxu0 }
0x2674   :  { %v4436_v43 = vpop.f32.mrf.mxu0 }
0x2675   :  { %v4440_v35 = vmul.f32 0.35355338, %v4436_v43 }
0x2676   :  { %v5621_v25 = vpop.f32.mrf.mxu0 }
0x2677   :  { %v4441_v29 = vsel %vm285_vm2, %v4440_v35, -inf }
0x2678   :  { %4442 = vmax.xlane.f32.xlu1 %v4441_v29 }
0x2689   :  { %4604 = vrot.lane.b32.xlu1 %v6589_v45, %s6789_s0 }
0x268d   :  { %4602 = vrot.lane.b32.xlu1 %v6597_v21, %s6789_s0 }
0x2701   :  { %v4443_v63 = vpop.xlane.xlu1 %4442 }
0x2702   :  { %v4444_v46 = vsub.f32 %v4440_v35, %v4443_v63 }
0x2704   :  { %v4445_v47 = vmul.f32 1.442695, %v4444_v46  ;;  %v5082_v46 = vld [vmem:[%s6756_s22] ss:$0 sm:$0xff] }
0x2705   :  { %v4605_v26 = vpop.permute.xlu1 %4604 }
0x2706   :  { %5750 = vpow2.f32 %v4445_v47 }
0x2709   :  { %v4603_v22 = vpop.permute.xlu1 %4602 }
0x2713   :  { %v5751_v51 = vpop.eup %5750 }
0x2714   :  { %v4447_v53 = vsel %vm285_vm2, %v5751_v51, 0.0 }
0x2715   :  { %4448 = vadd.xlane.f32.xlu0 %v4447_v53 }
0x272b   :  { %4452 = vrot.lane.b32.xlu0 %v6589_v45, %s6790_s26 }
0x279e   :  { %v4449_v54 = vpop.xlane.xlu0 %4448 }
0x279f   :  { %5752 = vrcp.f32 %v4449_v54 }
0x27a2   :  { %v4453_v55 = vpop.permute.xlu0 %4452 }
0x27a3   :  { %5623 = vmatpush3.msra.mxu1 %v4453_v55 }
0x27a4   :  { %5632 = vmatprep.subr.mxu1 %v5766_v0 }
0x27ac   :  { %v5753_v56 = vpop.eup %5752 }
0x27ad   :  { %v4451_v21 = vmul.f32 %v5753_v56, %v5751_v51  ;;  %v5083_v51 = vld [vmem:[%s6757_s23] ss:$0 sm:$0xff] }
0x27af   :  { %5625 = vmatmul.mubr.msk.f32.vlgmr.msra.gmra.mxu1 %vm285_vm2, %v4451_v21 }
0x27b0   :  { %5633 = vmatpush3.xpose.msk.msra.mxu1 %vm285_vm2, %v4605_v26  ;;  %5634 = vmatprep.mubr.msk.f32.mxu1 %vm5767_vm1, %v5766_v0 }
0x27b1   :  { %5642 = vmatprep.subr.mxu1 %v5766_v0 }
0x27b3   :  { %5635 = vmatmul.mubr.msk.f32.vlgmr.msra.gmra.mxu1 %vm285_vm2, %v4603_v22 }
0x27b4   :  { %5643 = vmatpush3.msra.mxu1 %v6301_v37  ;;  %5644 = vmatprep.mubr.msk.f32.mxu1 %vm5767_vm1, %v5766_v0 }
0x27b5   :  { %5658 = vmatprep.subr.mxu1 %v5766_v0 }
0x286f   :  { %v4524_v31 = vpop.f32.mrf.mxu1 }
0x2870   :  { %5630 = vmatmul.mubr.msk.f32.vlgmr.msra.gmra.mxu0 %vm285_vm2, %v4524_v31 }
0x2871   :  { %v5626_v10 = vpop.f32.mrf.mxu1  ;;  %5639 = vmatprep.mubr.msk.f32.mxu0 %vm5767_vm1, %v5766_v0 }
0x2873   :  { %v4676_v11 = vpop.f32.mrf.mxu1 }
0x2874   :  { %v4680_v52 = vmul.f32 0.35355338, %v4676_v11 }
0x2875   :  { %v5636_v60 = vpop.f32.mrf.mxu1 }
0x2876   :  { %v4681_v62 = vsel %vm285_vm2, %v4680_v52, -inf }
0x2877   :  { %4682 = vmax.xlane.f32.xlu0 %v4681_v62 }
0x288d   :  { %4692 = vrot.lane.b32.xlu0 %v6589_v45, %s6791_s28 }
0x2900   :  { %v4683_v37 = vpop.xlane.xlu0 %4682 }
0x2901   :  { %v4684_v12 = vsub.f32 %v4680_v52, %v4683_v37 }
0x2903   :  { %v4685_v58 = vmul.f32 1.442695, %v4684_v12 }
0x2904   :  { %v4693_v13 = vpop.permute.xlu0 %4692 }
0x2905   :  { %5754 = vpow2.f32 %v4685_v58  ;;  %5638 = vmatpush3.msra.mxu0 %v4693_v13 }
0x2906   :  { %5647 = vmatprep.subr.mxu0 %v5766_v0 }
0x2912   :  { %v5755_v50 = vpop.eup %5754 }
0x2913   :  { %v4687_v16 = vsel %vm285_vm2, %v5755_v50, 0.0 }
0x2914   :  { %4688 = vadd.xlane.f32.xlu1 %v4687_v16 }
0x2930   :  { %v4597_v9 = vpop.f32.mrf.mxu0 }
0x2931   :  { %v4601_v15 = vadd.f32 %v4597_v9, %v4359_v49 }
0x2932   :  { %v5631_v28 = vpop.f32.mrf.mxu0 }
0x299d   :  { %v4689_v59 = vpop.xlane.xlu1 %4688 }
0x299e   :  { %5756 = vrcp.f32 %v4689_v59 }
0x29ab   :  { %v5757_v30 = vpop.eup %5756 }
0x29ac   :  { %v4691_v61 = vmul.f32 %v5757_v30, %v5755_v50 }
0x29ae   :  { %5640 = vmatmul.mubr.msk.f32.vlgmr.msra.gmra.mxu0 %vm285_vm2, %v4691_v61 }
0x29af   :  { %5648 = vmatpush3.msra.mxu0 %v6323_v17  ;;  %5655 = vmatprep.mubr.msk.f32.mxu0 %vm5767_vm1, %v5766_v0 }
0x29b0   :  { %5649 = vmatprep.subr.mxu0 %v5766_v0 }
0x29b1   :  { %5650 = vmatpush3.msra.mxu0 %v6330_v24 }
0x29b2   :  { %5651 = vmatprep.subr.mxu0 %v5766_v0 }
0x29b3   :  { %5652 = vmatpush3.msra.mxu0 %v6335_v18 }
0x29b4   :  { %5653 = vmatprep.subr.mxu0 %v5766_v0 }
0x29b5   :  { %5654 = vmatpush3.msra.mxu0 %v6342_v19 }
0x2a6e   :  { %v4764_v45 = vpop.f32.mrf.mxu0 }
0x2a6f   :  { %5645 = vmatmul.mubr.msk.f32.vlgmr.msra.gmra.mxu1 %vm285_vm2, %v4764_v45 }
0x2a70   :  { %v5641_v44 = vpop.f32.mrf.mxu0  ;;  %5659 = vmatpush3.msra.mxu1 %v6398_v1  ;;  %5674 = vmatprep.mubr.msk.f32.mxu1 %vm5767_vm1, %v5766_v0 }
0x2a71   :  { %5660 = vmatprep.subr.mxu1 %v5766_v0 }
0x2a72   :  { %5661 = vmatpush3.msra.mxu1 %v6405_v2 }
0x2a73   :  { %5662 = vmatprep.subr.mxu1 %v5766_v0 }
0x2a74   :  { %5663 = vmatpush3.msra.mxu1 %v6412_v3  ;;  %v5080_v3 = vld [vmem:[%s6755_s21] ss:$0 sm:$0xff] }
0x2a75   :  { %5664 = vmatprep.subr.mxu1 %v5766_v0 }
0x2a76   :  { %5665 = vmatpush3.msra.mxu1 %v6419_v4 }
0x2a77   :  { %5666 = vmatprep.subr.mxu1 %v5766_v0 }
0x2a78   :  { %5667 = vmatpush3.msra.mxu1 %v6426_v5 }
0x2a79   :  { %5668 = vmatprep.subr.mxu1 %v5766_v0 }
0x2a7a   :  { %5669 = vmatpush3.msra.mxu1 %v6433_v6 }
0x2a7b   :  { %5670 = vmatprep.subr.mxu1 %v5766_v0 }
0x2a7c   :  { %5671 = vmatpush3.msra.mxu1 %v6440_v7 }
0x2a7d   :  { %5672 = vmatprep.subr.mxu1 %v5766_v0  ;;  %v2588_v0 = vadd.f32 %v5080_v3, %v6484_v57 }
0x2a7e   :  { %5673 = vmatpush3.msra.mxu1 %v6447_v8 }
0x2a7f   :  { %v2591_v38 = vadd.f32 %v2588_v0, %v6360_v27 }
0x2b2f   :  { %v4837_v17 = vpop.f32.mrf.mxu1 }
0x2b30   :  { %v4841_v24 = vadd.f32 %v4837_v17, %v4601_v15 }
0x2b31   :  { %v5646_v18 = vpop.f32.mrf.mxu1 }
0x2b32   :  { %v4842_v19 = vadd.f32 %v6314_v39, %v4841_v24  ;;  %v2592_v39 = vsel %vm135_vm0, %v2591_v38, 0.0 }
0x2b34   :  { %v4843_v1 = vadd.f32 %v4842_v19, %v6582_v41 }
0x2b36   :  { %v4844_v2 = vsel %vm135_vm0, %v4843_v1, 0.0 }
0x2b37   :  { %4845 = vadd.xlane.f32.xlu1 %v4844_v2 }
0x2bc0   :  { %v4846_v4 = vpop.xlane.xlu1 %4845 }
0x2bc1   :  { %v4847_v5 = vmul.f32 0.03125, %v4846_v4 }
0x2bc3   :  { %v4848_v6 = vsub.f32 %v4843_v1, %v4847_v5 }
0x2bc5   :  { %v4849_v7 = vmul.f32 %v4848_v6, %v4848_v6 }
0x2bc7   :  { %v4850_v8 = vsel %vm135_vm0, %v4849_v7, 0.0 }
0x2bc8   :  { %4851 = vadd.xlane.f32.xlu1 %v4850_v8 }
0x2bcc   :  { %2593 = vadd.xlane.f32.xlu1 %v2592_v39 }
0x2c51   :  { %v4852_v41 = vpop.xlane.xlu1 %4851 }
0x2c52   :  { %v4853_v32 = vmul.f32 0.03125, %v4852_v41 }
0x2c54   :  { %v4854_v48 = vadd.f32 1e-05, %v4853_v32 }
0x2c55   :  { %v2594_v23 = vpop.xlane.xlu1 %2593 }
0x2c56   :  { %5758 = vrsqrt.f32 %v4854_v48  ;;  %v2595_v34 = vmul.f32 0.03125, %v2594_v23 }
0x2c58   :  { %v2596_v14 = vsub.f32 %v2591_v38, %v2595_v34 }
0x2c5a   :  { %v2597_v42 = vmul.f32 %v2596_v14, %v2596_v14 }
0x2c5c   :  { %v2598_v57 = vsel %vm135_vm0, %v2597_v42, 0.0 }
0x2c5d   :  { %2599 = vadd.xlane.f32.xlu0 %v2598_v57 }
0x2c63   :  { %v5759_v49 = vpop.eup %5758 }
0x2c64   :  { %v4856_v20 = vmul.f32 %v5759_v49, %v4848_v6 }
0x2c66   :  { %v4857_v43 = vmul.f32 %v6351_v33, %v4856_v20 }
0x2c68   :  { %v4858_v27 = vadd.f32 %v6356_v36, %v4857_v43 }
0x2c6a   :  { %5656 = vmatmul.mubr.msk.f32.vlgmr.msra.gmra.mxu0 %vm135_vm0, %v4858_v27 }
0x2ce6   :  { %v2600_v35 = vpop.xlane.xlu0 %2599 }
0x2ce7   :  { %v2601_v25 = vmul.f32 0.03125, %v2600_v35 }
0x2ce9   :  { %v2602_v29 = vadd.f32 1e-05, %v2601_v25 }
0x2ceb   :  { %5760 = vrsqrt.f32 %v2602_v29 }
0x2cf8   :  { %v5761_v63 = vpop.eup %5760 }
0x2cf9   :  { %v2604_v47 = vmul.f32 %v5761_v63, %v2596_v14 }
0x2cfb   :  { %v2611_v53 = vmul.f32 %v5082_v46, %v2604_v47 }
0x2cfd   :  { %v2618_v33 = vadd.f32 %v5083_v51, %v2611_v53 }
0x2cff   :  { %2619 = vst.msk [vmem:[%s6758_s24] sm:$0xff] %vm135_vm0, %v2618_v33 }
0x2d2a   :  { %v4928_v36 = vpop.f32.mrf.mxu0 }
0x2d2b   :  { %v4929_v54 = vadd.f32 %v6454_v40, %v4928_v36 }
0x2d2c   :  { %v5657_v55 = vpop.f32.mrf.mxu0 }
0x2d2d   :  { %v4933_v56 = vmul.f32 0.70710677, %v4929_v54  ;;  %v4932_v21 = vmul.f32 0.5, %v4929_v54 }
0x2d2f   :  { %5762 = verf.f32 %v4933_v56 }
0x2d3c   :  { %v5763_v26 = vpop.eup %5762 }
0x2d3d   :  { %v4935_v22 = vadd.f32 1.0, %v5763_v26 }
0x2d3f   :  { %v4936_v31 = vmul.f32 %v4935_v22, %v4932_v21 }
0x2d41   :  { %5675 = vmatmul.mubr.msk.f32.vlgmr.msra.gmra.mxu1 %vm2517_vm3, %v4936_v31 }
0x2e01   :  { %v5006_v10 = vpop.f32.mrf.mxu1 }
0x2e02   :  { %v5007_v11 = vadd.f32 %v5080_v3, %v5006_v10 }
0x2e03   :  { %v5676_v52 = vpop.f32.mrf.mxu1 }
0x2e04   :  { %v5010_v60 = vadd.f32 %v5007_v11, %v4858_v27 }
0x2e06   :  { %v5011_v62 = vsel %vm135_vm0, %v5010_v60, 0.0 }
0x2e07   :  { %5012 = vadd.xlane.f32.xlu1 %v5011_v62 }
0x2e90   :  { %v5013_v37 = vpop.xlane.xlu1 %5012 }
0x2e91   :  { %v5014_v12 = vmul.f32 0.03125, %v5013_v37 }
0x2e93   :  { %v5015_v58 = vsub.f32 %v5010_v60, %v5014_v12 }
0x2e95   :  { %v5016_v40 = vmul.f32 %v5015_v58, %v5015_v58 }
0x2e97   :  { %v5017_v13 = vsel %vm135_vm0, %v5016_v40, 0.0 }
0x2e98   :  { %5018 = vadd.xlane.f32.xlu1 %v5017_v13 }
0x2f21   :  { %v5019_v50 = vpop.xlane.xlu1 %5018 }
0x2f22   :  { %v5020_v16 = vmul.f32 0.03125, %v5019_v50 }
0x2f24   :  { %v5021_v9 = vadd.f32 1e-05, %v5020_v16 }
0x2f26   :  { %5764 = vrsqrt.f32 %v5021_v9 }
0x2f33   :  { %v5765_v15 = vpop.eup %5764 }
0x2f34   :  { %v5023_v28 = vmul.f32 %v5765_v15, %v5015_v58 }
0x2f36   :  { %v5024_v59 = vmul.f32 %v5082_v46, %v5023_v28 }
0x2f38   :  { %v5025_v30 = vadd.f32 %v5083_v51, %v5024_v59 }
0x2f3a   :  { %5124 = vst.msk [vmem:[%s6758_s24 + $0x8] sm:$0xff] %vm135_vm0, %v5025_v30 }

</bundles_post_ra>
